<compile_context>
chip_gen: v6e
topology: v6e:2x2x1
jax: 0.10.0
libtpu: 0.0.40
codegen_flags: <defaults>
</compile_context>

<pallas_src>
import functools

import jax
import jax.numpy as jnp
from jax.experimental import pallas as pl
from jax.experimental.pallas import tpu as pltpu


def _round_up(v, m):
    return ((v + m - 1) // m) * m


# -----------------------------------------------------------------------------
# Fused Conv3x3(pad=1) + BatchNorm(eval) + ReLU kernel (one image per grid step).
#
# The wrapper pads the image spatially (1 top, 2 bottom, 1 left/right), flattens
# (H+3, W+2) -> L rows, and the kernel gathers tap (kh,kw) as the contiguous row
# slice starting at offset kh*(W+2)+kw — no im2col in HBM.  Output rows are
# h*(W+2)+w (2 junk columns per row, sliced off in the wrapper).
# -----------------------------------------------------------------------------
def _conv_bn_relu_kernel(x_ref, w_ref, scale_ref, shift_ref, o_ref, *, Wp):
    Lo = o_ref.shape[1]
    Cin = x_ref.shape[2]
    xv = x_ref[0]                                   # (L, Cin) f32, lives in VMEM
    acc = None
    for kh in range(3):
        for kw in range(3):
            off = kh * Wp + kw
            patch = xv[off:off + Lo, :]             # (Lo, Cin)
            if Cin == 1:
                # K=1 "matmul" is just an outer product -> do it on the VPU.
                contrib = patch * w_ref[kh * 3 + kw].astype(jnp.float32)
            else:
                contrib = jnp.dot(patch.astype(jnp.bfloat16),
                                  w_ref[kh * 3 + kw],       # bf16 (Cin, Coutp)
                                  preferred_element_type=jnp.float32)
            acc = contrib if acc is None else acc + contrib
    y = acc * scale_ref[...] + shift_ref[...]        # folded eval-BN (+conv bias)
    y = jnp.maximum(y, 0.0)
    o_ref[0] = y.astype(o_ref.dtype)


def conv_bn_relu_pool(x_nhwc, w_oihw, b, gamma, beta, mean, var, ph, pw, eps=1e-5):
    N, H, W, Cin_x = x_nhwc.shape
    Cout, Cin_w = w_oihw.shape[0], w_oihw.shape[1]
    Coutp = _round_up(Cout, 128)                     # lane-dense output
    Wp = W + 2
    L = (H + 3) * Wp                                 # 1 top + 2 bottom pad rows
    Lo = H * Wp

    xpad = jnp.pad(x_nhwc, ((0, 0), (1, 2), (1, 1), (0, 0)))
    xflat = xpad.reshape(N, L, Cin_x)

    # (Cout, Cin, 3, 3) -> (9, Cin, Coutp) bf16, matching the tap ordering above.
    w = jnp.transpose(w_oihw, (2, 3, 1, 0)).reshape(9, Cin_w, Cout)
    if Cin_w < Cin_x:                                # previous layer's zero lanes
        w = jnp.pad(w, ((0, 0), (0, Cin_x - Cin_w), (0, 0)))
    w = jnp.pad(w, ((0, 0), (0, 0), (0, Coutp - Cout))).astype(jnp.bfloat16)

    scale = gamma / jnp.sqrt(var + eps)
    shift = (b - mean) * scale + beta
    scale = jnp.pad(scale, (0, Coutp - Cout)).reshape(1, Coutp)
    shift = jnp.pad(shift, (0, Coutp - Cout)).reshape(1, Coutp)

    out = pl.pallas_call(
        functools.partial(_conv_bn_relu_kernel, Wp=Wp),
        out_shape=jax.ShapeDtypeStruct((N, Lo, Coutp), jnp.float32),
        grid_spec=pltpu.PrefetchScalarGridSpec(
            num_scalar_prefetch=0,
            grid=(N,),
            in_specs=[
                pl.BlockSpec((1, L, Cin_x), lambda n: (n, 0, 0)),
                pl.BlockSpec((9, Cin_x, Coutp), lambda n: (0, 0, 0)),
                pl.BlockSpec((1, Coutp), lambda n: (0, 0)),
                pl.BlockSpec((1, Coutp), lambda n: (0, 0)),
            ],
            out_specs=pl.BlockSpec((1, Lo, Coutp), lambda n: (n, 0, 0)),
        ),
        compiler_params=pltpu.CompilerParams(dimension_semantics=("parallel",)),
    )(xflat, w, scale, shift)

    y = out.reshape(N, H, Wp, Coutp)[:, :, :W, :]    # drop the 2 junk columns
    # MaxPool (ph, pw): plain window-max on the small conv output (XLA reduce,
    # no 6-D transpose copy, no extra pallas_call).
    y = jnp.max(y.reshape(N, H // ph, ph, W // pw, pw, Coutp), axis=(2, 4))
    return y                                         # padded channels stay zero


# -----------------------------------------------------------------------------
# Fused fc (Linear -> 128) + both LSTM input projections (one kernel, 2 matmuls).
# dropout(0.4) / LSTM dropout: identity at inference.
# -----------------------------------------------------------------------------
def _fc_proj_kernel(x_ref, wfc_ref, bfc_ref, wih_ref, bih_ref, o_ref):
    h = jnp.dot(x_ref[...].astype(jnp.bfloat16), wfc_ref[...],
                preferred_element_type=jnp.float32) + bfc_ref[...]
    g = jnp.dot(h.astype(jnp.bfloat16), wih_ref[...],
                preferred_element_type=jnp.float32) + bih_ref[...]
    o_ref[...] = g


def fc_lstm_proj(feat, wfc, bfc, wih, bih):
    M, F = feat.shape
    Hd = wfc.shape[1]
    G = wih.shape[1]
    return pl.pallas_call(
        _fc_proj_kernel,
        out_shape=jax.ShapeDtypeStruct((M, G), jnp.float32),
        grid_spec=pltpu.PrefetchScalarGridSpec(
            num_scalar_prefetch=0,
            grid=(1,),
            in_specs=[
                pl.BlockSpec((M, F), lambda i: (0, 0)),
                pl.BlockSpec((F, Hd), lambda i: (0, 0)),
                pl.BlockSpec((1, Hd), lambda i: (0, 0)),
                pl.BlockSpec((Hd, G), lambda i: (0, 0)),
                pl.BlockSpec((1, G), lambda i: (0, 0)),
            ],
            out_specs=pl.BlockSpec((M, G), lambda i: (0, 0)),
        ),
    )(feat, wfc, bfc, wih, bih)


# -----------------------------------------------------------------------------
# Bidirectional LSTM: one pallas_call, grid=(2,) over direction ("parallel"),
# full time loop in-kernel (fori_loop, unrolled), backward reversal via index
# arithmetic, h/c kept in f32, h@Whh in bf16 on the MXU.
# PyTorch gate order: i, f, g, o;  b_ih + b_hh are pre-folded into xp.
# -----------------------------------------------------------------------------
def _bilstm_kernel(xp_ref, whh_ref, o_ref):
    d = pl.program_id(0)                              # 0 = fwd, 1 = bwd
    T, B, _ = xp_ref.shape
    HID = whh_ref.shape[1]
    whh = whh_ref[0]                                  # (HID, 4*HID) bf16

    def step(s, carry):
        h, c = carry
        tt = jnp.where(d == 0, s, T - 1 - s)          # time index for this dir
        gates = xp_ref[tt] + jnp.dot(h.astype(jnp.bfloat16), whh,
                                     preferred_element_type=jnp.float32)
        i = jax.nn.sigmoid(gates[:, :HID])
        f = jax.nn.sigmoid(gates[:, HID:2 * HID])
        g = jnp.tanh(gates[:, 2 * HID:3 * HID])
        o = jax.nn.sigmoid(gates[:, 3 * HID:])
        c = f * c + i * g
        h = o * jnp.tanh(c)
        o_ref[tt] = h
        return h, c

    zero = jnp.zeros((B, HID), jnp.float32)
    jax.lax.fori_loop(0, T, step, (zero, zero), unroll=True)


def bilstm(xp_tb, whh_2):
    T, B, G2 = xp_tb.shape
    HID = whh_2.shape[1]
    G = G2 // 2                                       # 4*HID
    return pl.pallas_call(
        _bilstm_kernel,
        out_shape=jax.ShapeDtypeStruct((T, B, 2 * HID), jnp.float32),
        grid_spec=pltpu.PrefetchScalarGridSpec(
            num_scalar_prefetch=0,
            grid=(2,),
            in_specs=[
                pl.BlockSpec((T, B, G), lambda d: (0, 0, d)),       # per-dir proj
                pl.BlockSpec((1, HID, G), lambda d: (d, 0, 0)),     # per-dir Whh
            ],
            out_specs=pl.BlockSpec((T, B, HID), lambda d: (0, 0, d)),
        ),
        compiler_params=pltpu.CompilerParams(dimension_semantics=("parallel",)),
    )(xp_tb, whh_2)


# -----------------------------------------------------------------------------
# Classifier: Linear with bias, output padded to 128 lanes (sliced in wrapper).
# -----------------------------------------------------------------------------
def _linear_bias_kernel(x_ref, w_ref, b_ref, o_ref):
    acc = jnp.dot(x_ref[...].astype(jnp.bfloat16), w_ref[...],
                  preferred_element_type=jnp.float32)
    o_ref[...] = (acc + b_ref[...]).astype(o_ref.dtype)


def linear_bias(x, w_bf16, b):
    M, K = x.shape
    N = w_bf16.shape[1]
    return pl.pallas_call(
        _linear_bias_kernel,
        out_shape=jax.ShapeDtypeStruct((M, N), jnp.float32),
        grid_spec=pltpu.PrefetchScalarGridSpec(
            num_scalar_prefetch=0,
            grid=(1,),
            in_specs=[
                pl.BlockSpec((M, K), lambda i: (0, 0)),
                pl.BlockSpec((K, N), lambda i: (0, 0)),
                pl.BlockSpec((1, N), lambda i: (0, 0)),
            ],
            out_specs=pl.BlockSpec((M, N), lambda i: (0, 0)),
        ),
    )(x, w_bf16, b.reshape(1, N))


# -----------------------------------------------------------------------------
# Parameter init (deterministic, synthetic) and the full forward pass.
# -----------------------------------------------------------------------------
def init_params(key, image_height, num_classes, hidden=128):
    fc_in = (image_height // 8) * 256
    ks = jax.random.split(key, 32)
    it = iter(range(32))

    def nrm(shape, s=0.05):
        return jax.random.normal(ks[next(it)], shape, jnp.float32) * s

    def pos(shape):
        return jax.random.uniform(ks[next(it)], shape, jnp.float32, 0.5, 1.5)

    p = {}
    for i, (cin, cout) in enumerate([(1, 64), (64, 128), (128, 256)], start=1):
        p[f"conv{i}_w"] = nrm((cout, cin, 3, 3))
        p[f"conv{i}_b"] = nrm((cout,))
        p[f"bn{i}_gamma"] = pos((cout,))
        p[f"bn{i}_beta"] = nrm((cout,))
        p[f"bn{i}_mean"] = nrm((cout,))
        p[f"bn{i}_var"] = pos((cout,))
    p["fc_w"] = nrm((hidden, fc_in))
    p["fc_b"] = nrm((hidden,))
    for d in ("fwd", "bwd"):
        p[f"lstm_wih_{d}"] = nrm((4 * hidden, hidden))
        p[f"lstm_whh_{d}"] = nrm((4 * hidden, hidden))
        p[f"lstm_bih_{d}"] = nrm((4 * hidden,))
        p[f"lstm_bhh_{d}"] = nrm((4 * hidden,))
    p["out_w"] = nrm((num_classes + 1, 2 * hidden))
    p["out_b"] = nrm((num_classes + 1,))
    return p


def cnn_lstm_forward(params, images_nchw, hidden=128):
    bs = images_nchw.shape[0]
    x = jnp.transpose(images_nchw, (0, 2, 3, 1)).astype(jnp.float32)  # NCHW->NHWC

    x = conv_bn_relu_pool(x, params["conv1_w"], params["conv1_b"],
                          params["bn1_gamma"], params["bn1_beta"],
                          params["bn1_mean"], params["bn1_var"], 2, 2)
    x = conv_bn_relu_pool(x, params["conv2_w"], params["conv2_b"],
                          params["bn2_gamma"], params["bn2_beta"],
                          params["bn2_mean"], params["bn2_var"], 2, 2)
    x = conv_bn_relu_pool(x, params["conv3_w"], params["conv3_b"],
                          params["bn3_gamma"], params["bn3_beta"],
                          params["bn3_mean"], params["bn3_var"], 2, 1)
    # x: (bs, H/8, W/4, 256)

    H8, T, C = x.shape[1], x.shape[2], x.shape[3]
    # PyTorch: permute(0,3,1,2).view(bs, W/4, 256*H/8).  Emit it time-major so
    # every downstream tensor is already (T, B, ...) and no transposes remain.
    feat = jnp.transpose(x, (2, 0, 3, 1)).reshape(T * bs, C * H8)

    wfc = params["fc_w"].T.astype(jnp.bfloat16)                     # (F, hidden)
    bfc = params["fc_b"].reshape(1, hidden)
    wih = jnp.concatenate([params["lstm_wih_fwd"].T,
                           params["lstm_wih_bwd"].T], axis=1).astype(jnp.bfloat16)
    bih = jnp.concatenate([params["lstm_bih_fwd"] + params["lstm_bhh_fwd"],
                           params["lstm_bih_bwd"] + params["lstm_bhh_bwd"]]
                          ).reshape(1, 8 * hidden)
    xp = fc_lstm_proj(feat, wfc, bfc, wih, bih).reshape(T, bs, 8 * hidden)

    whh = jnp.stack([params["lstm_whh_fwd"].T,
                     params["lstm_whh_bwd"].T]).astype(jnp.bfloat16)  # (2,H,4H)
    hseq = bilstm(xp, whh)                                            # (T, bs, 2H)

    ncls1 = params["out_b"].shape[0]
    Np = _round_up(ncls1, 128)
    wout = jnp.pad(params["out_w"].T,
                   ((0, 0), (0, Np - ncls1))).astype(jnp.bfloat16)    # (2H, Np)
    bout = jnp.pad(params["out_b"], (0, Np - ncls1))
    y = linear_bias(hseq.reshape(T * bs, 2 * hidden), wout, bout)     # (T*bs, Np)
    y = y[:, :ncls1].reshape(T, bs, ncls1)
    # TODO(synk): CTC loss branch (labels is not None) not implemented; this is
    # the inference path (labels=None) only.
    return y


if __name__ == "__main__":
    IMAGE_H, IMAGE_W, NUM_CLASSES, BS = 16, 32, 10, 2
    key = jax.random.PRNGKey(0)
    k_img, k_par = jax.random.split(key)
    images = jax.random.normal(k_img, (BS, 1, IMAGE_H, IMAGE_W), jnp.float32)
    params = init_params(k_par, image_height=IMAGE_H, num_classes=NUM_CLASSES)

    fwd = jax.jit(cnn_lstm_forward)
    out = jax.block_until_ready(fwd(params, images))

    T = IMAGE_W // 4
    assert out.shape == (T, BS, NUM_CLASSES + 1), out.shape
    assert bool(jnp.all(jnp.isfinite(out)))
    print("KERNEL_OK")
</pallas_src>

<mosaic_0001>
module attributes {stable_mosaic.version = 11 : i64} {
  func.func @_conv_bn_relu_kernel(%arg0: i32, %arg1: memref<1x646x1xf32, #tpu.memory_space<vmem>>, %arg2: memref<9x1x128xbf16, #tpu.memory_space<vmem>>, %arg3: memref<1x128xf32, #tpu.memory_space<vmem>>, %arg4: memref<1x128xf32, #tpu.memory_space<vmem>>, %arg5: memref<1x544x128xf32, #tpu.memory_space<vmem>>) attributes {dimension_semantics = [#tpu.dimension_semantics<parallel>], iteration_bounds = array<i64: 2>, scalar_prefetch = 0 : i64, scratch_operands = 0 : i64, tpu.core_type = #tpu.core_type<tc>, window_params = [{transform_indices = @transform_0, window_bounds = array<i64: 1, 646, 1>}, {pipeline_mode = #tpu.pipeline_mode<synchronous>, transform_indices = @transform_1, window_bounds = array<i64: 9, 1, 128>}, {pipeline_mode = #tpu.pipeline_mode<synchronous>, transform_indices = @transform_2, window_bounds = array<i64: 1, 128>}, {pipeline_mode = #tpu.pipeline_mode<synchronous>, transform_indices = @transform_3, window_bounds = array<i64: 1, 128>}, {transform_indices = @transform_4, window_bounds = array<i64: 1, 544, 128>}]} {
    %c0 = arith.constant 0 : index
    %c0_0 = arith.constant 0 : index
    %c0_1 = arith.constant 0 : index
    %0 = vector.load %arg1[%c0, %c0_0, %c0_1] : memref<1x646x1xf32, #tpu.memory_space<vmem>>, vector<1x646x1xf32>
    %1 = vector.shape_cast %0 : vector<1x646x1xf32> to vector<646x1xf32>
    %2 = vector.extract_strided_slice %1 {offsets = [0, 0], sizes = [544, 1], strides = [1, 1]} : vector<646x1xf32> to vector<544x1xf32>
    %c0_2 = arith.constant 0 : index
    %c0_3 = arith.constant 0 : index
    %c0_4 = arith.constant 0 : index
    %3 = vector.load %arg2[%c0_2, %c0_3, %c0_4] : memref<9x1x128xbf16, #tpu.memory_space<vmem>>, vector<1x1x128xbf16>
    %4 = vector.shape_cast %3 : vector<1x1x128xbf16> to vector<1x128xbf16>
    %5 = arith.extf %4 : vector<1x128xbf16> to vector<1x128xf32>
    %6 = vector.broadcast %2 : vector<544x1xf32> to vector<544x128xf32>
    %7 = vector.broadcast %5 : vector<1x128xf32> to vector<544x128xf32>
    %8 = arith.mulf %6, %7 : vector<544x128xf32>
    %9 = vector.extract_strided_slice %1 {offsets = [1, 0], sizes = [544, 1], strides = [1, 1]} : vector<646x1xf32> to vector<544x1xf32>
    %c1 = arith.constant 1 : index
    %c0_5 = arith.constant 0 : index
    %c0_6 = arith.constant 0 : index
    %10 = vector.load %arg2[%c1, %c0_5, %c0_6] : memref<9x1x128xbf16, #tpu.memory_space<vmem>>, vector<1x1x128xbf16>
    %11 = vector.shape_cast %10 : vector<1x1x128xbf16> to vector<1x128xbf16>
    %12 = arith.extf %11 : vector<1x128xbf16> to vector<1x128xf32>
    %13 = vector.broadcast %9 : vector<544x1xf32> to vector<544x128xf32>
    %14 = vector.broadcast %12 : vector<1x128xf32> to vector<544x128xf32>
    %15 = arith.mulf %13, %14 : vector<544x128xf32>
    %16 = arith.addf %8, %15 : vector<544x128xf32>
    %17 = vector.extract_strided_slice %1 {offsets = [2, 0], sizes = [544, 1], strides = [1, 1]} : vector<646x1xf32> to vector<544x1xf32>
    %c2 = arith.constant 2 : index
    %c0_7 = arith.constant 0 : index
    %c0_8 = arith.constant 0 : index
    %18 = vector.load %arg2[%c2, %c0_7, %c0_8] : memref<9x1x128xbf16, #tpu.memory_space<vmem>>, vector<1x1x128xbf16>
    %19 = vector.shape_cast %18 : vector<1x1x128xbf16> to vector<1x128xbf16>
    %20 = arith.extf %19 : vector<1x128xbf16> to vector<1x128xf32>
    %21 = vector.broadcast %17 : vector<544x1xf32> to vector<544x128xf32>
    %22 = vector.broadcast %20 : vector<1x128xf32> to vector<544x128xf32>
    %23 = arith.mulf %21, %22 : vector<544x128xf32>
    %24 = arith.addf %16, %23 : vector<544x128xf32>
    %25 = vector.extract_strided_slice %1 {offsets = [34, 0], sizes = [544, 1], strides = [1, 1]} : vector<646x1xf32> to vector<544x1xf32>
    %c3 = arith.constant 3 : index
    %c0_9 = arith.constant 0 : index
    %c0_10 = arith.constant 0 : index
    %26 = vector.load %arg2[%c3, %c0_9, %c0_10] : memref<9x1x128xbf16, #tpu.memory_space<vmem>>, vector<1x1x128xbf16>
    %27 = vector.shape_cast %26 : vector<1x1x128xbf16> to vector<1x128xbf16>
    %28 = arith.extf %27 : vector<1x128xbf16> to vector<1x128xf32>
    %29 = vector.broadcast %25 : vector<544x1xf32> to vector<544x128xf32>
    %30 = vector.broadcast %28 : vector<1x128xf32> to vector<544x128xf32>
    %31 = arith.mulf %29, %30 : vector<544x128xf32>
    %32 = arith.addf %24, %31 : vector<544x128xf32>
    %33 = vector.extract_strided_slice %1 {offsets = [35, 0], sizes = [544, 1], strides = [1, 1]} : vector<646x1xf32> to vector<544x1xf32>
    %c4 = arith.constant 4 : index
    %c0_11 = arith.constant 0 : index
    %c0_12 = arith.constant 0 : index
    %34 = vector.load %arg2[%c4, %c0_11, %c0_12] : memref<9x1x128xbf16, #tpu.memory_space<vmem>>, vector<1x1x128xbf16>
    %35 = vector.shape_cast %34 : vector<1x1x128xbf16> to vector<1x128xbf16>
    %36 = arith.extf %35 : vector<1x128xbf16> to vector<1x128xf32>
    %37 = vector.broadcast %33 : vector<544x1xf32> to vector<544x128xf32>
    %38 = vector.broadcast %36 : vector<1x128xf32> to vector<544x128xf32>
    %39 = arith.mulf %37, %38 : vector<544x128xf32>
    %40 = arith.addf %32, %39 : vector<544x128xf32>
    %41 = vector.extract_strided_slice %1 {offsets = [36, 0], sizes = [544, 1], strides = [1, 1]} : vector<646x1xf32> to vector<544x1xf32>
    %c5 = arith.constant 5 : index
    %c0_13 = arith.constant 0 : index
    %c0_14 = arith.constant 0 : index
    %42 = vector.load %arg2[%c5, %c0_13, %c0_14] : memref<9x1x128xbf16, #tpu.memory_space<vmem>>, vector<1x1x128xbf16>
    %43 = vector.shape_cast %42 : vector<1x1x128xbf16> to vector<1x128xbf16>
    %44 = arith.extf %43 : vector<1x128xbf16> to vector<1x128xf32>
    %45 = vector.broadcast %41 : vector<544x1xf32> to vector<544x128xf32>
    %46 = vector.broadcast %44 : vector<1x128xf32> to vector<544x128xf32>
    %47 = arith.mulf %45, %46 : vector<544x128xf32>
    %48 = arith.addf %40, %47 : vector<544x128xf32>
    %49 = vector.extract_strided_slice %1 {offsets = [68, 0], sizes = [544, 1], strides = [1, 1]} : vector<646x1xf32> to vector<544x1xf32>
    %c6 = arith.constant 6 : index
    %c0_15 = arith.constant 0 : index
    %c0_16 = arith.constant 0 : index
    %50 = vector.load %arg2[%c6, %c0_15, %c0_16] : memref<9x1x128xbf16, #tpu.memory_space<vmem>>, vector<1x1x128xbf16>
    %51 = vector.shape_cast %50 : vector<1x1x128xbf16> to vector<1x128xbf16>
    %52 = arith.extf %51 : vector<1x128xbf16> to vector<1x128xf32>
    %53 = vector.broadcast %49 : vector<544x1xf32> to vector<544x128xf32>
    %54 = vector.broadcast %52 : vector<1x128xf32> to vector<544x128xf32>
    %55 = arith.mulf %53, %54 : vector<544x128xf32>
    %56 = arith.addf %48, %55 : vector<544x128xf32>
    %57 = vector.extract_strided_slice %1 {offsets = [69, 0], sizes = [544, 1], strides = [1, 1]} : vector<646x1xf32> to vector<544x1xf32>
    %c7 = arith.constant 7 : index
    %c0_17 = arith.constant 0 : index
    %c0_18 = arith.constant 0 : index
    %58 = vector.load %arg2[%c7, %c0_17, %c0_18] : memref<9x1x128xbf16, #tpu.memory_space<vmem>>, vector<1x1x128xbf16>
    %59 = vector.shape_cast %58 : vector<1x1x128xbf16> to vector<1x128xbf16>
    %60 = arith.extf %59 : vector<1x128xbf16> to vector<1x128xf32>
    %61 = vector.broadcast %57 : vector<544x1xf32> to vector<544x128xf32>
    %62 = vector.broadcast %60 : vector<1x128xf32> to vector<544x128xf32>
    %63 = arith.mulf %61, %62 : vector<544x128xf32>
    %64 = arith.addf %56, %63 : vector<544x128xf32>
    %65 = vector.extract_strided_slice %1 {offsets = [70, 0], sizes = [544, 1], strides = [1, 1]} : vector<646x1xf32> to vector<544x1xf32>
    %c8 = arith.constant 8 : index
    %c0_19 = arith.constant 0 : index
    %c0_20 = arith.constant 0 : index
    %66 = vector.load %arg2[%c8, %c0_19, %c0_20] : memref<9x1x128xbf16, #tpu.memory_space<vmem>>, vector<1x1x128xbf16>
    %67 = vector.shape_cast %66 : vector<1x1x128xbf16> to vector<1x128xbf16>
    %68 = arith.extf %67 : vector<1x128xbf16> to vector<1x128xf32>
    %69 = vector.broadcast %65 : vector<544x1xf32> to vector<544x128xf32>
    %70 = vector.broadcast %68 : vector<1x128xf32> to vector<544x128xf32>
    %71 = arith.mulf %69, %70 : vector<544x128xf32>
    %72 = arith.addf %64, %71 : vector<544x128xf32>
    %c0_21 = arith.constant 0 : index
    %c0_22 = arith.constant 0 : index
    %73 = vector.load %arg3[%c0_21, %c0_22] : memref<1x128xf32, #tpu.memory_space<vmem>>, vector<1x128xf32>
    %74 = vector.broadcast %73 : vector<1x128xf32> to vector<544x128xf32>
    %75 = arith.mulf %72, %74 : vector<544x128xf32>
    %c0_23 = arith.constant 0 : index
    %c0_24 = arith.constant 0 : index
    %76 = vector.load %arg4[%c0_23, %c0_24] : memref<1x128xf32, #tpu.memory_space<vmem>>, vector<1x128xf32>
    %77 = vector.broadcast %76 : vector<1x128xf32> to vector<544x128xf32>
    %78 = arith.addf %75, %77 : vector<544x128xf32>
    %cst = arith.constant 0.000000e+00 : f32
    %79 = vector.broadcast %cst : f32 to vector<544x128xf32>
    %80 = arith.maximumf %78, %79 : vector<544x128xf32>
    %c0_25 = arith.constant 0 : index
    %c0_26 = arith.constant 0 : index
    %c0_27 = arith.constant 0 : index
    %81 = vector.load %arg5[%c0_25, %c0_26, %c0_27] : memref<1x544x128xf32, #tpu.memory_space<vmem>>, vector<1x544x128xf32>
    %82 = vector.shape_cast %81 : vector<1x544x128xf32> to vector<544x128xf32>
    %83 = vector.shape_cast %80 : vector<544x128xf32> to vector<1x544x128xf32>
    tpu.vector_store %arg5[%c0_25, %c0_26, %c0_27], %83 {strides = array<i32>} : memref<1x544x128xf32, #tpu.memory_space<vmem>>, vector<1x544x128xf32>,
    return
  }
  func.func @transform_0(%arg0: i32) -> (i32, i32, i32) {
    %c0_i32 = arith.constant 0 : i32
    %c0_i32_0 = arith.constant 0 : i32
    %c0_i32_1 = arith.constant 0 : i32
    return %arg0, %c0_i32, %c0_i32_0 : i32, i32, i32
  }
  func.func @transform_1(%arg0: i32) -> (i32, i32, i32) {
    %c0_i32 = arith.constant 0 : i32
    %c0_i32_0 = arith.constant 0 : i32
    %c0_i32_1 = arith.constant 0 : i32
    %c0_i32_2 = arith.constant 0 : i32
    return %c0_i32, %c0_i32_0, %c0_i32_1 : i32, i32, i32
  }
  func.func @transform_2(%arg0: i32) -> (i32, i32) {
    %c0_i32 = arith.constant 0 : i32
    %c0_i32_0 = arith.constant 0 : i32
    %c0_i32_1 = arith.constant 0 : i32
    return %c0_i32, %c0_i32_0 : i32, i32
  }
  func.func @transform_3(%arg0: i32) -> (i32, i32) {
    %c0_i32 = arith.constant 0 : i32
    %c0_i32_0 = arith.constant 0 : i32
    %c0_i32_1 = arith.constant 0 : i32
    return %c0_i32, %c0_i32_0 : i32, i32
  }
  func.func @transform_4(%arg0: i32) -> (i32, i32, i32) {
    %c0_i32 = arith.constant 0 : i32
    %c0_i32_0 = arith.constant 0 : i32
    %c0_i32_1 = arith.constant 0 : i32
    return %arg0, %c0_i32, %c0_i32_0 : i32, i32, i32
  }
}

module attributes {stable_mosaic.version = 11 : i64} {
  func.func @_conv_bn_relu_kernel(%arg0: i32, %arg1: memref<1x198x128xf32, #tpu.memory_space<vmem>>, %arg2: memref<9x128x128xbf16, #tpu.memory_space<vmem>>, %arg3: memref<1x128xf32, #tpu.memory_space<vmem>>, %arg4: memref<1x128xf32, #tpu.memory_space<vmem>>, %arg5: memref<1x144x128xf32, #tpu.memory_space<vmem>>) attributes {dimension_semantics = [#tpu.dimension_semantics<parallel>], iteration_bounds = array<i64: 2>, scalar_prefetch = 0 : i64, scratch_operands = 0 : i64, tpu.core_type = #tpu.core_type<tc>, window_params = [{transform_indices = @transform_0, window_bounds = array<i64: 1, 198, 128>}, {pipeline_mode = #tpu.pipeline_mode<synchronous>, transform_indices = @transform_1, window_bounds = array<i64: 9, 128, 128>}, {pipeline_mode = #tpu.pipeline_mode<synchronous>, transform_indices = @transform_2, window_bounds = array<i64: 1, 128>}, {pipeline_mode = #tpu.pipeline_mode<synchronous>, transform_indices = @transform_3, window_bounds = array<i64: 1, 128>}, {transform_indices = @transform_4, window_bounds = array<i64: 1, 144, 128>}]} {
    %c0 = arith.constant 0 : index
    %c0_0 = arith.constant 0 : index
    %c0_1 = arith.constant 0 : index
    %0 = vector.load %arg1[%c0, %c0_0, %c0_1] : memref<1x198x128xf32, #tpu.memory_space<vmem>>, vector<1x198x128xf32>
    %1 = vector.shape_cast %0 : vector<1x198x128xf32> to vector<198x128xf32>
    %2 = vector.extract_strided_slice %1 {offsets = [0, 0], sizes = [144, 128], strides = [1, 1]} : vector<198x128xf32> to vector<144x128xf32>
    %3 = arith.truncf %2 : vector<144x128xf32> to vector<144x128xbf16>
    %c0_2 = arith.constant 0 : index
    %c0_3 = arith.constant 0 : index
    %c0_4 = arith.constant 0 : index
    %4 = vector.load %arg2[%c0_2, %c0_3, %c0_4] : memref<9x128x128xbf16, #tpu.memory_space<vmem>>, vector<1x128x128xbf16>
    %5 = vector.shape_cast %4 : vector<1x128x128xbf16> to vector<128x128xbf16>
    %cst = arith.constant dense<0.000000e+00> : vector<144x128xf32>
    %6 = tpu.matmul %3, %5, %cst {dimension_numbers = #tpu.dot_dimension_numbers<[1], [0], [0], [1], [0, 0, 1, 1], [], []>} : vector<144x128xbf16>, vector<128x128xbf16>, vector<144x128xf32> -> vector<144x128xf32>
    %7 = vector.extract_strided_slice %1 {offsets = [1, 0], sizes = [144, 128], strides = [1, 1]} : vector<198x128xf32> to vector<144x128xf32>
    %8 = arith.truncf %7 : vector<144x128xf32> to vector<144x128xbf16>
    %c1 = arith.constant 1 : index
    %c0_5 = arith.constant 0 : index
    %c0_6 = arith.constant 0 : index
    %9 = vector.load %arg2[%c1, %c0_5, %c0_6] : memref<9x128x128xbf16, #tpu.memory_space<vmem>>, vector<1x128x128xbf16>
    %10 = vector.shape_cast %9 : vector<1x128x128xbf16> to vector<128x128xbf16>
    %cst_7 = arith.constant dense<0.000000e+00> : vector<144x128xf32>
    %11 = tpu.matmul %8, %10, %cst_7 {dimension_numbers = #tpu.dot_dimension_numbers<[1], [0], [0], [1], [0, 0, 1, 1], [], []>} : vector<144x128xbf16>, vector<128x128xbf16>, vector<144x128xf32> -> vector<144x128xf32>
    %12 = arith.addf %6, %11 : vector<144x128xf32>
    %13 = vector.extract_strided_slice %1 {offsets = [2, 0], sizes = [144, 128], strides = [1, 1]} : vector<198x128xf32> to vector<144x128xf32>
    %14 = arith.truncf %13 : vector<144x128xf32> to vector<144x128xbf16>
    %c2 = arith.constant 2 : index
    %c0_8 = arith.constant 0 : index
    %c0_9 = arith.constant 0 : index
    %15 = vector.load %arg2[%c2, %c0_8, %c0_9] : memref<9x128x128xbf16, #tpu.memory_space<vmem>>, vector<1x128x128xbf16>
    %16 = vector.shape_cast %15 : vector<1x128x128xbf16> to vector<128x128xbf16>
    %cst_10 = arith.constant dense<0.000000e+00> : vector<144x128xf32>
    %17 = tpu.matmul %14, %16, %cst_10 {dimension_numbers = #tpu.dot_dimension_numbers<[1], [0], [0], [1], [0, 0, 1, 1], [], []>} : vector<144x128xbf16>, vector<128x128xbf16>, vector<144x128xf32> -> vector<144x128xf32>
    %18 = arith.addf %12, %17 : vector<144x128xf32>
    %19 = vector.extract_strided_slice %1 {offsets = [18, 0], sizes = [144, 128], strides = [1, 1]} : vector<198x128xf32> to vector<144x128xf32>
    %20 = arith.truncf %19 : vector<144x128xf32> to vector<144x128xbf16>
    %c3 = arith.constant 3 : index
    %c0_11 = arith.constant 0 : index
    %c0_12 = arith.constant 0 : index
    %21 = vector.load %arg2[%c3, %c0_11, %c0_12] : memref<9x128x128xbf16, #tpu.memory_space<vmem>>, vector<1x128x128xbf16>
    %22 = vector.shape_cast %21 : vector<1x128x128xbf16> to vector<128x128xbf16>
    %cst_13 = arith.constant dense<0.000000e+00> : vector<144x128xf32>
    %23 = tpu.matmul %20, %22, %cst_13 {dimension_numbers = #tpu.dot_dimension_numbers<[1], [0], [0], [1], [0, 0, 1, 1], [], []>} : vector<144x128xbf16>, vector<128x128xbf16>, vector<144x128xf32> -> vector<144x128xf32>
    %24 = arith.addf %18, %23 : vector<144x128xf32>
    %25 = vector.extract_strided_slice %1 {offsets = [19, 0], sizes = [144, 128], strides = [1, 1]} : vector<198x128xf32> to vector<144x128xf32>
    %26 = arith.truncf %25 : vector<144x128xf32> to vector<144x128xbf16>
    %c4 = arith.constant 4 : index
    %c0_14 = arith.constant 0 : index
    %c0_15 = arith.constant 0 : index
    %27 = vector.load %arg2[%c4, %c0_14, %c0_15] : memref<9x128x128xbf16, #tpu.memory_space<vmem>>, vector<1x128x128xbf16>
    %28 = vector.shape_cast %27 : vector<1x128x128xbf16> to vector<128x128xbf16>
    %cst_16 = arith.constant dense<0.000000e+00> : vector<144x128xf32>
    %29 = tpu.matmul %26, %28, %cst_16 {dimension_numbers = #tpu.dot_dimension_numbers<[1], [0], [0], [1], [0, 0, 1, 1], [], []>} : vector<144x128xbf16>, vector<128x128xbf16>, vector<144x128xf32> -> vector<144x128xf32>
    %30 = arith.addf %24, %29 : vector<144x128xf32>
    %31 = vector.extract_strided_slice %1 {offsets = [20, 0], sizes = [144, 128], strides = [1, 1]} : vector<198x128xf32> to vector<144x128xf32>
    %32 = arith.truncf %31 : vector<144x128xf32> to vector<144x128xbf16>
    %c5 = arith.constant 5 : index
    %c0_17 = arith.constant 0 : index
    %c0_18 = arith.constant 0 : index
    %33 = vector.load %arg2[%c5, %c0_17, %c0_18] : memref<9x128x128xbf16, #tpu.memory_space<vmem>>, vector<1x128x128xbf16>
    %34 = vector.shape_cast %33 : vector<1x128x128xbf16> to vector<128x128xbf16>
    %cst_19 = arith.constant dense<0.000000e+00> : vector<144x128xf32>
    %35 = tpu.matmul %32, %34, %cst_19 {dimension_numbers = #tpu.dot_dimension_numbers<[1], [0], [0], [1], [0, 0, 1, 1], [], []>} : vector<144x128xbf16>, vector<128x128xbf16>, vector<144x128xf32> -> vector<144x128xf32>
    %36 = arith.addf %30, %35 : vector<144x128xf32>
    %37 = vector.extract_strided_slice %1 {offsets = [36, 0], sizes = [144, 128], strides = [1, 1]} : vector<198x128xf32> to vector<144x128xf32>
    %38 = arith.truncf %37 : vector<144x128xf32> to vector<144x128xbf16>
    %c6 = arith.constant 6 : index
    %c0_20 = arith.constant 0 : index
    %c0_21 = arith.constant 0 : index
    %39 = vector.load %arg2[%c6, %c0_20, %c0_21] : memref<9x128x128xbf16, #tpu.memory_space<vmem>>, vector<1x128x128xbf16>
    %40 = vector.shape_cast %39 : vector<1x128x128xbf16> to vector<128x128xbf16>
    %cst_22 = arith.constant dense<0.000000e+00> : vector<144x128xf32>
    %41 = tpu.matmul %38, %40, %cst_22 {dimension_numbers = #tpu.dot_dimension_numbers<[1], [0], [0], [1], [0, 0, 1, 1], [], []>} : vector<144x128xbf16>, vector<128x128xbf16>, vector<144x128xf32> -> vector<144x128xf32>
    %42 = arith.addf %36, %41 : vector<144x128xf32>
    %43 = vector.extract_strided_slice %1 {offsets = [37, 0], sizes = [144, 128], strides = [1, 1]} : vector<198x128xf32> to vector<144x128xf32>
    %44 = arith.truncf %43 : vector<144x128xf32> to vector<144x128xbf16>
    %c7 = arith.constant 7 : index
    %c0_23 = arith.constant 0 : index
    %c0_24 = arith.constant 0 : index
    %45 = vector.load %arg2[%c7, %c0_23, %c0_24] : memref<9x128x128xbf16, #tpu.memory_space<vmem>>, vector<1x128x128xbf16>
    %46 = vector.shape_cast %45 : vector<1x128x128xbf16> to vector<128x128xbf16>
    %cst_25 = arith.constant dense<0.000000e+00> : vector<144x128xf32>
    %47 = tpu.matmul %44, %46, %cst_25 {dimension_numbers = #tpu.dot_dimension_numbers<[1], [0], [0], [1], [0, 0, 1, 1], [], []>} : vector<144x128xbf16>, vector<128x128xbf16>, vector<144x128xf32> -> vector<144x128xf32>
    %48 = arith.addf %42, %47 : vector<144x128xf32>
    %49 = vector.extract_strided_slice %1 {offsets = [38, 0], sizes = [144, 128], strides = [1, 1]} : vector<198x128xf32> to vector<144x128xf32>
    %50 = arith.truncf %49 : vector<144x128xf32> to vector<144x128xbf16>
    %c8 = arith.constant 8 : index
    %c0_26 = arith.constant 0 : index
    %c0_27 = arith.constant 0 : index
    %51 = vector.load %arg2[%c8, %c0_26, %c0_27] : memref<9x128x128xbf16, #tpu.memory_space<vmem>>, vector<1x128x128xbf16>
    %52 = vector.shape_cast %51 : vector<1x128x128xbf16> to vector<128x128xbf16>
    %cst_28 = arith.constant dense<0.000000e+00> : vector<144x128xf32>
    %53 = tpu.matmul %50, %52, %cst_28 {dimension_numbers = #tpu.dot_dimension_numbers<[1], [0], [0], [1], [0, 0, 1, 1], [], []>} : vector<144x128xbf16>, vector<128x128xbf16>, vector<144x128xf32> -> vector<144x128xf32>
    %54 = arith.addf %48, %53 : vector<144x128xf32>
    %c0_29 = arith.constant 0 : index
    %c0_30 = arith.constant 0 : index
    %55 = vector.load %arg3[%c0_29, %c0_30] : memref<1x128xf32, #tpu.memory_space<vmem>>, vector<1x128xf32>
    %56 = vector.broadcast %55 : vector<1x128xf32> to vector<144x128xf32>
    %57 = arith.mulf %54, %56 : vector<144x128xf32>
    %c0_31 = arith.constant 0 : index
    %c0_32 = arith.constant 0 : index
    %58 = vector.load %arg4[%c0_31, %c0_32] : memref<1x128xf32, #tpu.memory_space<vmem>>, vector<1x128xf32>
    %59 = vector.broadcast %58 : vector<1x128xf32> to vector<144x128xf32>
    %60 = arith.addf %57, %59 : vector<144x128xf32>
    %cst_33 = arith.constant 0.000000e+00 : f32
    %61 = vector.broadcast %cst_33 : f32 to vector<144x128xf32>
    %62 = arith.maximumf %60, %61 : vector<144x128xf32>
    %c0_34 = arith.constant 0 : index
    %c0_35 = arith.constant 0 : index
    %c0_36 = arith.constant 0 : index
    %63 = vector.load %arg5[%c0_34, %c0_35, %c0_36] : memref<1x144x128xf32, #tpu.memory_space<vmem>>, vector<1x144x128xf32>
    %64 = vector.shape_cast %63 : vector<1x144x128xf32> to vector<144x128xf32>
    %65 = vector.shape_cast %62 : vector<144x128xf32> to vector<1x144x128xf32>
    tpu.vector_store %arg5[%c0_34, %c0_35, %c0_36], %65 {strides = array<i32>} : memref<1x144x128xf32, #tpu.memory_space<vmem>>, vector<1x144x128xf32>,
    return
  }
  func.func @transform_0(%arg0: i32) -> (i32, i32, i32) {
    %c0_i32 = arith.constant 0 : i32
    %c0_i32_0 = arith.constant 0 : i32
    %c0_i32_1 = arith.constant 0 : i32
    return %arg0, %c0_i32, %c0_i32_0 : i32, i32, i32
  }
  func.func @transform_1(%arg0: i32) -> (i32, i32, i32) {
    %c0_i32 = arith.constant 0 : i32
    %c0_i32_0 = arith.constant 0 : i32
    %c0_i32_1 = arith.constant 0 : i32
    %c0_i32_2 = arith.constant 0 : i32
    return %c0_i32, %c0_i32_0, %c0_i32_1 : i32, i32, i32
  }
  func.func @transform_2(%arg0: i32) -> (i32, i32) {
    %c0_i32 = arith.constant 0 : i32
    %c0_i32_0 = arith.constant 0 : i32
    %c0_i32_1 = arith.constant 0 : i32
    return %c0_i32, %c0_i32_0 : i32, i32
  }
  func.func @transform_3(%arg0: i32) -> (i32, i32) {
    %c0_i32 = arith.constant 0 : i32
    %c0_i32_0 = arith.constant 0 : i32
    %c0_i32_1 = arith.constant 0 : i32
    return %c0_i32, %c0_i32_0 : i32, i32
  }
  func.func @transform_4(%arg0: i32) -> (i32, i32, i32) {
    %c0_i32 = arith.constant 0 : i32
    %c0_i32_0 = arith.constant 0 : i32
    %c0_i32_1 = arith.constant 0 : i32
    return %arg0, %c0_i32, %c0_i32_0 : i32, i32, i32
  }
}

module attributes {stable_mosaic.version = 11 : i64} {
  func.func @_conv_bn_relu_kernel(%arg0: i32, %arg1: memref<1x70x128xf32, #tpu.memory_space<vmem>>, %arg2: memref<9x128x256xbf16, #tpu.memory_space<vmem>>, %arg3: memref<1x256xf32, #tpu.memory_space<vmem>>, %arg4: memref<1x256xf32, #tpu.memory_space<vmem>>, %arg5: memref<1x40x256xf32, #tpu.memory_space<vmem>>) attributes {dimension_semantics = [#tpu.dimension_semantics<parallel>], iteration_bounds = array<i64: 2>, scalar_prefetch = 0 : i64, scratch_operands = 0 : i64, tpu.core_type = #tpu.core_type<tc>, window_params = [{transform_indices = @transform_0, window_bounds = array<i64: 1, 70, 128>}, {pipeline_mode = #tpu.pipeline_mode<synchronous>, transform_indices = @transform_1, window_bounds = array<i64: 9, 128, 256>}, {pipeline_mode = #tpu.pipeline_mode<synchronous>, transform_indices = @transform_2, window_bounds = array<i64: 1, 256>}, {pipeline_mode = #tpu.pipeline_mode<synchronous>, transform_indices = @transform_3, window_bounds = array<i64: 1, 256>}, {transform_indices = @transform_4, window_bounds = array<i64: 1, 40, 256>}]} {
    %c0 = arith.constant 0 : index
    %c0_0 = arith.constant 0 : index
    %c0_1 = arith.constant 0 : index
    %0 = vector.load %arg1[%c0, %c0_0, %c0_1] : memref<1x70x128xf32, #tpu.memory_space<vmem>>, vector<1x70x128xf32>
    %1 = vector.shape_cast %0 : vector<1x70x128xf32> to vector<70x128xf32>
    %2 = vector.extract_strided_slice %1 {offsets = [0, 0], sizes = [40, 128], strides = [1, 1]} : vector<70x128xf32> to vector<40x128xf32>
    %3 = arith.truncf %2 : vector<40x128xf32> to vector<40x128xbf16>
    %c0_2 = arith.constant 0 : index
    %c0_3 = arith.constant 0 : index
    %c0_4 = arith.constant 0 : index
    %4 = vector.load %arg2[%c0_2, %c0_3, %c0_4] : memref<9x128x256xbf16, #tpu.memory_space<vmem>>, vector<1x128x256xbf16>
    %5 = vector.shape_cast %4 : vector<1x128x256xbf16> to vector<128x256xbf16>
    %cst = arith.constant dense<0.000000e+00> : vector<40x256xf32>
    %6 = tpu.matmul %3, %5, %cst {dimension_numbers = #tpu.dot_dimension_numbers<[1], [0], [0], [1], [0, 0, 1, 1], [], []>} : vector<40x128xbf16>, vector<128x256xbf16>, vector<40x256xf32> -> vector<40x256xf32>
    %7 = vector.extract_strided_slice %1 {offsets = [1, 0], sizes = [40, 128], strides = [1, 1]} : vector<70x128xf32> to vector<40x128xf32>
    %8 = arith.truncf %7 : vector<40x128xf32> to vector<40x128xbf16>
    %c1 = arith.constant 1 : index
    %c0_5 = arith.constant 0 : index
    %c0_6 = arith.constant 0 : index
    %9 = vector.load %arg2[%c1, %c0_5, %c0_6] : memref<9x128x256xbf16, #tpu.memory_space<vmem>>, vector<1x128x256xbf16>
    %10 = vector.shape_cast %9 : vector<1x128x256xbf16> to vector<128x256xbf16>
    %cst_7 = arith.constant dense<0.000000e+00> : vector<40x256xf32>
    %11 = tpu.matmul %8, %10, %cst_7 {dimension_numbers = #tpu.dot_dimension_numbers<[1], [0], [0], [1], [0, 0, 1, 1], [], []>} : vector<40x128xbf16>, vector<128x256xbf16>, vector<40x256xf32> -> vector<40x256xf32>
    %12 = arith.addf %6, %11 : vector<40x256xf32>
    %13 = vector.extract_strided_slice %1 {offsets = [2, 0], sizes = [40, 128], strides = [1, 1]} : vector<70x128xf32> to vector<40x128xf32>
    %14 = arith.truncf %13 : vector<40x128xf32> to vector<40x128xbf16>
    %c2 = arith.constant 2 : index
    %c0_8 = arith.constant 0 : index
    %c0_9 = arith.constant 0 : index
    %15 = vector.load %arg2[%c2, %c0_8, %c0_9] : memref<9x128x256xbf16, #tpu.memory_space<vmem>>, vector<1x128x256xbf16>
    %16 = vector.shape_cast %15 : vector<1x128x256xbf16> to vector<128x256xbf16>
    %cst_10 = arith.constant dense<0.000000e+00> : vector<40x256xf32>
    %17 = tpu.matmul %14, %16, %cst_10 {dimension_numbers = #tpu.dot_dimension_numbers<[1], [0], [0], [1], [0, 0, 1, 1], [], []>} : vector<40x128xbf16>, vector<128x256xbf16>, vector<40x256xf32> -> vector<40x256xf32>
    %18 = arith.addf %12, %17 : vector<40x256xf32>
    %19 = vector.extract_strided_slice %1 {offsets = [10, 0], sizes = [40, 128], strides = [1, 1]} : vector<70x128xf32> to vector<40x128xf32>
    %20 = arith.truncf %19 : vector<40x128xf32> to vector<40x128xbf16>
    %c3 = arith.constant 3 : index
    %c0_11 = arith.constant 0 : index
    %c0_12 = arith.constant 0 : index
    %21 = vector.load %arg2[%c3, %c0_11, %c0_12] : memref<9x128x256xbf16, #tpu.memory_space<vmem>>, vector<1x128x256xbf16>
    %22 = vector.shape_cast %21 : vector<1x128x256xbf16> to vector<128x256xbf16>
    %cst_13 = arith.constant dense<0.000000e+00> : vector<40x256xf32>
    %23 = tpu.matmul %20, %22, %cst_13 {dimension_numbers = #tpu.dot_dimension_numbers<[1], [0], [0], [1], [0, 0, 1, 1], [], []>} : vector<40x128xbf16>, vector<128x256xbf16>, vector<40x256xf32> -> vector<40x256xf32>
    %24 = arith.addf %18, %23 : vector<40x256xf32>
    %25 = vector.extract_strided_slice %1 {offsets = [11, 0], sizes = [40, 128], strides = [1, 1]} : vector<70x128xf32> to vector<40x128xf32>
    %26 = arith.truncf %25 : vector<40x128xf32> to vector<40x128xbf16>
    %c4 = arith.constant 4 : index
    %c0_14 = arith.constant 0 : index
    %c0_15 = arith.constant 0 : index
    %27 = vector.load %arg2[%c4, %c0_14, %c0_15] : memref<9x128x256xbf16, #tpu.memory_space<vmem>>, vector<1x128x256xbf16>
    %28 = vector.shape_cast %27 : vector<1x128x256xbf16> to vector<128x256xbf16>
    %cst_16 = arith.constant dense<0.000000e+00> : vector<40x256xf32>
    %29 = tpu.matmul %26, %28, %cst_16 {dimension_numbers = #tpu.dot_dimension_numbers<[1], [0], [0], [1], [0, 0, 1, 1], [], []>} : vector<40x128xbf16>, vector<128x256xbf16>, vector<40x256xf32> -> vector<40x256xf32>
    %30 = arith.addf %24, %29 : vector<40x256xf32>
    %31 = vector.extract_strided_slice %1 {offsets = [12, 0], sizes = [40, 128], strides = [1, 1]} : vector<70x128xf32> to vector<40x128xf32>
    %32 = arith.truncf %31 : vector<40x128xf32> to vector<40x128xbf16>
    %c5 = arith.constant 5 : index
    %c0_17 = arith.constant 0 : index
    %c0_18 = arith.constant 0 : index
    %33 = vector.load %arg2[%c5, %c0_17, %c0_18] : memref<9x128x256xbf16, #tpu.memory_space<vmem>>, vector<1x128x256xbf16>
    %34 = vector.shape_cast %33 : vector<1x128x256xbf16> to vector<128x256xbf16>
    %cst_19 = arith.constant dense<0.000000e+00> : vector<40x256xf32>
    %35 = tpu.matmul %32, %34, %cst_19 {dimension_numbers = #tpu.dot_dimension_numbers<[1], [0], [0], [1], [0, 0, 1, 1], [], []>} : vector<40x128xbf16>, vector<128x256xbf16>, vector<40x256xf32> -> vector<40x256xf32>
    %36 = arith.addf %30, %35 : vector<40x256xf32>
    %37 = vector.extract_strided_slice %1 {offsets = [20, 0], sizes = [40, 128], strides = [1, 1]} : vector<70x128xf32> to vector<40x128xf32>
    %38 = arith.truncf %37 : vector<40x128xf32> to vector<40x128xbf16>
    %c6 = arith.constant 6 : index
    %c0_20 = arith.constant 0 : index
    %c0_21 = arith.constant 0 : index
    %39 = vector.load %arg2[%c6, %c0_20, %c0_21] : memref<9x128x256xbf16, #tpu.memory_space<vmem>>, vector<1x128x256xbf16>
    %40 = vector.shape_cast %39 : vector<1x128x256xbf16> to vector<128x256xbf16>
    %cst_22 = arith.constant dense<0.000000e+00> : vector<40x256xf32>
    %41 = tpu.matmul %38, %40, %cst_22 {dimension_numbers = #tpu.dot_dimension_numbers<[1], [0], [0], [1], [0, 0, 1, 1], [], []>} : vector<40x128xbf16>, vector<128x256xbf16>, vector<40x256xf32> -> vector<40x256xf32>
    %42 = arith.addf %36, %41 : vector<40x256xf32>
    %43 = vector.extract_strided_slice %1 {offsets = [21, 0], sizes = [40, 128], strides = [1, 1]} : vector<70x128xf32> to vector<40x128xf32>
    %44 = arith.truncf %43 : vector<40x128xf32> to vector<40x128xbf16>
    %c7 = arith.constant 7 : index
    %c0_23 = arith.constant 0 : index
    %c0_24 = arith.constant 0 : index
    %45 = vector.load %arg2[%c7, %c0_23, %c0_24] : memref<9x128x256xbf16, #tpu.memory_space<vmem>>, vector<1x128x256xbf16>
    %46 = vector.shape_cast %45 : vector<1x128x256xbf16> to vector<128x256xbf16>
    %cst_25 = arith.constant dense<0.000000e+00> : vector<40x256xf32>
    %47 = tpu.matmul %44, %46, %cst_25 {dimension_numbers = #tpu.dot_dimension_numbers<[1], [0], [0], [1], [0, 0, 1, 1], [], []>} : vector<40x128xbf16>, vector<128x256xbf16>, vector<40x256xf32> -> vector<40x256xf32>
    %48 = arith.addf %42, %47 : vector<40x256xf32>
    %49 = vector.extract_strided_slice %1 {offsets = [22, 0], sizes = [40, 128], strides = [1, 1]} : vector<70x128xf32> to vector<40x128xf32>
    %50 = arith.truncf %49 : vector<40x128xf32> to vector<40x128xbf16>
    %c8 = arith.constant 8 : index
    %c0_26 = arith.constant 0 : index
    %c0_27 = arith.constant 0 : index
    %51 = vector.load %arg2[%c8, %c0_26, %c0_27] : memref<9x128x256xbf16, #tpu.memory_space<vmem>>, vector<1x128x256xbf16>
    %52 = vector.shape_cast %51 : vector<1x128x256xbf16> to vector<128x256xbf16>
    %cst_28 = arith.constant dense<0.000000e+00> : vector<40x256xf32>
    %53 = tpu.matmul %50, %52, %cst_28 {dimension_numbers = #tpu.dot_dimension_numbers<[1], [0], [0], [1], [0, 0, 1, 1], [], []>} : vector<40x128xbf16>, vector<128x256xbf16>, vector<40x256xf32> -> vector<40x256xf32>
    %54 = arith.addf %48, %53 : vector<40x256xf32>
    %c0_29 = arith.constant 0 : index
    %c0_30 = arith.constant 0 : index
    %55 = vector.load %arg3[%c0_29, %c0_30] : memref<1x256xf32, #tpu.memory_space<vmem>>, vector<1x256xf32>
    %56 = vector.broadcast %55 : vector<1x256xf32> to vector<40x256xf32>
    %57 = arith.mulf %54, %56 : vector<40x256xf32>
    %c0_31 = arith.constant 0 : index
    %c0_32 = arith.constant 0 : index
    %58 = vector.load %arg4[%c0_31, %c0_32] : memref<1x256xf32, #tpu.memory_space<vmem>>, vector<1x256xf32>
    %59 = vector.broadcast %58 : vector<1x256xf32> to vector<40x256xf32>
    %60 = arith.addf %57, %59 : vector<40x256xf32>
    %cst_33 = arith.constant 0.000000e+00 : f32
    %61 = vector.broadcast %cst_33 : f32 to vector<40x256xf32>
    %62 = arith.maximumf %60, %61 : vector<40x256xf32>
    %c0_34 = arith.constant 0 : index
    %c0_35 = arith.constant 0 : index
    %c0_36 = arith.constant 0 : index
    %63 = vector.load %arg5[%c0_34, %c0_35, %c0_36] : memref<1x40x256xf32, #tpu.memory_space<vmem>>, vector<1x40x256xf32>
    %64 = vector.shape_cast %63 : vector<1x40x256xf32> to vector<40x256xf32>
    %65 = vector.shape_cast %62 : vector<40x256xf32> to vector<1x40x256xf32>
    tpu.vector_store %arg5[%c0_34, %c0_35, %c0_36], %65 {strides = array<i32>} : memref<1x40x256xf32, #tpu.memory_space<vmem>>, vector<1x40x256xf32>,
    return
  }
  func.func @transform_0(%arg0: i32) -> (i32, i32, i32) {
    %c0_i32 = arith.constant 0 : i32
    %c0_i32_0 = arith.constant 0 : i32
    %c0_i32_1 = arith.constant 0 : i32
    return %arg0, %c0_i32, %c0_i32_0 : i32, i32, i32
  }
  func.func @transform_1(%arg0: i32) -> (i32, i32, i32) {
    %c0_i32 = arith.constant 0 : i32
    %c0_i32_0 = arith.constant 0 : i32
    %c0_i32_1 = arith.constant 0 : i32
    %c0_i32_2 = arith.constant 0 : i32
    return %c0_i32, %c0_i32_0, %c0_i32_1 : i32, i32, i32
  }
  func.func @transform_2(%arg0: i32) -> (i32, i32) {
    %c0_i32 = arith.constant 0 : i32
    %c0_i32_0 = arith.constant 0 : i32
    %c0_i32_1 = arith.constant 0 : i32
    return %c0_i32, %c0_i32_0 : i32, i32
  }
  func.func @transform_3(%arg0: i32) -> (i32, i32) {
    %c0_i32 = arith.constant 0 : i32
    %c0_i32_0 = arith.constant 0 : i32
    %c0_i32_1 = arith.constant 0 : i32
    return %c0_i32, %c0_i32_0 : i32, i32
  }
  func.func @transform_4(%arg0: i32) -> (i32, i32, i32) {
    %c0_i32 = arith.constant 0 : i32
    %c0_i32_0 = arith.constant 0 : i32
    %c0_i32_1 = arith.constant 0 : i32
    return %arg0, %c0_i32, %c0_i32_0 : i32, i32, i32
  }
}

module attributes {stable_mosaic.version = 11 : i64} {
  func.func @_fc_proj_kernel(%arg0: i32, %arg1: memref<16x512xf32, #tpu.memory_space<vmem>>, %arg2: memref<512x128xbf16, #tpu.memory_space<vmem>>, %arg3: memref<1x128xf32, #tpu.memory_space<vmem>>, %arg4: memref<128x1024xbf16, #tpu.memory_space<vmem>>, %arg5: memref<1x1024xf32, #tpu.memory_space<vmem>>, %arg6: memref<16x1024xf32, #tpu.memory_space<vmem>>) attributes {dimension_semantics = [#tpu.dimension_semantics<arbitrary>], iteration_bounds = array<i64: 1>, scalar_prefetch = 0 : i64, scratch_operands = 0 : i64, tpu.core_type = #tpu.core_type<tc>, window_params = [{pipeline_mode = #tpu.pipeline_mode<synchronous>, transform_indices = @transform_0, window_bounds = array<i64: 16, 512>}, {pipeline_mode = #tpu.pipeline_mode<synchronous>, transform_indices = @transform_1, window_bounds = array<i64: 512, 128>}, {pipeline_mode = #tpu.pipeline_mode<synchronous>, transform_indices = @transform_2, window_bounds = array<i64: 1, 128>}, {pipeline_mode = #tpu.pipeline_mode<synchronous>, transform_indices = @transform_3, window_bounds = array<i64: 128, 1024>}, {pipeline_mode = #tpu.pipeline_mode<synchronous>, transform_indices = @transform_4, window_bounds = array<i64: 1, 1024>}, {pipeline_mode = #tpu.pipeline_mode<synchronous>, transform_indices = @transform_5, window_bounds = array<i64: 16, 1024>}]} {
    %c0 = arith.constant 0 : index
    %c0_0 = arith.constant 0 : index
    %0 = vector.load %arg1[%c0, %c0_0] : memref<16x512xf32, #tpu.memory_space<vmem>>, vector<16x512xf32>
    %1 = arith.truncf %0 : vector<16x512xf32> to vector<16x512xbf16>
    %c0_1 = arith.constant 0 : index
    %c0_2 = arith.constant 0 : index
    %2 = vector.load %arg2[%c0_1, %c0_2] : memref<512x128xbf16, #tpu.memory_space<vmem>>, vector<512x128xbf16>
    %cst = arith.constant dense<0.000000e+00> : vector<16x128xf32>
    %3 = tpu.matmul %1, %2, %cst {dimension_numbers = #tpu.dot_dimension_numbers<[1], [0], [0], [1], [0, 0, 1, 1], [], []>} : vector<16x512xbf16>, vector<512x128xbf16>, vector<16x128xf32> -> vector<16x128xf32>
    %c0_3 = arith.constant 0 : index
    %c0_4 = arith.constant 0 : index
    %4 = vector.load %arg3[%c0_3, %c0_4] : memref<1x128xf32, #tpu.memory_space<vmem>>, vector<1x128xf32>
    %5 = vector.broadcast %4 : vector<1x128xf32> to vector<16x128xf32>
    %6 = arith.addf %3, %5 : vector<16x128xf32>
    %7 = arith.truncf %6 : vector<16x128xf32> to vector<16x128xbf16>
    %c0_5 = arith.constant 0 : index
    %c0_6 = arith.constant 0 : index
    %8 = vector.load %arg4[%c0_5, %c0_6] : memref<128x1024xbf16, #tpu.memory_space<vmem>>, vector<128x1024xbf16>
    %cst_7 = arith.constant dense<0.000000e+00> : vector<16x1024xf32>
    %9 = tpu.matmul %7, %8, %cst_7 {dimension_numbers = #tpu.dot_dimension_numbers<[1], [0], [0], [1], [0, 0, 1, 1], [], []>} : vector<16x128xbf16>, vector<128x1024xbf16>, vector<16x1024xf32> -> vector<16x1024xf32>
    %c0_8 = arith.constant 0 : index
    %c0_9 = arith.constant 0 : index
    %10 = vector.load %arg5[%c0_8, %c0_9] : memref<1x1024xf32, #tpu.memory_space<vmem>>, vector<1x1024xf32>
    %11 = vector.broadcast %10 : vector<1x1024xf32> to vector<16x1024xf32>
    %12 = arith.addf %9, %11 : vector<16x1024xf32>
    %c0_10 = arith.constant 0 : index
    %c0_11 = arith.constant 0 : index
    %13 = vector.load %arg6[%c0_10, %c0_11] : memref<16x1024xf32, #tpu.memory_space<vmem>>, vector<16x1024xf32>
    tpu.vector_store %arg6[%c0_10, %c0_11], %12 {strides = array<i32>} : memref<16x1024xf32, #tpu.memory_space<vmem>>, vector<16x1024xf32>,
    return
  }
  func.func @transform_0(%arg0: i32) -> (i32, i32) {
    %c0_i32 = arith.constant 0 : i32
    %c0_i32_0 = arith.constant 0 : i32
    %c0_i32_1 = arith.constant 0 : i32
    return %c0_i32, %c0_i32_0 : i32, i32
  }
  func.func @transform_1(%arg0: i32) -> (i32, i32) {
    %c0_i32 = arith.constant 0 : i32
    %c0_i32_0 = arith.constant 0 : i32
    %c0_i32_1 = arith.constant 0 : i32
    return %c0_i32, %c0_i32_0 : i32, i32
  }
  func.func @transform_2(%arg0: i32) -> (i32, i32) {
    %c0_i32 = arith.constant 0 : i32
    %c0_i32_0 = arith.constant 0 : i32
    %c0_i32_1 = arith.constant 0 : i32
    return %c0_i32, %c0_i32_0 : i32, i32
  }
  func.func @transform_3(%arg0: i32) -> (i32, i32) {
    %c0_i32 = arith.constant 0 : i32
    %c0_i32_0 = arith.constant 0 : i32
    %c0_i32_1 = arith.constant 0 : i32
    return %c0_i32, %c0_i32_0 : i32, i32
  }
  func.func @transform_4(%arg0: i32) -> (i32, i32) {
    %c0_i32 = arith.constant 0 : i32
    %c0_i32_0 = arith.constant 0 : i32
    %c0_i32_1 = arith.constant 0 : i32
    return %c0_i32, %c0_i32_0 : i32, i32
  }
  func.func @transform_5(%arg0: i32) -> (i32, i32) {
    %c0_i32 = arith.constant 0 : i32
    %c0_i32_0 = arith.constant 0 : i32
    %c0_i32_1 = arith.constant 0 : i32
    return %c0_i32, %c0_i32_0 : i32, i32
  }
}

module attributes {stable_mosaic.version = 11 : i64} {
  func.func @_bilstm_kernel(%arg0: i32, %arg1: memref<8x2x512xf32, #tpu.memory_space<vmem>>, %arg2: memref<1x128x512xbf16, #tpu.memory_space<vmem>>, %arg3: memref<8x2x128xf32, #tpu.memory_space<vmem>>) attributes {dimension_semantics = [#tpu.dimension_semantics<parallel>], iteration_bounds = array<i64: 2>, scalar_prefetch = 0 : i64, scratch_operands = 0 : i64, tpu.core_type = #tpu.core_type<tc>, window_params = [{transform_indices = @transform_0, window_bounds = array<i64: 8, 2, 512>}, {transform_indices = @transform_1, window_bounds = array<i64: 1, 128, 512>}, {transform_indices = @transform_2, window_bounds = array<i64: 8, 2, 128>}]} {
    %c0 = arith.constant 0 : index
    %c0_0 = arith.constant 0 : index
    %c0_1 = arith.constant 0 : index
    %0 = vector.load %arg2[%c0, %c0_0, %c0_1] : memref<1x128x512xbf16, #tpu.memory_space<vmem>>, vector<1x128x512xbf16>
    %1 = vector.shape_cast %0 : vector<1x128x512xbf16> to vector<128x512xbf16>
    %cst = arith.constant 0.000000e+00 : f32
    %2 = vector.broadcast %cst : f32 to vector<2x128xf32>
    %c0_i32 = arith.constant 0 : i32
    %c0_i32_2 = arith.constant 0 : i32
    %3 = arith.cmpi eq, %arg0, %c0_i32_2 : i32
    %c7_i32 = arith.constant 7 : i32
    %4 = arith.subi %c7_i32, %c0_i32 : i32
    %5 = arith.select %3, %c0_i32, %4 : i32
    %6 = arith.index_cast %5 : i32 to index
    %c0_3 = arith.constant 0 : index
    %c0_4 = arith.constant 0 : index
    %7 = vector.load %arg1[%6, %c0_3, %c0_4] : memref<8x2x512xf32, #tpu.memory_space<vmem>>, vector<1x2x512xf32>
    %8 = vector.shape_cast %7 : vector<1x2x512xf32> to vector<2x512xf32>
    %9 = arith.truncf %2 : vector<2x128xf32> to vector<2x128xbf16>
    %cst_5 = arith.constant dense<0.000000e+00> : vector<2x512xf32>
    %10 = tpu.matmul %9, %1, %cst_5 {dimension_numbers = #tpu.dot_dimension_numbers<[1], [0], [0], [1], [0, 0, 1, 1], [], []>} : vector<2x128xbf16>, vector<128x512xbf16>, vector<2x512xf32> -> vector<2x512xf32>
    %11 = arith.addf %8, %10 : vector<2x512xf32>
    %12 = vector.extract_strided_slice %11 {offsets = [0, 0], sizes = [2, 128], strides = [1, 1]} : vector<2x512xf32> to vector<2x128xf32>
    %13 = arith.negf %12 : vector<2x128xf32>
    %14 = math.exp %13 : vector<2x128xf32>
    %cst_6 = arith.constant 1.000000e+00 : f32
    %15 = vector.broadcast %cst_6 : f32 to vector<2x128xf32>
    %16 = arith.addf %15, %14 : vector<2x128xf32>
    %17 = arith.divf %15, %16 : vector<2x128xf32>
    %18 = vector.extract_strided_slice %11 {offsets = [0, 128], sizes = [2, 128], strides = [1, 1]} : vector<2x512xf32> to vector<2x128xf32>
    %19 = arith.negf %18 : vector<2x128xf32>
    %20 = math.exp %19 : vector<2x128xf32>
    %cst_7 = arith.constant 1.000000e+00 : f32
    %21 = vector.broadcast %cst_7 : f32 to vector<2x128xf32>
    %22 = arith.addf %21, %20 : vector<2x128xf32>
    %23 = arith.divf %21, %22 : vector<2x128xf32>
    %24 = vector.extract_strided_slice %11 {offsets = [0, 256], sizes = [2, 128], strides = [1, 1]} : vector<2x512xf32> to vector<2x128xf32>
    %25 = math.tanh %24 : vector<2x128xf32>
    %26 = vector.extract_strided_slice %11 {offsets = [0, 384], sizes = [2, 128], strides = [1, 1]} : vector<2x512xf32> to vector<2x128xf32>
    %27 = arith.negf %26 : vector<2x128xf32>
    %28 = math.exp %27 : vector<2x128xf32>
    %cst_8 = arith.constant 1.000000e+00 : f32
    %29 = vector.broadcast %cst_8 : f32 to vector<2x128xf32>
    %30 = arith.addf %29, %28 : vector<2x128xf32>
    %31 = arith.divf %29, %30 : vector<2x128xf32>
    %32 = arith.mulf %23, %2 : vector<2x128xf32>
    %33 = arith.mulf %17, %25 : vector<2x128xf32>
    %34 = arith.addf %32, %33 : vector<2x128xf32>
    %35 = math.tanh %34 : vector<2x128xf32>
    %36 = arith.mulf %31, %35 : vector<2x128xf32>
    %37 = arith.index_cast %5 : i32 to index
    %c0_9 = arith.constant 0 : index
    %c0_10 = arith.constant 0 : index
    %38 = vector.load %arg3[%37, %c0_9, %c0_10] : memref<8x2x128xf32, #tpu.memory_space<vmem>>, vector<1x2x128xf32>
    %39 = vector.shape_cast %38 : vector<1x2x128xf32> to vector<2x128xf32>
    %40 = vector.shape_cast %36 : vector<2x128xf32> to vector<1x2x128xf32>
    tpu.vector_store %arg3[%37, %c0_9, %c0_10], %40 {strides = array<i32>} : memref<8x2x128xf32, #tpu.memory_space<vmem>>, vector<1x2x128xf32>,
    %c1_i32 = arith.constant 1 : i32
    %c0_i32_11 = arith.constant 0 : i32
    %41 = arith.cmpi eq, %arg0, %c0_i32_11 : i32
    %c7_i32_12 = arith.constant 7 : i32
    %42 = arith.subi %c7_i32_12, %c1_i32 : i32
    %43 = arith.select %41, %c1_i32, %42 : i32
    %44 = arith.index_cast %43 : i32 to index
    %c0_13 = arith.constant 0 : index
    %c0_14 = arith.constant 0 : index
    %45 = vector.load %arg1[%44, %c0_13, %c0_14] : memref<8x2x512xf32, #tpu.memory_space<vmem>>, vector<1x2x512xf32>
    %46 = vector.shape_cast %45 : vector<1x2x512xf32> to vector<2x512xf32>
    %47 = arith.truncf %36 : vector<2x128xf32> to vector<2x128xbf16>
    %cst_15 = arith.constant dense<0.000000e+00> : vector<2x512xf32>
    %48 = tpu.matmul %47, %1, %cst_15 {dimension_numbers = #tpu.dot_dimension_numbers<[1], [0], [0], [1], [0, 0, 1, 1], [], []>} : vector<2x128xbf16>, vector<128x512xbf16>, vector<2x512xf32> -> vector<2x512xf32>
    %49 = arith.addf %46, %48 : vector<2x512xf32>
    %50 = vector.extract_strided_slice %49 {offsets = [0, 0], sizes = [2, 128], strides = [1, 1]} : vector<2x512xf32> to vector<2x128xf32>
    %51 = arith.negf %50 : vector<2x128xf32>
    %52 = math.exp %51 : vector<2x128xf32>
    %cst_16 = arith.constant 1.000000e+00 : f32
    %53 = vector.broadcast %cst_16 : f32 to vector<2x128xf32>
    %54 = arith.addf %53, %52 : vector<2x128xf32>
    %55 = arith.divf %53, %54 : vector<2x128xf32>
    %56 = vector.extract_strided_slice %49 {offsets = [0, 128], sizes = [2, 128], strides = [1, 1]} : vector<2x512xf32> to vector<2x128xf32>
    %57 = arith.negf %56 : vector<2x128xf32>
    %58 = math.exp %57 : vector<2x128xf32>
    %cst_17 = arith.constant 1.000000e+00 : f32
    %59 = vector.broadcast %cst_17 : f32 to vector<2x128xf32>
    %60 = arith.addf %59, %58 : vector<2x128xf32>
    %61 = arith.divf %59, %60 : vector<2x128xf32>
    %62 = vector.extract_strided_slice %49 {offsets = [0, 256], sizes = [2, 128], strides = [1, 1]} : vector<2x512xf32> to vector<2x128xf32>
    %63 = math.tanh %62 : vector<2x128xf32>
    %64 = vector.extract_strided_slice %49 {offsets = [0, 384], sizes = [2, 128], strides = [1, 1]} : vector<2x512xf32> to vector<2x128xf32>
    %65 = arith.negf %64 : vector<2x128xf32>
    %66 = math.exp %65 : vector<2x128xf32>
    %cst_18 = arith.constant 1.000000e+00 : f32
    %67 = vector.broadcast %cst_18 : f32 to vector<2x128xf32>
    %68 = arith.addf %67, %66 : vector<2x128xf32>
    %69 = arith.divf %67, %68 : vector<2x128xf32>
    %70 = arith.mulf %61, %34 : vector<2x128xf32>
    %71 = arith.mulf %55, %63 : vector<2x128xf32>
    %72 = arith.addf %70, %71 : vector<2x128xf32>
    %73 = math.tanh %72 : vector<2x128xf32>
    %74 = arith.mulf %69, %73 : vector<2x128xf32>
    %75 = arith.index_cast %43 : i32 to index
    %c0_19 = arith.constant 0 : index
    %c0_20 = arith.constant 0 : index
    %76 = vector.load %arg3[%75, %c0_19, %c0_20] : memref<8x2x128xf32, #tpu.memory_space<vmem>>, vector<1x2x128xf32>
    %77 = vector.shape_cast %76 : vector<1x2x128xf32> to vector<2x128xf32>
    %78 = vector.shape_cast %74 : vector<2x128xf32> to vector<1x2x128xf32>
    tpu.vector_store %arg3[%75, %c0_19, %c0_20], %78 {strides = array<i32>} : memref<8x2x128xf32, #tpu.memory_space<vmem>>, vector<1x2x128xf32>,
    %c2_i32 = arith.constant 2 : i32
    %c0_i32_21 = arith.constant 0 : i32
    %79 = arith.cmpi eq, %arg0, %c0_i32_21 : i32
    %c7_i32_22 = arith.constant 7 : i32
    %80 = arith.subi %c7_i32_22, %c2_i32 : i32
    %81 = arith.select %79, %c2_i32, %80 : i32
    %82 = arith.index_cast %81 : i32 to index
    %c0_23 = arith.constant 0 : index
    %c0_24 = arith.constant 0 : index
    %83 = vector.load %arg1[%82, %c0_23, %c0_24] : memref<8x2x512xf32, #tpu.memory_space<vmem>>, vector<1x2x512xf32>
    %84 = vector.shape_cast %83 : vector<1x2x512xf32> to vector<2x512xf32>
    %85 = arith.truncf %74 : vector<2x128xf32> to vector<2x128xbf16>
    %cst_25 = arith.constant dense<0.000000e+00> : vector<2x512xf32>
    %86 = tpu.matmul %85, %1, %cst_25 {dimension_numbers = #tpu.dot_dimension_numbers<[1], [0], [0], [1], [0, 0, 1, 1], [], []>} : vector<2x128xbf16>, vector<128x512xbf16>, vector<2x512xf32> -> vector<2x512xf32>
    %87 = arith.addf %84, %86 : vector<2x512xf32>
    %88 = vector.extract_strided_slice %87 {offsets = [0, 0], sizes = [2, 128], strides = [1, 1]} : vector<2x512xf32> to vector<2x128xf32>
    %89 = arith.negf %88 : vector<2x128xf32>
    %90 = math.exp %89 : vector<2x128xf32>
    %cst_26 = arith.constant 1.000000e+00 : f32
    %91 = vector.broadcast %cst_26 : f32 to vector<2x128xf32>
    %92 = arith.addf %91, %90 : vector<2x128xf32>
    %93 = arith.divf %91, %92 : vector<2x128xf32>
    %94 = vector.extract_strided_slice %87 {offsets = [0, 128], sizes = [2, 128], strides = [1, 1]} : vector<2x512xf32> to vector<2x128xf32>
    %95 = arith.negf %94 : vector<2x128xf32>
    %96 = math.exp %95 : vector<2x128xf32>
    %cst_27 = arith.constant 1.000000e+00 : f32
    %97 = vector.broadcast %cst_27 : f32 to vector<2x128xf32>
    %98 = arith.addf %97, %96 : vector<2x128xf32>
    %99 = arith.divf %97, %98 : vector<2x128xf32>
    %100 = vector.extract_strided_slice %87 {offsets = [0, 256], sizes = [2, 128], strides = [1, 1]} : vector<2x512xf32> to vector<2x128xf32>
    %101 = math.tanh %100 : vector<2x128xf32>
    %102 = vector.extract_strided_slice %87 {offsets = [0, 384], sizes = [2, 128], strides = [1, 1]} : vector<2x512xf32> to vector<2x128xf32>
    %103 = arith.negf %102 : vector<2x128xf32>
    %104 = math.exp %103 : vector<2x128xf32>
    %cst_28 = arith.constant 1.000000e+00 : f32
    %105 = vector.broadcast %cst_28 : f32 to vector<2x128xf32>
    %106 = arith.addf %105, %104 : vector<2x128xf32>
    %107 = arith.divf %105, %106 : vector<2x128xf32>
    %108 = arith.mulf %99, %72 : vector<2x128xf32>
    %109 = arith.mulf %93, %101 : vector<2x128xf32>
    %110 = arith.addf %108, %109 : vector<2x128xf32>
    %111 = math.tanh %110 : vector<2x128xf32>
    %112 = arith.mulf %107, %111 : vector<2x128xf32>
    %113 = arith.index_cast %81 : i32 to index
    %c0_29 = arith.constant 0 : index
    %c0_30 = arith.constant 0 : index
    %114 = vector.load %arg3[%113, %c0_29, %c0_30] : memref<8x2x128xf32, #tpu.memory_space<vmem>>, vector<1x2x128xf32>
    %115 = vector.shape_cast %114 : vector<1x2x128xf32> to vector<2x128xf32>
    %116 = vector.shape_cast %112 : vector<2x128xf32> to vector<1x2x128xf32>
    tpu.vector_store %arg3[%113, %c0_29, %c0_30], %116 {strides = array<i32>} : memref<8x2x128xf32, #tpu.memory_space<vmem>>, vector<1x2x128xf32>,
    %c3_i32 = arith.constant 3 : i32
    %c0_i32_31 = arith.constant 0 : i32
    %117 = arith.cmpi eq, %arg0, %c0_i32_31 : i32
    %c7_i32_32 = arith.constant 7 : i32
    %118 = arith.subi %c7_i32_32, %c3_i32 : i32
    %119 = arith.select %117, %c3_i32, %118 : i32
    %120 = arith.index_cast %119 : i32 to index
    %c0_33 = arith.constant 0 : index
    %c0_34 = arith.constant 0 : index
    %121 = vector.load %arg1[%120, %c0_33, %c0_34] : memref<8x2x512xf32, #tpu.memory_space<vmem>>, vector<1x2x512xf32>
    %122 = vector.shape_cast %121 : vector<1x2x512xf32> to vector<2x512xf32>
    %123 = arith.truncf %112 : vector<2x128xf32> to vector<2x128xbf16>
    %cst_35 = arith.constant dense<0.000000e+00> : vector<2x512xf32>
    %124 = tpu.matmul %123, %1, %cst_35 {dimension_numbers = #tpu.dot_dimension_numbers<[1], [0], [0], [1], [0, 0, 1, 1], [], []>} : vector<2x128xbf16>, vector<128x512xbf16>, vector<2x512xf32> -> vector<2x512xf32>
    %125 = arith.addf %122, %124 : vector<2x512xf32>
    %126 = vector.extract_strided_slice %125 {offsets = [0, 0], sizes = [2, 128], strides = [1, 1]} : vector<2x512xf32> to vector<2x128xf32>
    %127 = arith.negf %126 : vector<2x128xf32>
    %128 = math.exp %127 : vector<2x128xf32>
    %cst_36 = arith.constant 1.000000e+00 : f32
    %129 = vector.broadcast %cst_36 : f32 to vector<2x128xf32>
    %130 = arith.addf %129, %128 : vector<2x128xf32>
    %131 = arith.divf %129, %130 : vector<2x128xf32>
    %132 = vector.extract_strided_slice %125 {offsets = [0, 128], sizes = [2, 128], strides = [1, 1]} : vector<2x512xf32> to vector<2x128xf32>
    %133 = arith.negf %132 : vector<2x128xf32>
    %134 = math.exp %133 : vector<2x128xf32>
    %cst_37 = arith.constant 1.000000e+00 : f32
    %135 = vector.broadcast %cst_37 : f32 to vector<2x128xf32>
    %136 = arith.addf %135, %134 : vector<2x128xf32>
    %137 = arith.divf %135, %136 : vector<2x128xf32>
    %138 = vector.extract_strided_slice %125 {offsets = [0, 256], sizes = [2, 128], strides = [1, 1]} : vector<2x512xf32> to vector<2x128xf32>
    %139 = math.tanh %138 : vector<2x128xf32>
    %140 = vector.extract_strided_slice %125 {offsets = [0, 384], sizes = [2, 128], strides = [1, 1]} : vector<2x512xf32> to vector<2x128xf32>
    %141 = arith.negf %140 : vector<2x128xf32>
    %142 = math.exp %141 : vector<2x128xf32>
    %cst_38 = arith.constant 1.000000e+00 : f32
    %143 = vector.broadcast %cst_38 : f32 to vector<2x128xf32>
    %144 = arith.addf %143, %142 : vector<2x128xf32>
    %145 = arith.divf %143, %144 : vector<2x128xf32>
    %146 = arith.mulf %137, %110 : vector<2x128xf32>
    %147 = arith.mulf %131, %139 : vector<2x128xf32>
    %148 = arith.addf %146, %147 : vector<2x128xf32>
    %149 = math.tanh %148 : vector<2x128xf32>
    %150 = arith.mulf %145, %149 : vector<2x128xf32>
    %151 = arith.index_cast %119 : i32 to index
    %c0_39 = arith.constant 0 : index
    %c0_40 = arith.constant 0 : index
    %152 = vector.load %arg3[%151, %c0_39, %c0_40] : memref<8x2x128xf32, #tpu.memory_space<vmem>>, vector<1x2x128xf32>
    %153 = vector.shape_cast %152 : vector<1x2x128xf32> to vector<2x128xf32>
    %154 = vector.shape_cast %150 : vector<2x128xf32> to vector<1x2x128xf32>
    tpu.vector_store %arg3[%151, %c0_39, %c0_40], %154 {strides = array<i32>} : memref<8x2x128xf32, #tpu.memory_space<vmem>>, vector<1x2x128xf32>,
    %c4_i32 = arith.constant 4 : i32
    %c0_i32_41 = arith.constant 0 : i32
    %155 = arith.cmpi eq, %arg0, %c0_i32_41 : i32
    %c7_i32_42 = arith.constant 7 : i32
    %156 = arith.subi %c7_i32_42, %c4_i32 : i32
    %157 = arith.select %155, %c4_i32, %156 : i32
    %158 = arith.index_cast %157 : i32 to index
    %c0_43 = arith.constant 0 : index
    %c0_44 = arith.constant 0 : index
    %159 = vector.load %arg1[%158, %c0_43, %c0_44] : memref<8x2x512xf32, #tpu.memory_space<vmem>>, vector<1x2x512xf32>
    %160 = vector.shape_cast %159 : vector<1x2x512xf32> to vector<2x512xf32>
    %161 = arith.truncf %150 : vector<2x128xf32> to vector<2x128xbf16>
    %cst_45 = arith.constant dense<0.000000e+00> : vector<2x512xf32>
    %162 = tpu.matmul %161, %1, %cst_45 {dimension_numbers = #tpu.dot_dimension_numbers<[1], [0], [0], [1], [0, 0, 1, 1], [], []>} : vector<2x128xbf16>, vector<128x512xbf16>, vector<2x512xf32> -> vector<2x512xf32>
    %163 = arith.addf %160, %162 : vector<2x512xf32>
    %164 = vector.extract_strided_slice %163 {offsets = [0, 0], sizes = [2, 128], strides = [1, 1]} : vector<2x512xf32> to vector<2x128xf32>
    %165 = arith.negf %164 : vector<2x128xf32>
    %166 = math.exp %165 : vector<2x128xf32>
    %cst_46 = arith.constant 1.000000e+00 : f32
    %167 = vector.broadcast %cst_46 : f32 to vector<2x128xf32>
    %168 = arith.addf %167, %166 : vector<2x128xf32>
    %169 = arith.divf %167, %168 : vector<2x128xf32>
    %170 = vector.extract_strided_slice %163 {offsets = [0, 128], sizes = [2, 128], strides = [1, 1]} : vector<2x512xf32> to vector<2x128xf32>
    %171 = arith.negf %170 : vector<2x128xf32>
    %172 = math.exp %171 : vector<2x128xf32>
    %cst_47 = arith.constant 1.000000e+00 : f32
    %173 = vector.broadcast %cst_47 : f32 to vector<2x128xf32>
    %174 = arith.addf %173, %172 : vector<2x128xf32>
    %175 = arith.divf %173, %174 : vector<2x128xf32>
    %176 = vector.extract_strided_slice %163 {offsets = [0, 256], sizes = [2, 128], strides = [1, 1]} : vector<2x512xf32> to vector<2x128xf32>
    %177 = math.tanh %176 : vector<2x128xf32>
    %178 = vector.extract_strided_slice %163 {offsets = [0, 384], sizes = [2, 128], strides = [1, 1]} : vector<2x512xf32> to vector<2x128xf32>
    %179 = arith.negf %178 : vector<2x128xf32>
    %180 = math.exp %179 : vector<2x128xf32>
    %cst_48 = arith.constant 1.000000e+00 : f32
    %181 = vector.broadcast %cst_48 : f32 to vector<2x128xf32>
    %182 = arith.addf %181, %180 : vector<2x128xf32>
    %183 = arith.divf %181, %182 : vector<2x128xf32>
    %184 = arith.mulf %175, %148 : vector<2x128xf32>
    %185 = arith.mulf %169, %177 : vector<2x128xf32>
    %186 = arith.addf %184, %185 : vector<2x128xf32>
    %187 = math.tanh %186 : vector<2x128xf32>
    %188 = arith.mulf %183, %187 : vector<2x128xf32>
    %189 = arith.index_cast %157 : i32 to index
    %c0_49 = arith.constant 0 : index
    %c0_50 = arith.constant 0 : index
    %190 = vector.load %arg3[%189, %c0_49, %c0_50] : memref<8x2x128xf32, #tpu.memory_space<vmem>>, vector<1x2x128xf32>
    %191 = vector.shape_cast %190 : vector<1x2x128xf32> to vector<2x128xf32>
    %192 = vector.shape_cast %188 : vector<2x128xf32> to vector<1x2x128xf32>
    tpu.vector_store %arg3[%189, %c0_49, %c0_50], %192 {strides = array<i32>} : memref<8x2x128xf32, #tpu.memory_space<vmem>>, vector<1x2x128xf32>,
    %c5_i32 = arith.constant 5 : i32
    %c0_i32_51 = arith.constant 0 : i32
    %193 = arith.cmpi eq, %arg0, %c0_i32_51 : i32
    %c7_i32_52 = arith.constant 7 : i32
    %194 = arith.subi %c7_i32_52, %c5_i32 : i32
    %195 = arith.select %193, %c5_i32, %194 : i32
    %196 = arith.index_cast %195 : i32 to index
    %c0_53 = arith.constant 0 : index
    %c0_54 = arith.constant 0 : index
    %197 = vector.load %arg1[%196, %c0_53, %c0_54] : memref<8x2x512xf32, #tpu.memory_space<vmem>>, vector<1x2x512xf32>
    %198 = vector.shape_cast %197 : vector<1x2x512xf32> to vector<2x512xf32>
    %199 = arith.truncf %188 : vector<2x128xf32> to vector<2x128xbf16>
    %cst_55 = arith.constant dense<0.000000e+00> : vector<2x512xf32>
    %200 = tpu.matmul %199, %1, %cst_55 {dimension_numbers = #tpu.dot_dimension_numbers<[1], [0], [0], [1], [0, 0, 1, 1], [], []>} : vector<2x128xbf16>, vector<128x512xbf16>, vector<2x512xf32> -> vector<2x512xf32>
    %201 = arith.addf %198, %200 : vector<2x512xf32>
    %202 = vector.extract_strided_slice %201 {offsets = [0, 0], sizes = [2, 128], strides = [1, 1]} : vector<2x512xf32> to vector<2x128xf32>
    %203 = arith.negf %202 : vector<2x128xf32>
    %204 = math.exp %203 : vector<2x128xf32>
    %cst_56 = arith.constant 1.000000e+00 : f32
    %205 = vector.broadcast %cst_56 : f32 to vector<2x128xf32>
    %206 = arith.addf %205, %204 : vector<2x128xf32>
    %207 = arith.divf %205, %206 : vector<2x128xf32>
    %208 = vector.extract_strided_slice %201 {offsets = [0, 128], sizes = [2, 128], strides = [1, 1]} : vector<2x512xf32> to vector<2x128xf32>
    %209 = arith.negf %208 : vector<2x128xf32>
    %210 = math.exp %209 : vector<2x128xf32>
    %cst_57 = arith.constant 1.000000e+00 : f32
    %211 = vector.broadcast %cst_57 : f32 to vector<2x128xf32>
    %212 = arith.addf %211, %210 : vector<2x128xf32>
    %213 = arith.divf %211, %212 : vector<2x128xf32>
    %214 = vector.extract_strided_slice %201 {offsets = [0, 256], sizes = [2, 128], strides = [1, 1]} : vector<2x512xf32> to vector<2x128xf32>
    %215 = math.tanh %214 : vector<2x128xf32>
    %216 = vector.extract_strided_slice %201 {offsets = [0, 384], sizes = [2, 128], strides = [1, 1]} : vector<2x512xf32> to vector<2x128xf32>
    %217 = arith.negf %216 : vector<2x128xf32>
    %218 = math.exp %217 : vector<2x128xf32>
    %cst_58 = arith.constant 1.000000e+00 : f32
    %219 = vector.broadcast %cst_58 : f32 to vector<2x128xf32>
    %220 = arith.addf %219, %218 : vector<2x128xf32>
    %221 = arith.divf %219, %220 : vector<2x128xf32>
    %222 = arith.mulf %213, %186 : vector<2x128xf32>
    %223 = arith.mulf %207, %215 : vector<2x128xf32>
    %224 = arith.addf %222, %223 : vector<2x128xf32>
    %225 = math.tanh %224 : vector<2x128xf32>
    %226 = arith.mulf %221, %225 : vector<2x128xf32>
    %227 = arith.index_cast %195 : i32 to index
    %c0_59 = arith.constant 0 : index
    %c0_60 = arith.constant 0 : index
    %228 = vector.load %arg3[%227, %c0_59, %c0_60] : memref<8x2x128xf32, #tpu.memory_space<vmem>>, vector<1x2x128xf32>
    %229 = vector.shape_cast %228 : vector<1x2x128xf32> to vector<2x128xf32>
    %230 = vector.shape_cast %226 : vector<2x128xf32> to vector<1x2x128xf32>
    tpu.vector_store %arg3[%227, %c0_59, %c0_60], %230 {strides = array<i32>} : memref<8x2x128xf32, #tpu.memory_space<vmem>>, vector<1x2x128xf32>,
    %c6_i32 = arith.constant 6 : i32
    %c0_i32_61 = arith.constant 0 : i32
    %231 = arith.cmpi eq, %arg0, %c0_i32_61 : i32
    %c7_i32_62 = arith.constant 7 : i32
    %232 = arith.subi %c7_i32_62, %c6_i32 : i32
    %233 = arith.select %231, %c6_i32, %232 : i32
    %234 = arith.index_cast %233 : i32 to index
    %c0_63 = arith.constant 0 : index
    %c0_64 = arith.constant 0 : index
    %235 = vector.load %arg1[%234, %c0_63, %c0_64] : memref<8x2x512xf32, #tpu.memory_space<vmem>>, vector<1x2x512xf32>
    %236 = vector.shape_cast %235 : vector<1x2x512xf32> to vector<2x512xf32>
    %237 = arith.truncf %226 : vector<2x128xf32> to vector<2x128xbf16>
    %cst_65 = arith.constant dense<0.000000e+00> : vector<2x512xf32>
    %238 = tpu.matmul %237, %1, %cst_65 {dimension_numbers = #tpu.dot_dimension_numbers<[1], [0], [0], [1], [0, 0, 1, 1], [], []>} : vector<2x128xbf16>, vector<128x512xbf16>, vector<2x512xf32> -> vector<2x512xf32>
    %239 = arith.addf %236, %238 : vector<2x512xf32>
    %240 = vector.extract_strided_slice %239 {offsets = [0, 0], sizes = [2, 128], strides = [1, 1]} : vector<2x512xf32> to vector<2x128xf32>
    %241 = arith.negf %240 : vector<2x128xf32>
    %242 = math.exp %241 : vector<2x128xf32>
    %cst_66 = arith.constant 1.000000e+00 : f32
    %243 = vector.broadcast %cst_66 : f32 to vector<2x128xf32>
    %244 = arith.addf %243, %242 : vector<2x128xf32>
    %245 = arith.divf %243, %244 : vector<2x128xf32>
    %246 = vector.extract_strided_slice %239 {offsets = [0, 128], sizes = [2, 128], strides = [1, 1]} : vector<2x512xf32> to vector<2x128xf32>
    %247 = arith.negf %246 : vector<2x128xf32>
    %248 = math.exp %247 : vector<2x128xf32>
    %cst_67 = arith.constant 1.000000e+00 : f32
    %249 = vector.broadcast %cst_67 : f32 to vector<2x128xf32>
    %250 = arith.addf %249, %248 : vector<2x128xf32>
    %251 = arith.divf %249, %250 : vector<2x128xf32>
    %252 = vector.extract_strided_slice %239 {offsets = [0, 256], sizes = [2, 128], strides = [1, 1]} : vector<2x512xf32> to vector<2x128xf32>
    %253 = math.tanh %252 : vector<2x128xf32>
    %254 = vector.extract_strided_slice %239 {offsets = [0, 384], sizes = [2, 128], strides = [1, 1]} : vector<2x512xf32> to vector<2x128xf32>
    %255 = arith.negf %254 : vector<2x128xf32>
    %256 = math.exp %255 : vector<2x128xf32>
    %cst_68 = arith.constant 1.000000e+00 : f32
    %257 = vector.broadcast %cst_68 : f32 to vector<2x128xf32>
    %258 = arith.addf %257, %256 : vector<2x128xf32>
    %259 = arith.divf %257, %258 : vector<2x128xf32>
    %260 = arith.mulf %251, %224 : vector<2x128xf32>
    %261 = arith.mulf %245, %253 : vector<2x128xf32>
    %262 = arith.addf %260, %261 : vector<2x128xf32>
    %263 = math.tanh %262 : vector<2x128xf32>
    %264 = arith.mulf %259, %263 : vector<2x128xf32>
    %265 = arith.index_cast %233 : i32 to index
    %c0_69 = arith.constant 0 : index
    %c0_70 = arith.constant 0 : index
    %266 = vector.load %arg3[%265, %c0_69, %c0_70] : memref<8x2x128xf32, #tpu.memory_space<vmem>>, vector<1x2x128xf32>
    %267 = vector.shape_cast %266 : vector<1x2x128xf32> to vector<2x128xf32>
    %268 = vector.shape_cast %264 : vector<2x128xf32> to vector<1x2x128xf32>
    tpu.vector_store %arg3[%265, %c0_69, %c0_70], %268 {strides = array<i32>} : memref<8x2x128xf32, #tpu.memory_space<vmem>>, vector<1x2x128xf32>,
    %c7_i32_71 = arith.constant 7 : i32
    %c0_i32_72 = arith.constant 0 : i32
    %269 = arith.cmpi eq, %arg0, %c0_i32_72 : i32
    %c7_i32_73 = arith.constant 7 : i32
    %270 = arith.subi %c7_i32_73, %c7_i32_71 : i32
    %271 = arith.select %269, %c7_i32_71, %270 : i32
    %272 = arith.index_cast %271 : i32 to index
    %c0_74 = arith.constant 0 : index
    %c0_75 = arith.constant 0 : index
    %273 = vector.load %arg1[%272, %c0_74, %c0_75] : memref<8x2x512xf32, #tpu.memory_space<vmem>>, vector<1x2x512xf32>
    %274 = vector.shape_cast %273 : vector<1x2x512xf32> to vector<2x512xf32>
    %275 = arith.truncf %264 : vector<2x128xf32> to vector<2x128xbf16>
    %cst_76 = arith.constant dense<0.000000e+00> : vector<2x512xf32>
    %276 = tpu.matmul %275, %1, %cst_76 {dimension_numbers = #tpu.dot_dimension_numbers<[1], [0], [0], [1], [0, 0, 1, 1], [], []>} : vector<2x128xbf16>, vector<128x512xbf16>, vector<2x512xf32> -> vector<2x512xf32>
    %277 = arith.addf %274, %276 : vector<2x512xf32>
    %278 = vector.extract_strided_slice %277 {offsets = [0, 0], sizes = [2, 128], strides = [1, 1]} : vector<2x512xf32> to vector<2x128xf32>
    %279 = arith.negf %278 : vector<2x128xf32>
    %280 = math.exp %279 : vector<2x128xf32>
    %cst_77 = arith.constant 1.000000e+00 : f32
    %281 = vector.broadcast %cst_77 : f32 to vector<2x128xf32>
    %282 = arith.addf %281, %280 : vector<2x128xf32>
    %283 = arith.divf %281, %282 : vector<2x128xf32>
    %284 = vector.extract_strided_slice %277 {offsets = [0, 128], sizes = [2, 128], strides = [1, 1]} : vector<2x512xf32> to vector<2x128xf32>
    %285 = arith.negf %284 : vector<2x128xf32>
    %286 = math.exp %285 : vector<2x128xf32>
    %cst_78 = arith.constant 1.000000e+00 : f32
    %287 = vector.broadcast %cst_78 : f32 to vector<2x128xf32>
    %288 = arith.addf %287, %286 : vector<2x128xf32>
    %289 = arith.divf %287, %288 : vector<2x128xf32>
    %290 = vector.extract_strided_slice %277 {offsets = [0, 256], sizes = [2, 128], strides = [1, 1]} : vector<2x512xf32> to vector<2x128xf32>
    %291 = math.tanh %290 : vector<2x128xf32>
    %292 = vector.extract_strided_slice %277 {offsets = [0, 384], sizes = [2, 128], strides = [1, 1]} : vector<2x512xf32> to vector<2x128xf32>
    %293 = arith.negf %292 : vector<2x128xf32>
    %294 = math.exp %293 : vector<2x128xf32>
    %cst_79 = arith.constant 1.000000e+00 : f32
    %295 = vector.broadcast %cst_79 : f32 to vector<2x128xf32>
    %296 = arith.addf %295, %294 : vector<2x128xf32>
    %297 = arith.divf %295, %296 : vector<2x128xf32>
    %298 = arith.mulf %289, %262 : vector<2x128xf32>
    %299 = arith.mulf %283, %291 : vector<2x128xf32>
    %300 = arith.addf %298, %299 : vector<2x128xf32>
    %301 = math.tanh %300 : vector<2x128xf32>
    %302 = arith.mulf %297, %301 : vector<2x128xf32>
    %303 = arith.index_cast %271 : i32 to index
    %c0_80 = arith.constant 0 : index
    %c0_81 = arith.constant 0 : index
    %304 = vector.load %arg3[%303, %c0_80, %c0_81] : memref<8x2x128xf32, #tpu.memory_space<vmem>>, vector<1x2x128xf32>
    %305 = vector.shape_cast %304 : vector<1x2x128xf32> to vector<2x128xf32>
    %306 = vector.shape_cast %302 : vector<2x128xf32> to vector<1x2x128xf32>
    tpu.vector_store %arg3[%303, %c0_80, %c0_81], %306 {strides = array<i32>} : memref<8x2x128xf32, #tpu.memory_space<vmem>>, vector<1x2x128xf32>,
    %c8_i32 = arith.constant 8 : i32
    return
  }
  func.func @transform_0(%arg0: i32) -> (i32, i32, i32) {
    %c0_i32 = arith.constant 0 : i32
    %c0_i32_0 = arith.constant 0 : i32
    %c0_i32_1 = arith.constant 0 : i32
    return %c0_i32, %c0_i32_0, %arg0 : i32, i32, i32
  }
  func.func @transform_1(%arg0: i32) -> (i32, i32, i32) {
    %c0_i32 = arith.constant 0 : i32
    %c0_i32_0 = arith.constant 0 : i32
    %c0_i32_1 = arith.constant 0 : i32
    return %arg0, %c0_i32, %c0_i32_0 : i32, i32, i32
  }
  func.func @transform_2(%arg0: i32) -> (i32, i32, i32) {
    %c0_i32 = arith.constant 0 : i32
    %c0_i32_0 = arith.constant 0 : i32
    %c0_i32_1 = arith.constant 0 : i32
    return %c0_i32, %c0_i32_0, %arg0 : i32, i32, i32
  }
}

module attributes {stable_mosaic.version = 11 : i64} {
  func.func @_linear_bias_kernel(%arg0: i32, %arg1: memref<16x256xf32, #tpu.memory_space<vmem>>, %arg2: memref<256x128xbf16, #tpu.memory_space<vmem>>, %arg3: memref<1x128xf32, #tpu.memory_space<vmem>>, %arg4: memref<16x128xf32, #tpu.memory_space<vmem>>) attributes {dimension_semantics = [#tpu.dimension_semantics<arbitrary>], iteration_bounds = array<i64: 1>, scalar_prefetch = 0 : i64, scratch_operands = 0 : i64, tpu.core_type = #tpu.core_type<tc>, window_params = [{pipeline_mode = #tpu.pipeline_mode<synchronous>, transform_indices = @transform_0, window_bounds = array<i64: 16, 256>}, {pipeline_mode = #tpu.pipeline_mode<synchronous>, transform_indices = @transform_1, window_bounds = array<i64: 256, 128>}, {pipeline_mode = #tpu.pipeline_mode<synchronous>, transform_indices = @transform_2, window_bounds = array<i64: 1, 128>}, {pipeline_mode = #tpu.pipeline_mode<synchronous>, transform_indices = @transform_3, window_bounds = array<i64: 16, 128>}]} {
    %c0 = arith.constant 0 : index
    %c0_0 = arith.constant 0 : index
    %0 = vector.load %arg1[%c0, %c0_0] : memref<16x256xf32, #tpu.memory_space<vmem>>, vector<16x256xf32>
    %1 = arith.truncf %0 : vector<16x256xf32> to vector<16x256xbf16>
    %c0_1 = arith.constant 0 : index
    %c0_2 = arith.constant 0 : index
    %2 = vector.load %arg2[%c0_1, %c0_2] : memref<256x128xbf16, #tpu.memory_space<vmem>>, vector<256x128xbf16>
    %cst = arith.constant dense<0.000000e+00> : vector<16x128xf32>
    %3 = tpu.matmul %1, %2, %cst {dimension_numbers = #tpu.dot_dimension_numbers<[1], [0], [0], [1], [0, 0, 1, 1], [], []>} : vector<16x256xbf16>, vector<256x128xbf16>, vector<16x128xf32> -> vector<16x128xf32>
    %c0_3 = arith.constant 0 : index
    %c0_4 = arith.constant 0 : index
    %4 = vector.load %arg3[%c0_3, %c0_4] : memref<1x128xf32, #tpu.memory_space<vmem>>, vector<1x128xf32>
    %5 = vector.broadcast %4 : vector<1x128xf32> to vector<16x128xf32>
    %6 = arith.addf %3, %5 : vector<16x128xf32>
    %c0_5 = arith.constant 0 : index
    %c0_6 = arith.constant 0 : index
    %7 = vector.load %arg4[%c0_5, %c0_6] : memref<16x128xf32, #tpu.memory_space<vmem>>, vector<16x128xf32>
    tpu.vector_store %arg4[%c0_5, %c0_6], %6 {strides = array<i32>} : memref<16x128xf32, #tpu.memory_space<vmem>>, vector<16x128xf32>,
    return
  }
  func.func @transform_0(%arg0: i32) -> (i32, i32) {
    %c0_i32 = arith.constant 0 : i32
    %c0_i32_0 = arith.constant 0 : i32
    %c0_i32_1 = arith.constant 0 : i32
    return %c0_i32, %c0_i32_0 : i32, i32
  }
  func.func @transform_1(%arg0: i32) -> (i32, i32) {
    %c0_i32 = arith.constant 0 : i32
    %c0_i32_0 = arith.constant 0 : i32
    %c0_i32_1 = arith.constant 0 : i32
    return %c0_i32, %c0_i32_0 : i32, i32
  }
  func.func @transform_2(%arg0: i32) -> (i32, i32) {
    %c0_i32 = arith.constant 0 : i32
    %c0_i32_0 = arith.constant 0 : i32
    %c0_i32_1 = arith.constant 0 : i32
    return %c0_i32, %c0_i32_0 : i32, i32
  }
  func.func @transform_3(%arg0: i32) -> (i32, i32) {
    %c0_i32 = arith.constant 0 : i32
    %c0_i32_0 = arith.constant 0 : i32
    %c0_i32_1 = arith.constant 0 : i32
    return %c0_i32, %c0_i32_0 : i32, i32
  }
}

</mosaic_0001>

<bundles_post_ra>
// kernel: cnn_lstm_forward.7
= control target key start
LH: loop header
LB: loop body
LE: loop exit
PB: predicated region body
PF: predicated region fallthrough
CT: control target
= control target key end

     0   :  { %s3316_s15 = smov 0   ;;  %s4402_s0 = inlined_call_operand.vmem [shape: f32[2,198,128], index: 0, kind: input, shape index: {}]   ;;  %s4403_s1 = inlined_call_operand.vmem [shape: bf16[9,128,128], index: 1, kind: input, shape index: {}]   ;;  %s4404_s2 = inlined_call_operand.vmem [shape: f32[1,128], index: 2, kind: input, shape index: {}]   ;;  %s4405_s3 = inlined_call_operand.vmem [shape: f32[1,128], index: 3, kind: input, shape index: {}]   ;;  %s4406_s4 = inlined_call_operand.vmem [shape: f32[2,144,128], index: 4, kind: output, shape index: {}]  }
   0x1 LB: > { %s2349_s16 = sadd.s32 4294967295, %s3287_s15   ;;  %p2353_p0 = scmp.ge.s32.totalorder %s3287_s15, 1  ;;  %s3287_s15 = sphi %s3316_s15, %s14_s15  }
   0x2   : > { %p162_p1 = scmp.lt.s32.totalorder %s3287_s15, 3 }
   0x4   : > { %p163_p2 = pnand %p2353_p0, %p162_p1 }
   0x5   : > { %p188_p3 = scmp.lt.s32.totalorder (!%p163_p2), %s2349_s16, 1 }
   0x6   : > { %166 = sbr.rel (%p163_p2) target bundleno = 572 (0x23c), region = 36 }
   0xb   : > { %v3209_v0 = vld [vmem:[%s4403_s1 + $0x78] sm:$0xff]   ;;  %v3289_v1 = vmov 0.0   ;;  %v3210_v2 = vld [vmem:[%s4403_s1 + $0x70] sm:$0xff]   ;;  %vm3290_vm0 = vmmov 0   ;;  %s4412_s16 = smov (!%p188_p3, %s2349_s16), 1  ;;  %v3211_v3 = vld [vmem:[%s4403_s1 + $0x68] sm:$0xff]  }
   0xc   : > { %3181 = vmatprep.subr.bf16.mxu1 %v3289_v1  ;;  %2713 = vmatprep.subr.bf16.mxu0 %v3289_v1  ;;  %s3197_s23 = smul.u32 200, %s4412_s16  ;;  %v3212_v4 = vld [vmem:[%s4403_s1 + $0x60] sm:$0xff]   ;;  %v3213_v12 = vld [vmem:[%s4403_s1 + $0x58] sm:$0xff]   ;;  %v3214_v18 = vld [vmem:[%s4403_s1 + $0x50] sm:$0xff]   ;;  %vm265_vm1 = vsmask.f32 7424 }
   0xd   : > { %3189 = vmatpush3.bf16.msra.mxu1 %v3209_v0  ;;  %2714 = vmatpush3.bf16.msra.mxu0 %v3209_v0  ;;  %v3215_v25 = vld [vmem:[%s4403_s1 + $0x48] sm:$0xff]   ;;  %v3216_v38 = vld [vmem:[%s4403_s1 + $0x40] sm:$0xff]   ;;  %v3217_v43 = vld [vmem:[%s4403_s1 + $0x38] sm:$0xff]   ;;  %vm684_vm2 = vcmask 1046528   ;;  %vm1099_vm3 = vsmask.f32 6400 }
   0xe   : > { %3182 = vmatprep.subr.bf16.mxu1 %v3289_v1  ;;  %2715 = vmatprep.subr.bf16.mxu0 %v3289_v1  ;;  %s3349_s26 = scalar_lea.vmem %s4402_s0, %s3197_s23  ;;  %v3219_v44 = vld [vmem:[%s4403_s1 + $0xb8] sm:$0xff]   ;;  %v3218_v54 = vld [vmem:[%s4403_s1 + $0x30] sm:$0xff]   ;;  %vm1346_vm4 = vcmask 1045504   ;;  %vm2008_vm5 = vcmask 1044480   ;;  %vm1761_vm6 = vsmask.f32 5376 }
   0xf   : > { %2745 = vmatprep.mubr.msk.bf16.mxu1 %vm3290_vm0, %v3289_v1  ;;  %2729 = vmatprep.mubr.msk.bf16.mxu0 %vm3290_vm0, %v3289_v1  ;;  %v207_v5 = vld [vmem:[%s3349_s26 + $0x40] sm:$0xff]  ;;  %v208_v6 = vld [vmem:[%s3349_s26 + $0x48] sm:$0xff]  ;;  %v201_v9 = vld [vmem:[%s3349_s26 + $0x10] sm:$0xff]  ;;  %s3198_s28 = smul.u32 144, %s4412_s16 }
  0x10   : > { %v199_v7 = vld [vmem:[%s3349_s26] sm:$0xff]  ;;  %v200_v8 = vld [vmem:[%s3349_s26 + $0x8] sm:$0xff]  ;;  %v202_v10 = vld [vmem:[%s3349_s26 + $0x18] sm:$0xff]  ;;  %v3369_v15 = vpack.c.bf16 %v208_v6, %v207_v5 }
  0x11   : > { %3190 = vmatpush3.bf16.msra.mxu1 %v3210_v2  ;;  %2716 = vmatpush3.bf16.msra.mxu0 %v3210_v2  ;;  %v3362_v11 = vpack.c.bf16 %v202_v10, %v201_v9  ;;  %v209_v13 = vld [vmem:[%s3349_s26 + $0x50] sm:$0xff]  ;;  %v210_v14 = vld [vmem:[%s3349_s26 + $0x58] sm:$0xff]  ;;  %v3371_v16 = vpack.c.bf16 %v200_v8, %v199_v7  ;;  %v211_v32 = vld [vmem:[%s3349_s26 + $0x60] sm:$0xff]  ;;  %s4329_s16 = scalar_lea.vmem %s4406_s4, %s3198_s28 }
  0x12   : > { %3183 = vmatprep.subr.bf16.mxu1 %v3289_v1  ;;  %2717 = vmatprep.subr.bf16.mxu0 %v3289_v1  ;;  %v3379_v19 = vpack.c.bf16 %v210_v14, %v209_v13  ;;  %v3385_v22 = vshll.u32 %v3369_v15, 16  ;;  %v3396_v26 = vshrl.u32 %v3369_v15, 16  ;;  %v212_v33 = vld [vmem:[%s3349_s26 + $0x68] sm:$0xff]  ;;  %v203_v34 = vld [vmem:[%s3349_s26 + $0x20] sm:$0xff]  ;;  %v213_v47 = vld [vmem:[%s3349_s26 + $0x70] sm:$0xff] }
  0x13   : > { %v274_v17 = vshll.u32 %v3362_v11, 16  ;;  %v278_v21 = vshrl.u32 %v3362_v11, 16  ;;  %v269_v23 = vshll.u32 %v3371_v16, 16  ;;  %v267_v30 = vshrl.u32 %v3371_v16, 16  ;;  %v204_v35 = vld [vmem:[%s3349_s26 + $0x28] sm:$0xff]  ;;  %v214_v48 = vld [vmem:[%s3349_s26 + $0x78] sm:$0xff] }
  0x14   : > { %v3399_v27 = vshll.u32 %v3379_v19, 16  ;;  %v300_v29 = vrot.slane %v3385_v22, 1  ;;  %v3412_v37 = vpack.c.bf16 %v212_v33, %v211_v32  ;;  %v3420_v42 = vpack.c.bf16 %v204_v35, %v203_v34  ;;  %v205_v52 = vld [vmem:[%s3349_s26 + $0x30] sm:$0xff]  ;;  %v206_v53 = vld [vmem:[%s3349_s26 + $0x38] sm:$0xff]  ;;  %v215_v56 = vld [vmem:[%s3349_s26 + $0x80] sm:$0xff] }
  0x15   : > { %3191 = vmatpush3.bf16.msra.mxu1 %v3211_v3  ;;  %2718 = vmatpush3.bf16.msra.mxu0 %v3211_v3  ;;  %v3381_v20 = vrot.slane %v274_v17, 2  ;;  %v3390_v24 = vrot.slane %v278_v21, 1  ;;  %v271_v31 = vrot.slane %v269_v23, 1  ;;  %v276_v41 = vrot.slane %v274_v17, 1  ;;  %v3220_v55 = vld [vmem:[%s4403_s1 + $0xb0] sm:$0xff]   ;;  %v216_v59 = vld [vmem:[%s3349_s26 + $0x88] sm:$0xff] }
  0x16   : > { %3184 = vmatprep.subr.bf16.mxu1 %v3289_v1  ;;  %2719 = vmatprep.subr.bf16.mxu0 %v3289_v1  ;;  %v308_v36 = vrot.slane %v3399_v27, 1  ;;  %v304_v39 = vor.u32 %v3396_v26, %v300_v29  ;;  %v3431_v45 = vshrl.u32 %v3379_v19, 16  ;;  %v3434_v46 = vshll.u32 %v3412_v37, 16  ;;  %v3463_v0 = vld [vmem:[%s3349_s26 + $0x90] sm:$0xff]  ;;  %v3221_v2 = vld [vmem:[%s4403_s1 + $0x28] sm:$0xff]   ;;  %v3223_v17 = vld [vmem:[%s4403_s1 + $0x20] sm:$0xff]  }
  0x17   : > { %v1102_v28 = vor.u32 %v3381_v20, %v3390_v24  ;;  %v272_v40 = vor.u32 %v271_v31, %v267_v30  ;;  %v3441_v51 = vshll.u32 %v3420_v42, 16  ;;  %v3455_v58 = vpack.c.bf16 %v214_v48, %v213_v47  ;;  %v3222_v3 = vld [vmem:[%s4403_s1 + $0xa8] sm:$0xff]   ;;  %v3225_v32 = vld [vmem:[%s4403_s1 + $0x18] sm:$0xff]   ;;  %v3252_v20 = vld [vmem:[%s4403_s1 + $0x1b0] sm:$0xff]  }
  0x18   : > { %v309_v49 = vsel %vm265_vm1, %v304_v39, %v308_v36  ;;  %v316_v57 = vrot.slane %v3434_v46, 1  ;;  %v312_v60 = vor.u32 %v3431_v45, %v308_v36  ;;  %v280_v61 = vor.u32 %v278_v21, %v276_v41  ;;  %v3226_v33 = vld [vmem:[%s4403_s1 + $0x98] sm:$0xff]   ;;  %v3229_v48 = vld [vmem:[%s4403_s1 + $0x88] sm:$0xff]  }
  0x19   : > { %3192 = vmatpush3.bf16.msra.mxu1 %v3212_v4  ;;  %2720 = vmatpush3.bf16.msra.mxu0 %v3212_v4  ;;  %v277_v50 = vsel %vm265_vm1, %v272_v40, %v276_v41  ;;  %v284_v62 = vrot.slane %v3441_v51, 1  ;;  %v3460_v63 = vpack.c.bf16 %v206_v53, %v205_v52  ;;  %v3478_v4 = vshrl.u32 %v3412_v37, 16  ;;  %v3227_v40 = vld [vmem:[%s4403_s1 + $0x10] sm:$0xff]   ;;  %v3249_v24 = vld [vmem:[%s4403_s1 + $0x178] sm:$0xff]  }
  0x1a   : > { %3185 = vmatprep.subr.bf16.mxu1 %v3289_v1  ;;  %2721 = vmatprep.subr.bf16.mxu0 %v3289_v1  ;;  %v3481_v5 = vshll.u32 %v3455_v58, 16  ;;  %v3483_v6 = vpack.c.bf16 %v216_v59, %v215_v56  ;;  %v3487_v7 = vpack.c.bf16 %v3463_v0, %v3463_v0  ;;  %v317_v8 = vsel %vm265_vm1, %v312_v60, %v316_v57  ;;  %v3231_v59 = vld [vmem:[%s4403_s1 + $0x80] sm:$0xff]   ;;  %v218_v60 = vld [vmem:[%s3349_s26 + $0x98] sm:$0xff] }
  0x1b   : > { %v285_v9 = vsel %vm265_vm1, %v280_v61, %v284_v62  ;;  %v3492_v10 = vshrl.u32 %v3420_v42, 16  ;;  %v320_v23 = vor.u32 %v3478_v4, %v316_v57  ;;  %v3530_v34 = vshrl.u32 %v3455_v58, 16  ;;  %v3232_v61 = vld [vmem:[%s4403_s1] sm:$0xff]  }
  0x1c   : > { %v3500_v13 = vrot.slane %v3483_v6, 1  ;;  %v702_v14 = vrot.slane %v3487_v7, 1  ;;  %v3538_v39 = vshrl.u32 %v3460_v63, 16  ;;  %v3565_v52 = vshrl.u32 %v3483_v6, 16 }
  0x1d   : > { %3193 = vmatpush3.bf16.msra.mxu1 %v3213_v12  ;;  %2722 = vmatpush3.bf16.msra.mxu0 %v3213_v12  ;;  %v3495_v12 = vshll.u32 %v3460_v63, 16  ;;  %v288_v30 = vor.u32 %v3492_v10, %v284_v62  ;;  %v338_v53 = vshll.u32 %v3487_v7, 16  ;;  %v3596_v7 = vpack.c.bf16 %v218_v60, %v3463_v0 }
  0x1e   : > { %3186 = vmatprep.subr.bf16.mxu1 %v3289_v1  ;;  %2723 = vmatprep.subr.bf16.mxu0 %v3289_v1  ;;  %v3511_v21 = vsel %vm684_vm2, %v3500_v13, %v702_v14  ;;  %v1103_v60 = vrot.slane %v3492_v10, 1 }
  0x1f   : > { %v292_v31 = vrot.slane %v3495_v12, 1  ;;  %v340_v57 = vrot.slane %v338_v53, 1  ;;  %v905_v14 = vrot.slane %v3596_v7, 1  ;;  %v3248_v53 = vld [vmem:[%s4403_s1 + $0x100] sm:$0xff]  }
  0x21   : > { %3194 = vmatpush3.bf16.msra.mxu1 %v3214_v18  ;;  %2724 = vmatpush3.bf16.msra.mxu0 %v3214_v18  ;;  %v3224_v18 = vld [vmem:[%s4403_s1 + $0xa0] sm:$0xff]   ;;  %v293_v36 = vsel %vm265_vm1, %v288_v30, %v292_v31  ;;  %v296_v47 = vor.u32 %v3538_v39, %v292_v31  ;;  %v3613_v0 = vsel %vm684_vm2, %v3500_v13, %v905_v14  ;;  %v690_v30 = vrot.slane %v3460_v63, 1 }
  0x22   : > { %3187 = vmatprep.subr.bf16.mxu1 %v3289_v1  ;;  %2725 = vmatprep.subr.bf16.mxu0 %v3289_v1 }
  0x25   : > { %3195 = vmatpush3.bf16.msra.mxu1 %v3215_v25  ;;  %2726 = vmatpush3.bf16.msra.mxu0 %v3215_v25  ;;  %v324_v25 = vrot.slane %v3481_v5, 1 }
  0x26   : > { %3188 = vmatprep.subr.bf16.mxu1 %v3289_v1  ;;  %2727 = vmatprep.subr.bf16.mxu0 %v3289_v1 }
  0x27   : > { %v325_v35 = vsel %vm265_vm1, %v320_v23, %v324_v25  ;;  %v328_v41 = vor.u32 %v3530_v34, %v324_v25  ;;  %v3238_v23 = vld [vmem:[%s4403_s1 + $0x128] sm:$0xff]   ;;  %v3235_v25 = vld [vmem:[%s4403_s1 + $0xf0] sm:$0xff]  }
  0x29   : > { %3196 = vmatpush3.bf16.msra.mxu1 %v3216_v38  ;;  %2728 = vmatpush3.bf16.msra.mxu0 %v3216_v38  ;;  %v3535_v38 = vshll.u32 %v3483_v6, 16 }
  0x2a   : > { %2765 = vmatprep.subr.bf16.mxu1 %v3289_v1  ;;  %2817 = vmatprep.subr.bf16.mxu0 %v3289_v1 }
  0x2c   : > { %2746 = vmatmul.mubr.bf16.vlgmr.msra.gmra.mxu1 %v309_v49  ;;  %2730 = vmatmul.mubr.bf16.vlgmr.msra.gmra.mxu0 %v277_v50  ;;  %v301_v50 = vsel %vm265_vm1, %v296_v47, %v300_v29  ;;  %v686_v29 = vrot.slane %v3362_v11, 1  ;;  %v3243_v47 = vld [vmem:[%s4403_s1 + $0xd0] sm:$0xff]  }
  0x2d   : > { %2766 = vmatpush3.bf16.msra.mxu1 %v3217_v43  ;;  %2818 = vmatpush3.bf16.msra.mxu0 %v3219_v44  ;;  %v332_v43 = vrot.slane %v3535_v38, 1  ;;  %v3228_v44 = vld [vmem:[%s4403_s1 + $0x90] sm:$0xff]  }
  0x2e   : > { %2767 = vmatprep.subr.bf16.mxu1 %v3289_v1  ;;  %2749 = vmatprep.mubr.msk.bf16.mxu1 %vm3290_vm0, %v3289_v1 }
  0x2f   : > { %2819 = vmatprep.subr.bf16.mxu0 %v3289_v1  ;;  %2733 = vmatprep.mubr.msk.bf16.mxu0 %vm3290_vm0, %v3289_v1  ;;  %v333_v49 = vsel %vm265_vm1, %v328_v41, %v332_v43  ;;  %v336_v56 = vor.u32 %v3565_v52, %v332_v43  ;;  %v3241_v41 = vld [vmem:[%s4403_s1 + $0xd8] sm:$0xff]   ;;  %v3244_v43 = vld [vmem:[%s4403_s1 + $0x110] sm:$0xff]  }
  0x31   : > { %2768 = vmatpush3.bf16.msra.mxu1 %v3218_v54  ;;  %2820 = vmatpush3.bf16.msra.mxu0 %v3220_v55  ;;  %v3230_v54 = vld [vmem:[%s4403_s1 + $0x8] sm:$0xff]   ;;  %v685_v55 = vrot.slane %v3371_v16, 1  ;;  %v341_v62 = vsel %vm265_vm1, %v336_v56, %v340_v57  ;;  %v698_v56 = vrot.slane %v3455_v58, 1 }
  0x32   : > { %2769 = vmatprep.subr.bf16.mxu1 %v3289_v1  ;;  %2821 = vmatprep.subr.bf16.mxu0 %v3289_v1 }
  0x34   : > { %2750 = vmatmul.mubr.bf16.gmra.mxu1 %v317_v8  ;;  %2734 = vmatmul.mubr.bf16.gmra.mxu0 %v285_v9  ;;  %v688_v8 = vrot.slane %v3420_v42, 1  ;;  %v3236_v9 = vld [vmem:[%s4403_s1 + $0x130] sm:$0xff]  }
  0x35   : > { %2770 = vmatpush3.bf16.msra.mxu1 %v3221_v2  ;;  %2822 = vmatpush3.bf16.msra.mxu0 %v3222_v3  ;;  %v687_v2 = vsel %vm684_vm2, %v685_v55, %v686_v29  ;;  %v3234_v3 = vld [vmem:[%s4403_s1 + $0x138] sm:$0xff]   ;;  %v3247_v55 = vld [vmem:[%s4403_s1 + $0xc0] sm:$0xff]  }
  0x36   : > { %2753 = vmatprep.mubr.msk.bf16.mxu1 %vm3290_vm0, %v3289_v1  ;;  %2771 = vmatprep.subr.bf16.mxu1 %v3289_v1  ;;  %v3641_v31 = vsel %vm684_vm2, %v688_v8, %v690_v30 }
  0x37   : > { %2823 = vmatprep.subr.bf16.mxu0 %v3289_v1  ;;  %2737 = vmatprep.mubr.msk.bf16.mxu0 %vm3290_vm0, %v3289_v1 }
  0x39   : > { %2772 = vmatpush3.bf16.msra.mxu1 %v3223_v17  ;;  %2824 = vmatpush3.bf16.msra.mxu0 %v3224_v18  ;;  %v3233_v17 = vld [vmem:[%s4403_s1 + $0xf8] sm:$0xff]   ;;  %v3619_v18 = vsel %vm684_vm2, %v686_v29, %v688_v8 }
  0x3a   : > { %2773 = vmatprep.subr.bf16.mxu1 %v3289_v1  ;;  %2825 = vmatprep.subr.bf16.mxu0 %v3289_v1 }
  0x3c   : > { %2754 = vmatmul.mubr.bf16.gmra.mxu1 %v325_v35  ;;  %2738 = vmatmul.mubr.bf16.gmra.mxu0 %v293_v36  ;;  %v692_v35 = vrot.slane %v3369_v15, 1  ;;  %v3239_v36 = vld [vmem:[%s4403_s1 + $0xe0] sm:$0xff]  }
  0x3d   : > { %2774 = vmatpush3.bf16.msra.mxu1 %v3225_v32  ;;  %2826 = vmatpush3.bf16.msra.mxu0 %v3226_v33  ;;  %v3237_v32 = vld [vmem:[%s4403_s1 + $0xe8] sm:$0xff]   ;;  %v3242_v33 = vld [vmem:[%s4403_s1 + $0x118] sm:$0xff]  }
  0x3e   : > { %2757 = vmatprep.mubr.msk.bf16.mxu1 %vm3290_vm0, %v3289_v1  ;;  %2775 = vmatprep.subr.bf16.mxu1 %v3289_v1 }
  0x3f   : > { %2827 = vmatprep.subr.bf16.mxu0 %v3289_v1  ;;  %2741 = vmatprep.mubr.msk.bf16.mxu0 %vm3290_vm0, %v3289_v1 }
  0x41   : > { %2776 = vmatpush3.bf16.msra.mxu1 %v3227_v40  ;;  %2828 = vmatpush3.bf16.msra.mxu0 %v3228_v44  ;;  %v3663_v40 = vsel %vm684_vm2, %v690_v30, %v692_v35  ;;  %v694_v44 = vrot.slane %v3379_v19, 1 }
  0x42   : > { %2829 = vmatprep.subr.bf16.mxu0 %v3289_v1  ;;  %2777 = vmatprep.subr.bf16.mxu1 %v3289_v1 }
  0x44   : > { %2758 = vmatmul.mubr.bf16.gmra.mxu1 %v333_v49  ;;  %2742 = vmatmul.mubr.bf16.gmra.mxu0 %v301_v50  ;;  %v3689_v49 = vsel %vm684_vm2, %v692_v35, %v694_v44  ;;  %v3245_v50 = vld [vmem:[%s4403_s1 + $0xc8] sm:$0xff]   ;;  %v1116_v35 = vrot.slane %v3399_v27, 2 }
  0x45   : > { %2830 = vmatpush3.bf16.msra.mxu0 %v3229_v48  ;;  %2761 = vmatprep.mubr.msk.bf16.mxu1 %vm3290_vm0, %v3289_v1  ;;  %v3246_v48 = vld [vmem:[%s4403_s1 + $0x108] sm:$0xff]  }
  0x46   : > { %2778 = vmatpush3.bf16.msra.mxu1 %v3230_v54  ;;  %2831 = vmatprep.subr.bf16.mxu0 %v3289_v1  ;;  %v696_v54 = vrot.slane %v3412_v37, 1 }
  0x47   : > { %2779 = vmatprep.subr.bf16.mxu1 %v3289_v1  ;;  %2833 = vmatprep.mubr.msk.bf16.mxu0 %vm3290_vm0, %v3289_v1 }
  0x48   : > { %v3712_v29 = vsel %vm684_vm2, %v694_v44, %v696_v54  ;;  %v3723_v57 = vsel %vm684_vm2, %v696_v54, %v698_v56  ;;  %v1119_v44 = vrot.slane %v3478_v4, 1  ;;  %v3259_v54 = vld [vmem:[%s4403_s1 + $0x150] sm:$0xff]  }
  0x49   : > { %2832 = vmatpush3.bf16.msra.mxu0 %v3231_v59  ;;  %v3733_v59 = vsel %vm684_vm2, %v698_v56, %v3500_v13  ;;  %v1123_v56 = vrot.slane %v3530_v34, 1 }
  0x4a   : > { %2780 = vmatpush3.bf16.msra.mxu1 %v3232_v61  ;;  %2921 = vmatprep.subr.bf16.mxu0 %v3289_v1  ;;  %v1104_v61 = vrot.slane %v3441_v51, 2 }
  0x4b   : > { %2869 = vmatprep.subr.bf16.mxu1 %v3289_v1 }
  0x4c   : > { %2762 = vmatmul.mubr.bf16.gmra.mxu1 %v341_v62  ;;  %2834 = vmatmul.mubr.bf16.vlgmr.msra.gmra.mxu0 %v687_v2  ;;  %v1105_v13 = vor.u32 %v1104_v61, %v1103_v60  ;;  %v3250_v2 = vld [vmem:[%s4403_s1 + $0x1b8] sm:$0xff]   ;;  %v1124_v60 = vrot.slane %v3481_v5, 2  ;;  %v3261_v61 = vld [vmem:[%s4403_s1 + $0x148] sm:$0xff]  }
  0x4d   : > { %2781 = vmatprep.mubr.msk.bf16.mxu1 %vm3290_vm0, %v3289_v1  ;;  %2922 = vmatpush3.bf16.msra.mxu0 %v3234_v3  ;;  %v1107_v3 = vrot.slane %v3538_v39, 1 }
  0x4e   : > { %2837 = vmatprep.mubr.msk.bf16.mxu0 %vm3290_vm0, %v3289_v1  ;;  %2923 = vmatprep.subr.bf16.mxu0 %v3289_v1  ;;  %v1106_v62 = vsel %vm1099_vm3, %v1102_v28, %v1105_v13 }
  0x51   : > { %2924 = vmatpush3.bf16.msra.mxu0 %v3236_v9  ;;  %v1111_v9 = vrot.slane %v3396_v26, 1 }
  0x52   : > { %2925 = vmatprep.subr.bf16.mxu0 %v3289_v1 }
  0x54   : > { %2782 = vmatmul.mubr.bf16.vlgmr.msra.gmra.mxu1 %v3371_v16  ;;  %2838 = vmatmul.mubr.bf16.gmra.mxu0 %v3619_v18  ;;  %v3240_v16 = vld [vmem:[%s4403_s1 + $0x120] sm:$0xff]  }
  0x55   : > { %2870 = vmatpush3.bf16.msra.mxu1 %v3233_v17  ;;  %2785 = vmatprep.mubr.msk.bf16.mxu1 %vm3290_vm0, %v3289_v1  ;;  %v1112_v17 = vrot.slane %v3385_v22, 2 }
  0x56   : > { %2871 = vmatprep.subr.bf16.mxu1 %v3289_v1  ;;  %2841 = vmatprep.mubr.msk.bf16.mxu0 %vm3290_vm0, %v3289_v1 }
  0x57   : > { %2926 = vmatpush3.bf16.msra.mxu0 %v3238_v23  ;;  %v3254_v23 = vld [vmem:[%s4403_s1 + $0x1a8] sm:$0xff]   ;;  %v1113_v30 = vor.u32 %v1112_v17, %v1111_v9 }
  0x58   : > { %2927 = vmatprep.subr.bf16.mxu0 %v3289_v1 }
  0x59   : > { %2872 = vmatpush3.bf16.msra.mxu1 %v3235_v25  ;;  %v3251_v25 = vld [vmem:[%s4403_s1 + $0x170] sm:$0xff]  }
  0x5a   : > { %2873 = vmatprep.subr.bf16.mxu1 %v3289_v1 }
  0x5b   : > { %2928 = vmatpush3.bf16.msra.mxu0 %v3240_v16 }
  0x5c   : > { %2786 = vmatmul.mubr.bf16.gmra.mxu1 %v3362_v11  ;;  %2842 = vmatmul.mubr.bf16.gmra.mxu0 %v3641_v31 }
  0x5d   : > { %2789 = vmatprep.mubr.msk.bf16.mxu1 %vm3290_vm0, %v3289_v1  ;;  %2874 = vmatpush3.bf16.msra.mxu1 %v3237_v32  ;;  %v3253_v32 = vld [vmem:[%s4403_s1 + $0x168] sm:$0xff]  }
  0x5e   : > { %2845 = vmatprep.mubr.msk.bf16.mxu0 %vm3290_vm0, %v3289_v1  ;;  %2875 = vmatprep.subr.bf16.mxu1 %v3289_v1 }
  0x5f   : > { %2929 = vmatprep.subr.bf16.mxu0 %v3289_v1 }
  0x60   : > { %2930 = vmatpush3.bf16.msra.mxu0 %v3242_v33  ;;  %v1115_v33 = vrot.slane %v3431_v45, 1 }
  0x61   : > { %2876 = vmatpush3.bf16.msra.mxu1 %v3239_v36  ;;  %2931 = vmatprep.subr.bf16.mxu0 %v3289_v1  ;;  %v3258_v36 = vld [vmem:[%s4403_s1 + $0x198] sm:$0xff]  }
  0x62   : > { %2877 = vmatprep.subr.bf16.mxu1 %v3289_v1 }
  0x64   : > { %2790 = vmatmul.mubr.bf16.gmra.mxu1 %v3420_v42  ;;  %2846 = vmatmul.mubr.bf16.gmra.mxu0 %v3663_v40 }
  0x65   : > { %2793 = vmatprep.mubr.msk.bf16.mxu1 %vm3290_vm0, %v3289_v1  ;;  %2849 = vmatprep.mubr.msk.bf16.mxu0 %vm3290_vm0, %v3289_v1 }
  0x66   : > { %2878 = vmatpush3.bf16.msra.mxu1 %v3241_v41  ;;  %2932 = vmatpush3.bf16.msra.mxu0 %v3244_v43  ;;  %v1117_v41 = vor.u32 %v1116_v35, %v1115_v33  ;;  %v3255_v43 = vld [vmem:[%s4403_s1 + $0x160] sm:$0xff]  }
  0x67   : > { %2879 = vmatprep.subr.bf16.mxu1 %v3289_v1  ;;  %2933 = vmatprep.subr.bf16.mxu0 %v3289_v1 }
  0x6a   : > { %2880 = vmatpush3.bf16.msra.mxu1 %v3243_v47  ;;  %2934 = vmatpush3.bf16.msra.mxu0 %v3246_v48  ;;  %v1120_v47 = vrot.slane %v3434_v46, 2  ;;  %v3257_v48 = vld [vmem:[%s4403_s1 + $0x158] sm:$0xff]  }
  0x6b   : > { %2881 = vmatprep.subr.bf16.mxu1 %v3289_v1  ;;  %2935 = vmatprep.subr.bf16.mxu0 %v3289_v1 }
  0x6c   : > { %2794 = vmatmul.mubr.bf16.gmra.mxu1 %v3460_v63  ;;  %2850 = vmatmul.mubr.bf16.gmra.mxu0 %v3689_v49 }
  0x6d   : > { %2797 = vmatprep.mubr.msk.bf16.mxu1 %vm3290_vm0, %v3289_v1  ;;  %2853 = vmatprep.mubr.msk.bf16.mxu0 %vm3290_vm0, %v3289_v1 }
  0x6e   : > { %2882 = vmatpush3.bf16.msra.mxu1 %v3245_v50  ;;  %2936 = vmatpush3.bf16.msra.mxu0 %v3248_v53  ;;  %v3260_v50 = vld [vmem:[%s4403_s1 + $0x190] sm:$0xff]   ;;  %v1121_v53 = vor.u32 %v1120_v47, %v1119_v44  ;;  %v1347_v44 = vrot.slane %v3362_v11, 2  ;;  %v1352_v47 = vrot.slane %v3369_v15, 2 }
  0x6f   : > { %2883 = vmatprep.subr.bf16.mxu1 %v3289_v1  ;;  %3025 = vmatprep.subr.bf16.mxu0 %v3289_v1 }
  0x72   : > { %2884 = vmatpush3.bf16.msra.mxu1 %v3247_v55  ;;  %v3262_v55 = vld [vmem:[%s4403_s1 + $0x188] sm:$0xff]  }
  0x73   : > { %2973 = vmatprep.subr.bf16.mxu1 %v3289_v1 }
  0x74   : > { %2798 = vmatmul.mubr.bf16.gmra.mxu1 %v3369_v15  ;;  %2854 = vmatmul.mubr.bf16.gmra.mxu0 %v3712_v29 }
  0x75   : > { %2801 = vmatprep.mubr.msk.bf16.mxu1 %vm3290_vm0, %v3289_v1  ;;  %2857 = vmatprep.mubr.msk.bf16.mxu0 %vm3290_vm0, %v3289_v1 }
  0x7c   : > { %2802 = vmatmul.mubr.bf16.gmra.mxu1 %v3379_v19  ;;  %2858 = vmatmul.mubr.bf16.gmra.mxu0 %v3723_v57 }
  0x7d   : > { %2805 = vmatprep.mubr.msk.bf16.mxu1 %vm3290_vm0, %v3289_v1  ;;  %2861 = vmatprep.mubr.msk.bf16.mxu0 %vm3290_vm0, %v3289_v1 }
  0x84   : > { %2806 = vmatmul.mubr.bf16.gmra.mxu1 %v3412_v37  ;;  %2862 = vmatmul.mubr.bf16.gmra.mxu0 %v3733_v59 }
  0x85   : > { %2809 = vmatprep.mubr.msk.bf16.mxu1 %vm3290_vm0, %v3289_v1  ;;  %2865 = vmatprep.mubr.msk.bf16.mxu0 %vm3290_vm0, %v3289_v1 }
  0x8c   : > { %2810 = vmatmul.mubr.bf16.gmra.mxu1 %v3455_v58  ;;  %2866 = vmatmul.mubr.bf16.gmra.mxu0 %v3511_v21  ;;  %v1108_v21 = vrot.slane %v3495_v12, 2 }
  0x8d   : > { %2813 = vmatprep.mubr.msk.bf16.mxu1 %vm3290_vm0, %v3289_v1  ;;  %2937 = vmatprep.mubr.msk.bf16.mxu0 %vm3290_vm0, %v3289_v1 }
  0x8e   : > { %v1109_v8 = vor.u32 %v1108_v21, %v1107_v3  ;;  %v1127_v3 = vrot.slane %v3565_v52, 1  ;;  %v1128_v21 = vrot.slane %v3535_v38, 2 }
  0x90   : > { %v1110_v28 = vsel %vm1099_vm3, %v1105_v13, %v1109_v8  ;;  %v1114_v16 = vsel %vm1099_vm3, %v1109_v8, %v1113_v30  ;;  %v3264_v13 = vld [vmem:[%s4403_s1 + $0x180] sm:$0xff]   ;;  %v1129_v8 = vor.u32 %v1128_v21, %v1127_v3 }
  0x94   : > { %2814 = vmatmul.mubr.bf16.gmra.mxu1 %v3483_v6  ;;  %2938 = vmatmul.mubr.bf16.vlgmr.msra.gmra.mxu0 %v1106_v62  ;;  %v1125_v62 = vor.u32 %v1124_v60, %v1123_v56  ;;  %v3269_v60 = vld [vmem:[%s4403_s1 + $0x1e8] sm:$0xff]  }
  0x95   : > { %2885 = vmatprep.mubr.msk.bf16.mxu1 %vm3290_vm0, %v3289_v1  ;;  %3026 = vmatpush3.bf16.msra.mxu0 %v3250_v2  ;;  %v3263_v2 = vld [vmem:[%s4403_s1 + $0x140] sm:$0xff]  }
  0x96   : > { %2941 = vmatprep.mubr.msk.bf16.mxu0 %vm3290_vm0, %v3289_v1  ;;  %3027 = vmatprep.subr.bf16.mxu0 %v3289_v1  ;;  %v1130_v9 = vsel %vm1099_vm3, %v1125_v62, %v1129_v8 }
  0x99   : > { %3028 = vmatpush3.bf16.msra.mxu0 %v3252_v20  ;;  %v4408_v20 = vshrl.u32 %v3596_v7, 16 }
  0x9a   : > { %3029 = vmatprep.subr.bf16.mxu0 %v3289_v1 }
  0x9b   : > { %v1134_v17 = vrot.slane %v4408_v20, 1 }
  0x9c   : > { %2886 = vmatmul.mubr.bf16.vlgmr.msra.gmra.mxu1 %v3619_v18  ;;  %2942 = vmatmul.mubr.bf16.gmra.mxu0 %v1110_v28  ;;  %v3256_v18 = vld [vmem:[%s4403_s1 + $0x1a0] sm:$0xff]  }
  0x9d   : > { %2974 = vmatpush3.bf16.msra.mxu1 %v3249_v24  ;;  %2889 = vmatprep.mubr.msk.bf16.mxu1 %vm3290_vm0, %v3289_v1  ;;  %v4407_v24 = vshll.u32 %v3596_v7, 16  ;;  %v3867_v28 = vld [vmem:[%s3349_s26 + $0xa0] sm:$0xff] }
  0x9e   : > { %2975 = vmatprep.subr.bf16.mxu1 %v3289_v1  ;;  %2945 = vmatprep.mubr.msk.bf16.mxu0 %vm3290_vm0, %v3289_v1 }
  0x9f   : > { %3030 = vmatpush3.bf16.msra.mxu0 %v3254_v23  ;;  %v3876_v23 = vpack.c.bf16 %v3867_v28, %v3867_v28 }
  0xa0   : > { %3031 = vmatprep.subr.bf16.mxu0 %v3289_v1 }
  0xa1   : > { %2976 = vmatpush3.bf16.msra.mxu1 %v3251_v25  ;;  %v1364_v20 = vrot.slane %v3876_v23, 2 }
  0xa2   : > { %2977 = vmatprep.subr.bf16.mxu1 %v3289_v1 }
  0xa3   : > { %3032 = vmatpush3.bf16.msra.mxu0 %v3256_v18  ;;  %v1144_v18 = vshll.u32 %v3876_v23, 16 }
  0xa4   : > { %2890 = vmatmul.mubr.bf16.gmra.mxu1 %v3641_v31  ;;  %2946 = vmatmul.mubr.bf16.gmra.mxu0 %v1114_v16  ;;  %v1118_v31 = vsel %vm1099_vm3, %v1113_v30, %v1117_v41  ;;  %v1141_v30 = vshrl.u32 %v3876_v23, 16 }
  0xa5   : > { %2893 = vmatprep.mubr.msk.bf16.mxu1 %vm3290_vm0, %v3289_v1  ;;  %2978 = vmatpush3.bf16.msra.mxu1 %v3253_v32  ;;  %v1146_v33 = vrot.slane %v1144_v18, 2  ;;  %v3276_v18 = vld [vmem:[%s4403_s1 + $0x210] sm:$0xff]  }
  0xa6   : > { %2949 = vmatprep.mubr.msk.bf16.mxu0 %vm3290_vm0, %v3289_v1  ;;  %2979 = vmatprep.subr.bf16.mxu1 %v3289_v1  ;;  %v1143_v32 = vrot.slane %v1141_v30, 1  ;;  %v3273_v30 = vld [vmem:[%s4403_s1 + $0x1d8] sm:$0xff]  }
  0xa7   : > { %3033 = vmatprep.subr.bf16.mxu0 %v3289_v1 }
  0xa8   : > { %3034 = vmatpush3.bf16.msra.mxu0 %v3258_v36  ;;  %v907_v36 = vrot.slane %v3876_v23, 1 }
  0xa9   : > { %2980 = vmatpush3.bf16.msra.mxu1 %v3255_v43  ;;  %3035 = vmatprep.subr.bf16.mxu0 %v3289_v1 }
  0xaa   : > { %2981 = vmatprep.subr.bf16.mxu1 %v3289_v1  ;;  %v908_v43 = vsel %vm684_vm2, %v905_v14, %v907_v36  ;;  %v3268_v14 = vld [vmem:[%s4403_s1 + $0x230] sm:$0xff]  }
  0xab   : > { %v3275_v36 = vld [vmem:[%s4403_s1 + $0x1d0] sm:$0xff]  }
  0xac   : > { %2894 = vmatmul.mubr.bf16.gmra.mxu1 %v3663_v40  ;;  %2950 = vmatmul.mubr.bf16.gmra.mxu0 %v1118_v31  ;;  %v1122_v40 = vsel %vm1099_vm3, %v1117_v41, %v1121_v53  ;;  %v1350_v41 = vrot.slane %v3460_v63, 2  ;;  %v3266_v31 = vld [vmem:[%s4403_s1 + $0x238] sm:$0xff]  }
  0xad   : > { %2897 = vmatprep.mubr.msk.bf16.mxu1 %vm3290_vm0, %v3289_v1  ;;  %2953 = vmatprep.mubr.msk.bf16.mxu0 %vm3290_vm0, %v3289_v1 }
  0xae   : > { %2982 = vmatpush3.bf16.msra.mxu1 %v3257_v48  ;;  %3036 = vmatpush3.bf16.msra.mxu0 %v3260_v50  ;;  %v3265_v50 = vld [vmem:[%s4403_s1 + $0x1f8] sm:$0xff]   ;;  %v1353_v11 = vsel %vm1346_vm4, %v1350_v41, %v1352_v47 }
  0xaf   : > { %2983 = vmatprep.subr.bf16.mxu1 %v3289_v1  ;;  %3037 = vmatprep.subr.bf16.mxu0 %v3289_v1 }
  0xb2   : > { %2984 = vmatpush3.bf16.msra.mxu1 %v3259_v54  ;;  %3038 = vmatpush3.bf16.msra.mxu0 %v3262_v55  ;;  %v3267_v54 = vld [vmem:[%s4403_s1 + $0x1f0] sm:$0xff]   ;;  %v1354_v55 = vrot.slane %v3379_v19, 2 }
  0xb3   : > { %2985 = vmatprep.subr.bf16.mxu1 %v3289_v1  ;;  %3039 = vmatprep.subr.bf16.mxu0 %v3289_v1 }
  0xb4   : > { %2898 = vmatmul.mubr.bf16.gmra.mxu1 %v3689_v49  ;;  %2954 = vmatmul.mubr.bf16.gmra.mxu0 %v1122_v40  ;;  %v1126_v49 = vsel %vm1099_vm3, %v1121_v53, %v1125_v62  ;;  %v3270_v53 = vld [vmem:[%s4403_s1 + $0x228] sm:$0xff]   ;;  %v3272_v40 = vld [vmem:[%s4403_s1 + $0x220] sm:$0xff]   ;;  %v1355_v56 = vsel %vm1346_vm4, %v1352_v47, %v1354_v55  ;;  %v3274_v62 = vld [vmem:[%s4403_s1 + $0x218] sm:$0xff]  }
  0xb5   : > { %2901 = vmatprep.mubr.msk.bf16.mxu1 %vm3290_vm0, %v3289_v1  ;;  %2957 = vmatprep.mubr.msk.bf16.mxu0 %vm3290_vm0, %v3289_v1  ;;  %v3277_v47 = vld [vmem:[%s4403_s1 + $0x1c8] sm:$0xff]  }
  0xb6   : > { %2986 = vmatpush3.bf16.msra.mxu1 %v3261_v61  ;;  %3040 = vmatpush3.bf16.msra.mxu0 %v3264_v13 }
  0xb7   : > { %2987 = vmatprep.subr.bf16.mxu1 %v3289_v1  ;;  %3129 = vmatprep.subr.bf16.mxu0 %v3289_v1 }
  0xba   : > { %2988 = vmatpush3.bf16.msra.mxu1 %v3263_v2  ;;  %v1356_v2 = vrot.slane %v3412_v37, 2 }
  0xbb   : > { %3077 = vmatprep.subr.bf16.mxu1 %v3289_v1 }
  0xbc   : > { %2902 = vmatmul.mubr.bf16.gmra.mxu1 %v3712_v29  ;;  %2958 = vmatmul.mubr.bf16.gmra.mxu0 %v1126_v49  ;;  %v1137_v29 = vrot.slane %v4407_v24, 2  ;;  %v3271_v49 = vld [vmem:[%s4403_s1 + $0x1e0] sm:$0xff]  }
  0xbd   : > { %2905 = vmatprep.mubr.msk.bf16.mxu1 %vm3290_vm0, %v3289_v1  ;;  %2961 = vmatprep.mubr.msk.bf16.mxu0 %vm3290_vm0, %v3289_v1 }
  0xbe   : > { %v1138_v25 = vor.u32 %v1137_v29, %v1134_v17  ;;  %v1357_v17 = vsel %vm1346_vm4, %v1354_v55, %v1356_v2  ;;  %v3279_v55 = vld [vmem:[%s4403_s1 + $0x1c0] sm:$0xff]  }
  0xc0   : > { %v1139_v16 = vsel %vm1099_vm3, %v1129_v8, %v1138_v25 }
  0xc4   : > { %2906 = vmatmul.mubr.bf16.gmra.mxu1 %v3723_v57  ;;  %2962 = vmatmul.mubr.bf16.gmra.mxu0 %v1130_v9  ;;  %v1147_v57 = vor.u32 %v1146_v33, %v1143_v32  ;;  %v1358_v33 = vrot.slane %v3455_v58, 2 }
  0xc5   : > { %2909 = vmatprep.mubr.msk.bf16.mxu1 %vm3290_vm0, %v3289_v1  ;;  %2965 = vmatprep.mubr.msk.bf16.mxu0 %vm3290_vm0, %v3289_v1 }
  0xc6   : > { %v1148_v35 = vsel %vm1099_vm3, %v1138_v25, %v1147_v57 }
  0xcc   : > { %2910 = vmatmul.mubr.bf16.gmra.mxu1 %v3733_v59  ;;  %2966 = vmatmul.mubr.bf16.gmra.mxu0 %v1139_v16  ;;  %v1348_v59 = vrot.slane %v3420_v42, 2 }
  0xcd   : > { %2913 = vmatprep.mubr.msk.bf16.mxu1 %vm3290_vm0, %v3289_v1  ;;  %2969 = vmatprep.mubr.msk.bf16.mxu0 %vm3290_vm0, %v3289_v1 }
  0xce   : > { %v1349_v48 = vsel %vm1346_vm4, %v1347_v44, %v1348_v59 }
  0xd4   : > { %2914 = vmatmul.mubr.bf16.gmra.mxu1 %v3613_v0  ;;  %2970 = vmatmul.mubr.bf16.gmra.mxu0 %v1148_v35  ;;  %v1351_v0 = vsel %vm1346_vm4, %v1348_v59, %v1350_v41  ;;  %v3278_v59 = vld [vmem:[%s4403_s1 + $0x208] sm:$0xff]  }
  0xd5   : > { %2917 = vmatprep.mubr.msk.bf16.mxu1 %vm3290_vm0, %v3289_v1  ;;  %3041 = vmatprep.mubr.msk.bf16.mxu0 %vm3290_vm0, %v3289_v1 }
  0xdc   : > { %2918 = vmatmul.mubr.bf16.gmra.mxu1 %v908_v43  ;;  %3042 = vmatmul.mubr.bf16.vlgmr.msra.gmra.mxu0 %v1351_v0 }
  0xdd   : > { %2989 = vmatprep.mubr.msk.bf16.mxu1 %vm3290_vm0, %v3289_v1  ;;  %3130 = vmatpush3.bf16.msra.mxu0 %v3266_v31 }
  0xde   : > { %3045 = vmatprep.mubr.msk.bf16.mxu0 %vm3290_vm0, %v3289_v1  ;;  %3131 = vmatprep.subr.bf16.mxu0 %v3289_v1 }
  0xe1   : > { %3132 = vmatpush3.bf16.msra.mxu0 %v3268_v14  ;;  %v3280_v14 = vld [vmem:[%s4403_s1 + $0x200] sm:$0xff]  }
  0xe2   : > { %3133 = vmatprep.subr.bf16.mxu0 %v3289_v1 }
  0xe4   : > { %2990 = vmatmul.mubr.bf16.vlgmr.msra.gmra.mxu1 %v1349_v48  ;;  %3046 = vmatmul.mubr.bf16.gmra.mxu0 %v1353_v11 }
  0xe5   : > { %3078 = vmatpush3.bf16.msra.mxu1 %v3265_v50  ;;  %2993 = vmatprep.mubr.msk.bf16.mxu1 %vm3290_vm0, %v3289_v1 }
  0xe6   : > { %3079 = vmatprep.subr.bf16.mxu1 %v3289_v1  ;;  %3049 = vmatprep.mubr.msk.bf16.mxu0 %vm3290_vm0, %v3289_v1 }
  0xe7   : > { %3134 = vmatpush3.bf16.msra.mxu0 %v3270_v53 }
  0xe8   : > { %3135 = vmatprep.subr.bf16.mxu0 %v3289_v1 }
  0xe9   : > { %3080 = vmatpush3.bf16.msra.mxu1 %v3267_v54 }
  0xea   : > { %3081 = vmatprep.subr.bf16.mxu1 %v3289_v1 }
  0xeb   : > { %3136 = vmatpush3.bf16.msra.mxu0 %v3272_v40 }
  0xec   : > { %v3944_v61 = vpop.f32.mrf.mxu1  ;;  %2994 = vmatmul.mubr.bf16.gmra.mxu1 %v1351_v0  ;;  %v3946_v13 = vpop.f32.mrf.mxu0  ;;  %3050 = vmatmul.mubr.bf16.gmra.mxu0 %v1355_v56  ;;  %v1359_v0 = vsel %vm1346_vm4, %v1356_v2, %v1358_v33 }
  0xed   : > { %2997 = vmatprep.mubr.msk.bf16.mxu1 %vm3290_vm0, %v3289_v1  ;;  %3082 = vmatpush3.bf16.msra.mxu1 %v3269_v60 }
  0xee   : > { %v2747_v3 = vpop.f32.mrf.mxu1  ;;  %v2731_v21 = vpop.f32.mrf.mxu0  ;;  %3053 = vmatprep.mubr.msk.bf16.mxu0 %vm3290_vm0, %v3289_v1  ;;  %3083 = vmatprep.subr.bf16.mxu1 %v3289_v1 }
  0xef   : > { %3137 = vmatprep.subr.bf16.mxu0 %v3289_v1  ;;  %v1362_v21 = vrot.slane %v3596_v7, 2 }
  0xf0   : > { %v3961_v8 = vpop.f32.mrf.mxu1  ;;  %v3963_v9 = vpop.f32.mrf.mxu0  ;;  %3138 = vmatpush3.bf16.msra.mxu0 %v3274_v62 }
  0xf1   : > { %3084 = vmatpush3.bf16.msra.mxu1 %v3271_v49  ;;  %3139 = vmatprep.subr.bf16.mxu0 %v3289_v1  ;;  %v1365_v23 = vsel %vm1346_vm4, %v1362_v21, %v1364_v20 }
  0xf2   : > { %v2748_v29 = vpop.f32.mrf.mxu1  ;;  %v2732_v25 = vpop.f32.mrf.mxu0  ;;  %3085 = vmatprep.subr.bf16.mxu1 %v3289_v1 }
  0xf4   : > { %v3974_v16 = vpop.f32.mrf.mxu1  ;;  %2998 = vmatmul.mubr.bf16.gmra.mxu1 %v1353_v11  ;;  %v3976_v32 = vpop.f32.mrf.mxu0  ;;  %3054 = vmatmul.mubr.bf16.gmra.mxu0 %v1357_v17  ;;  %v1360_v11 = vrot.slane %v3483_v6, 2 }
  0xf5   : > { %3001 = vmatprep.mubr.msk.bf16.mxu1 %vm3290_vm0, %v3289_v1  ;;  %3057 = vmatprep.mubr.msk.bf16.mxu0 %vm3290_vm0, %v3289_v1 }
  0xf6   : > { %v2751_v57 = vpop.f32.mrf.mxu1  ;;  %v2735_v35 = vpop.f32.mrf.mxu0  ;;  %3086 = vmatpush3.bf16.msra.mxu1 %v3273_v30  ;;  %3140 = vmatpush3.bf16.msra.mxu0 %v3276_v18  ;;  %v1361_v60 = vsel %vm1346_vm4, %v1358_v33, %v1360_v11  ;;  %v220_v30 = vld [vmem:[%s3349_s26 + $0xa8] sm:$0xff] }
  0xf7   : > { %3087 = vmatprep.subr.bf16.mxu1 %v3289_v1  ;;  %3141 = vmatprep.subr.bf16.mxu0 %v3289_v1  ;;  %v4038_v57 = vpack.c.bf16 %v220_v30, %v3867_v28 }
  0xf8   : > { %v3991_v41 = vpop.f32.mrf.mxu1  ;;  %v3993_v43 = vpop.f32.mrf.mxu0 }
  0xfa   : > { %v2752_v31 = vpop.f32.mrf.mxu1  ;;  %v2736_v44 = vpop.f32.mrf.mxu0  ;;  %3088 = vmatpush3.bf16.msra.mxu1 %v3275_v36  ;;  %3142 = vmatpush3.bf16.msra.mxu0 %v3278_v59 }
  0xfb   : > { %3089 = vmatprep.subr.bf16.mxu1 %v3289_v1  ;;  %3143 = vmatprep.subr.bf16.mxu0 %v3289_v1  ;;  %v1567_v44 = vrot.slane %v4038_v57, 2 }
  0xfc   : > { %v4004_v48 = vpop.f32.mrf.mxu1  ;;  %3002 = vmatmul.mubr.bf16.gmra.mxu1 %v1355_v56  ;;  %v4006_v50 = vpop.f32.mrf.mxu0  ;;  %3058 = vmatmul.mubr.bf16.gmra.mxu0 %v1359_v0 }
  0xfd   : > { %3005 = vmatprep.mubr.msk.bf16.mxu1 %vm3290_vm0, %v3289_v1  ;;  %3061 = vmatprep.mubr.msk.bf16.mxu0 %vm3290_vm0, %v3289_v1 }
  0xfe   : > { %v2755_v53 = vpop.f32.mrf.mxu1  ;;  %v2739_v54 = vpop.f32.mrf.mxu0  ;;  %3090 = vmatpush3.bf16.msra.mxu1 %v3277_v47  ;;  %3144 = vmatpush3.bf16.msra.mxu0 %v3280_v14 }
  0xff   : > { %3091 = vmatprep.subr.bf16.mxu1 %v3289_v1  ;;  %v1568_v54 = vsel %vm1346_vm4, %v1362_v21, %v1567_v44 }
 0x100   : > { %v4017_v40 = vpop.f32.mrf.mxu1  ;;  %v4019_v56 = vpop.f32.mrf.mxu0 }
 0x102   : > { %v2756_v62 = vpop.f32.mrf.mxu1  ;;  %v2740_v2 = vpop.f32.mrf.mxu0  ;;  %3092 = vmatpush3.bf16.msra.mxu1 %v3279_v55 }
 0x104   : > { %v4022_v49 = vpop.f32.mrf.mxu1  ;;  %3006 = vmatmul.mubr.bf16.gmra.mxu1 %v1357_v17  ;;  %v4024_v3 = vpop.f32.mrf.mxu0  ;;  %3062 = vmatmul.mubr.bf16.gmra.mxu0 %v1361_v60  ;;  %v1363_v17 = vsel %vm1346_vm4, %v1360_v11, %v1362_v21  ;;  %v221_v11 = vld [vmem:[%s3349_s26 + $0xb0] sm:$0xff] }
 0x105   : > { %3009 = vmatprep.mubr.msk.bf16.mxu1 %vm3290_vm0, %v3289_v1  ;;  %3065 = vmatprep.mubr.msk.bf16.mxu0 %vm3290_vm0, %v3289_v1  ;;  %v4051_v55 = vpack.c.bf16 %v221_v11, %v221_v11 }
 0x106   : > { %v2759_v29 = vpop.f32.mrf.mxu1  ;;  %v2743_v25 = vpop.f32.mrf.mxu0 }
 0x107   : > { %v1569_v30 = vrot.slane %v4051_v55, 2 }
 0x108   : > { %v4032_v18 = vpop.f32.mrf.mxu1  ;;  %v4034_v33 = vpop.f32.mrf.mxu0 }
 0x10a   : > { %v2760_v35 = vpop.f32.mrf.mxu1  ;;  %v2744_v36 = vpop.f32.mrf.mxu0 }
 0x10c   : > { %v4040_v59 = vpop.f32.mrf.mxu1  ;;  %3010 = vmatmul.mubr.bf16.gmra.mxu1 %v1359_v0  ;;  %v795_v31 = vpop.f32.mrf.mxu0  ;;  %3066 = vmatmul.mubr.bf16.gmra.mxu0 %v1363_v17 }
 0x10d   : > { %3013 = vmatprep.mubr.msk.bf16.mxu1 %vm3290_vm0, %v3289_v1  ;;  %3069 = vmatprep.mubr.msk.bf16.mxu0 %vm3290_vm0, %v3289_v1 }
 0x10e   : > { %v2763_v47 = vpop.f32.mrf.mxu1  ;;  %v2835_v14 = vpop.f32.mrf.mxu0 }
 0x110   : > { %v4048_v28 = vpop.f32.mrf.mxu1  ;;  %v798_v53 = vpop.f32.mrf.mxu0 }
 0x112   : > { %v2764_v0 = vpop.f32.mrf.mxu1  ;;  %v2836_v62 = vpop.f32.mrf.mxu0 }
 0x114   : > { %v586_v2 = vpop.f32.mrf.mxu1  ;;  %3014 = vmatmul.mubr.bf16.gmra.mxu1 %v1361_v60  ;;  %v803_v29 = vpop.f32.mrf.mxu0  ;;  %3070 = vmatmul.mubr.bf16.gmra.mxu0 %v1568_v54  ;;  %v1570_v54 = vsel %vm1346_vm4, %v1567_v44, %v1569_v30 }
 0x115   : > { %v587_v25 = vadd.f32 %v586_v2, %v3946_v13  ;;  %3017 = vmatprep.mubr.msk.bf16.mxu1 %vm3290_vm0, %v3289_v1  ;;  %3073 = vmatprep.mubr.msk.bf16.mxu0 %vm3290_vm0, %v3289_v1 }
 0x116   : > { %v2783_v35 = vpop.f32.mrf.mxu1  ;;  %v2839_v36 = vpop.f32.mrf.mxu0 }
 0x117   : > { %v4059_v47 = vadd.f32 %v795_v31, %v587_v25  ;;  %v2009_v35 = vrot.slane %v3420_v42, 3  ;;  %v2010_v31 = vrot.slane %v3460_v63, 3  ;;  %v1762_v63 = vrot.slane %v3492_v10, 2 }
 0x118   : > { %v589_v14 = vpop.f32.mrf.mxu1  ;;  %v806_v11 = vpop.f32.mrf.mxu0  ;;  %v1763_v36 = vrot.slane %v3441_v51, 3  ;;  %v2012_v51 = vrot.slane %v3369_v15, 3 }
 0x119   : > { %v590_v60 = vadd.f32 %v589_v14, %v3963_v9  ;;  %v2011_v42 = vsel %vm2008_vm5, %v2009_v35, %v2010_v31  ;;  %v1765_v14 = vrot.slane %v3538_v39, 2 }
 0x11a   : > { %v2784_v0 = vpop.f32.mrf.mxu1  ;;  %v2840_v13 = vpop.f32.mrf.mxu0  ;;  %v1764_v10 = vor.u32 %v1763_v36, %v1762_v63 }
 0x11b   : > { %v4063_v62 = vadd.f32 %v798_v53, %v590_v60  ;;  %v1766_v60 = vrot.slane %v3495_v12, 3 }
 0x11c   : > { %v594_v2 = vpop.f32.mrf.mxu1  ;;  %3018 = vmatmul.mubr.bf16.gmra.mxu1 %v1363_v17  ;;  %v811_v24 = vpop.f32.mrf.mxu0  ;;  %3074 = vmatmul.mubr.bf16.gmra.mxu0 %v1570_v54 }
 0x11d   : > { %v595_v25 = vadd.f32 %v594_v2, %v3976_v32  ;;  %3021 = vmatprep.mubr.msk.bf16.mxu1 %vm3290_vm0, %v3289_v1  ;;  %3145 = vmatprep.mubr.msk.bf16.mxu0 %vm3290_vm0, %v3289_v1 }
 0x11e   : > { %v2787_v9 = vpop.f32.mrf.mxu1  ;;  %v2843_v44 = vpop.f32.mrf.mxu0 }
 0x11f   : > { %v4073_v17 = vadd.f32 %v803_v29, %v595_v25  ;;  %v1769_v25 = vrot.slane %v3396_v26, 2 }
 0x120   : > { %v597_v53 = vpop.f32.mrf.mxu1  ;;  %v814_v30 = vpop.f32.mrf.mxu0 }
 0x121   : > { %v598_v32 = vadd.f32 %v597_v53, %v3993_v43  ;;  %v1767_v43 = vor.u32 %v1766_v60, %v1765_v14  ;;  %v2013_v53 = vsel %vm2008_vm5, %v2010_v31, %v2012_v51 }
 0x122   : > { %v2788_v54 = vpop.f32.mrf.mxu1  ;;  %v2844_v0 = vpop.f32.mrf.mxu0 }
 0x123   : > { %v4082_v29 = vadd.f32 %v806_v11, %v598_v32  ;;  %v1768_v44 = vsel %vm1761_vm6, %v1764_v10, %v1767_v43  ;;  %v1773_v0 = vrot.slane %v3431_v45, 2  ;;  %v2016_v45 = vrot.slane %v3412_v37, 3 }
 0x124   : > { %v602_v13 = vpop.f32.mrf.mxu1  ;;  %3022 = vmatmul.mubr.bf16.gmra.mxu1 %v1365_v23  ;;  %v819_v20 = vpop.f32.mrf.mxu0  ;;  %3146 = vmatmul.mubr.bf16.vlgmr.msra.gmra.mxu0 %v2011_v42 }
 0x125   : > { %v603_v21 = vadd.f32 %v602_v13, %v4006_v50  ;;  %3093 = vmatprep.mubr.msk.bf16.mxu1 %vm3290_vm0, %v3289_v1  ;;  %3149 = vmatprep.mubr.msk.bf16.mxu0 %vm3290_vm0, %v3289_v1  ;;  %v1770_v50 = vrot.slane %v3385_v22, 3  ;;  %v2014_v22 = vrot.slane %v3379_v19, 3  ;;  %v1774_v13 = vrot.slane %v3399_v27, 3 }
 0x126   : > { %v2791_v12 = vpop.f32.mrf.mxu1  ;;  %v2847_v39 = vpop.f32.mrf.mxu0 }
 0x127   : > { %v4090_v11 = vadd.f32 %v811_v24, %v603_v21  ;;  %v1771_v32 = vor.u32 %v1770_v50, %v1769_v25  ;;  %v1777_v25 = vrot.slane %v3478_v4, 2  ;;  %v1778_v50 = vrot.slane %v3434_v46, 3 }
 0x128   : > { %v605_v2 = vpop.f32.mrf.mxu1  ;;  %v822_v35 = vpop.f32.mrf.mxu0  ;;  %v2018_v46 = vrot.slane %v3455_v58, 3 }
 0x129   : > { %v606_v9 = vadd.f32 %v605_v2, %v4019_v56  ;;  %v1772_v14 = vsel %vm1761_vm6, %v1767_v43, %v1771_v32 }
 0x12a   : > { %v2792_v23 = vpop.f32.mrf.mxu1  ;;  %v2848_v42 = vpop.f32.mrf.mxu0 }
 0x12b   : > { %v4097_v15 = vadd.f32 %v814_v30, %v606_v9 }
 0x12c   : > { %v610_v63 = vpop.f32.mrf.mxu1  ;;  %3094 = vmatmul.mubr.bf16.vlgmr.msra.gmra.mxu1 %v1768_v44  ;;  %v827_v24 = vpop.f32.mrf.mxu0  ;;  %3150 = vmatmul.mubr.bf16.gmra.mxu0 %v2013_v53  ;;  %v2017_v44 = vsel %vm2008_vm5, %v2014_v22, %v2016_v45 }
 0x12d   : > { %v611_v36 = vadd.f32 %v610_v63, %v4024_v3  ;;  %3097 = vmatprep.mubr.msk.bf16.mxu1 %vm3290_vm0, %v3289_v1  ;;  %3153 = vmatprep.mubr.msk.bf16.mxu0 %vm3290_vm0, %v3289_v1  ;;  %v2015_v3 = vsel %vm2008_vm5, %v2012_v51, %v2014_v22 }
 0x12e   : > { %v2795_v26 = vpop.f32.mrf.mxu1  ;;  %v2851_v56 = vpop.f32.mrf.mxu0 }
 0x12f   : > { %v4105_v31 = vadd.f32 %v819_v20, %v611_v36 }
 0x130   : > { %v613_v30 = vpop.f32.mrf.mxu1  ;;  %v830_v60 = vpop.f32.mrf.mxu0 }
 0x131   : > { %v614_v54 = vadd.f32 %v613_v30, %v4034_v33  ;;  %v1775_v33 = vor.u32 %v1774_v13, %v1773_v0 }
 0x132   : > { %v2796_v21 = vpop.f32.mrf.mxu1  ;;  %v2852_v10 = vpop.f32.mrf.mxu0 }
 0x133   : > { %v4112_v12 = vadd.f32 %v822_v35, %v614_v54  ;;  %v1776_v9 = vsel %vm1761_vm6, %v1771_v32, %v1775_v33 }
 0x134   : > { %v618_v19 = vpop.f32.mrf.mxu1  ;;  %3098 = vmatmul.mubr.bf16.gmra.mxu1 %v1772_v14  ;;  %v835_v20 = vpop.f32.mrf.mxu0  ;;  %3154 = vmatmul.mubr.bf16.gmra.mxu0 %v2015_v3  ;;  %v1781_v14 = vrot.slane %v3530_v34, 2  ;;  %v2020_v34 = vrot.slane %v3483_v6, 3 }
 0x135   : > { %v619_v39 = vadd.f32 %v618_v19, %v3944_v61  ;;  %3101 = vmatprep.mubr.msk.bf16.mxu1 %vm3290_vm0, %v3289_v1  ;;  %3157 = vmatprep.mubr.msk.bf16.mxu0 %vm3290_vm0, %v3289_v1 }
 0x136   : > { %v2799_v27 = vpop.f32.mrf.mxu1  ;;  %v2855_v43 = vpop.f32.mrf.mxu0 }
 0x137   : > { %v4120_v51 = vadd.f32 %v827_v24, %v619_v39  ;;  %v1779_v24 = vor.u32 %v1778_v50, %v1777_v25  ;;  %v2021_v43 = vsel %vm2008_vm5, %v2018_v46, %v2020_v34 }
 0x138   : > { %v621_v2 = vpop.f32.mrf.mxu1  ;;  %v838_v35 = vpop.f32.mrf.mxu0 }
 0x139   : > { %v622_v61 = vadd.f32 %v621_v2, %v3961_v8  ;;  %v1780_v26 = vsel %vm1761_vm6, %v1775_v33, %v1779_v24  ;;  %v1785_v33 = vrot.slane %v3565_v52, 2 }
 0x13a   : > { %v2800_v53 = vpop.f32.mrf.mxu1  ;;  %v2856_v23 = vpop.f32.mrf.mxu0 }
 0x13b   : > { %v4127_v42 = vadd.f32 %v830_v60, %v622_v61  ;;  %v1782_v60 = vrot.slane %v3481_v5, 3 }
 0x13c   : > { %v626_v37 = vpop.f32.mrf.mxu1  ;;  %3102 = vmatmul.mubr.bf16.gmra.mxu1 %v1776_v9  ;;  %v843_v63 = vpop.f32.mrf.mxu0  ;;  %3158 = vmatmul.mubr.bf16.gmra.mxu0 %v2017_v44 }
 0x13d   : > { %v627_v36 = vadd.f32 %v626_v37, %v3974_v16  ;;  %3105 = vmatprep.mubr.msk.bf16.mxu1 %vm3290_vm0, %v3289_v1  ;;  %3161 = vmatprep.mubr.msk.bf16.mxu0 %vm3290_vm0, %v3289_v1  ;;  %v2019_v16 = vsel %vm2008_vm5, %v2016_v45, %v2018_v46  ;;  %v1786_v45 = vrot.slane %v3535_v38, 3  ;;  %v2022_v38 = vrot.slane %v3596_v7, 3 }
 0x13e   : > { %v2803_v4 = vpop.f32.mrf.mxu1  ;;  %v2859_v8 = vpop.f32.mrf.mxu0  ;;  %v4410_v46 = vshll.u32 %v3596_v7, 16 }
 0x13f   : > { %v4135_v32 = vadd.f32 %v835_v20, %v627_v36  ;;  %v1787_v61 = vor.u32 %v1786_v45, %v1785_v33 }
 0x140   : > { %v629_v22 = vpop.f32.mrf.mxu1  ;;  %v846_v56 = vpop.f32.mrf.mxu0  ;;  %v1790_v4 = vrot.slane %v4410_v46, 3 }
 0x141   : > { %v630_v30 = vadd.f32 %v629_v22, %v3991_v41  ;;  %v1783_v41 = vor.u32 %v1782_v60, %v1781_v14 }
 0x142   : > { %v2804_v54 = vpop.f32.mrf.mxu1  ;;  %v2860_v3 = vpop.f32.mrf.mxu0 }
 0x143   : > { %v4142_v0 = vadd.f32 %v838_v35, %v630_v30  ;;  %v1784_v27 = vsel %vm1761_vm6, %v1779_v24, %v1783_v41  ;;  %v1788_v23 = vsel %vm1761_vm6, %v1783_v41, %v1787_v61  ;;  %v4409_v24 = vshrl.u32 %v3596_v7, 16 }
 0x144   : > { %v634_v58 = vpop.f32.mrf.mxu1  ;;  %3106 = vmatmul.mubr.bf16.gmra.mxu1 %v1780_v26  ;;  %v851_v13 = vpop.f32.mrf.mxu0  ;;  %3162 = vmatmul.mubr.bf16.gmra.mxu0 %v2019_v16  ;;  %v1794_v16 = vshrl.u32 %v4038_v57, 16  ;;  %v2024_v7 = vrot.slane %v4038_v57, 3 }
 0x145   : > { %v635_v21 = vadd.f32 %v634_v58, %v4004_v48  ;;  %3109 = vmatprep.mubr.msk.bf16.mxu1 %vm3290_vm0, %v3289_v1  ;;  %3165 = vmatprep.mubr.msk.bf16.mxu0 %vm3290_vm0, %v3289_v1  ;;  %v1789_v36 = vrot.slane %v4409_v24, 2 }
 0x146   : > { %v2807_v5 = vpop.f32.mrf.mxu1  ;;  %v2863_v10 = vpop.f32.mrf.mxu0  ;;  %v1796_v41 = vrot.slane %v1794_v16, 2 }
 0x147   : > { %v4150_v19 = vadd.f32 %v843_v63, %v635_v21  ;;  %v1791_v60 = vor.u32 %v1790_v4, %v1789_v36  ;;  %v2025_v10 = vsel %vm2008_vm5, %v2022_v38, %v2024_v7 }
 0x148   : > { %v637_v20 = vpop.f32.mrf.mxu1  ;;  %v854_v39 = vpop.f32.mrf.mxu0 }
 0x149   : > { %v638_v48 = vadd.f32 %v637_v20, %v4017_v40 }
 0x14a   : > { %v2808_v2 = vpop.f32.mrf.mxu1  ;;  %v2864_v35 = vpop.f32.mrf.mxu0 }
 0x14b   : > { %v4157_v25 = vadd.f32 %v846_v56, %v638_v48  ;;  %v1806_v2 = vshll.u32 %v4051_v55, 16 }
 0x14c   : > { %v642_v6 = vpop.f32.mrf.mxu1  ;;  %3110 = vmatmul.mubr.bf16.gmra.mxu1 %v1784_v27  ;;  %v859_v50 = vpop.f32.mrf.mxu0  ;;  %3166 = vmatmul.mubr.bf16.gmra.mxu0 %v2021_v43  ;;  %v1803_v43 = vshrl.u32 %v4051_v55, 16 }
 0x14d   : > { %v643_v9 = vadd.f32 %v642_v6, %v4022_v49  ;;  %3113 = vmatprep.mubr.msk.bf16.mxu1 %vm3290_vm0, %v3289_v1  ;;  %3169 = vmatprep.mubr.msk.bf16.mxu0 %vm3290_vm0, %v3289_v1  ;;  %v2023_v49 = vsel %vm2008_vm5, %v2020_v34, %v2022_v38 }
 0x14e   : > { %v2811_v52 = vpop.f32.mrf.mxu1  ;;  %v2867_v40 = vpop.f32.mrf.mxu0 }
 0x14f   : > { %v4165_v44 = vadd.f32 %v851_v13, %v643_v9  ;;  %v1805_v40 = vrot.slane %v1803_v43, 2 }
 0x150   : > { %v645_v53 = vpop.f32.mrf.mxu1  ;;  %v862_v37 = vpop.f32.mrf.mxu0 }
 0x151   : > { %v646_v63 = vadd.f32 %v645_v53, %v4032_v18  ;;  %v1797_v18 = vshll.u32 %v4038_v57, 16  ;;  %v1808_v53 = vrot.slane %v1806_v2, 3 }
 0x152   : > { %v2812_v8 = vpop.f32.mrf.mxu1  ;;  %v2868_v22 = vpop.f32.mrf.mxu0 }
 0x153   : > { %v4174_v26 = vadd.f32 %v854_v39, %v646_v63  ;;  %v1799_v34 = vrot.slane %v1797_v18, 3  ;;  %v1809_v36 = vor.u32 %v1808_v53, %v1805_v40 }
 0x154   : > { %v650_v56 = vpop.f32.mrf.mxu1  ;;  %3114 = vmatmul.mubr.bf16.gmra.mxu1 %v1788_v23  ;;  %v1240_v30 = vpop.f32.mrf.mxu0  ;;  %3170 = vmatmul.mubr.bf16.gmra.mxu0 %v2023_v49 }
 0x155   : > { %v651_v14 = vadd.f32 %v650_v56, %v4040_v59  ;;  %3117 = vmatprep.mubr.msk.bf16.mxu1 %vm3290_vm0, %v3289_v1  ;;  %3173 = vmatprep.mubr.msk.bf16.mxu0 %vm3290_vm0, %v3289_v1  ;;  %v1792_v59 = vsel %vm1761_vm6, %v1787_v61, %v1791_v60  ;;  %v1800_v48 = vor.u32 %v1799_v34, %v1796_v41 }
 0x156   : > { %v2815_v54 = vpop.f32.mrf.mxu1  ;;  %v2939_v3 = vpop.f32.mrf.mxu0 }
 0x157   : > { %v4184_v58 = vadd.f32 %v859_v50, %v651_v14  ;;  %v1801_v9 = vsel %vm1761_vm6, %v1791_v60, %v1800_v48 }
 0x158   : > { %v653_v13 = vpop.f32.mrf.mxu1  ;;  %v1243_v21 = vpop.f32.mrf.mxu0 }
 0x159   : > { %v654_v5 = vadd.f32 %v653_v13, %v4048_v28  ;;  %v2026_v28 = vrot.slane %v4051_v55, 3 }
 0x15a   : > { %v2816_v20 = vpop.f32.mrf.mxu1  ;;  %v2940_v39 = vpop.f32.mrf.mxu0 }
 0x15b   : > { %v4189_v33 = vadd.f32 %v862_v37, %v654_v5  ;;  %v2027_v52 = vsel %vm2008_vm5, %v2024_v7, %v2026_v28 }
 0x15c   : > { %v993_v45 = vpop.f32.mrf.mxu1  ;;  %3118 = vmatmul.mubr.bf16.gmra.mxu1 %v1792_v59  ;;  %v1248_v57 = vpop.f32.mrf.mxu0  ;;  %3174 = vmatmul.mubr.bf16.gmra.mxu0 %v2025_v10 }
 0x15d   : > { %v1064_v27 = vadd.f32 %v993_v45, %v4059_v47  ;;  %3121 = vmatprep.mubr.msk.bf16.mxu1 %vm3290_vm0, %v3289_v1  ;;  %3177 = vmatprep.mubr.msk.bf16.mxu0 %vm3290_vm0, %v3289_v1 }
 0x15e   : > { %v2887_v35 = vpop.f32.mrf.mxu1  ;;  %v2943_v6 = vpop.f32.mrf.mxu0 }
 0x15f   : > { %v4199_v50 = vadd.f32 %v1240_v30, %v1064_v27  ;;  %v1810_v30 = vsel %vm1761_vm6, %v1800_v48, %v1809_v36 }
 0x160   : > { %v996_v61 = vpop.f32.mrf.mxu1  ;;  %v1251_v47 = vpop.f32.mrf.mxu0 }
 0x161   : > { %v1065_v38 = vadd.f32 %v996_v61, %v4063_v62 }
 0x162   : > { %v2888_v23 = vpop.f32.mrf.mxu1  ;;  %v2944_v37 = vpop.f32.mrf.mxu0 }
 0x163   : > { %v4204_v63 = vadd.f32 %v1243_v21, %v1065_v38 }
 0x164   : > { %v1001_v49 = vpop.f32.mrf.mxu1  ;;  %3122 = vmatmul.mubr.bf16.gmra.mxu1 %v1801_v9  ;;  %v1256_v55 = vpop.f32.mrf.mxu0  ;;  %3178 = vmatmul.mubr.bf16.gmra.mxu0 %v2027_v52 }
 0x165   : > { %v1066_v24 = vadd.f32 %v1001_v49, %v4073_v17  ;;  %3125 = vmatprep.mubr.msk.bf16.mxu1 %vm3290_vm0, %v3289_v1 }
 0x166   : > { %v2891_v46 = vpop.f32.mrf.mxu1  ;;  %v2947_v62 = vpop.f32.mrf.mxu0 }
 0x167   : > { %v4209_v4 = vadd.f32 %v1248_v57, %v1066_v24 }
 0x168   : > { %v1004_v8 = vpop.f32.mrf.mxu1  ;;  %v1259_v22 = vpop.f32.mrf.mxu0 }
 0x169   : > { %v1067_v56 = vadd.f32 %v1004_v8, %v4082_v29 }
 0x16a   : > { %v2892_v16 = vpop.f32.mrf.mxu1  ;;  %v2948_v18 = vpop.f32.mrf.mxu0 }
 0x16b   : > { %v4213_v14 = vadd.f32 %v1251_v47, %v1067_v56 }
 0x16c   : > { %v1009_v60 = vpop.f32.mrf.mxu1  ;;  %3126 = vmatmul.mubr.bf16.gmra.mxu1 %v1810_v30  ;;  %v1264_v17 = vpop.f32.mrf.mxu0 }
 0x16d   : > { %v1068_v1 = vadd.f32 %v1009_v60, %v4090_v11 }
 0x16e   : > { %v2895_v7 = vpop.f32.mrf.mxu1  ;;  %v2951_v54 = vpop.f32.mrf.mxu0 }
 0x16f   : > { %v4216_v3 = vadd.f32 %v1256_v55, %v1068_v1 }
 0x170   : > { %v1012_v13 = vpop.f32.mrf.mxu1  ;;  %v1267_v21 = vpop.f32.mrf.mxu0 }
 0x171   : > { %v1069_v41 = vadd.f32 %v1012_v13, %v4097_v15 }
 0x172   : > { %v2896_v29 = vpop.f32.mrf.mxu1  ;;  %v2952_v34 = vpop.f32.mrf.mxu0 }
 0x173   : > { %v4219_v5 = vadd.f32 %v1259_v22, %v1069_v41 }
 0x174   : > { %v1017_v59 = vpop.f32.mrf.mxu1  ;;  %v1272_v10 = vpop.f32.mrf.mxu0 }
 0x175   : > { %v1070_v20 = vadd.f32 %v1017_v59, %v4105_v31 }
 0x176   : > { %v2899_v39 = vpop.f32.mrf.mxu1  ;;  %v2955_v45 = vpop.f32.mrf.mxu0 }
 0x177   : > { %v4222_v57 = vadd.f32 %v1264_v17, %v1070_v20 }
 0x178   : > { %v1020_v11 = vpop.f32.mrf.mxu1  ;;  %v1275_v48 = vpop.f32.mrf.mxu0 }
 0x179   : > { %v1071_v27 = vadd.f32 %v1020_v11, %v4112_v12 }
 0x17a   : > { %v2900_v28 = vpop.f32.mrf.mxu1  ;;  %v2956_v43 = vpop.f32.mrf.mxu0 }
 0x17b   : > { %v4225_v2 = vadd.f32 %v1267_v21, %v1071_v27 }
 0x17c   : > { %v1025_v15 = vpop.f32.mrf.mxu1  ;;  %v1280_v35 = vpop.f32.mrf.mxu0 }
 0x17d   : > { %v1072_v6 = vadd.f32 %v1025_v15, %v4120_v51 }
 0x17e   : > { %v2903_v61 = vpop.f32.mrf.mxu1  ;;  %v2959_v9 = vpop.f32.mrf.mxu0 }
 0x17f   : > { %v4228_v47 = vadd.f32 %v1272_v10, %v1072_v6 }
 0x180   : > { %v1028_v31 = vpop.f32.mrf.mxu1  ;;  %v1283_v38 = vpop.f32.mrf.mxu0 }
 0x181   : > { %v1073_v52 = vadd.f32 %v1028_v31, %v4127_v42 }
 0x182   : > { %v2904_v40 = vpop.f32.mrf.mxu1  ;;  %v2960_v53 = vpop.f32.mrf.mxu0 }
 0x183   : > { %v4231_v23 = vadd.f32 %v1275_v48, %v1073_v52 }
 0x184   : > { %v1033_v12 = vpop.f32.mrf.mxu1  ;;  %v1288_v37 = vpop.f32.mrf.mxu0 }
 0x185   : > { %v1074_v49 = vadd.f32 %v1033_v12, %v4135_v32 }
 0x186   : > { %v2907_v55 = vpop.f32.mrf.mxu1  ;;  %v2963_v24 = vpop.f32.mrf.mxu0 }
 0x187   : > { %v4234_v36 = vadd.f32 %v1280_v35, %v1074_v49 }
 0x188   : > { %v1036_v51 = vpop.f32.mrf.mxu1  ;;  %v1291_v46 = vpop.f32.mrf.mxu0 }
 0x189   : > { %v1075_v62 = vadd.f32 %v1036_v51, %v4142_v0 }
 0x18a   : > { %v2908_v8 = vpop.f32.mrf.mxu1  ;;  %v2964_v22 = vpop.f32.mrf.mxu0 }
 0x18b   : > { %v4237_v56 = vadd.f32 %v1283_v38, %v1075_v62 }
 0x18c   : > { %v1041_v42 = vpop.f32.mrf.mxu1  ;;  %v1296_v30 = vpop.f32.mrf.mxu0 }
 0x18d   : > { %v1076_v16 = vadd.f32 %v1041_v42, %v4150_v19 }
 0x18e   : > { %v2911_v18 = vpop.f32.mrf.mxu1  ;;  %v2967_v60 = vpop.f32.mrf.mxu0 }
 0x18f   : > { %v4240_v17 = vadd.f32 %v1288_v37, %v1076_v16 }
 0x190   : > { %v1044_v32 = vpop.f32.mrf.mxu1  ;;  %v1299_v1 = vpop.f32.mrf.mxu0 }
 0x191   : > { %v1077_v7 = vadd.f32 %v1044_v32, %v4157_v25 }
 0x192   : > { %v2912_v54 = vpop.f32.mrf.mxu1  ;;  %v2968_v13 = vpop.f32.mrf.mxu0 }
 0x193   : > { %v4243_v21 = vadd.f32 %v1291_v46, %v1077_v7 }
 0x194   : > { %v1049_v0 = vpop.f32.mrf.mxu1  ;;  %v1304_v41 = vpop.f32.mrf.mxu0 }
 0x195   : > { %v1078_v29 = vadd.f32 %v1049_v0, %v4165_v44 }
 0x196   : > { %v2915_v34 = vpop.f32.mrf.mxu1  ;;  %v2971_v59 = vpop.f32.mrf.mxu0 }
 0x197   : > { %v4246_v10 = vadd.f32 %v1296_v30, %v1078_v29 }
 0x198   : > { %v1052_v19 = vpop.f32.mrf.mxu1  ;;  %v1307_v20 = vpop.f32.mrf.mxu0 }
 0x199   : > { %v1079_v39 = vadd.f32 %v1052_v19, %v4174_v26 }
 0x19a   : > { %v2916_v45 = vpop.f32.mrf.mxu1  ;;  %v2972_v11 = vpop.f32.mrf.mxu0 }
 0x19b   : > { %v4249_v48 = vadd.f32 %v1299_v1, %v1079_v39 }
 0x19c   : > { %v1057_v25 = vpop.f32.mrf.mxu1  ;;  %v1655_v27 = vpop.f32.mrf.mxu0 }
 0x19d   : > { %v1080_v28 = vadd.f32 %v1057_v25, %v4184_v58 }
 0x19e   : > { %v2919_v43 = vpop.f32.mrf.mxu1  ;;  %v3043_v15 = vpop.f32.mrf.mxu0 }
 0x19f   : > { %v4252_v35 = vadd.f32 %v1304_v41, %v1080_v28 }
 0x1a0   : > { %v1060_v44 = vpop.f32.mrf.mxu1  ;;  %v1658_v6 = vpop.f32.mrf.mxu0 }
 0x1a1   : > { %v1081_v61 = vadd.f32 %v1060_v44, %v4189_v33 }
 0x1a2   : > { %v2920_v9 = vpop.f32.mrf.mxu1  ;;  %v3044_v31 = vpop.f32.mrf.mxu0 }
 0x1a3   : > { %v4255_v38 = vadd.f32 %v1307_v20, %v1081_v61 }
 0x1a4   : > { %v1457_v26 = vpop.f32.mrf.mxu1  ;;  %v1663_v52 = vpop.f32.mrf.mxu0 }
 0x1a5   : > { %v1528_v40 = vadd.f32 %v1457_v26, %v4199_v50 }
 0x1a6   : > { %v2991_v53 = vpop.f32.mrf.mxu1  ;;  %v3047_v12 = vpop.f32.mrf.mxu0 }
 0x1a7   : > { %v4258_v37 = vadd.f32 %v1655_v27, %v1528_v40 }
 0x1a8   : > { %v1460_v58 = vpop.f32.mrf.mxu1  ;;  %v1666_v49 = vpop.f32.mrf.mxu0 }
 0x1a9   : > { %v1529_v55 = vadd.f32 %v1460_v58, %v4204_v63 }
 0x1aa   : > { %v2992_v24 = vpop.f32.mrf.mxu1  ;;  %v3048_v51 = vpop.f32.mrf.mxu0 }
 0x1ab   : > { %v4261_v46 = vadd.f32 %v1658_v6, %v1529_v55 }
 0x1ac   : > { %v1465_v33 = vpop.f32.mrf.mxu1  ;;  %v1671_v62 = vpop.f32.mrf.mxu0 }
 0x1ad   : > { %v1530_v8 = vadd.f32 %v1465_v33, %v4209_v4 }
 0x1ae   : > { %v2995_v22 = vpop.f32.mrf.mxu1  ;;  %v3051_v42 = vpop.f32.mrf.mxu0 }
 0x1af   : > { %v4264_v30 = vadd.f32 %v1663_v52, %v1530_v8 }
 0x1b0   : > { %v1468_v50 = vpop.f32.mrf.mxu1  ;;  %v1674_v16 = vpop.f32.mrf.mxu0 }
 0x1b1   : > { %v1531_v18 = vadd.f32 %v1468_v50, %v4213_v14 }
 0x1b2   : > { %v2996_v60 = vpop.f32.mrf.mxu1  ;;  %v3052_v32 = vpop.f32.mrf.mxu0 }
 0x1b3   : > { %v4267_v1 = vadd.f32 %v1666_v49, %v1531_v18 }
 0x1b4   : > { %v1473_v63 = vpop.f32.mrf.mxu1  ;;  %v1679_v7 = vpop.f32.mrf.mxu0 }
 0x1b5   : > { %v1532_v54 = vadd.f32 %v1473_v63, %v4216_v3 }
 0x1b6   : > { %v2999_v13 = vpop.f32.mrf.mxu1  ;;  %v3055_v0 = vpop.f32.mrf.mxu0 }
 0x1b7   : > { %v4270_v41 = vadd.f32 %v1671_v62, %v1532_v54 }
 0x1b8   : > { %v1476_v4 = vpop.f32.mrf.mxu1  ;;  %v1682_v29 = vpop.f32.mrf.mxu0 }
 0x1b9   : > { %v1533_v34 = vadd.f32 %v1476_v4, %v4219_v5 }
 0x1ba   : > { %v3000_v59 = vpop.f32.mrf.mxu1  ;;  %v3056_v19 = vpop.f32.mrf.mxu0 }
 0x1bb   : > { %v4273_v20 = vadd.f32 %v1674_v16, %v1533_v34 }
 0x1bc   : > { %v1481_v14 = vpop.f32.mrf.mxu1  ;;  %v1687_v39 = vpop.f32.mrf.mxu0 }
 0x1bd   : > { %v1534_v45 = vadd.f32 %v1481_v14, %v4222_v57 }
 0x1be   : > { %v3003_v11 = vpop.f32.mrf.mxu1  ;;  %v3059_v25 = vpop.f32.mrf.mxu0 }
 0x1bf   : > { %v4276_v27 = vadd.f32 %v1679_v7, %v1534_v45 }
 0x1c0   : > { %v1484_v3 = vpop.f32.mrf.mxu1  ;;  %v1690_v28 = vpop.f32.mrf.mxu0 }
 0x1c1   : > { %v1535_v43 = vadd.f32 %v1484_v3, %v4225_v2 }
 0x1c2   : > { %v3004_v15 = vpop.f32.mrf.mxu1  ;;  %v3060_v44 = vpop.f32.mrf.mxu0 }
 0x1c3   : > { %v4279_v6 = vadd.f32 %v1682_v29, %v1535_v43 }
 0x1c4   : > { %v1489_v5 = vpop.f32.mrf.mxu1  ;;  %v1695_v61 = vpop.f32.mrf.mxu0 }
 0x1c5   : > { %v1536_v9 = vadd.f32 %v1489_v5, %v4228_v47 }
 0x1c6   : > { %v3007_v31 = vpop.f32.mrf.mxu1  ;;  %v3063_v26 = vpop.f32.mrf.mxu0 }
 0x1c7   : > { %v4282_v52 = vadd.f32 %v1687_v39, %v1536_v9 }
 0x1c8   : > { %v1492_v57 = vpop.f32.mrf.mxu1  ;;  %v1698_v40 = vpop.f32.mrf.mxu0 }
 0x1c9   : > { %v1537_v53 = vadd.f32 %v1492_v57, %v4231_v23 }
 0x1ca   : > { %v3008_v12 = vpop.f32.mrf.mxu1  ;;  %v3064_v58 = vpop.f32.mrf.mxu0 }
 0x1cb   : > { %v4285_v49 = vadd.f32 %v1690_v28, %v1537_v53 }
 0x1cc   : > { %v1497_v2 = vpop.f32.mrf.mxu1  ;;  %v1703_v55 = vpop.f32.mrf.mxu0 }
 0x1cd   : > { %v1538_v24 = vadd.f32 %v1497_v2, %v4234_v36 }
 0x1ce   : > { %v3011_v51 = vpop.f32.mrf.mxu1  ;;  %v3067_v33 = vpop.f32.mrf.mxu0 }
 0x1cf   : > { %v4288_v62 = vadd.f32 %v1695_v61, %v1538_v24 }
 0x1d0   : > { %v1500_v47 = vpop.f32.mrf.mxu1  ;;  %v1706_v8 = vpop.f32.mrf.mxu0 }
 0x1d1   : > { %v1539_v22 = vadd.f32 %v1500_v47, %v4237_v56 }
 0x1d2   : > { %v3012_v42 = vpop.f32.mrf.mxu1  ;;  %v3068_v50 = vpop.f32.mrf.mxu0 }
 0x1d3   : > { %v4291_v16 = vadd.f32 %v1698_v40, %v1539_v22 }
 0x1d4   : > { %v1505_v23 = vpop.f32.mrf.mxu1  ;;  %v1711_v18 = vpop.f32.mrf.mxu0 }
 0x1d5   : > { %v1540_v60 = vadd.f32 %v1505_v23, %v4240_v17 }
 0x1d6   : > { %v3015_v32 = vpop.f32.mrf.mxu1  ;;  %v3071_v63 = vpop.f32.mrf.mxu0 }
 0x1d7   : > { %v4294_v7 = vadd.f32 %v1703_v55, %v1540_v60 }
 0x1d8   : > { %v1508_v36 = vpop.f32.mrf.mxu1  ;;  %v1714_v54 = vpop.f32.mrf.mxu0 }
 0x1d9   : > { %v1541_v13 = vadd.f32 %v1508_v36, %v4243_v21 }
 0x1da   : > { %v3016_v0 = vpop.f32.mrf.mxu1  ;;  %v3072_v4 = vpop.f32.mrf.mxu0 }
 0x1db   : > { %v4297_v29 = vadd.f32 %v1706_v8, %v1541_v13 }
 0x1dc   : > { %v1513_v56 = vpop.f32.mrf.mxu1  ;;  %v1719_v34 = vpop.f32.mrf.mxu0 }
 0x1dd   : > { %v1542_v59 = vadd.f32 %v1513_v56, %v4246_v10 }
 0x1de   : > { %v3019_v19 = vpop.f32.mrf.mxu1  ;;  %v3075_v14 = vpop.f32.mrf.mxu0 }
 0x1df   : > { %v4300_v39 = vadd.f32 %v1711_v18, %v1542_v59 }
 0x1e0   : > { %v1516_v17 = vpop.f32.mrf.mxu1  ;;  %v1722_v45 = vpop.f32.mrf.mxu0 }
 0x1e1   : > { %v1543_v11 = vadd.f32 %v1516_v17, %v4249_v48 }
 0x1e2   : > { %v3020_v25 = vpop.f32.mrf.mxu1  ;;  %v3076_v3 = vpop.f32.mrf.mxu0 }
 0x1e3   : > { %v4303_v28 = vadd.f32 %v1714_v54, %v1543_v11 }
 0x1e4   : > { %v1521_v21 = vpop.f32.mrf.mxu1  ;;  %v2119_v43 = vpop.f32.mrf.mxu0 }
 0x1e5   : > { %v1544_v15 = vadd.f32 %v1521_v21, %v4252_v35  ;;  %v4315_v35 = vld [vmem:[%s4404_s2] ss:$0 sm:$0xff] }
 0x1e6   : > { %v3023_v44 = vpop.f32.mrf.mxu1  ;;  %v3147_v5 = vpop.f32.mrf.mxu0 }
 0x1e7   : > { %v4306_v10 = vadd.f32 %v1719_v34, %v1544_v15 }
 0x1e8   : > { %v1524_v61 = vpop.f32.mrf.mxu1  ;;  %v2122_v9 = vpop.f32.mrf.mxu0 }
 0x1e9   : > { %v1545_v31 = vadd.f32 %v1524_v61, %v4255_v38  ;;  %v4321_v38 = vld [vmem:[%s4405_s3] ss:$0 sm:$0xff] }
 0x1ea   : > { %v3024_v26 = vpop.f32.mrf.mxu1  ;;  %v3148_v57 = vpop.f32.mrf.mxu0 }
 0x1eb   : > { %v4309_v48 = vadd.f32 %v1722_v45, %v1545_v31 }
 0x1ec   : > { %v1902_v40 = vpop.f32.mrf.mxu1  ;;  %v2127_v53 = vpop.f32.mrf.mxu0 }
 0x1ed   : > { %v1973_v12 = vadd.f32 %v1902_v40, %v4258_v37 }
 0x1ee   : > { %v3095_v58 = vpop.f32.mrf.mxu1  ;;  %v3151_v2 = vpop.f32.mrf.mxu0 }
 0x1ef   : > { %v2190_v55 = vadd.f32 %v2119_v43, %v1973_v12 }
 0x1f0   : > { %v1905_v24 = vpop.f32.mrf.mxu1  ;;  %v2130_v51 = vpop.f32.mrf.mxu0 }
 0x1f1   : > { %v2215_v33 = vmul.f32 %v4315_v35, %v2190_v55  ;;  %v1974_v37 = vadd.f32 %v1905_v24, %v4261_v46 }
 0x1f2   : > { %v3096_v47 = vpop.f32.mrf.mxu1  ;;  %v3152_v8 = vpop.f32.mrf.mxu0 }
 0x1f3   : > { %v2240_v22 = vadd.f32 %v4321_v38, %v2215_v33  ;;  %v2191_v42 = vadd.f32 %v2122_v9, %v1974_v37 }
 0x1f4   : > { %v1910_v50 = vpop.f32.mrf.mxu1  ;;  %v2135_v23 = vpop.f32.mrf.mxu0 }
 0x1f5   : > { %v2258_v18 = vmax.f32 %v2240_v22, 0.0  ;;  %v2216_v60 = vmul.f32 %v4315_v35, %v2191_v42  ;;  %v1975_v32 = vadd.f32 %v1910_v50, %v4264_v30 }
 0x1f6   : > { %v3099_v46 = vpop.f32.mrf.mxu1  ;;  %v3155_v63 = vpop.f32.mrf.mxu0 }
 0x1f7   : > { %2276 = vst [vmem:[%s4329_s16] sm:$0xff] %v2258_v18  ;;  %v2241_v36 = vadd.f32 %v4321_v38, %v2216_v60  ;;  %v2192_v54 = vadd.f32 %v2127_v53, %v1975_v32 }
 0x1f8   : > { %v1913_v13 = vpop.f32.mrf.mxu1  ;;  %v2138_v0 = vpop.f32.mrf.mxu0 }
 0x1f9   : > { %v2259_v4 = vmax.f32 %v2241_v36, 0.0  ;;  %v2217_v56 = vmul.f32 %v4315_v35, %v2192_v54  ;;  %v1976_v34 = vadd.f32 %v1913_v13, %v4267_v1 }
 0x1fa   : > { %v3100_v59 = vpop.f32.mrf.mxu1  ;;  %v3156_v19 = vpop.f32.mrf.mxu0 }
 0x1fb   : > { %2277 = vst [vmem:[%s4329_s16 + $0x8] sm:$0xff] %v2259_v4  ;;  %v2242_v14 = vadd.f32 %v4321_v38, %v2217_v56  ;;  %v2193_v30 = vadd.f32 %v2130_v51, %v1976_v34 }
 0x1fc   : > { %v1918_v17 = vpop.f32.mrf.mxu1  ;;  %v2143_v45 = vpop.f32.mrf.mxu0 }
 0x1fd   : > { %v2260_v11 = vmax.f32 %v2242_v14, 0.0  ;;  %v2218_v25 = vmul.f32 %v4315_v35, %v2193_v30  ;;  %v1977_v3 = vadd.f32 %v1918_v17, %v4270_v41 }
 0x1fe   : > { %v3103_v21 = vpop.f32.mrf.mxu1  ;;  %v3159_v43 = vpop.f32.mrf.mxu0 }
 0x1ff   : > { %2278 = vst [vmem:[%s4329_s16 + $0x10] sm:$0xff] %v2260_v11  ;;  %v2243_v15 = vadd.f32 %v4321_v38, %v2218_v25  ;;  %v2194_v1 = vadd.f32 %v2135_v23, %v1977_v3 }
 0x200   : > { %v1921_v44 = vpop.f32.mrf.mxu1  ;;  %v2146_v5 = vpop.f32.mrf.mxu0 }
 0x201   : > { %v2261_v61 = vmax.f32 %v2243_v15, 0.0  ;;  %v2219_v9 = vmul.f32 %v4315_v35, %v2194_v1  ;;  %v1978_v31 = vadd.f32 %v1921_v44, %v4273_v20 }
 0x202   : > { %v3104_v26 = vpop.f32.mrf.mxu1  ;;  %v3160_v57 = vpop.f32.mrf.mxu0 }
 0x203   : > { %2279 = vst [vmem:[%s4329_s16 + $0x18] sm:$0xff] %v2261_v61  ;;  %v2244_v40 = vadd.f32 %v4321_v38, %v2219_v9  ;;  %v2195_v41 = vadd.f32 %v2138_v0, %v1978_v31 }
 0x204   : > { %v1926_v53 = vpop.f32.mrf.mxu1  ;;  %v2151_v12 = vpop.f32.mrf.mxu0 }
 0x205   : > { %v2262_v58 = vmax.f32 %v2244_v40, 0.0  ;;  %v2220_v2 = vmul.f32 %v4315_v35, %v2195_v41  ;;  %v1979_v55 = vadd.f32 %v1926_v53, %v4276_v27 }
 0x206   : > { %v3107_v24 = vpop.f32.mrf.mxu1  ;;  %v3163_v51 = vpop.f32.mrf.mxu0 }
 0x207   : > { %2280 = vst [vmem:[%s4329_s16 + $0x20] sm:$0xff] %v2262_v58  ;;  %v2245_v33 = vadd.f32 %v4321_v38, %v2220_v2  ;;  %v2196_v20 = vadd.f32 %v2143_v45, %v1979_v55 }
 0x208   : > { %v1929_v37 = vpop.f32.mrf.mxu1  ;;  %v2154_v47 = vpop.f32.mrf.mxu0 }
 0x209   : > { %v2263_v8 = vmax.f32 %v2245_v33, 0.0  ;;  %v2221_v22 = vmul.f32 %v4315_v35, %v2196_v20  ;;  %v1980_v42 = vadd.f32 %v1929_v37, %v4279_v6 }
 0x20a   : > { %v3108_v50 = vpop.f32.mrf.mxu1  ;;  %v3164_v23 = vpop.f32.mrf.mxu0 }
 0x20b   : > { %2281 = vst [vmem:[%s4329_s16 + $0x28] sm:$0xff] %v2263_v8  ;;  %v2246_v18 = vadd.f32 %v4321_v38, %v2221_v22  ;;  %v2197_v27 = vadd.f32 %v2146_v5, %v1980_v42 }
 0x20c   : > { %v1934_v60 = vpop.f32.mrf.mxu1  ;;  %v2159_v32 = vpop.f32.mrf.mxu0 }
 0x20d   : > { %v2264_v46 = vmax.f32 %v2246_v18, 0.0  ;;  %v2222_v63 = vmul.f32 %v4315_v35, %v2197_v27  ;;  %v1981_v36 = vadd.f32 %v1934_v60, %v4282_v52 }
 0x20e   : > { %v3111_v54 = vpop.f32.mrf.mxu1  ;;  %v3167_v13 = vpop.f32.mrf.mxu0 }
 0x20f   : > { %2282 = vst [vmem:[%s4329_s16 + $0x30] sm:$0xff] %v2264_v46  ;;  %v2247_v0 = vadd.f32 %v4321_v38, %v2222_v63  ;;  %v2198_v6 = vadd.f32 %v2151_v12, %v1981_v36 }
 0x210   : > { %v1937_v4 = vpop.f32.mrf.mxu1  ;;  %v2162_v56 = vpop.f32.mrf.mxu0 }
 0x211   : > { %v2265_v34 = vmax.f32 %v2247_v0, 0.0  ;;  %v2223_v59 = vmul.f32 %v4315_v35, %v2198_v6  ;;  %v1982_v19 = vadd.f32 %v1937_v4, %v4285_v49 }
 0x212   : > { %v3112_v14 = vpop.f32.mrf.mxu1  ;;  %v3168_v30 = vpop.f32.mrf.mxu0 }
 0x213   : > { %2283 = vst [vmem:[%s4329_s16 + $0x38] sm:$0xff] %v2265_v34  ;;  %v2248_v17 = vadd.f32 %v4321_v38, %v2223_v59  ;;  %v2199_v52 = vadd.f32 %v2154_v47, %v1982_v19 }
 0x214   : > { %v1942_v45 = vpop.f32.mrf.mxu1  ;;  %v2167_v11 = vpop.f32.mrf.mxu0 }
 0x215   : > { %v2266_v25 = vmax.f32 %v2248_v17, 0.0  ;;  %v2224_v3 = vmul.f32 %v4315_v35, %v2199_v52  ;;  %v1983_v21 = vadd.f32 %v1942_v45, %v4288_v62 }
 0x216   : > { %v3115_v43 = vpop.f32.mrf.mxu1  ;;  %v3171_v15 = vpop.f32.mrf.mxu0 }
 0x217   : > { %2284 = vst [vmem:[%s4329_s16 + $0x40] sm:$0xff] %v2266_v25  ;;  %v2249_v1 = vadd.f32 %v4321_v38, %v2224_v3  ;;  %v2200_v49 = vadd.f32 %v2159_v32, %v1983_v21 }
 0x218   : > { %v1945_v44 = vpop.f32.mrf.mxu1  ;;  %v2170_v5 = vpop.f32.mrf.mxu0 }
 0x219   : > { %v2267_v61 = vmax.f32 %v2249_v1, 0.0  ;;  %v2225_v9 = vmul.f32 %v4315_v35, %v2200_v49  ;;  %v1984_v31 = vadd.f32 %v1945_v44, %v4291_v16 }
 0x21a   : > { %v3116_v26 = vpop.f32.mrf.mxu1  ;;  %v3172_v57 = vpop.f32.mrf.mxu0 }
 0x21b   : > { %2285 = vst [vmem:[%s4329_s16 + $0x48] sm:$0xff] %v2267_v61  ;;  %v2250_v40 = vadd.f32 %v4321_v38, %v2225_v9  ;;  %v2201_v62 = vadd.f32 %v2162_v56, %v1984_v31 }
 0x21c   : > { %v1950_v41 = vpop.f32.mrf.mxu1  ;;  %v2175_v53 = vpop.f32.mrf.mxu0 }
 0x21d   : > { %v2268_v12 = vmax.f32 %v2250_v40, 0.0  ;;  %v2226_v58 = vmul.f32 %v4315_v35, %v2201_v62  ;;  %v1985_v2 = vadd.f32 %v1950_v41, %v4294_v7 }
 0x21e   : > { %v3119_v55 = vpop.f32.mrf.mxu1  ;;  %v3175_v24 = vpop.f32.mrf.mxu0 }
 0x21f   : > { %2286 = vst [vmem:[%s4329_s16 + $0x50] sm:$0xff] %v2268_v12  ;;  %v2251_v51 = vadd.f32 %v4321_v38, %v2226_v58  ;;  %v2202_v16 = vadd.f32 %v2167_v11, %v1985_v2 }
 0x220   : > { %v1953_v33 = vpop.f32.mrf.mxu1  ;;  %v2178_v20 = vpop.f32.mrf.mxu0 }
 0x221   : > { %v2269_v37 = vmax.f32 %v2251_v51, 0.0  ;;  %v2227_v47 = vmul.f32 %v4315_v35, %v2202_v16  ;;  %v1986_v8 = vadd.f32 %v1953_v33, %v4297_v29 }
 0x222   : > { %v3120_v22 = vpop.f32.mrf.mxu1  ;;  %v3176_v42 = vpop.f32.mrf.mxu0 }
 0x223   : > { %2287 = vst [vmem:[%s4329_s16 + $0x58] sm:$0xff] %v2269_v37  ;;  %v2252_v50 = vadd.f32 %v4321_v38, %v2227_v47  ;;  %v2203_v7 = vadd.f32 %v2170_v5, %v1986_v8 }
 0x224   : > { %v1958_v23 = vpop.f32.mrf.mxu1  ;;  %v2183_v18 = vpop.f32.mrf.mxu0 }
 0x225   : > { %v2270_v27 = vmax.f32 %v2252_v50, 0.0  ;;  %v2228_v60 = vmul.f32 %v4315_v35, %v2203_v7  ;;  %v1987_v32 = vadd.f32 %v1958_v23, %v4300_v39 }
 0x226   : > { %v3123_v46 = vpop.f32.mrf.mxu1  ;;  %v3179_v63 = vpop.f32.mrf.mxu0 }
 0x227   : > { %2288 = vst [vmem:[%s4329_s16 + $0x60] sm:$0xff] %v2270_v27  ;;  %v2253_v36 = vadd.f32 %v4321_v38, %v2228_v60  ;;  %v2204_v29 = vadd.f32 %v2175_v53, %v1987_v32 }
 0x228   : > { %v1961_v54 = vpop.f32.mrf.mxu1  ;;  %v2186_v13 = vpop.f32.mrf.mxu0 }
 0x229   : > { %v2271_v0 = vmax.f32 %v2253_v36, 0.0  ;;  %v2229_v6 = vmul.f32 %v4315_v35, %v2204_v29  ;;  %v1988_v4 = vadd.f32 %v1961_v54, %v4303_v28 }
 0x22a   : > { %v3124_v56 = vpop.f32.mrf.mxu1  ;;  %v3180_v34 = vpop.f32.mrf.mxu0 }
 0x22b   : > { %2289 = vst [vmem:[%s4329_s16 + $0x68] sm:$0xff] %v2271_v0  ;;  %v2254_v39 = vadd.f32 %v4321_v38, %v2229_v6  ;;  %v2205_v59 = vadd.f32 %v2178_v20, %v1988_v4 }
 0x22c   : > { %v1966_v19 = vpop.f32.mrf.mxu1 }
 0x22d   : > { %v2272_v14 = vmax.f32 %v2254_v39, 0.0  ;;  %v2230_v30 = vmul.f32 %v4315_v35, %v2205_v59  ;;  %v1989_v17 = vadd.f32 %v1966_v19, %v4306_v10 }
 0x22e   : > { %v3127_v52 = vpop.f32.mrf.mxu1 }
 0x22f   : > { %2290 = vst [vmem:[%s4329_s16 + $0x70] sm:$0xff] %v2272_v14  ;;  %v2255_v45 = vadd.f32 %v4321_v38, %v2230_v30  ;;  %v2206_v28 = vadd.f32 %v2183_v18, %v1989_v17 }
 0x230   : > { %v1969_v11 = vpop.f32.mrf.mxu1 }
 0x231   : > { %v2273_v25 = vmax.f32 %v2255_v45, 0.0  ;;  %v2231_v3 = vmul.f32 %v4315_v35, %v2206_v28  ;;  %v1990_v21 = vadd.f32 %v1969_v11, %v4309_v48 }
 0x232   : > { %v3128_v43 = vpop.f32.mrf.mxu1 }
 0x233   : > { %2291 = vst [vmem:[%s4329_s16 + $0x78] sm:$0xff] %v2273_v25  ;;  %v2256_v15 = vadd.f32 %v4321_v38, %v2231_v3  ;;  %v2207_v1 = vadd.f32 %v2186_v13, %v1990_v21 }
 0x235   : > { %v2274_v49 = vmax.f32 %v2256_v15, 0.0  ;;  %v2232_v10 = vmul.f32 %v4315_v35, %v2207_v1 }
 0x237   : > { %2292 = vst [vmem:[%s4329_s16 + $0x80] sm:$0xff] %v2274_v49  ;;  %v2257_v44 = vadd.f32 %v4321_v38, %v2232_v10 }
 0x239   : > { %v2275_v5 = vmax.f32 %v2257_v44, 0.0 }
 0x23b   : > { %2293 = vst [vmem:[%s4329_s16 + $0x88] sm:$0xff] %v2275_v5 }
 0x23c PF: > { %s14_s15 = sadd.s32 1, %s3287_s15  }
 0x23d   : > { %p11_p4 = scmp.ge.s32.totalorder %s14_s15, 4  }
 0x23f   :  { %13 = sbr.rel (!%p11_p4) target bundleno = 1 (0x1), region = 74 }

// kernel: cnn_lstm_forward.6
= control target key start
LH: loop header
LB: loop body
LE: loop exit
PB: predicated region body
PF: predicated region fallthrough
CT: control target
= control target key end

     0   :  { %s4499_s15 = smov 0   ;;  %s8544_s0 = inlined_call_operand.vmem [shape: f32[2,646,1], index: 0, kind: input, shape index: {}]   ;;  %s8545_s1 = inlined_call_operand.vmem [shape: bf16[9,1,128], index: 1, kind: input, shape index: {}]   ;;  %s8546_s2 = inlined_call_operand.vmem [shape: f32[1,128], index: 2, kind: input, shape index: {}]   ;;  %s8547_s3 = inlined_call_operand.vmem [shape: f32[1,128], index: 3, kind: input, shape index: {}]   ;;  %s8548_s4 = inlined_call_operand.vmem [shape: f32[2,544,128], index: 4, kind: output, shape index: {}]  }
   0x1 LB: > { %s4425_s16 = sadd.s32 4294967295, %s4471_s15   ;;  %p4429_p0 = scmp.ge.s32.totalorder %s4471_s15, 1  ;;  %s4471_s15 = sphi %s4499_s15, %s14_s15  }
   0x2   : > { %p162_p1 = scmp.lt.s32.totalorder %s4471_s15, 3 }
   0x4   : > { %p163_p2 = pnand %p4429_p0, %p162_p1 }
   0x6   : > { %166 = sbr.rel (%p163_p2) target bundleno = 809 (0x329), region = 36 }
   0xb   : > { %p188_p3 = scmp.lt.s32.totalorder %s4425_s16, 1  ;;  %v4473_v0 = vmov 0   ;;  %v617_v59 = vlaneseq  ;;  %v4432_v63 = vld [vmem:[%s8545_s1 + $0x1] sm:$0x1]  ;;  %vm839_vm0 = vcmask 1046528   ;;  %vm1258_vm1 = vcmask 1045504  }
   0xc   : > { %4456 = vset.pattern.permute.xlu1 %v4473_v0  ;;  %4455 = vset.pattern.permute.xlu0 %v4473_v0  ;;  %vm2115_vm2 = vcmask 1044480   ;;  %vm2534_vm3 = vcmask 1043456   ;;  %vm3391_vm4 = vcmask 1042432   ;;  %vm3810_vm5 = vcmask 1041408  }
   0xd   : > { %s8845_s16 = smov (!%p188_p3, %s4425_s16), 1  ;;  %v618_v62 = vshrl.u32 %v617_v59, 7 }
   0xe   : > { %s4444_s17 = smul.u32 648, %s8845_s16 }
  0x10   : > { %s4513_s20 = scalar_lea.vmem %s8544_s0, %s4444_s17  ;;  %s4445_s17 = smul.u32 544, %s8845_s16 }
  0x11   : > { %v200_v1 = vld [vmem:[%s4513_s20 + $0x10] sm:$0xff]  ;;  %v198_v2 = vld [vmem:[%s4513_s20] sm:$0xff]  ;;  %v201_v3 = vld [vmem:[%s4513_s20 + $0x18] sm:$0xff] }
  0x12   : > { %289 = vperm.xlu1 %4456, %v200_v1   ;;  %279 = vperm.xlu0 %4455, %v198_v2   ;;  %v199_v4 = vld [vmem:[%s4513_s20 + $0x8] sm:$0xff]  ;;  %v202_v6 = vld [vmem:[%s4513_s20 + $0x20] sm:$0xff]  ;;  %v205_v7 = vld [vmem:[%s4513_s20 + $0x38] sm:$0xff]  ;;  %s4932_s21 = scalar_lea.vmem %s8548_s4, %s4445_s17 }
  0x13   : > { %v203_v5 = vld [vmem:[%s4513_s20 + $0x28] sm:$0xff]  ;;  %v204_v8 = vld [vmem:[%s4513_s20 + $0x30] sm:$0xff]  ;;  %v206_v10 = vld [vmem:[%s4513_s20 + $0x40] sm:$0xff] }
  0x14   : > { %v207_v9 = vld [vmem:[%s4513_s20 + $0x48] sm:$0xff]  ;;  %v209_v11 = vld [vmem:[%s4513_s20 + $0x58] sm:$0xff]  ;;  %v208_v12 = vld [vmem:[%s4513_s20 + $0x50] sm:$0xff] }
  0x15   : > { %v211_v13 = vld [vmem:[%s4513_s20 + $0x68] sm:$0xff]  ;;  %v210_v14 = vld [vmem:[%s4513_s20 + $0x60] sm:$0xff]  ;;  %v213_v15 = vld [vmem:[%s4513_s20 + $0x78] sm:$0xff] }
  0x16   : > { %294 = vperm.xlu1 %4456, %v201_v3   ;;  %284 = vperm.xlu0 %4455, %v199_v4   ;;  %v212_v16 = vld [vmem:[%s4513_s20 + $0x70] sm:$0xff]  ;;  %v215_v17 = vld [vmem:[%s4513_s20 + $0x88] sm:$0xff]  ;;  %v214_v18 = vld [vmem:[%s4513_s20 + $0x80] sm:$0xff]  ;;  %v619_v4 = vsub.s32 0, %v618_v62 }
  0x17   : > { %v217_v19 = vld [vmem:[%s4513_s20 + $0x98] sm:$0xff]  ;;  %v216_v20 = vld [vmem:[%s4513_s20 + $0x90] sm:$0xff]  ;;  %v219_v21 = vld [vmem:[%s4513_s20 + $0xa8] sm:$0xff] }
  0x18   : > { %v218_v22 = vld [vmem:[%s4513_s20 + $0xa0] sm:$0xff]  ;;  %v221_v23 = vld [vmem:[%s4513_s20 + $0xb8] sm:$0xff]  ;;  %v220_v24 = vld [vmem:[%s4513_s20 + $0xb0] sm:$0xff] }
  0x19   : > { %v223_v25 = vld [vmem:[%s4513_s20 + $0xc8] sm:$0xff]  ;;  %v222_v26 = vld [vmem:[%s4513_s20 + $0xc0] sm:$0xff]  ;;  %v225_v27 = vld [vmem:[%s4513_s20 + $0xd8] sm:$0xff] }
  0x1a   : > { %304 = vperm.xlu1 %4456, %v203_v5   ;;  %299 = vperm.xlu0 %4455, %v202_v6   ;;  %v224_v28 = vld [vmem:[%s4513_s20 + $0xd0] sm:$0xff]  ;;  %v227_v29 = vld [vmem:[%s4513_s20 + $0xe8] sm:$0xff]  ;;  %v226_v30 = vld [vmem:[%s4513_s20 + $0xe0] sm:$0xff]  ;;  %v691_v5 = vunpack.c.l.bf16 %v4432_v63 }
  0x1b   : > { %v229_v31 = vld [vmem:[%s4513_s20 + $0xf8] sm:$0xff]  ;;  %v228_v32 = vld [vmem:[%s4513_s20 + $0xf0] sm:$0xff]  ;;  %v231_v33 = vld [vmem:[%s4513_s20 + $0x108] sm:$0xff] }
  0x1c   : > { %v230_v34 = vld [vmem:[%s4513_s20 + $0x100] sm:$0xff]  ;;  %v233_v35 = vld [vmem:[%s4513_s20 + $0x118] sm:$0xff]  ;;  %v232_v36 = vld [vmem:[%s4513_s20 + $0x110] sm:$0xff] }
  0x1d   : > { %v235_v37 = vld [vmem:[%s4513_s20 + $0x128] sm:$0xff]  ;;  %v234_v38 = vld [vmem:[%s4513_s20 + $0x120] sm:$0xff]  ;;  %v237_v39 = vld [vmem:[%s4513_s20 + $0x138] sm:$0xff] }
  0x1e   : > { %314 = vperm.xlu1 %4456, %v205_v7   ;;  %309 = vperm.xlu0 %4455, %v204_v8   ;;  %v236_v40 = vld [vmem:[%s4513_s20 + $0x130] sm:$0xff]  ;;  %v239_v41 = vld [vmem:[%s4513_s20 + $0x148] sm:$0xff]  ;;  %v238_v42 = vld [vmem:[%s4513_s20 + $0x140] sm:$0xff] }
  0x1f   : > { %v241_v43 = vld [vmem:[%s4513_s20 + $0x158] sm:$0xff]  ;;  %v240_v44 = vld [vmem:[%s4513_s20 + $0x150] sm:$0xff]  ;;  %v243_v45 = vld [vmem:[%s4513_s20 + $0x168] sm:$0xff] }
  0x20   : > { %v242_v46 = vld [vmem:[%s4513_s20 + $0x160] sm:$0xff]  ;;  %v245_v47 = vld [vmem:[%s4513_s20 + $0x178] sm:$0xff]  ;;  %v244_v48 = vld [vmem:[%s4513_s20 + $0x170] sm:$0xff] }
  0x21   : > { %v247_v49 = vld [vmem:[%s4513_s20 + $0x188] sm:$0xff]  ;;  %v246_v50 = vld [vmem:[%s4513_s20 + $0x180] sm:$0xff]  ;;  %v249_v51 = vld [vmem:[%s4513_s20 + $0x198] sm:$0xff] }
  0x22   : > { %324 = vperm.xlu1 %4456, %v207_v9   ;;  %319 = vperm.xlu0 %4455, %v206_v10   ;;  %v248_v52 = vld [vmem:[%s4513_s20 + $0x190] sm:$0xff]  ;;  %v251_v53 = vld [vmem:[%s4513_s20 + $0x1a8] sm:$0xff]  ;;  %v250_v54 = vld [vmem:[%s4513_s20 + $0x1a0] sm:$0xff] }
  0x23   : > { %v253_v55 = vld [vmem:[%s4513_s20 + $0x1b8] sm:$0xff]  ;;  %v252_v56 = vld [vmem:[%s4513_s20 + $0x1b0] sm:$0xff]  ;;  %v255_v57 = vld [vmem:[%s4513_s20 + $0x1c8] sm:$0xff] }
  0x24   : > { %v254_v58 = vld [vmem:[%s4513_s20 + $0x1c0] sm:$0xff]  ;;  %v257_v60 = vld [vmem:[%s4513_s20 + $0x1d8] sm:$0xff]  ;;  %v256_v61 = vld [vmem:[%s4513_s20 + $0x1d0] sm:$0xff] }
  0x25   : > { %v259_v0 = vld [vmem:[%s4513_s20 + $0x1e8] sm:$0xff]  ;;  %v258_v1 = vld [vmem:[%s4513_s20 + $0x1e0] sm:$0xff]  ;;  %v261_v9 = vld [vmem:[%s4513_s20 + $0x1f8] sm:$0xff] }
  0x26   : > { %334 = vperm.xlu1 %4456, %v209_v11   ;;  %329 = vperm.xlu0 %4455, %v208_v12   ;;  %v4433_v2 = vld [vmem:[%s8545_s1 + $0x2] sm:$0x1]  ;;  %v275_v3 = vld [vmem:[%s8545_s1] sm:$0x1]  ;;  %v4434_v7 = vld [vmem:[%s8545_s1 + $0x3] sm:$0x1]  ;;  %v4593_v11 = vrot.slane %v691_v5, %v619_v4 }
  0x27   : > { %v1115_v6 = vunpack.c.l.bf16 %v4433_v2  ;;  %v276_v8 = vunpack.c.l.bf16 %v275_v3  ;;  %v4435_v10 = vld [vmem:[%s8545_s1 + $0x4] sm:$0x1]  ;;  %v260_v12 = vld [vmem:[%s4513_s20 + $0x1f0] sm:$0xff]  ;;  %v267_v62 = vld [vmem:[%s4513_s20 + $0x228] sm:$0xff] }
  0x2a   : > { %344 = vperm.xlu1 %4456, %v211_v13   ;;  %339 = vperm.xlu0 %4455, %v210_v14   ;;  %v4436_v13 = vld [vmem:[%s8545_s1 + $0x5] sm:$0x1] }
  0x2e   : > { %354 = vperm.xlu1 %4456, %v213_v15   ;;  %349 = vperm.xlu0 %4455, %v212_v16   ;;  %v1534_v16 = vunpack.c.l.bf16 %v4434_v7 }
  0x32   : > { %364 = vperm.xlu1 %4456, %v215_v17   ;;  %359 = vperm.xlu0 %4455, %v214_v18   ;;  %v4437_v17 = vld [vmem:[%s8545_s1 + $0x6] sm:$0x1]  ;;  %v4602_v18 = vrot.slane %v1115_v6, %v619_v4 }
  0x36   : > { %374 = vperm.xlu1 %4456, %v217_v19   ;;  %369 = vperm.xlu0 %4455, %v216_v20   ;;  %v1972_v20 = vunpack.c.l.bf16 %v4435_v10 }
  0x3a   : > { %384 = vperm.xlu1 %4456, %v219_v21   ;;  %379 = vperm.xlu0 %4455, %v218_v22   ;;  %v4438_v21 = vld [vmem:[%s8545_s1 + $0x7] sm:$0x1]  ;;  %v4439_v22 = vld [vmem:[%s8545_s1 + $0x8] sm:$0x1] }
  0x3e   : > { %394 = vperm.xlu1 %4456, %v221_v23   ;;  %389 = vperm.xlu0 %4455, %v220_v24   ;;  %v4611_v23 = vrot.slane %v276_v8, %v619_v4  ;;  %v263_v24 = vld [vmem:[%s4513_s20 + $0x208] sm:$0xff] }
  0x40   : > { %8642 = vst [vmem:[#allocation2_spill] sm:$0xff] %v4611_v23 }
  0x42   : > { %404 = vperm.xlu1 %4456, %v223_v25   ;;  %399 = vperm.xlu0 %4455, %v222_v26   ;;  %v2391_v25 = vunpack.c.l.bf16 %v4436_v13 }
  0x46   : > { %414 = vperm.xlu1 %4456, %v225_v27   ;;  %409 = vperm.xlu0 %4455, %v224_v28   ;;  %v262_v27 = vld [vmem:[%s4513_s20 + $0x200] sm:$0xff]  ;;  %v2810_v28 = vunpack.c.l.bf16 %v4437_v17 }
  0x4a   : > { %424 = vperm.xlu1 %4456, %v227_v29   ;;  %419 = vperm.xlu0 %4455, %v226_v30  }
  0x4e   : > { %434 = vperm.xlu1 %4456, %v229_v31   ;;  %429 = vperm.xlu0 %4455, %v228_v32   ;;  %v4619_v32 = vrot.slane %v1534_v16, %v619_v4 }
  0x52   : > { %444 = vperm.xlu1 %4456, %v231_v33   ;;  %439 = vperm.xlu0 %4455, %v230_v34   ;;  %v3248_v33 = vunpack.c.l.bf16 %v4438_v21  ;;  %v3667_v34 = vunpack.c.l.bf16 %v4439_v22 }
  0x56   : > { %454 = vperm.xlu1 %4456, %v233_v35   ;;  %449 = vperm.xlu0 %4455, %v232_v36  }
  0x5a   : > { %464 = vperm.xlu1 %4456, %v235_v37   ;;  %459 = vperm.xlu0 %4455, %v234_v38   ;;  %v4627_v38 = vrot.slane %v1972_v20, %v619_v4  ;;  %v269_v20 = vld [vmem:[%s4513_s20 + $0x238] sm:$0xff] }
  0x5e   : > { %474 = vperm.xlu1 %4456, %v237_v39   ;;  %469 = vperm.xlu0 %4455, %v236_v40  }
  0x62   : > { %484 = vperm.xlu1 %4456, %v239_v41   ;;  %479 = vperm.xlu0 %4455, %v238_v42   ;;  %v4632_v42 = vrot.slane %v2391_v25, %v619_v4 }
  0x66   : > { %494 = vperm.xlu1 %4456, %v241_v43   ;;  %489 = vperm.xlu0 %4455, %v240_v44   ;;  %v265_v43 = vld [vmem:[%s4513_s20 + $0x218] sm:$0xff] }
  0x6a   : > { %504 = vperm.xlu1 %4456, %v243_v45   ;;  %499 = vperm.xlu0 %4455, %v242_v46  }
  0x6e   : > { %514 = vperm.xlu1 %4456, %v245_v47   ;;  %509 = vperm.xlu0 %4455, %v244_v48   ;;  %v264_v47 = vld [vmem:[%s4513_s20 + $0x210] sm:$0xff]  ;;  %v4639_v48 = vrot.slane %v2810_v28, %v619_v4 }
  0x72   : > { %524 = vperm.xlu1 %4456, %v247_v49   ;;  %519 = vperm.xlu0 %4455, %v246_v50  }
  0x76   : > { %534 = vperm.xlu1 %4456, %v249_v51   ;;  %529 = vperm.xlu0 %4455, %v248_v52   ;;  %v4641_v52 = vrot.slane %v3248_v33, %v619_v4 }
  0x7a   : > { %544 = vperm.xlu1 %4456, %v251_v53   ;;  %539 = vperm.xlu0 %4455, %v250_v54   ;;  %v4643_v53 = vrot.slane %v3667_v34, %v619_v4  ;;  %v266_v4 = vld [vmem:[%s4513_s20 + $0x220] sm:$0xff] }
  0x7e   : > { %554 = vperm.xlu1 %4456, %v253_v55   ;;  %549 = vperm.xlu0 %4455, %v252_v56  }
  0x82   : > { %564 = vperm.xlu1 %4456, %v255_v57   ;;  %559 = vperm.xlu0 %4455, %v254_v58  }
  0x86   : > { %574 = vperm.xlu1 %4456, %v257_v60   ;;  %569 = vperm.xlu0 %4455, %v256_v61  }
  0x8a   : > { %584 = vperm.xlu1 %4456, %v259_v0   ;;  %579 = vperm.xlu0 %4455, %v258_v1  }
  0x8d   : > { %v290_v14 = vpop.permute.xlu1 %289  ;;  %v280_v15 = vpop.permute.xlu0 %279 }
  0x8e   : > { %v703_v19 = vmul.f32 %v4593_v11, %v290_v14  ;;  %594 = vperm.xlu1 %4456, %v261_v9   ;;  %589 = vperm.xlu0 %4455, %v260_v12   ;;  %v4615_v26 = vmul.f32 %v4602_v18, %v290_v14  ;;  %v701_v29 = vmul.f32 %v4593_v11, %v280_v15 }
  0x8f   : > { %v1120_v39 = vmul.f32 %v4602_v18, %v280_v15  ;;  %v623_v54 = vmul.f32 %v4611_v23, %v290_v14  ;;  %v621_v55 = vmul.f32 %v4611_v23, %v280_v15 }
  0x90   : > { %v843_v35 = vrot.slane %v703_v19, 1  ;;  %v1262_v44 = vrot.slane %v4615_v26, 2  ;;  %v840_v49 = vrot.slane %v701_v29, 1  ;;  %v268_v26 = vld [vmem:[%s4513_s20 + $0x230] sm:$0xff] }
  0x91   : > { %v295_v30 = vpop.permute.xlu1 %294  ;;  %v285_v31 = vpop.permute.xlu0 %284  ;;  %v1259_v58 = vrot.slane %v1120_v39, 2 }
  0x92   : > { %v4622_v36 = vmul.f32 %v4593_v11, %v295_v30  ;;  %v4625_v37 = vmul.f32 %v4602_v18, %v295_v30  ;;  %604 = vperm.xlu1 %4456, %v263_v24   ;;  %v702_v40 = vmul.f32 %v4593_v11, %v285_v31  ;;  %v1121_v41 = vmul.f32 %v4602_v18, %v285_v31 }
  0x93   : > { %599 = vperm.xlu0 %4455, %v262_v27   ;;  %v624_v63 = vmul.f32 %v4611_v23, %v295_v30  ;;  %v622_v1 = vmul.f32 %v4611_v23, %v285_v31 }
  0x94   : > { %v845_v45 = vrot.slane %v4622_v36, 1  ;;  %v1264_v46 = vrot.slane %v4625_v37, 2  ;;  %v841_v50 = vrot.slane %v702_v40, 1  ;;  %v1260_v57 = vrot.slane %v1121_v41, 2 }
  0x95   : > { %v305_v51 = vpop.permute.xlu1 %304  ;;  %v300_v3 = vpop.permute.xlu0 %299 }
  0x96   : > { %v846_v56 = vsel %vm839_vm0, %v843_v35, %v845_v45  ;;  %614 = vperm.xlu1 %4456, %v265_v43   ;;  %v842_v59 = vsel %vm839_vm0, %v840_v49, %v841_v50  ;;  %v844_v60 = vsel %vm839_vm0, %v841_v50, %v843_v35  ;;  %v4651_v61 = vmul.f32 %v4593_v11, %v305_v51  ;;  %v271_v43 = vld [vmem:[%s4513_s20 + $0x248] sm:$0xff] }
  0x97   : > { %609 = vperm.xlu0 %4455, %v264_v47   ;;  %v1265_v0 = vsel %vm1258_vm1, %v1262_v44, %v1264_v46  ;;  %v1045_v2 = vadd.f32 %v842_v59, %v621_v55  ;;  %v1047_v5 = vadd.f32 %v846_v56, %v623_v54  ;;  %v4661_v6 = vmul.f32 %v4611_v23, %v305_v51  ;;  %v270_v54 = vld [vmem:[%s4513_s20 + $0x240] sm:$0xff] }
  0x98   : > { %v4664_v7 = vmul.f32 %v4602_v18, %v305_v51  ;;  %v4667_v8 = vmul.f32 %v4619_v32, %v305_v51  ;;  %v1046_v9 = vadd.f32 %v844_v60, %v622_v1  ;;  %v1261_v10 = vsel %vm1258_vm1, %v1259_v58, %v1260_v57 }
  0x99   : > { %v4671_v12 = vmul.f32 %v4627_v38, %v305_v51  ;;  %v4674_v13 = vmul.f32 %v4632_v42, %v305_v51  ;;  %v315_v14 = vpop.permute.xlu1 %314  ;;  %v1263_v15 = vsel %vm1258_vm1, %v1260_v57, %v1262_v44  ;;  %v1464_v16 = vadd.f32 %v1261_v10, %v1045_v2  ;;  %v310_v51 = vpop.permute.xlu0 %309 }
  0x9a   : > { %1537 = vperm.xlu1 %4456, %v267_v62   ;;  %v849_v17 = vrot.slane %v4651_v61, 1  ;;  %v705_v19 = vmul.f32 %v4593_v11, %v300_v3  ;;  %v1268_v21 = vrot.slane %v4664_v7, 2  ;;  %v1124_v22 = vmul.f32 %v4602_v18, %v300_v3 }
  0x9b   : > { %694 = vperm.xlu0 %4455, %v266_v4   ;;  %v1559_v24 = vmul.f32 %v4619_v32, %v300_v3  ;;  %v1977_v25 = vmul.f32 %v4627_v38, %v300_v3  ;;  %v1698_v27 = vrot.slane %v4667_v8, 2  ;;  %v2396_v29 = vmul.f32 %v4632_v42, %v300_v3 }
  0x9c   : > { %v847_v28 = vrot.slane %v705_v19, 1  ;;  %v4688_v30 = vmul.f32 %v4593_v11, %v315_v14  ;;  %v2117_v31 = vrot.slane %v4671_v12, 3  ;;  %v2536_v33 = vrot.slane %v4674_v13, 4 }
  0x9d   : > { %v1266_v34 = vrot.slane %v1124_v22, 2  ;;  %v1697_v35 = vrot.slane %v1559_v24, 2  ;;  %v2116_v40 = vrot.slane %v1977_v25, 3  ;;  %v2535_v41 = vrot.slane %v2396_v29, 4  ;;  %v325_v29 = vpop.permute.xlu1 %324 }
  0x9e   : > { %1547 = vperm.xlu1 %4456, %v269_v20   ;;  %v848_v36 = vsel %vm839_vm0, %v845_v45, %v847_v28  ;;  %v850_v39 = vsel %vm839_vm0, %v847_v28, %v849_v17  ;;  %v1466_v44 = vadd.f32 %v1265_v0, %v1047_v5  ;;  %v1465_v47 = vadd.f32 %v1263_v15, %v1046_v9  ;;  %v272_v5 = vld [vmem:[%s4513_s20 + $0x250] sm:$0xff] }
  0x9f   : > { %1542 = vperm.xlu0 %4455, %v268_v26   ;;  %v625_v49 = vmul.f32 %v4611_v23, %v300_v3  ;;  %v4697_v50 = vmul.f32 %v4611_v23, %v315_v14  ;;  %v1048_v55 = vadd.f32 %v848_v36, %v624_v63  ;;  %v1699_v45 = vsel %vm1258_vm1, %v1697_v35, %v1698_v27 }
  0xa0   : > { %v853_v56 = vrot.slane %v4688_v30, 1  ;;  %v4705_v57 = vmul.f32 %v4602_v18, %v315_v14  ;;  %v1267_v59 = vsel %vm1258_vm1, %v1264_v46, %v1266_v34  ;;  %v1902_v60 = vadd.f32 %v1699_v45, %v1464_v16  ;;  %v273_v46 = vld [vmem:[%s4513_s20 + $0x258] sm:$0xff] }
  0xa1   : > { %v1049_v58 = vadd.f32 %v850_v39, %v625_v49  ;;  %v4711_v61 = vmul.f32 %v4619_v32, %v315_v14  ;;  %v1269_v62 = vsel %vm1258_vm1, %v1266_v34, %v1268_v21  ;;  %v2118_v63 = vsel %vm2115_vm2, %v2116_v40, %v2117_v31  ;;  %v274_v40 = vld [vmem:[%s4513_s20 + $0x260] sm:$0xff] }
  0xa2   : > { %2813 = vperm.xlu1 %4456, %v271_v43   ;;  %v2537_v0 = vsel %vm2534_vm3, %v2535_v41, %v2536_v33  ;;  %v707_v37 = vmul.f32 %v4593_v11, %v310_v51  ;;  %v4725_v1 = vmul.f32 %v4627_v38, %v315_v14  ;;  %v4728_v2 = vmul.f32 %v4632_v42, %v315_v14 }
  0xa3   : > { %1552 = vperm.xlu0 %4455, %v270_v54   ;;  %v1126_v3 = vmul.f32 %v4602_v18, %v310_v51  ;;  %v1561_v4 = vmul.f32 %v4619_v32, %v310_v51  ;;  %v2321_v9 = vadd.f32 %v2118_v63, %v1902_v60  ;;  %v1702_v10 = vrot.slane %v4711_v61, 2 }
  0xa4   : > { %v851_v15 = vrot.slane %v707_v37, 1  ;;  %v1979_v16 = vmul.f32 %v4627_v38, %v310_v51  ;;  %v4735_v19 = vadd.f32 %v1267_v59, %v1048_v55  ;;  %v4737_v20 = vadd.f32 %v1269_v62, %v1049_v58 }
  0xa5   : > { %v1272_v22 = vrot.slane %v4705_v57, 2  ;;  %v1700_v14 = vrot.slane %v1561_v4, 2  ;;  %v2398_v28 = vmul.f32 %v4632_v42, %v310_v51  ;;  %v2121_v34 = vrot.slane %v4725_v1, 3 }
  0xa6   : > { %2823 = vperm.xlu1 %4456, %v273_v46   ;;  %v852_v24 = vsel %vm839_vm0, %v849_v17, %v851_v15  ;;  %v854_v25 = vsel %vm839_vm0, %v851_v15, %v853_v56  ;;  %v2119_v26 = vrot.slane %v1979_v16, 3  ;;  %v2540_v35 = vrot.slane %v4728_v2, 4 }
  0xa7   : > { %2818 = vperm.xlu0 %4455, %v272_v5   ;;  %v627_v36 = vmul.f32 %v4611_v23, %v310_v51  ;;  %v1270_v39 = vrot.slane %v1126_v3, 2  ;;  %v4749_v41 = vadd.f32 %v2537_v0, %v2321_v9  ;;  %v1050_v17 = vadd.f32 %v852_v24, %v4661_v6 }
  0xa8   : > { %v1701_v43 = vsel %vm1258_vm1, %v1698_v27, %v1700_v14  ;;  %v1703_v49 = vsel %vm1258_vm1, %v1700_v14, %v1702_v10  ;;  %v4759_v58 = vmul.f32 %v4611_v23, %v325_v29  ;;  %v2120_v51 = vsel %vm2115_vm2, %v2117_v31, %v2119_v26 }
  0xa9   : > { %v1051_v54 = vadd.f32 %v854_v25, %v627_v36  ;;  %v1903_v55 = vadd.f32 %v1701_v43, %v1465_v47  ;;  %v1904_v45 = vadd.f32 %v1703_v49, %v1466_v44  ;;  %v2538_v59 = vrot.slane %v2398_v28, 4 }
  0xaa   : > { %v4765_v6 = vmul.f32 %v4593_v11, %v325_v29  ;;  %v4768_v8 = vmul.f32 %v4602_v18, %v325_v29  ;;  %v1271_v27 = vsel %vm1258_vm1, %v1268_v21, %v1270_v39  ;;  %v1273_v44 = vsel %vm1258_vm1, %v1270_v39, %v1272_v22  ;;  %v320_v21 = vpop.permute.xlu0 %319 }
  0xab   : > { %2828 = vperm.xlu0 %4455, %v274_v40   ;;  %v2322_v47 = vadd.f32 %v2120_v51, %v1903_v55  ;;  %v4777_v12 = vmul.f32 %v4619_v32, %v325_v29  ;;  %v4779_v31 = vadd.f32 %v1271_v27, %v1050_v17  ;;  %v2122_v60 = vsel %vm2115_vm2, %v2119_v26, %v2121_v34 }
  0xac   : > { %v4785_v62 = vmul.f32 %v4627_v38, %v325_v29  ;;  %v4788_v7 = vmul.f32 %v4632_v42, %v325_v29  ;;  %v4790_v63 = vadd.f32 %v1273_v44, %v1051_v54  ;;  %v2323_v0 = vadd.f32 %v2122_v60, %v1904_v45 }
  0xad   : > { %v2539_v37 = vsel %vm2534_vm3, %v2536_v33, %v2538_v59  ;;  %v2541_v46 = vsel %vm2534_vm3, %v2538_v59, %v2540_v35  ;;  %v857_v4 = vrot.slane %v4765_v6, 1  ;;  %v1276_v5 = vrot.slane %v4768_v8, 2 }
  0xae   : > { %v4798_v3 = vadd.f32 %v2539_v37, %v2322_v47  ;;  %v4803_v9 = vmul.f32 %v4639_v48, %v325_v29  ;;  %v1706_v15 = vrot.slane %v4777_v12, 2  ;;  %v709_v13 = vmul.f32 %v4593_v11, %v320_v21 }
  0xaf   : > { %v1128_v33 = vmul.f32 %v4602_v18, %v320_v21  ;;  %v1563_v16 = vmul.f32 %v4619_v32, %v320_v21  ;;  %v2125_v14 = vrot.slane %v4785_v62, 3  ;;  %v8551_v24 = vrot.slane %v4788_v7, 4 }
  0xb0   : > { %v4812_v25 = vmul.f32 %v4641_v52, %v325_v29  ;;  %v1981_v26 = vmul.f32 %v4627_v38, %v320_v21  ;;  %v4816_v28 = vmul.f32 %v4643_v53, %v325_v29  ;;  %v629_v36 = vmul.f32 %v4611_v23, %v320_v21 }
  0xb1   : > { %v855_v39 = vrot.slane %v709_v13, 1  ;;  %v1704_v40 = vrot.slane %v1563_v16, 2  ;;  %v2974_v17 = vrot.slane %v4803_v9, 4  ;;  %v1274_v43 = vrot.slane %v1128_v33, 2  ;;  %v335_v16 = vpop.permute.xlu1 %334 }
  0xb2   : > { %v2400_v49 = vmul.f32 %v4632_v42, %v320_v21  ;;  %v2835_v54 = vmul.f32 %v4639_v48, %v320_v21  ;;  %v2123_v45 = vrot.slane %v1981_v26, 3  ;;  %v3253_v51 = vmul.f32 %v4641_v52, %v320_v21 }
  0xb3   : > { %v856_v55 = vsel %vm839_vm0, %v853_v56, %v855_v39  ;;  %v858_v29 = vsel %vm839_vm0, %v855_v39, %v857_v4  ;;  %v8550_v59 = vrot.slane %v4812_v25, 5  ;;  %v1705_v27 = vsel %vm1258_vm1, %v1702_v10, %v1704_v40 }
  0xb4   : > { %v1707_v44 = vsel %vm1258_vm1, %v1704_v40, %v1706_v15  ;;  %v3672_v30 = vmul.f32 %v4643_v53, %v320_v21  ;;  %v1052_v56 = vadd.f32 %v856_v55, %v4697_v50  ;;  %v1053_v47 = vadd.f32 %v858_v29, %v629_v36 }
  0xb5   : > { %v1905_v60 = vadd.f32 %v1705_v27, %v4735_v19  ;;  %v1906_v37 = vadd.f32 %v1707_v44, %v4737_v20  ;;  %v8549_v13 = vrot.slane %v4816_v28, 6  ;;  %v1275_v61 = vsel %vm1258_vm1, %v1272_v22, %v1274_v43 }
  0xb6   : > { %v1277_v10 = vsel %vm1258_vm1, %v1274_v43, %v1276_v5  ;;  %v2973_v33 = vrot.slane %v2835_v54, 4  ;;  %v2124_v50 = vsel %vm2115_vm2, %v2121_v34, %v2123_v45  ;;  %v2126_v19 = vsel %vm2115_vm2, %v2123_v45, %v2125_v14  ;;  %v330_v45 = vpop.permute.xlu0 %329 }
  0xb7   : > { %v2542_v20 = vrot.slane %v2400_v49, 4  ;;  %v3392_v21 = vrot.slane %v3253_v51, 5  ;;  %v2324_v26 = vadd.f32 %v2124_v50, %v1905_v60  ;;  %v2325_v57 = vadd.f32 %v2126_v19, %v1906_v37  ;;  %v4887_v51 = vld [vmem:[%s8546_s2] ss:$0 sm:$0xff] }
  0xb8   : > { %v2975_v22 = vsel %vm2534_vm3, %v2973_v33, %v2974_v17  ;;  %v3811_v36 = vrot.slane %v3672_v30, 6  ;;  %v4856_v39 = vadd.f32 %v2541_v46, %v2323_v0  ;;  %v4858_v40 = vadd.f32 %v1275_v61, %v1052_v56  ;;  %v4910_v37 = vld [vmem:[%s8547_s3] ss:$0 sm:$0xff] }
  0xb9   : > { %v4860_v1 = vadd.f32 %v1277_v10, %v1053_v47  ;;  %v3178_v34 = vadd.f32 %v2975_v22, %v4749_v41  ;;  %v3394_v43 = vsel %vm3391_vm4, %v3392_v21, %v8550_v59  ;;  %v4867_v49 = vmul.f32 %v4593_v11, %v335_v16 }
  0xba   : > { %v4870_v54 = vmul.f32 %v4602_v18, %v335_v16  ;;  %v4873_v0 = vmul.f32 %v4619_v32, %v335_v16  ;;  %v2543_v46 = vsel %vm2534_vm3, %v2540_v35, %v2542_v20  ;;  %v2545_v41 = vsel %vm2534_vm3, %v2542_v20, %v8551_v24 }
  0xbb   : > { %v3597_v55 = vadd.f32 %v3394_v43, %v3178_v34  ;;  %v4882_v29 = vmul.f32 %v4611_v23, %v335_v16  ;;  %v4889_v27 = vadd.f32 %v2543_v46, %v2324_v26  ;;  %v4891_v44 = vadd.f32 %v2545_v41, %v2325_v57 }
  0xbc   : > { %v3813_v2 = vsel %vm3810_vm5, %v3811_v36, %v8549_v13  ;;  %v4897_v35 = vmul.f32 %v4627_v38, %v335_v16  ;;  %v861_v56 = vrot.slane %v4867_v49, 1  ;;  %v4901_v47 = vmul.f32 %v4632_v42, %v335_v16 }
  0xbd   : > { %v4016_v30 = vadd.f32 %v3813_v2, %v3597_v55  ;;  %v4904_v60 = vmul.f32 %v4639_v48, %v335_v16  ;;  %v1280_v61 = vrot.slane %v4870_v54, 2  ;;  %v1710_v10 = vrot.slane %v4873_v0, 2 }
  0xbe   : > { %v4915_v33 = vmul.f32 %v4641_v52, %v335_v16  ;;  %v711_v50 = vmul.f32 %v4593_v11, %v330_v45  ;;  %v1130_v20 = vmul.f32 %v4602_v18, %v330_v45  ;;  %v1565_v21 = vmul.f32 %v4619_v32, %v330_v45 }
  0xbf   : > { %v4091_v19 = vmul.f32 %v4887_v51, %v4016_v30  ;;  %v1983_v26 = vmul.f32 %v4627_v38, %v330_v45  ;;  %v4923_v57 = vmul.f32 %v4643_v53, %v335_v16  ;;  %v631_v22 = vmul.f32 %v4611_v23, %v330_v45 }
  0xc0   : > { %v859_v36 = vrot.slane %v711_v50, 1  ;;  %v2837_v34 = vmul.f32 %v4639_v48, %v330_v45  ;;  %v1278_v46 = vrot.slane %v1130_v20, 2  ;;  %v1708_v41 = vrot.slane %v1565_v21, 2 }
  0xc1   : > { %v4166_v43 = vadd.f32 %v4910_v37, %v4091_v19  ;;  %v2402_v55 = vmul.f32 %v4632_v42, %v330_v45  ;;  %v2127_v30 = vrot.slane %v1983_v26, 3  ;;  %v2129_v20 = vrot.slane %v4897_v35, 3 }
  0xc2   : > { %v860_v16 = vsel %vm839_vm0, %v857_v4, %v859_v36  ;;  %v862_v2 = vsel %vm839_vm0, %v859_v36, %v861_v56  ;;  %v2976_v50 = vrot.slane %v2837_v34, 4  ;;  %v2978_v21 = vrot.slane %v4904_v60, 4 }
  0xc3   : > { %v4234_v19 = vmax.f32 %v4166_v43, 0.0  ;;  %v1054_v13 = vadd.f32 %v860_v16, %v4759_v58  ;;  %v8554_v59 = vrot.slane %v4901_v47, 4  ;;  %v1055_v24 = vadd.f32 %v862_v2, %v631_v22 }
  0xc4   : > { %v1709_v6 = vsel %vm1258_vm1, %v1706_v15, %v1708_v41  ;;  %v1711_v4 = vsel %vm1258_vm1, %v1708_v41, %v1710_v10  ;;  %v8553_v26 = vrot.slane %v4915_v33, 5  ;;  %v2546_v43 = vrot.slane %v2402_v55, 4 }
  0xc5   : > { %4302 = vst [vmem:[%s4932_s21] sm:$0xff] %v4234_v19  ;;  %v1907_v36 = vadd.f32 %v1709_v6, %v4779_v31  ;;  %v1908_v34 = vadd.f32 %v1711_v4, %v4790_v63  ;;  %v8552_v58 = vrot.slane %v4923_v57, 6  ;;  %v1279_v12 = vsel %vm1258_vm1, %v1276_v5, %v1278_v46  ;;  %v345_v5 = vpop.permute.xlu1 %344 }
  0xc6   : > { %v2128_v15 = vsel %vm2115_vm2, %v2125_v14, %v2127_v30  ;;  %v2977_v22 = vsel %vm2534_vm3, %v2974_v17, %v2976_v50  ;;  %v1281_v31 = vsel %vm1258_vm1, %v1278_v46, %v1280_v61  ;;  %v4967_v63 = vadd.f32 %v1279_v12, %v1054_v13  ;;  %v340_v12 = vpop.permute.xlu0 %339 }
  0xc7   : > { %v2326_v41 = vadd.f32 %v2128_v15, %v1907_v36  ;;  %v2979_v8 = vsel %vm2534_vm3, %v2976_v50, %v2978_v21  ;;  %v4972_v55 = vadd.f32 %v1281_v31, %v1055_v24  ;;  %v2130_v62 = vsel %vm2115_vm2, %v2127_v30, %v2129_v20 }
  0xc8   : > { %v3255_v9 = vmul.f32 %v4641_v52, %v330_v45  ;;  %v3674_v14 = vmul.f32 %v4643_v53, %v330_v45  ;;  %v2327_v17 = vadd.f32 %v2130_v62, %v1908_v34  ;;  %v8643_v13 = vrot.slane %v4788_v7, 4 }
  0xc9   : > { %v3179_v16 = vadd.f32 %v2977_v22, %v4798_v3  ;;  %v3180_v2 = vadd.f32 %v2979_v8, %v4856_v39  ;;  %v4985_v19 = vmul.f32 %v4593_v11, %v345_v5  ;;  %v4988_v30 = vmul.f32 %v4602_v18, %v345_v5  ;;  %v355_v54 = vpop.permute.xlu1 %354 }
  0xca   : > { %v2547_v46 = vsel %vm2534_vm3, %v8643_v13, %v2546_v43  ;;  %v3395_v50 = vrot.slane %v3255_v9, 5  ;;  %v3814_v24 = vrot.slane %v3674_v14, 6  ;;  %v2549_v45 = vsel %vm2534_vm3, %v2546_v43, %v8554_v59 }
  0xcb   : > { %v4993_v6 = vadd.f32 %v2547_v46, %v2326_v41  ;;  %v4996_v7 = vmul.f32 %v4611_v23, %v345_v5  ;;  %v4999_v3 = vmul.f32 %v4619_v32, %v345_v5  ;;  %v8644_v39 = vrot.slane %v4812_v25, 5 }
  0xcc   : > { %v3398_v36 = vsel %vm3391_vm4, %v3395_v50, %v8553_v26  ;;  %v5008_v34 = vmul.f32 %v4627_v38, %v345_v5  ;;  %v5011_v43 = vmul.f32 %v4632_v42, %v345_v5  ;;  %v5013_v15 = vadd.f32 %v2549_v45, %v2327_v17 }
  0xcd   : > { %v3396_v4 = vsel %vm3391_vm4, %v8644_v39, %v3395_v50  ;;  %v3599_v31 = vadd.f32 %v3398_v36, %v3180_v2  ;;  %v5016_v41 = vmul.f32 %v4639_v48, %v345_v5  ;;  %v8645_v25 = vrot.slane %v4816_v28, 6 }
  0xce   : > { %v3598_v22 = vadd.f32 %v3396_v4, %v3179_v16  ;;  %v3817_v62 = vsel %vm3810_vm5, %v3814_v24, %v8552_v58  ;;  %v865_v9 = vrot.slane %v4985_v19, 1  ;;  %v1284_v14 = vrot.slane %v4988_v30, 2 }
  0xcf   : > { %v3815_v8 = vsel %vm3810_vm5, %v8645_v25, %v3814_v24  ;;  %v4018_v17 = vadd.f32 %v3817_v62, %v3599_v31  ;;  %v1714_v46 = vrot.slane %v4999_v3, 2  ;;  %v713_v16 = vmul.f32 %v4593_v11, %v340_v12 }
  0xd0   : > { %v4017_v13 = vadd.f32 %v3815_v8, %v3598_v22  ;;  %v2133_v2 = vrot.slane %v5008_v34, 3  ;;  %v1132_v50 = vmul.f32 %v4602_v18, %v340_v12  ;;  %v1567_v45 = vmul.f32 %v4619_v32, %v340_v12 }
  0xd1   : > { %v4093_v39 = vmul.f32 %v4887_v51, %v4018_v17  ;;  %v8557_v4 = vrot.slane %v5016_v41, 4  ;;  %v863_v36 = vrot.slane %v713_v16, 1  ;;  %v5036_v22 = vmul.f32 %v4641_v52, %v345_v5 }
  0xd2   : > { %v4092_v24 = vmul.f32 %v4887_v51, %v4017_v13  ;;  %v5039_v31 = vmul.f32 %v4643_v53, %v345_v5  ;;  %v1712_v25 = vrot.slane %v1567_v45, 2  ;;  %v1985_v8 = vmul.f32 %v4627_v38, %v340_v12 }
  0xd3   : > { %v4168_v58 = vadd.f32 %v4910_v37, %v4093_v39  ;;  %v864_v13 = vsel %vm839_vm0, %v861_v56, %v863_v36  ;;  %v2839_v17 = vmul.f32 %v4639_v48, %v340_v12  ;;  %v866_v5 = vsel %vm839_vm0, %v863_v36, %v865_v9 }
  0xd4   : > { %v4167_v62 = vadd.f32 %v4910_v37, %v4092_v24  ;;  %v1056_v16 = vadd.f32 %v864_v13, %v4882_v29  ;;  %v1282_v45 = vrot.slane %v1132_v50, 2  ;;  %v2404_v26 = vmul.f32 %v4632_v42, %v340_v12 }
  0xd5   : > { %v4236_v28 = vmax.f32 %v4168_v58, 0.0  ;;  %v1713_v49 = vsel %vm1258_vm1, %v1710_v10, %v1712_v25  ;;  %v1715_v56 = vsel %vm1258_vm1, %v1712_v25, %v1714_v46  ;;  %v8556_v39 = vrot.slane %v5036_v22, 5 }
  0xd6   : > { %v4235_v24 = vmax.f32 %v4167_v62, 0.0  ;;  %v633_v59 = vmul.f32 %v4611_v23, %v340_v12  ;;  %v1909_v36 = vadd.f32 %v1713_v49, %v4858_v40  ;;  %v1910_v29 = vadd.f32 %v1715_v56, %v4860_v1 }
  0xd7   : > { %4304 = vst [vmem:[%s4932_s21 + $0x10] sm:$0xff] %v4236_v28  ;;  %v8555_v58 = vrot.slane %v5039_v31, 6  ;;  %v2131_v50 = vrot.slane %v1985_v8, 3  ;;  %v2980_v0 = vrot.slane %v2839_v17, 4  ;;  %v3257_v10 = vmul.f32 %v4641_v52, %v340_v12 }
  0xd8   : > { %4303 = vst [vmem:[%s4932_s21 + $0x8] sm:$0xff] %v4235_v24  ;;  %v1057_v62 = vadd.f32 %v866_v5, %v633_v59  ;;  %v1283_v25 = vsel %vm1258_vm1, %v1280_v61, %v1282_v45  ;;  %v1285_v13 = vsel %vm1258_vm1, %v1282_v45, %v1284_v14  ;;  %v3676_v40 = vmul.f32 %v4643_v53, %v340_v12 }
  0xd9   : > { %v5074_v1 = vadd.f32 %v1283_v25, %v1056_v16  ;;  %v2132_v28 = vsel %vm2115_vm2, %v2129_v20, %v2131_v50  ;;  %v2134_v59 = vsel %vm2115_vm2, %v2131_v50, %v2133_v2  ;;  %v2550_v8 = vrot.slane %v2404_v26, 4 }
  0xda   : > { %v2328_v17 = vadd.f32 %v2132_v28, %v1909_v36  ;;  %v2329_v61 = vadd.f32 %v2134_v59, %v1910_v29  ;;  %v2981_v5 = vsel %vm2534_vm3, %v2978_v21, %v2980_v0  ;;  %v2983_v12 = vsel %vm2534_vm3, %v2980_v0, %v8557_v4  ;;  %v350_v59 = vpop.permute.xlu0 %349 }
  0xdb   : > { %v3181_v35 = vadd.f32 %v2981_v5, %v4889_v27  ;;  %v3182_v20 = vadd.f32 %v2983_v12, %v4891_v44  ;;  %v3399_v16 = vrot.slane %v3257_v10, 5  ;;  %v3818_v45 = vrot.slane %v3676_v40, 6 }
  0xdc   : > { %v5090_v24 = vadd.f32 %v1285_v13, %v1057_v62  ;;  %v5093_v26 = vmul.f32 %v4611_v23, %v355_v54  ;;  %v5096_v49 = vmul.f32 %v4593_v11, %v355_v54  ;;  %v5099_v60 = vmul.f32 %v4602_v18, %v355_v54 }
  0xdd   : > { %v8646_v21 = vrot.slane %v4901_v47, 4  ;;  %v8647_v27 = vrot.slane %v5011_v43, 4  ;;  %v8648_v36 = vrot.slane %v4915_v33, 5  ;;  %v3402_v50 = vsel %vm3391_vm4, %v3399_v16, %v8556_v39 }
  0xde   : > { %v3601_v62 = vadd.f32 %v3402_v50, %v3182_v20  ;;  %v5116_v47 = vmul.f32 %v4619_v32, %v355_v54  ;;  %v8649_v13 = vrot.slane %v4923_v57, 6  ;;  %v3821_v33 = vsel %vm3810_vm5, %v3818_v45, %v8555_v58 }
  0xdf   : > { %v2551_v56 = vsel %vm2534_vm3, %v8646_v21, %v2550_v8  ;;  %v2553_v44 = vsel %vm2534_vm3, %v2550_v8, %v8647_v27  ;;  %v3400_v29 = vsel %vm3391_vm4, %v8648_v36, %v3399_v16  ;;  %v5127_v28 = vmul.f32 %v4627_v38, %v355_v54 }
  0xe0   : > { %v5113_v0 = vadd.f32 %v2551_v56, %v2328_v17  ;;  %v3600_v10 = vadd.f32 %v3400_v29, %v3181_v35  ;;  %v5118_v25 = vadd.f32 %v2553_v44, %v2329_v61  ;;  %v3819_v40 = vsel %vm3810_vm5, %v8649_v13, %v3818_v45 }
  0xe1   : > { %v4020_v17 = vadd.f32 %v3821_v33, %v3601_v62  ;;  %v869_v5 = vrot.slane %v5096_v49, 1  ;;  %v1288_v12 = vrot.slane %v5099_v60, 2  ;;  %v5132_v61 = vmul.f32 %v4632_v42, %v355_v54 }
  0xe2   : > { %v4019_v8 = vadd.f32 %v3819_v40, %v3600_v10  ;;  %v5135_v57 = vmul.f32 %v4639_v48, %v355_v54  ;;  %v5138_v35 = vmul.f32 %v4641_v52, %v355_v54  ;;  %v5141_v20 = vmul.f32 %v4643_v53, %v355_v54 }
  0xe3   : > { %v4095_v45 = vmul.f32 %v4887_v51, %v4020_v17  ;;  %v1718_v21 = vrot.slane %v5116_v47, 2  ;;  %v715_v56 = vmul.f32 %v4593_v11, %v350_v59  ;;  %v2137_v27 = vrot.slane %v5127_v28, 3 }
  0xe4   : > { %v4094_v16 = vmul.f32 %v4887_v51, %v4019_v8  ;;  %v1134_v44 = vmul.f32 %v4602_v18, %v350_v59  ;;  %v1569_v36 = vmul.f32 %v4619_v32, %v350_v59  ;;  %v1987_v29 = vmul.f32 %v4627_v38, %v350_v59 }
  0xe5   : > { %v4170_v54 = vadd.f32 %v4910_v37, %v4095_v45  ;;  %v635_v10 = vmul.f32 %v4611_v23, %v350_v59  ;;  %v867_v62 = vrot.slane %v715_v56, 1  ;;  %v2406_v33 = vmul.f32 %v4632_v42, %v350_v59 }
  0xe6   : > { %v4169_v50 = vadd.f32 %v4910_v37, %v4094_v16  ;;  %v1286_v13 = vrot.slane %v1134_v44, 2  ;;  %v1716_v40 = vrot.slane %v1569_v36, 2  ;;  %v2841_v8 = vmul.f32 %v4639_v48, %v350_v59 }
  0xe7   : > { %v4238_v58 = vmax.f32 %v4170_v54, 0.0  ;;  %v868_v39 = vsel %vm839_vm0, %v865_v9, %v867_v62  ;;  %v870_v16 = vsel %vm839_vm0, %v867_v62, %v869_v5  ;;  %v2135_v44 = vrot.slane %v1987_v29, 3 }
  0xe8   : > { %v4237_v17 = vmax.f32 %v4169_v50, 0.0  ;;  %v1058_v45 = vadd.f32 %v868_v39, %v4996_v7  ;;  %v1059_v4 = vadd.f32 %v870_v16, %v635_v10  ;;  %v1289_v56 = vsel %vm1258_vm1, %v1286_v13, %v1288_v12 }
  0xe9   : > { %4306 = vst [vmem:[%s4932_s21 + $0x20] sm:$0xff] %v4238_v58  ;;  %v2986_v36 = vrot.slane %v5135_v57, 4  ;;  %v1287_v19 = vsel %vm1258_vm1, %v1284_v14, %v1286_v13  ;;  %v1717_v9 = vsel %vm1258_vm1, %v1714_v46, %v1716_v40  ;;  %v1719_v7 = vsel %vm1258_vm1, %v1716_v40, %v1718_v21  ;;  %v365_v13 = vpop.permute.xlu1 %364 }
  0xea   : > { %4305 = vst [vmem:[%s4932_s21 + $0x18] sm:$0xff] %v4237_v17  ;;  %v5178_v39 = vadd.f32 %v1287_v19, %v1058_v45  ;;  %v5180_v50 = vadd.f32 %v1289_v56, %v1059_v4  ;;  %v1911_v58 = vadd.f32 %v1717_v9, %v4967_v63  ;;  %v1912_v29 = vadd.f32 %v1719_v7, %v4972_v55 }
  0xeb   : > { %v8559_v30 = vrot.slane %v5132_v61, 4  ;;  %v3405_v14 = vrot.slane %v5138_v35, 5  ;;  %v2984_v54 = vrot.slane %v2841_v8, 4  ;;  %v3259_v3 = vmul.f32 %v4641_v52, %v350_v59 }
  0xec   : > { %v8558_v46 = vrot.slane %v5141_v20, 6  ;;  %v2136_v10 = vsel %vm2115_vm2, %v2133_v2, %v2135_v44  ;;  %v2554_v62 = vrot.slane %v2406_v33, 4  ;;  %v3678_v4 = vmul.f32 %v4643_v53, %v350_v59 }
  0xed   : > { %v2138_v63 = vsel %vm2115_vm2, %v2135_v44, %v2137_v27  ;;  %v8650_v55 = vrot.slane %v5016_v41, 4  ;;  %v2987_v8 = vsel %vm2534_vm3, %v2984_v54, %v2986_v36  ;;  %v3403_v17 = vrot.slane %v3259_v3, 5 }
  0xee   : > { %v2330_v34 = vadd.f32 %v2136_v10, %v1911_v58  ;;  %v2331_v16 = vadd.f32 %v2138_v63, %v1912_v29  ;;  %v3184_v59 = vadd.f32 %v2987_v8, %v5013_v15  ;;  %v8651_v33 = vrot.slane %v5036_v22, 5 }
  0xef   : > { %v2985_v40 = vsel %vm2534_vm3, %v8650_v55, %v2984_v54  ;;  %v3406_v41 = vsel %vm3391_vm4, %v3403_v17, %v3405_v14  ;;  %v3822_v56 = vrot.slane %v3678_v4, 6  ;;  %v5210_v44 = vmul.f32 %v4593_v11, %v365_v13  ;;  %v360_v55 = vpop.permute.xlu0 %359 }
  0xf0   : > { %v3183_v2 = vadd.f32 %v2985_v40, %v4993_v6  ;;  %v3404_v45 = vsel %vm3391_vm4, %v8651_v33, %v3403_v17  ;;  %v3603_v9 = vadd.f32 %v3406_v41, %v3184_v59  ;;  %v5213_v7 = vmul.f32 %v4602_v18, %v365_v13 }
  0xf1   : > { %v5216_v6 = vmul.f32 %v4619_v32, %v365_v13  ;;  %v8652_v15 = vrot.slane %v5039_v31, 6  ;;  %v3825_v58 = vsel %vm3810_vm5, %v3822_v56, %v8558_v46  ;;  %v5225_v29 = vmul.f32 %v4627_v38, %v365_v13 }
  0xf2   : > { %v3602_v19 = vadd.f32 %v3404_v45, %v3183_v2  ;;  %v5228_v54 = vmul.f32 %v4632_v42, %v365_v13  ;;  %v8653_v3 = vrot.slane %v5011_v43, 4  ;;  %v2557_v31 = vsel %vm2534_vm3, %v2554_v62, %v8559_v30 }
  0xf3   : > { %v3823_v22 = vsel %vm3810_vm5, %v8652_v15, %v3822_v56  ;;  %v4022_v63 = vadd.f32 %v3825_v58, %v3603_v9  ;;  %v5238_v8 = vadd.f32 %v2557_v31, %v2331_v16  ;;  %v5241_v17 = vmul.f32 %v4611_v23, %v365_v13 }
  0xf4   : > { %v2555_v10 = vsel %vm2534_vm3, %v8653_v3, %v2554_v62  ;;  %v4021_v4 = vadd.f32 %v3823_v22, %v3602_v19  ;;  %v8560_v2 = vrot.slane %v5210_v44, 1  ;;  %v1292_v33 = vrot.slane %v5213_v7, 2 }
  0xf5   : > { %v5236_v40 = vadd.f32 %v2555_v10, %v2330_v34  ;;  %v4097_v59 = vmul.f32 %v4887_v51, %v4022_v63  ;;  %v8561_v62 = vrot.slane %v5216_v6, 2  ;;  %v2141_v45 = vrot.slane %v5225_v29, 3 }
  0xf6   : > { %v4096_v43 = vmul.f32 %v4887_v51, %v4021_v4  ;;  %v717_v16 = vmul.f32 %v4593_v11, %v360_v55  ;;  %v1136_v41 = vmul.f32 %v4602_v18, %v360_v55  ;;  %v5255_v9 = vmul.f32 %v4639_v48, %v365_v13 }
  0xf7   : > { %v4172_v19 = vadd.f32 %v4910_v37, %v4097_v59  ;;  %v1571_v15 = vmul.f32 %v4619_v32, %v360_v55  ;;  %v5259_v22 = vmul.f32 %v4641_v52, %v365_v13  ;;  %v5262_v58 = vmul.f32 %v4643_v53, %v365_v13 }
  0xf8   : > { %v4171_v56 = vadd.f32 %v4910_v37, %v4096_v43  ;;  %v871_v3 = vrot.slane %v717_v16, 1  ;;  %v1989_v10 = vmul.f32 %v4627_v38, %v360_v55  ;;  %v2843_v43 = vmul.f32 %v4639_v48, %v360_v55 }
  0xf9   : > { %v4240_v4 = vmax.f32 %v4172_v19, 0.0  ;;  %v1720_v63 = vrot.slane %v1571_v15, 2  ;;  %v637_v59 = vmul.f32 %v4611_v23, %v360_v55  ;;  %v1290_v46 = vrot.slane %v1136_v41, 2  ;;  %v375_v41 = vpop.permute.xlu1 %374 }
  0xfa   : > { %v4239_v31 = vmax.f32 %v4171_v56, 0.0  ;;  %v872_v34 = vsel %vm839_vm0, %v869_v5, %v871_v3  ;;  %v2408_v30 = vmul.f32 %v4632_v42, %v360_v55  ;;  %v2990_v13 = vrot.slane %v5255_v9, 4 }
  0xfb   : > { %4308 = vst [vmem:[%s4932_s21 + $0x30] sm:$0xff] %v4240_v4  ;;  %v874_v16 = vsel %vm839_vm0, %v871_v3, %v8560_v2  ;;  %v1721_v56 = vsel %vm1258_vm1, %v1718_v21, %v1720_v63  ;;  %v1723_v49 = vsel %vm1258_vm1, %v1720_v63, %v8561_v62  ;;  %v8562_v5 = vrot.slane %v5259_v22, 5 }
  0xfc   : > { %4307 = vst [vmem:[%s4932_s21 + $0x28] sm:$0xff] %v4239_v31  ;;  %v1060_v19 = vadd.f32 %v872_v34, %v5093_v26  ;;  %v2139_v15 = vrot.slane %v1989_v10, 3  ;;  %v1913_v31 = vadd.f32 %v1721_v56, %v5074_v1  ;;  %v1914_v4 = vadd.f32 %v1723_v49, %v5090_v24 }
  0xfd   : > { %v2988_v3 = vrot.slane %v2843_v43, 4  ;;  %v3261_v47 = vmul.f32 %v4641_v52, %v360_v55  ;;  %v1061_v2 = vadd.f32 %v874_v16, %v637_v59  ;;  %v1291_v21 = vsel %vm1258_vm1, %v1288_v12, %v1290_v46 }
  0xfe   : > { %v1293_v63 = vsel %vm1258_vm1, %v1290_v46, %v1292_v33  ;;  %v2558_v62 = vrot.slane %v2408_v30, 4  ;;  %v2140_v1 = vsel %vm2115_vm2, %v2137_v27, %v2139_v15  ;;  %v2142_v24 = vsel %vm2115_vm2, %v2139_v15, %v2141_v45 }
  0xff   : > { %v2989_v26 = vsel %vm2534_vm3, %v2986_v36, %v2988_v3  ;;  %v2991_v60 = vsel %vm2534_vm3, %v2988_v3, %v2990_v13  ;;  %v3407_v46 = vrot.slane %v3261_v47, 5  ;;  %v3680_v28 = vmul.f32 %v4643_v53, %v360_v55 }
 0x100   : > { %v3185_v12 = vadd.f32 %v2989_v26, %v5113_v0  ;;  %v3186_v30 = vadd.f32 %v2991_v60, %v5118_v25  ;;  %v5310_v27 = vadd.f32 %v1291_v21, %v1060_v19  ;;  %v2332_v34 = vadd.f32 %v2140_v1, %v1913_v31 }
 0x101   : > { %v2333_v10 = vadd.f32 %v2142_v24, %v1914_v4  ;;  %v5313_v43 = vmul.f32 %v4593_v11, %v375_v41  ;;  %v3408_v57 = vsel %vm3391_vm4, %v3405_v14, %v3407_v46  ;;  %v3410_v0 = vsel %vm3391_vm4, %v3407_v46, %v8562_v5 }
 0x102   : > { %v3826_v36 = vrot.slane %v3680_v28, 6  ;;  %v5322_v25 = vmul.f32 %v4602_v18, %v375_v41  ;;  %v5324_v55 = vadd.f32 %v1293_v63, %v1061_v2  ;;  %v3604_v59 = vadd.f32 %v3408_v57, %v3185_v12  ;;  %v370_v63 = vpop.permute.xlu0 %369 }
 0x103   : > { %v3605_v16 = vadd.f32 %v3410_v0, %v3186_v30  ;;  %v5327_v56 = vmul.f32 %v4619_v32, %v375_v41  ;;  %v8654_v49 = vrot.slane %v5132_v61, 4  ;;  %v8655_v14 = vrot.slane %v5141_v20, 6 }
 0x104   : > { %v8656_v15 = vrot.slane %v5262_v58, 6  ;;  %v5339_v2 = vmul.f32 %v4627_v38, %v375_v41  ;;  %v8657_v4 = vrot.slane %v5228_v54, 4  ;;  %v5349_v20 = vmul.f32 %v4611_v23, %v375_v41 }
 0x105   : > { %v2559_v35 = vsel %vm2534_vm3, %v8654_v49, %v2558_v62  ;;  %v3827_v19 = vsel %vm3810_vm5, %v8655_v14, %v3826_v36  ;;  %v8563_v24 = vrot.slane %v5313_v43, 1  ;;  %v1296_v26 = vrot.slane %v5322_v25, 2 }
 0x106   : > { %v3829_v31 = vsel %vm3810_vm5, %v3826_v36, %v8656_v15  ;;  %v2561_v3 = vsel %vm2534_vm3, %v2558_v62, %v8657_v4  ;;  %v5344_v47 = vadd.f32 %v2559_v35, %v2332_v34  ;;  %v4023_v61 = vadd.f32 %v3827_v19, %v3604_v59 }
 0x107   : > { %v4024_v21 = vadd.f32 %v3829_v31, %v3605_v16  ;;  %v5346_v1 = vadd.f32 %v2561_v3, %v2333_v10  ;;  %v1726_v62 = vrot.slane %v5327_v56, 2  ;;  %v5357_v30 = vmul.f32 %v4632_v42, %v375_v41 }
 0x108   : > { %v4098_v60 = vmul.f32 %v4887_v51, %v4023_v61  ;;  %v2145_v46 = vrot.slane %v5339_v2, 3  ;;  %v5361_v28 = vmul.f32 %v4639_v48, %v375_v41  ;;  %v5364_v34 = vmul.f32 %v4641_v52, %v375_v41 }
 0x109   : > { %v4099_v12 = vmul.f32 %v4887_v51, %v4024_v21  ;;  %v719_v10 = vmul.f32 %v4593_v11, %v370_v63  ;;  %v1138_v36 = vmul.f32 %v4602_v18, %v370_v63  ;;  %v1573_v59 = vmul.f32 %v4619_v32, %v370_v63 }
 0x10a   : > { %v4173_v57 = vadd.f32 %v4910_v37, %v4098_v60  ;;  %v5372_v16 = vmul.f32 %v4643_v53, %v375_v41  ;;  %v639_v49 = vmul.f32 %v4611_v23, %v370_v63  ;;  %v1991_v14 = vmul.f32 %v4627_v38, %v370_v63 }
 0x10b   : > { %v4174_v0 = vadd.f32 %v4910_v37, %v4099_v12  ;;  %v875_v35 = vrot.slane %v719_v10, 1  ;;  %v1724_v31 = vrot.slane %v1573_v59, 2  ;;  %v2410_v4 = vmul.f32 %v4632_v42, %v370_v63 }
 0x10c   : > { %v4241_v19 = vmax.f32 %v4173_v57, 0.0  ;;  %v8658_v3 = vrot.slane %v5210_v44, 1  ;;  %v1294_v41 = vrot.slane %v1138_v36, 2  ;;  %v2845_v60 = vmul.f32 %v4639_v48, %v370_v63 }
 0x10d   : > { %v4242_v15 = vmax.f32 %v4174_v0, 0.0  ;;  %v878_v21 = vsel %vm839_vm0, %v875_v35, %v8563_v24  ;;  %v8565_v12 = vrot.slane %v5357_v30, 4  ;;  %v2994_v10 = vrot.slane %v5361_v28, 4 }
 0x10e   : > { %v876_v61 = vsel %vm839_vm0, %v8658_v3, %v875_v35  ;;  %4309 = vst [vmem:[%s4932_s21 + $0x38] sm:$0xff] %v4241_v19  ;;  %v2143_v0 = vrot.slane %v1991_v14, 3  ;;  %v3413_v44 = vrot.slane %v5364_v34, 5  ;;  %v1063_v59 = vadd.f32 %v878_v21, %v639_v49 }
 0x10f   : > { %4310 = vst [vmem:[%s4932_s21 + $0x40] sm:$0xff] %v4242_v15  ;;  %v1062_v57 = vadd.f32 %v876_v61, %v5241_v17  ;;  %v8659_v3 = vrot.slane %v5216_v6, 2  ;;  %v1727_v36 = vsel %vm1258_vm1, %v1724_v31, %v1726_v62  ;;  %v8564_v35 = vrot.slane %v5372_v16, 6 }
 0x110   : > { %v1916_v15 = vadd.f32 %v1727_v36, %v5180_v50  ;;  %v2562_v24 = vrot.slane %v2410_v4, 4  ;;  %v1295_v17 = vsel %vm1258_vm1, %v1292_v33, %v1294_v41  ;;  %v1297_v6 = vsel %vm1258_vm1, %v1294_v41, %v1296_v26  ;;  %v385_v33 = vpop.permute.xlu1 %384 }
 0x111   : > { %v1725_v5 = vsel %vm1258_vm1, %v8659_v3, %v1724_v31  ;;  %v2992_v49 = vrot.slane %v2845_v60, 4  ;;  %v3263_v14 = vmul.f32 %v4641_v52, %v370_v63  ;;  %v5406_v61 = vadd.f32 %v1295_v17, %v1062_v57 }
 0x112   : > { %v1915_v19 = vadd.f32 %v1725_v5, %v5178_v39  ;;  %v2144_v39 = vsel %vm2115_vm2, %v2141_v45, %v2143_v0  ;;  %v2146_v50 = vsel %vm2115_vm2, %v2143_v0, %v2145_v46  ;;  %v3682_v7 = vmul.f32 %v4643_v53, %v370_v63 }
 0x113   : > { %v5415_v5 = vadd.f32 %v1297_v6, %v1063_v59  ;;  %v2993_v31 = vsel %vm2534_vm3, %v2990_v13, %v2992_v49  ;;  %v2995_v4 = vsel %vm2534_vm3, %v2992_v49, %v2994_v10  ;;  %v3411_v29 = vrot.slane %v3263_v14, 5 }
 0x114   : > { %v2334_v21 = vadd.f32 %v2144_v39, %v1915_v19  ;;  %v2335_v45 = vadd.f32 %v2146_v50, %v1916_v15  ;;  %v3187_v41 = vadd.f32 %v2993_v31, %v5236_v40  ;;  %v3188_v60 = vadd.f32 %v2995_v4, %v5238_v8  ;;  %v380_v50 = vpop.permute.xlu0 %379 }
 0x115   : > { %v8660_v63 = vrot.slane %v5259_v22, 5  ;;  %v3414_v9 = vsel %vm3391_vm4, %v3411_v29, %v3413_v44  ;;  %v3830_v13 = vrot.slane %v3682_v7, 6  ;;  %v5432_v0 = vmul.f32 %v4593_v11, %v385_v33 }
 0x116   : > { %v3607_v3 = vadd.f32 %v3414_v9, %v3188_v60  ;;  %v5435_v36 = vmul.f32 %v4602_v18, %v385_v33  ;;  %v5438_v40 = vmul.f32 %v4619_v32, %v385_v33  ;;  %v8661_v8 = vrot.slane %v5262_v58, 6 }
 0x117   : > { %v3412_v57 = vsel %vm3391_vm4, %v8660_v63, %v3411_v29  ;;  %v3833_v19 = vsel %vm3810_vm5, %v3830_v13, %v8564_v35  ;;  %v5447_v15 = vmul.f32 %v4627_v38, %v385_v33  ;;  %v5450_v17 = vmul.f32 %v4632_v42, %v385_v33 }
 0x118   : > { %v3606_v59 = vadd.f32 %v3412_v57, %v3187_v41  ;;  %v3831_v22 = vsel %vm3810_vm5, %v8661_v8, %v3830_v13  ;;  %v8662_v6 = vrot.slane %v5228_v54, 4  ;;  %v2565_v58 = vsel %vm2534_vm3, %v2562_v24, %v8565_v12 }
 0x119   : > { %v4026_v39 = vadd.f32 %v3833_v19, %v3607_v3  ;;  %v5460_v31 = vadd.f32 %v2565_v58, %v2335_v45  ;;  %v5463_v4 = vmul.f32 %v4611_v23, %v385_v33  ;;  %v8566_v29 = vrot.slane %v5432_v0, 1 }
 0x11a   : > { %v2563_v49 = vsel %vm2534_vm3, %v8662_v6, %v2562_v24  ;;  %v4025_v14 = vadd.f32 %v3831_v22, %v3606_v59  ;;  %v1300_v60 = vrot.slane %v5435_v36, 2  ;;  %v8567_v24 = vrot.slane %v5438_v40, 2 }
 0x11b   : > { %v5458_v7 = vadd.f32 %v2563_v49, %v2334_v21  ;;  %v4101_v41 = vmul.f32 %v4887_v51, %v4026_v39  ;;  %v2149_v63 = vrot.slane %v5447_v15, 3  ;;  %v721_v45 = vmul.f32 %v4593_v11, %v380_v50 }
 0x11c   : > { %v4100_v54 = vmul.f32 %v4887_v51, %v4025_v14  ;;  %v1140_v57 = vmul.f32 %v4602_v18, %v380_v50  ;;  %v5477_v59 = vmul.f32 %v4639_v48, %v385_v33  ;;  %v1575_v3 = vmul.f32 %v4619_v32, %v380_v50 }
 0x11d   : > { %v4176_v13 = vadd.f32 %v4910_v37, %v4101_v41  ;;  %v5481_v8 = vmul.f32 %v4641_v52, %v385_v33  ;;  %v5484_v22 = vmul.f32 %v4643_v53, %v385_v33  ;;  %v879_v19 = vrot.slane %v721_v45, 1 }
 0x11e   : > { %v4175_v9 = vadd.f32 %v4910_v37, %v4100_v54  ;;  %v1993_v6 = vmul.f32 %v4627_v38, %v380_v50  ;;  %v1728_v14 = vrot.slane %v1575_v3, 2  ;;  %v2847_v39 = vmul.f32 %v4639_v48, %v380_v50 }
 0x11f   : > { %v4244_v58 = vmax.f32 %v4176_v13, 0.0  ;;  %v641_v54 = vmul.f32 %v4611_v23, %v380_v50  ;;  %v8663_v41 = vrot.slane %v5313_v43, 1  ;;  %v1298_v35 = vrot.slane %v1140_v57, 2  ;;  %v395_v13 = vpop.permute.xlu1 %394 }
 0x120   : > { %v4243_v49 = vmax.f32 %v4175_v9, 0.0  ;;  %v2412_v12 = vmul.f32 %v4632_v42, %v380_v50  ;;  %v2998_v33 = vrot.slane %v5477_v59, 4  ;;  %v882_v45 = vsel %vm839_vm0, %v879_v19, %v8566_v29 }
 0x121   : > { %v880_v21 = vsel %vm839_vm0, %v8663_v41, %v879_v19  ;;  %4312 = vst [vmem:[%s4932_s21 + $0x50] sm:$0xff] %v4244_v58  ;;  %v1729_v9 = vsel %vm1258_vm1, %v1726_v62, %v1728_v14  ;;  %v1731_v43 = vsel %vm1258_vm1, %v1728_v14, %v8567_v24  ;;  %v3417_v57 = vrot.slane %v5481_v8, 5 }
 0x122   : > { %4311 = vst [vmem:[%s4932_s21 + $0x48] sm:$0xff] %v4243_v49  ;;  %v1064_v3 = vadd.f32 %v880_v21, %v5349_v20  ;;  %v2147_v49 = vrot.slane %v1993_v6, 3  ;;  %v1917_v58 = vadd.f32 %v1729_v9, %v5310_v27  ;;  %v1918_v41 = vadd.f32 %v1731_v43, %v5324_v55 }
 0x123   : > { %v2996_v19 = vrot.slane %v2847_v39, 4  ;;  %v3265_v56 = vmul.f32 %v4641_v52, %v380_v50  ;;  %v1065_v29 = vadd.f32 %v882_v45, %v641_v54  ;;  %v1299_v62 = vsel %vm1258_vm1, %v1296_v26, %v1298_v35 }
 0x124   : > { %v1301_v14 = vsel %vm1258_vm1, %v1298_v35, %v1300_v60  ;;  %v2566_v24 = vrot.slane %v2412_v12, 4  ;;  %v2148_v27 = vsel %vm2115_vm2, %v2145_v46, %v2147_v49  ;;  %v2150_v55 = vsel %vm2115_vm2, %v2147_v49, %v2149_v63 }
 0x125   : > { %v2997_v25 = vsel %vm2534_vm3, %v2994_v10, %v2996_v19  ;;  %v2999_v20 = vsel %vm2534_vm3, %v2996_v19, %v2998_v33  ;;  %v3415_v35 = vrot.slane %v3265_v56, 5  ;;  %v3684_v2 = vmul.f32 %v4643_v53, %v380_v50 }
 0x126   : > { %v3189_v26 = vadd.f32 %v2997_v25, %v5344_v47  ;;  %v3190_v12 = vadd.f32 %v2999_v20, %v5346_v1  ;;  %v5532_v46 = vadd.f32 %v1299_v62, %v1064_v3  ;;  %v2336_v21 = vadd.f32 %v2148_v27, %v1917_v58 }
 0x127   : > { %v2337_v6 = vadd.f32 %v2150_v55, %v1918_v41  ;;  %v5535_v39 = vmul.f32 %v4593_v11, %v395_v13  ;;  %v3416_v28 = vsel %vm3391_vm4, %v3413_v44, %v3415_v35  ;;  %v3418_v47 = vsel %vm3391_vm4, %v3415_v35, %v3417_v57 }
 0x128   : > { %v3834_v10 = vrot.slane %v3684_v2, 6  ;;  %v5544_v1 = vmul.f32 %v4602_v18, %v395_v13  ;;  %v5546_v50 = vadd.f32 %v1301_v14, %v1065_v29  ;;  %v3608_v54 = vadd.f32 %v3416_v28, %v3189_v26  ;;  %v390_v14 = vpop.permute.xlu0 %389 }
 0x129   : > { %v3609_v45 = vadd.f32 %v3418_v47, %v3190_v12  ;;  %v5549_v9 = vmul.f32 %v4619_v32, %v395_v13  ;;  %v8664_v43 = vrot.slane %v5357_v30, 4  ;;  %v8665_v44 = vrot.slane %v5372_v16, 6 }
 0x12a   : > { %v8666_v49 = vrot.slane %v5484_v22, 6  ;;  %v5561_v29 = vmul.f32 %v4627_v38, %v395_v13  ;;  %v8667_v41 = vrot.slane %v5450_v17, 4  ;;  %v5571_v16 = vmul.f32 %v4611_v23, %v395_v13 }
 0x12b   : > { %v2567_v34 = vsel %vm2534_vm3, %v8664_v43, %v2566_v24  ;;  %v3835_v3 = vsel %vm3810_vm5, %v8665_v44, %v3834_v10  ;;  %v885_v55 = vrot.slane %v5535_v39, 1  ;;  %v1304_v25 = vrot.slane %v5544_v1, 2 }
 0x12c   : > { %v3837_v58 = vsel %vm3810_vm5, %v3834_v10, %v8666_v49  ;;  %v2569_v19 = vsel %vm2534_vm3, %v2566_v24, %v8667_v41  ;;  %v5566_v56 = vadd.f32 %v2567_v34, %v2336_v21  ;;  %v4027_v30 = vadd.f32 %v3835_v3, %v3608_v54 }
 0x12d   : > { %v4028_v62 = vadd.f32 %v3837_v58, %v3609_v45  ;;  %v5568_v27 = vadd.f32 %v2569_v19, %v2337_v6  ;;  %v1734_v24 = vrot.slane %v5549_v9, 2  ;;  %v5579_v12 = vmul.f32 %v4632_v42, %v395_v13 }
 0x12e   : > { %v4102_v20 = vmul.f32 %v4887_v51, %v4027_v30  ;;  %v2153_v35 = vrot.slane %v5561_v29, 3  ;;  %v5583_v2 = vmul.f32 %v4639_v48, %v395_v13  ;;  %v5586_v21 = vmul.f32 %v4641_v52, %v395_v13 }
 0x12f   : > { %v4103_v26 = vmul.f32 %v4887_v51, %v4028_v62  ;;  %v723_v6 = vmul.f32 %v4593_v11, %v390_v14  ;;  %v1142_v47 = vmul.f32 %v4602_v18, %v390_v14  ;;  %v1577_v10 = vmul.f32 %v4619_v32, %v390_v14 }
 0x130   : > { %v4177_v28 = vadd.f32 %v4910_v37, %v4102_v20  ;;  %v5594_v54 = vmul.f32 %v4643_v53, %v395_v13  ;;  %v643_v45 = vmul.f32 %v4611_v23, %v390_v14  ;;  %v1995_v34 = vmul.f32 %v4627_v38, %v390_v14 }
 0x131   : > { %v4178_v51 = vadd.f32 %v4910_v37, %v4103_v26  ;;  %v883_v43 = vrot.slane %v723_v6, 1  ;;  %v1732_v49 = vrot.slane %v1577_v10, 2  ;;  %v2414_v58 = vmul.f32 %v4632_v42, %v390_v14 }
 0x132   : > { %v4245_v44 = vmax.f32 %v4177_v28, 0.0  ;;  %v8668_v37 = vrot.slane %v5432_v0, 1  ;;  %v1302_v13 = vrot.slane %v1142_v47, 2  ;;  %v2849_v30 = vmul.f32 %v4639_v48, %v390_v14 }
 0x133   : > { %v4246_v3 = vmax.f32 %v4178_v51, 0.0  ;;  %v886_v19 = vsel %vm839_vm0, %v883_v43, %v885_v55  ;;  %v8569_v62 = vrot.slane %v5579_v12, 4  ;;  %v3002_v20 = vrot.slane %v5583_v2, 4 }
 0x134   : > { %v884_v41 = vsel %vm839_vm0, %v8668_v37, %v883_v43  ;;  %4313 = vst [vmem:[%s4932_s21 + $0x58] sm:$0xff] %v4245_v44  ;;  %v2151_v6 = vrot.slane %v1995_v34, 3  ;;  %v3421_v0 = vrot.slane %v5586_v21, 5  ;;  %v1067_v28 = vadd.f32 %v886_v19, %v643_v45 }
 0x135   : > { %4314 = vst [vmem:[%s4932_s21 + $0x60] sm:$0xff] %v4246_v3  ;;  %v1066_v26 = vadd.f32 %v884_v41, %v5463_v4  ;;  %v8669_v51 = vrot.slane %v5438_v40, 2  ;;  %v1735_v47 = vsel %vm1258_vm1, %v1732_v49, %v1734_v24  ;;  %v8568_v43 = vrot.slane %v5594_v54, 6 }
 0x136   : > { %v1920_v3 = vadd.f32 %v1735_v47, %v5415_v5  ;;  %v2570_v37 = vrot.slane %v2414_v58, 4  ;;  %v1303_v4 = vsel %vm1258_vm1, %v1300_v60, %v1302_v13  ;;  %v1305_v40 = vsel %vm1258_vm1, %v1302_v13, %v1304_v25  ;;  %v405_v60 = vpop.permute.xlu1 %404 }
 0x137   : > { %v1733_v10 = vsel %vm1258_vm1, %v8669_v51, %v1732_v49  ;;  %v3000_v45 = vrot.slane %v2849_v30, 4  ;;  %v3267_v34 = vmul.f32 %v4641_v52, %v390_v14  ;;  %v5628_v41 = vadd.f32 %v1303_v4, %v1066_v26 }
 0x138   : > { %v1919_v44 = vadd.f32 %v1733_v10, %v5406_v61  ;;  %v2152_v61 = vsel %vm2115_vm2, %v2149_v63, %v2151_v6  ;;  %v2154_v5 = vsel %vm2115_vm2, %v2151_v6, %v2153_v35  ;;  %v3686_v36 = vmul.f32 %v4643_v53, %v390_v14 }
 0x139   : > { %v5637_v49 = vadd.f32 %v1305_v40, %v1067_v28  ;;  %v3001_v58 = vsel %vm2534_vm3, %v2998_v33, %v3000_v45  ;;  %v3003_v19 = vsel %vm2534_vm3, %v3000_v45, %v3002_v20  ;;  %v3419_v15 = vrot.slane %v3267_v34, 5  ;;  %v400_v34 = vpop.permute.xlu0 %399 }
 0x13a   : > { %v2338_v13 = vadd.f32 %v2152_v61, %v1919_v44  ;;  %v2339_v63 = vadd.f32 %v2154_v5, %v1920_v3  ;;  %v3191_v30 = vadd.f32 %v3001_v58, %v5458_v7  ;;  %v3192_v26 = vadd.f32 %v3003_v19, %v5460_v31 }
 0x13b   : > { %v3420_v14 = vsel %vm3391_vm4, %v3417_v57, %v3419_v15  ;;  %v3422_v59 = vsel %vm3391_vm4, %v3419_v15, %v3421_v0  ;;  %v3838_v33 = vrot.slane %v3686_v36, 6  ;;  %v5654_v6 = vmul.f32 %v4593_v11, %v405_v60 }
 0x13c   : > { %v3610_v28 = vadd.f32 %v3420_v14, %v3191_v30  ;;  %v3611_v51 = vadd.f32 %v3422_v59, %v3192_v26  ;;  %v5657_v10 = vmul.f32 %v4602_v18, %v405_v60  ;;  %v5660_v7 = vmul.f32 %v4619_v32, %v405_v60  ;;  %v5704_v59 = vld [vmem:[%s8547_s3] ss:$0 sm:$0xff] }
 0x13d   : > { %v8670_v31 = vrot.slane %v5484_v22, 6  ;;  %v3841_v57 = vsel %vm3810_vm5, %v3838_v33, %v8568_v43  ;;  %v5669_v47 = vmul.f32 %v4627_v38, %v405_v60  ;;  %v5672_v44 = vmul.f32 %v4632_v42, %v405_v60 }
 0x13e   : > { %v8671_v3 = vrot.slane %v5450_v17, 4  ;;  %v2573_v22 = vsel %vm2534_vm3, %v2570_v37, %v8569_v62  ;;  %v4030_v45 = vadd.f32 %v3841_v57, %v3611_v51  ;;  %v5685_v36 = vmul.f32 %v4611_v23, %v405_v60  ;;  %v5691_v17 = vld [vmem:[%s8546_s2] ss:$0 sm:$0xff] }
 0x13f   : > { %v3839_v8 = vsel %vm3810_vm5, %v8670_v31, %v3838_v33  ;;  %v5682_v5 = vadd.f32 %v2573_v22, %v2339_v63  ;;  %v8570_v58 = vrot.slane %v5654_v6, 1  ;;  %v1308_v15 = vrot.slane %v5657_v10, 2 }
 0x140   : > { %v2571_v4 = vsel %vm2534_vm3, %v8671_v3, %v2570_v37  ;;  %v4029_v40 = vadd.f32 %v3839_v8, %v3610_v28  ;;  %v4105_v37 = vmul.f32 %v5691_v17, %v4030_v45  ;;  %v2157_v63 = vrot.slane %v5669_v47, 3 }
 0x141   : > { %v5680_v61 = vadd.f32 %v2571_v4, %v2338_v13  ;;  %v8571_v13 = vrot.slane %v5660_v7, 2  ;;  %v725_v26 = vmul.f32 %v4593_v11, %v400_v34  ;;  %v1144_v14 = vmul.f32 %v4602_v18, %v400_v34 }
 0x142   : > { %v4104_v19 = vmul.f32 %v5691_v17, %v4029_v40  ;;  %v4180_v28 = vadd.f32 %v5704_v59, %v4105_v37  ;;  %v5709_v51 = vmul.f32 %v4639_v48, %v405_v60  ;;  %v1579_v31 = vmul.f32 %v4619_v32, %v400_v34 }
 0x143   : > { %v5713_v8 = vmul.f32 %v4641_v52, %v405_v60  ;;  %v5716_v57 = vmul.f32 %v4643_v53, %v405_v60  ;;  %v887_v3 = vrot.slane %v725_v26, 1  ;;  %v1997_v4 = vmul.f32 %v4627_v38, %v400_v34 }
 0x144   : > { %v4179_v33 = vadd.f32 %v5704_v59, %v4104_v19  ;;  %v4248_v40 = vmax.f32 %v4180_v28, 0.0  ;;  %v1736_v45 = vrot.slane %v1579_v31, 2  ;;  %v2851_v19 = vmul.f32 %v4639_v48, %v400_v34 }
 0x145   : > { %v645_v37 = vmul.f32 %v4611_v23, %v400_v34  ;;  %v888_v30 = vsel %vm839_vm0, %v885_v55, %v887_v3  ;;  %v1306_v43 = vrot.slane %v1144_v14, 2  ;;  %v2416_v62 = vmul.f32 %v4632_v42, %v400_v34  ;;  %v415_v14 = vpop.permute.xlu1 %414 }
 0x146   : > { %v4247_v22 = vmax.f32 %v4179_v33, 0.0  ;;  %4316 = vst [vmem:[%s4932_s21 + $0x70] sm:$0xff] %v4248_v40  ;;  %v3006_v60 = vrot.slane %v5709_v51, 4  ;;  %v890_v26 = vsel %vm839_vm0, %v887_v3, %v8570_v58  ;;  %v1737_v33 = vsel %vm1258_vm1, %v1734_v24, %v1736_v45 }
 0x147   : > { %v1739_v39 = vsel %vm1258_vm1, %v1736_v45, %v8571_v13  ;;  %v8572_v55 = vrot.slane %v5713_v8, 5  ;;  %v1068_v28 = vadd.f32 %v888_v30, %v5571_v16  ;;  %v2155_v31 = vrot.slane %v1997_v4, 3 }
 0x148   : > { %4315 = vst [vmem:[%s4932_s21 + $0x68] sm:$0xff] %v4247_v22  ;;  %v1921_v22 = vadd.f32 %v1737_v33, %v5532_v46  ;;  %v1922_v40 = vadd.f32 %v1739_v39, %v5546_v50  ;;  %v3004_v3 = vrot.slane %v2851_v19, 4  ;;  %v3269_v9 = vmul.f32 %v4641_v52, %v400_v34 }
 0x149   : > { %v1069_v58 = vadd.f32 %v890_v26, %v645_v37  ;;  %v1307_v24 = vsel %vm1258_vm1, %v1304_v25, %v1306_v43  ;;  %v1309_v45 = vsel %vm1258_vm1, %v1306_v43, %v1308_v15  ;;  %v2574_v13 = vrot.slane %v2416_v62, 4 }
 0x14a   : > { %v2156_v46 = vsel %vm2115_vm2, %v2153_v35, %v2155_v31  ;;  %v2158_v50 = vsel %vm2115_vm2, %v2155_v31, %v2157_v63  ;;  %v3005_v1 = vsel %vm2534_vm3, %v3002_v20, %v3004_v3  ;;  %v3007_v16 = vsel %vm2534_vm3, %v3004_v3, %v3006_v60 }
 0x14b   : > { %v3193_v25 = vadd.f32 %v3005_v1, %v5566_v56  ;;  %v3194_v62 = vadd.f32 %v3007_v16, %v5568_v27  ;;  %v3423_v43 = vrot.slane %v3269_v9, 5  ;;  %v3688_v29 = vmul.f32 %v4643_v53, %v400_v34 }
 0x14c   : > { %v5764_v35 = vadd.f32 %v1307_v24, %v1068_v28  ;;  %v2340_v30 = vadd.f32 %v2156_v46, %v1921_v22  ;;  %v2341_v4 = vadd.f32 %v2158_v50, %v1922_v40  ;;  %v5767_v19 = vmul.f32 %v4593_v11, %v415_v14 }
 0x14d   : > { %v3424_v2 = vsel %vm3391_vm4, %v3421_v0, %v3423_v43  ;;  %v3426_v56 = vsel %vm3391_vm4, %v3423_v43, %v8572_v55  ;;  %v3842_v20 = vrot.slane %v3688_v29, 6  ;;  %v5776_v27 = vmul.f32 %v4602_v18, %v415_v14 }
 0x14e   : > { %v5778_v34 = vadd.f32 %v1309_v45, %v1069_v58  ;;  %v3612_v37 = vadd.f32 %v3424_v2, %v3193_v25  ;;  %v3613_v26 = vadd.f32 %v3426_v56, %v3194_v62  ;;  %v5781_v33 = vmul.f32 %v4619_v32, %v415_v14  ;;  %v410_v45 = vpop.permute.xlu0 %409 }
 0x14f   : > { %v8672_v39 = vrot.slane %v5579_v12, 4  ;;  %v8673_v0 = vrot.slane %v5594_v54, 6  ;;  %v8674_v31 = vrot.slane %v5716_v57, 6  ;;  %v5793_v58 = vmul.f32 %v4627_v38, %v415_v14 }
 0x150   : > { %v8675_v40 = vrot.slane %v5672_v44, 4  ;;  %v5803_v54 = vmul.f32 %v4611_v23, %v415_v14  ;;  %v8573_v50 = vrot.slane %v5767_v19, 1  ;;  %v1312_v1 = vrot.slane %v5776_v27, 2 }
 0x151   : > { %v2575_v21 = vsel %vm2534_vm3, %v8672_v39, %v2574_v13  ;;  %v3843_v28 = vsel %vm3810_vm5, %v8673_v0, %v3842_v20  ;;  %v3845_v22 = vsel %vm3810_vm5, %v3842_v20, %v8674_v31  ;;  %v5811_v62 = vmul.f32 %v4632_v42, %v415_v14 }
 0x152   : > { %v2577_v3 = vsel %vm2534_vm3, %v2574_v13, %v8675_v40  ;;  %v5798_v9 = vadd.f32 %v2575_v21, %v2340_v30  ;;  %v4031_v12 = vadd.f32 %v3843_v28, %v3612_v37  ;;  %v4032_v24 = vadd.f32 %v3845_v22, %v3613_v26 }
 0x153   : > { %v5800_v46 = vadd.f32 %v2577_v3, %v2341_v4  ;;  %v1742_v13 = vrot.slane %v5781_v33, 2  ;;  %v2161_v43 = vrot.slane %v5793_v58, 3  ;;  %v5815_v29 = vmul.f32 %v4639_v48, %v415_v14 }
 0x154   : > { %v4106_v16 = vmul.f32 %v5691_v17, %v4031_v12  ;;  %v4107_v25 = vmul.f32 %v5691_v17, %v4032_v24  ;;  %v5818_v30 = vmul.f32 %v4641_v52, %v415_v14  ;;  %v727_v4 = vmul.f32 %v4593_v11, %v410_v45 }
 0x155   : > { %v1146_v20 = vmul.f32 %v4602_v18, %v410_v45  ;;  %v1581_v37 = vmul.f32 %v4619_v32, %v410_v45  ;;  %v5826_v26 = vmul.f32 %v4643_v53, %v415_v14  ;;  %v647_v39 = vmul.f32 %v4611_v23, %v410_v45 }
 0x156   : > { %v4181_v2 = vadd.f32 %v5704_v59, %v4106_v16  ;;  %v4182_v56 = vadd.f32 %v5704_v59, %v4107_v25  ;;  %v891_v21 = vrot.slane %v727_v4, 1  ;;  %v1999_v0 = vmul.f32 %v4627_v38, %v410_v45 }
 0x157   : > { %v1740_v22 = vrot.slane %v1581_v37, 2  ;;  %v2418_v40 = vmul.f32 %v4632_v42, %v410_v45  ;;  %v8676_v3 = vrot.slane %v5654_v6, 1  ;;  %v1310_v14 = vrot.slane %v1146_v20, 2 }
 0x158   : > { %v4249_v28 = vmax.f32 %v4181_v2, 0.0  ;;  %v4250_v31 = vmax.f32 %v4182_v56, 0.0  ;;  %v894_v24 = vsel %vm839_vm0, %v891_v21, %v8573_v50  ;;  %v2853_v16 = vmul.f32 %v4639_v48, %v410_v45 }
 0x159   : > { %v892_v12 = vsel %vm839_vm0, %v8676_v3, %v891_v21  ;;  %v8575_v25 = vrot.slane %v5811_v62, 4  ;;  %v3010_v4 = vrot.slane %v5815_v29, 4  ;;  %v2159_v56 = vrot.slane %v1999_v0, 3 }
 0x15a   : > { %4317 = vst [vmem:[%s4932_s21 + $0x78] sm:$0xff] %v4249_v28  ;;  %4318 = vst [vmem:[%s4932_s21 + $0x80] sm:$0xff] %v4250_v31  ;;  %v1070_v2 = vadd.f32 %v892_v12, %v5685_v36  ;;  %v3429_v6 = vrot.slane %v5818_v30, 5  ;;  %v1071_v37 = vadd.f32 %v894_v24, %v647_v39  ;;  %v8677_v3 = vrot.slane %v5660_v7, 2 }
 0x15b   : > { %v1743_v20 = vsel %vm1258_vm1, %v1740_v22, %v1742_v13  ;;  %v8574_v21 = vrot.slane %v5826_v26, 6  ;;  %v2578_v50 = vrot.slane %v2418_v40, 4  ;;  %v1311_v36 = vsel %vm1258_vm1, %v1308_v15, %v1310_v14  ;;  %v425_v15 = vpop.permute.xlu1 %424 }
 0x15c   : > { %v1741_v55 = vsel %vm1258_vm1, %v8677_v3, %v1740_v22  ;;  %v1924_v31 = vadd.f32 %v1743_v20, %v5637_v49  ;;  %v1313_v7 = vsel %vm1258_vm1, %v1310_v14, %v1312_v1  ;;  %v3008_v39 = vrot.slane %v2853_v16, 4 }
 0x15d   : > { %v1923_v28 = vadd.f32 %v1741_v55, %v5628_v41  ;;  %v3271_v0 = vmul.f32 %v4641_v52, %v410_v45  ;;  %v5860_v12 = vadd.f32 %v1311_v36, %v1070_v2  ;;  %v2160_v41 = vsel %vm2115_vm2, %v2157_v63, %v2159_v56 }
 0x15e   : > { %v2162_v49 = vsel %vm2115_vm2, %v2159_v56, %v2161_v43  ;;  %v3690_v10 = vmul.f32 %v4643_v53, %v410_v45  ;;  %v5869_v55 = vadd.f32 %v1313_v7, %v1071_v37  ;;  %v3009_v22 = vsel %vm2534_vm3, %v3006_v60, %v3008_v39 }
 0x15f   : > { %v3011_v40 = vsel %vm2534_vm3, %v3008_v39, %v3010_v4  ;;  %v3427_v47 = vrot.slane %v3271_v0, 5  ;;  %v2342_v24 = vadd.f32 %v2160_v41, %v1923_v28  ;;  %v2343_v63 = vadd.f32 %v2162_v49, %v1924_v31  ;;  %v420_v49 = vpop.permute.xlu0 %419 }
 0x160   : > { %v3195_v14 = vadd.f32 %v3009_v22, %v5680_v61  ;;  %v3196_v16 = vadd.f32 %v3011_v40, %v5682_v5  ;;  %v8678_v45 = vrot.slane %v5713_v8, 5  ;;  %v3846_v60 = vrot.slane %v3690_v10, 6 }
 0x161   : > { %v3430_v51 = vsel %vm3391_vm4, %v3427_v47, %v3429_v6  ;;  %v5886_v56 = vmul.f32 %v4593_v11, %v425_v15  ;;  %v5889_v20 = vmul.f32 %v4602_v18, %v425_v15  ;;  %v5892_v61 = vmul.f32 %v4619_v32, %v425_v15 }
 0x162   : > { %v3428_v2 = vsel %vm3391_vm4, %v8678_v45, %v3427_v47  ;;  %v3615_v3 = vadd.f32 %v3430_v51, %v3196_v16  ;;  %v8679_v5 = vrot.slane %v5716_v57, 6  ;;  %v3849_v28 = vsel %vm3810_vm5, %v3846_v60, %v8574_v21 }
 0x163   : > { %v3614_v37 = vadd.f32 %v3428_v2, %v3195_v14  ;;  %v5901_v31 = vmul.f32 %v4627_v38, %v425_v15  ;;  %v5904_v36 = vmul.f32 %v4632_v42, %v425_v15  ;;  %v8680_v7 = vrot.slane %v5672_v44, 4 }
 0x164   : > { %v3847_v8 = vsel %vm3810_vm5, %v8679_v5, %v3846_v60  ;;  %v2581_v57 = vsel %vm2534_vm3, %v2578_v50, %v8575_v25  ;;  %v4034_v41 = vadd.f32 %v3849_v28, %v3615_v3  ;;  %v5917_v40 = vmul.f32 %v4611_v23, %v425_v15 }
 0x165   : > { %v2579_v39 = vsel %vm2534_vm3, %v8680_v7, %v2578_v50  ;;  %v4033_v0 = vadd.f32 %v3847_v8, %v3614_v37  ;;  %v5914_v22 = vadd.f32 %v2581_v57, %v2343_v63  ;;  %v8576_v47 = vrot.slane %v5886_v56, 1 }
 0x166   : > { %v5912_v10 = vadd.f32 %v2579_v39, %v2342_v24  ;;  %v4109_v14 = vmul.f32 %v5691_v17, %v4034_v41  ;;  %v1316_v16 = vrot.slane %v5889_v20, 2  ;;  %v8577_v50 = vrot.slane %v5892_v61, 2 }
 0x167   : > { %v4108_v44 = vmul.f32 %v5691_v17, %v4033_v0  ;;  %v2165_v45 = vrot.slane %v5901_v31, 3  ;;  %v729_v63 = vmul.f32 %v4593_v11, %v420_v49  ;;  %v1148_v2 = vmul.f32 %v4602_v18, %v420_v49 }
 0x168   : > { %v4184_v60 = vadd.f32 %v5704_v59, %v4109_v14  ;;  %v5931_v37 = vmul.f32 %v4639_v48, %v425_v15  ;;  %v1583_v3 = vmul.f32 %v4619_v32, %v420_v49  ;;  %v5935_v5 = vmul.f32 %v4641_v52, %v425_v15 }
 0x169   : > { %v4183_v51 = vadd.f32 %v5704_v59, %v4108_v44  ;;  %v5938_v8 = vmul.f32 %v4643_v53, %v425_v15  ;;  %v895_v28 = vrot.slane %v729_v63, 1  ;;  %v2001_v7 = vmul.f32 %v4627_v38, %v420_v49 }
 0x16a   : > { %v4252_v57 = vmax.f32 %v4184_v60, 0.0  ;;  %v1744_v0 = vrot.slane %v1583_v3, 2  ;;  %v2855_v41 = vmul.f32 %v4639_v48, %v420_v49  ;;  %v649_v44 = vmul.f32 %v4611_v23, %v420_v49  ;;  %v435_v60 = vpop.permute.xlu1 %434 }
 0x16b   : > { %v4251_v39 = vmax.f32 %v4183_v51, 0.0  ;;  %v8681_v14 = vrot.slane %v5767_v19, 1  ;;  %v1314_v21 = vrot.slane %v1148_v2, 2  ;;  %v2420_v25 = vmul.f32 %v4632_v42, %v420_v49 }
 0x16c   : > { %4320 = vst [vmem:[%s4932_s21 + $0x90] sm:$0xff] %v4252_v57  ;;  %v3014_v15 = vrot.slane %v5931_v37, 4  ;;  %v898_v63 = vsel %vm839_vm0, %v895_v28, %v8576_v47  ;;  %v1745_v51 = vsel %vm1258_vm1, %v1742_v13, %v1744_v0  ;;  %v1747_v19 = vsel %vm1258_vm1, %v1744_v0, %v8577_v50 }
 0x16d   : > { %v896_v24 = vsel %vm839_vm0, %v8681_v14, %v895_v28  ;;  %4319 = vst [vmem:[%s4932_s21 + $0x88] sm:$0xff] %v4251_v39  ;;  %v8578_v2 = vrot.slane %v5935_v5, 5  ;;  %v2163_v39 = vrot.slane %v2001_v7, 3  ;;  %v1925_v57 = vadd.f32 %v1745_v51, %v5764_v35 }
 0x16e   : > { %v1072_v3 = vadd.f32 %v896_v24, %v5803_v54  ;;  %v1926_v14 = vadd.f32 %v1747_v19, %v5778_v34  ;;  %v3012_v28 = vrot.slane %v2855_v41, 4  ;;  %v3273_v33 = vmul.f32 %v4641_v52, %v420_v49 }
 0x16f   : > { %v1073_v47 = vadd.f32 %v898_v63, %v649_v44  ;;  %v1315_v13 = vsel %vm1258_vm1, %v1312_v1, %v1314_v21  ;;  %v1317_v0 = vsel %vm1258_vm1, %v1314_v21, %v1316_v16  ;;  %v2582_v50 = vrot.slane %v2420_v25, 4 }
 0x170   : > { %v2164_v35 = vsel %vm2115_vm2, %v2161_v43, %v2163_v39  ;;  %v2166_v34 = vsel %vm2115_vm2, %v2163_v39, %v2165_v45  ;;  %v3013_v27 = vsel %vm2534_vm3, %v3010_v4, %v3012_v28  ;;  %v3015_v54 = vsel %vm2534_vm3, %v3012_v28, %v3014_v15 }
 0x171   : > { %v3197_v1 = vadd.f32 %v3013_v27, %v5798_v9  ;;  %v3198_v25 = vadd.f32 %v3015_v54, %v5800_v46  ;;  %v3431_v21 = vrot.slane %v3273_v33, 5  ;;  %v3692_v58 = vmul.f32 %v4643_v53, %v420_v49 }
 0x172   : > { %v5986_v43 = vadd.f32 %v1315_v13, %v1072_v3  ;;  %v2344_v24 = vadd.f32 %v2164_v35, %v1925_v57  ;;  %v2345_v7 = vadd.f32 %v2166_v34, %v1926_v14  ;;  %v5989_v41 = vmul.f32 %v4593_v11, %v435_v60 }
 0x173   : > { %v3432_v29 = vsel %vm3391_vm4, %v3429_v6, %v3431_v21  ;;  %v3434_v9 = vsel %vm3391_vm4, %v3431_v21, %v8578_v2  ;;  %v3850_v4 = vrot.slane %v3692_v58, 6  ;;  %v5998_v46 = vmul.f32 %v4602_v18, %v435_v60 }
 0x174   : > { %v6000_v49 = vadd.f32 %v1317_v0, %v1073_v47  ;;  %v3616_v44 = vadd.f32 %v3432_v29, %v3197_v1  ;;  %v3617_v63 = vadd.f32 %v3434_v9, %v3198_v25  ;;  %v6003_v51 = vmul.f32 %v4619_v32, %v435_v60  ;;  %v430_v0 = vpop.permute.xlu0 %429 }
 0x175   : > { %v8682_v19 = vrot.slane %v5811_v62, 4  ;;  %v8683_v6 = vrot.slane %v5826_v26, 6  ;;  %v8684_v39 = vrot.slane %v5938_v8, 6  ;;  %v6015_v47 = vmul.f32 %v4627_v38, %v435_v60 }
 0x176   : > { %v8685_v14 = vrot.slane %v5904_v36, 4  ;;  %v6025_v26 = vmul.f32 %v4611_v23, %v435_v60  ;;  %v8579_v34 = vrot.slane %v5989_v41, 1  ;;  %v1320_v27 = vrot.slane %v5998_v46, 2 }
 0x177   : > { %v2583_v30 = vsel %vm2534_vm3, %v8682_v19, %v2582_v50  ;;  %v3851_v3 = vsel %vm3810_vm5, %v8683_v6, %v3850_v4  ;;  %v3853_v57 = vsel %vm3810_vm5, %v3850_v4, %v8684_v39  ;;  %v6033_v25 = vmul.f32 %v4632_v42, %v435_v60 }
 0x178   : > { %v2585_v28 = vsel %vm2534_vm3, %v2582_v50, %v8685_v14  ;;  %v6020_v33 = vadd.f32 %v2583_v30, %v2344_v24  ;;  %v4035_v62 = vadd.f32 %v3851_v3, %v3616_v44  ;;  %v4036_v13 = vadd.f32 %v3853_v57, %v3617_v63 }
 0x179   : > { %v6022_v35 = vadd.f32 %v2585_v28, %v2345_v7  ;;  %v1750_v50 = vrot.slane %v6003_v51, 2  ;;  %v2169_v21 = vrot.slane %v6015_v47, 3  ;;  %v6037_v58 = vmul.f32 %v4639_v48, %v435_v60 }
 0x17a   : > { %v4110_v54 = vmul.f32 %v5691_v17, %v4035_v62  ;;  %v4111_v1 = vmul.f32 %v5691_v17, %v4036_v13  ;;  %v6040_v24 = vmul.f32 %v4641_v52, %v435_v60  ;;  %v731_v7 = vmul.f32 %v4593_v11, %v430_v0 }
 0x17b   : > { %v1150_v4 = vmul.f32 %v4602_v18, %v430_v0  ;;  %v1585_v44 = vmul.f32 %v4619_v32, %v430_v0  ;;  %v6048_v63 = vmul.f32 %v4643_v53, %v435_v60  ;;  %v651_v19 = vmul.f32 %v4611_v23, %v430_v0 }
 0x17c   : > { %v4185_v29 = vadd.f32 %v5704_v59, %v4110_v54  ;;  %v4186_v9 = vadd.f32 %v5704_v59, %v4111_v1  ;;  %v899_v30 = vrot.slane %v731_v7, 1  ;;  %v2003_v6 = vmul.f32 %v4627_v38, %v430_v0 }
 0x17d   : > { %v1748_v57 = vrot.slane %v1585_v44, 2  ;;  %v2422_v14 = vmul.f32 %v4632_v42, %v430_v0  ;;  %v8686_v28 = vrot.slane %v5886_v56, 1  ;;  %v1318_v60 = vrot.slane %v1150_v4, 2 }
 0x17e   : > { %v4253_v3 = vmax.f32 %v4185_v29, 0.0  ;;  %v4254_v39 = vmax.f32 %v4186_v9, 0.0  ;;  %v902_v13 = vsel %vm839_vm0, %v899_v30, %v8579_v34  ;;  %v2857_v54 = vmul.f32 %v4639_v48, %v430_v0 }
 0x17f   : > { %v900_v62 = vsel %vm839_vm0, %v8686_v28, %v899_v30  ;;  %v8581_v1 = vrot.slane %v6033_v25, 4  ;;  %v3018_v7 = vrot.slane %v6037_v58, 4  ;;  %v2167_v9 = vrot.slane %v2003_v6, 3 }
 0x180   : > { %4321 = vst [vmem:[%s4932_s21 + $0x98] sm:$0xff] %v4253_v3  ;;  %4322 = vst [vmem:[%s4932_s21 + $0xa0] sm:$0xff] %v4254_v39  ;;  %v1074_v29 = vadd.f32 %v900_v62, %v5917_v40  ;;  %v3437_v56 = vrot.slane %v6040_v24, 5  ;;  %v1075_v44 = vadd.f32 %v902_v13, %v651_v19  ;;  %v8687_v28 = vrot.slane %v5892_v61, 2 }
 0x181   : > { %v1751_v4 = vsel %vm1258_vm1, %v1748_v57, %v1750_v50  ;;  %v8580_v30 = vrot.slane %v6048_v63, 6  ;;  %v2586_v34 = vrot.slane %v2422_v14, 4  ;;  %v1319_v40 = vsel %vm1258_vm1, %v1316_v16, %v1318_v60  ;;  %v445_v16 = vpop.permute.xlu1 %444 }
 0x182   : > { %v1749_v2 = vsel %vm1258_vm1, %v8687_v28, %v1748_v57  ;;  %v1928_v39 = vadd.f32 %v1751_v4, %v5869_v55  ;;  %v1321_v61 = vsel %vm1258_vm1, %v1318_v60, %v1320_v27  ;;  %v3016_v19 = vrot.slane %v2857_v54, 4 }
 0x183   : > { %v1927_v3 = vadd.f32 %v1749_v2, %v5860_v12  ;;  %v3275_v6 = vmul.f32 %v4641_v52, %v430_v0  ;;  %v6082_v62 = vadd.f32 %v1319_v40, %v1074_v29  ;;  %v2168_v12 = vsel %vm2115_vm2, %v2165_v45, %v2167_v9 }
 0x184   : > { %v2170_v55 = vsel %vm2115_vm2, %v2167_v9, %v2169_v21  ;;  %v3694_v20 = vmul.f32 %v4643_v53, %v430_v0  ;;  %v6091_v2 = vadd.f32 %v1321_v61, %v1075_v44  ;;  %v3017_v57 = vsel %vm2534_vm3, %v3014_v15, %v3016_v19 }
 0x185   : > { %v3019_v14 = vsel %vm2534_vm3, %v3016_v19, %v3018_v7  ;;  %v3435_v31 = vrot.slane %v3275_v6, 5  ;;  %v2346_v13 = vadd.f32 %v2168_v12, %v1927_v3  ;;  %v2347_v45 = vadd.f32 %v2170_v55, %v1928_v39  ;;  %v440_v55 = vpop.permute.xlu0 %439 }
 0x186   : > { %v3199_v60 = vadd.f32 %v3017_v57, %v5912_v10  ;;  %v3200_v54 = vadd.f32 %v3019_v14, %v5914_v22  ;;  %v8688_v0 = vrot.slane %v5935_v5, 5  ;;  %v3854_v15 = vrot.slane %v3694_v20, 6 }
 0x187   : > { %v3438_v37 = vsel %vm3391_vm4, %v3435_v31, %v3437_v56  ;;  %v6108_v9 = vmul.f32 %v4593_v11, %v445_v16  ;;  %v6111_v4 = vmul.f32 %v4602_v18, %v445_v16  ;;  %v6114_v10 = vmul.f32 %v4619_v32, %v445_v16 }
 0x188   : > { %v3436_v29 = vsel %vm3391_vm4, %v8688_v0, %v3435_v31  ;;  %v3619_v28 = vadd.f32 %v3438_v37, %v3200_v54  ;;  %v8689_v22 = vrot.slane %v5938_v8, 6  ;;  %v3857_v3 = vsel %vm3810_vm5, %v3854_v15, %v8580_v30 }
 0x189   : > { %v3618_v44 = vadd.f32 %v3436_v29, %v3199_v60  ;;  %v6123_v39 = vmul.f32 %v4627_v38, %v445_v16  ;;  %v6126_v40 = vmul.f32 %v4632_v42, %v445_v16  ;;  %v8690_v61 = vrot.slane %v5904_v36, 4 }
 0x18a   : > { %v3855_v5 = vsel %vm3810_vm5, %v8689_v22, %v3854_v15  ;;  %v2589_v8 = vsel %vm2534_vm3, %v2586_v34, %v8581_v1  ;;  %v4038_v12 = vadd.f32 %v3857_v3, %v3619_v28  ;;  %v6139_v14 = vmul.f32 %v4611_v23, %v445_v16 }
 0x18b   : > { %v2587_v19 = vsel %vm2534_vm3, %v8690_v61, %v2586_v34  ;;  %v4037_v6 = vadd.f32 %v3855_v5, %v3618_v44  ;;  %v6136_v57 = vadd.f32 %v2589_v8, %v2347_v45  ;;  %v8582_v31 = vrot.slane %v6108_v9, 1 }
 0x18c   : > { %v6134_v20 = vadd.f32 %v2587_v19, %v2346_v13  ;;  %v4113_v60 = vmul.f32 %v5691_v17, %v4038_v12  ;;  %v1324_v54 = vrot.slane %v6111_v4, 2  ;;  %v8583_v34 = vrot.slane %v6114_v10, 2 }
 0x18d   : > { %v4112_v36 = vmul.f32 %v5691_v17, %v4037_v6  ;;  %v2173_v0 = vrot.slane %v6123_v39, 3  ;;  %v733_v45 = vmul.f32 %v4593_v11, %v440_v55  ;;  %v1152_v29 = vmul.f32 %v4602_v18, %v440_v55 }
 0x18e   : > { %v4188_v15 = vadd.f32 %v5704_v59, %v4113_v60  ;;  %v6153_v44 = vmul.f32 %v4639_v48, %v445_v16  ;;  %v1587_v28 = vmul.f32 %v4619_v32, %v440_v55  ;;  %v6157_v22 = vmul.f32 %v4641_v52, %v445_v16 }
 0x18f   : > { %v4187_v37 = vadd.f32 %v5704_v59, %v4112_v36  ;;  %v6160_v5 = vmul.f32 %v4643_v53, %v445_v16  ;;  %v903_v3 = vrot.slane %v733_v45, 1  ;;  %v2005_v61 = vmul.f32 %v4627_v38, %v440_v55 }
 0x190   : > { %v4256_v8 = vmax.f32 %v4188_v15, 0.0  ;;  %v1752_v6 = vrot.slane %v1587_v28, 2  ;;  %v2859_v12 = vmul.f32 %v4639_v48, %v440_v55  ;;  %v653_v36 = vmul.f32 %v4611_v23, %v440_v55  ;;  %v455_v15 = vpop.permute.xlu1 %454 }
 0x191   : > { %v4255_v19 = vmax.f32 %v4187_v37, 0.0  ;;  %v8691_v60 = vrot.slane %v5989_v41, 1  ;;  %v1322_v30 = vrot.slane %v1152_v29, 2  ;;  %v2424_v1 = vmul.f32 %v4632_v42, %v440_v55 }
 0x192   : > { %4324 = vst [vmem:[%s4932_s21 + $0xb0] sm:$0xff] %v4256_v8  ;;  %v3022_v16 = vrot.slane %v6153_v44, 4  ;;  %v906_v45 = vsel %vm839_vm0, %v903_v3, %v8582_v31  ;;  %v1753_v37 = vsel %vm1258_vm1, %v1750_v50, %v1752_v6  ;;  %v1755_v41 = vsel %vm1258_vm1, %v1752_v6, %v8583_v34 }
 0x193   : > { %v904_v13 = vsel %vm839_vm0, %v8691_v60, %v903_v3  ;;  %4323 = vst [vmem:[%s4932_s21 + $0xa8] sm:$0xff] %v4255_v19  ;;  %v8584_v29 = vrot.slane %v6157_v22, 5  ;;  %v2171_v19 = vrot.slane %v2005_v61, 3  ;;  %v1929_v8 = vadd.f32 %v1753_v37, %v5986_v43 }
 0x194   : > { %v1076_v28 = vadd.f32 %v904_v13, %v6025_v26  ;;  %v1930_v60 = vadd.f32 %v1755_v41, %v6000_v49  ;;  %v3020_v3 = vrot.slane %v2859_v12, 4  ;;  %v3277_v51 = vmul.f32 %v4641_v52, %v440_v55 }
 0x195   : > { %v1077_v31 = vadd.f32 %v906_v45, %v653_v36  ;;  %v1323_v50 = vsel %vm1258_vm1, %v1320_v27, %v1322_v30  ;;  %v1325_v6 = vsel %vm1258_vm1, %v1322_v30, %v1324_v54  ;;  %v2590_v34 = vrot.slane %v2424_v1, 4 }
 0x196   : > { %v2172_v43 = vsel %vm2115_vm2, %v2169_v21, %v2171_v19  ;;  %v2174_v49 = vsel %vm2115_vm2, %v2171_v19, %v2173_v0  ;;  %v3021_v46 = vsel %vm2534_vm3, %v3018_v7, %v3020_v3  ;;  %v3023_v26 = vsel %vm2534_vm3, %v3020_v3, %v3022_v16 }
 0x197   : > { %v3201_v27 = vadd.f32 %v3021_v46, %v6020_v33  ;;  %v3202_v1 = vadd.f32 %v3023_v26, %v6022_v35  ;;  %v3439_v30 = vrot.slane %v3277_v51, 5  ;;  %v3696_v47 = vmul.f32 %v4643_v53, %v440_v55 }
 0x198   : > { %v6208_v21 = vadd.f32 %v1323_v50, %v1076_v28  ;;  %v2348_v13 = vadd.f32 %v2172_v43, %v1929_v8  ;;  %v2349_v61 = vadd.f32 %v2174_v49, %v1930_v60  ;;  %v6211_v12 = vmul.f32 %v4593_v11, %v455_v15 }
 0x199   : > { %v3440_v58 = vsel %vm3391_vm4, %v3437_v56, %v3439_v30  ;;  %v3442_v33 = vsel %vm3391_vm4, %v3439_v30, %v8584_v29  ;;  %v3858_v7 = vrot.slane %v3696_v47, 6  ;;  %v6220_v35 = vmul.f32 %v4602_v18, %v455_v15 }
 0x19a   : > { %v6222_v55 = vadd.f32 %v1325_v6, %v1077_v31  ;;  %v3620_v36 = vadd.f32 %v3440_v58, %v3201_v27  ;;  %v3621_v45 = vadd.f32 %v3442_v33, %v3202_v1  ;;  %v6225_v37 = vmul.f32 %v4619_v32, %v455_v15  ;;  %v450_v6 = vpop.permute.xlu0 %449 }
 0x19b   : > { %v8692_v41 = vrot.slane %v6033_v25, 4  ;;  %v8693_v56 = vrot.slane %v6048_v63, 6  ;;  %v8694_v19 = vrot.slane %v6160_v5, 6  ;;  %v6237_v31 = vmul.f32 %v4627_v38, %v455_v15 }
 0x19c   : > { %v8695_v60 = vrot.slane %v6126_v40, 4  ;;  %v6247_v63 = vmul.f32 %v4611_v23, %v455_v15  ;;  %v8585_v49 = vrot.slane %v6211_v12, 1  ;;  %v1328_v46 = vrot.slane %v6220_v35, 2 }
 0x19d   : > { %v2591_v24 = vsel %vm2534_vm3, %v8692_v41, %v2590_v34  ;;  %v3859_v28 = vsel %vm3810_vm5, %v8693_v56, %v3858_v7  ;;  %v3861_v8 = vsel %vm3810_vm5, %v3858_v7, %v8694_v19  ;;  %v6255_v1 = vmul.f32 %v4632_v42, %v455_v15 }
 0x19e   : > { %v2593_v3 = vsel %vm2534_vm3, %v2590_v34, %v8695_v60  ;;  %v6242_v51 = vadd.f32 %v2591_v24, %v2348_v13  ;;  %v4039_v25 = vadd.f32 %v3859_v28, %v3620_v36  ;;  %v4040_v50 = vadd.f32 %v3861_v8, %v3621_v45 }
 0x19f   : > { %v6244_v43 = vadd.f32 %v2593_v3, %v2349_v61  ;;  %v1758_v34 = vrot.slane %v6225_v37, 2  ;;  %v2177_v30 = vrot.slane %v6237_v31, 3  ;;  %v6259_v47 = vmul.f32 %v4639_v48, %v455_v15 }
 0x1a0   : > { %v4114_v26 = vmul.f32 %v5691_v17, %v4039_v25  ;;  %v4115_v27 = vmul.f32 %v5691_v17, %v4040_v50  ;;  %v6262_v13 = vmul.f32 %v4641_v52, %v455_v15  ;;  %v735_v61 = vmul.f32 %v4593_v11, %v450_v6 }
 0x1a1   : > { %v1154_v7 = vmul.f32 %v4602_v18, %v450_v6  ;;  %v1589_v36 = vmul.f32 %v4619_v32, %v450_v6  ;;  %v6270_v45 = vmul.f32 %v4643_v53, %v455_v15  ;;  %v655_v41 = vmul.f32 %v4611_v23, %v450_v6 }
 0x1a2   : > { %v4189_v58 = vadd.f32 %v5704_v59, %v4114_v26  ;;  %v4190_v33 = vadd.f32 %v5704_v59, %v4115_v27  ;;  %v907_v24 = vrot.slane %v735_v61, 1  ;;  %v2007_v56 = vmul.f32 %v4627_v38, %v450_v6 }
 0x1a3   : > { %v1756_v8 = vrot.slane %v1589_v36, 2  ;;  %v2426_v60 = vmul.f32 %v4632_v42, %v450_v6  ;;  %v8696_v3 = vrot.slane %v6108_v9, 1  ;;  %v1326_v15 = vrot.slane %v1154_v7, 2 }
 0x1a4   : > { %v4257_v28 = vmax.f32 %v4189_v58, 0.0  ;;  %v4258_v19 = vmax.f32 %v4190_v33, 0.0  ;;  %v910_v50 = vsel %vm839_vm0, %v907_v24, %v8585_v49  ;;  %v2861_v26 = vmul.f32 %v4639_v48, %v450_v6 }
 0x1a5   : > { %v908_v25 = vsel %vm839_vm0, %v8696_v3, %v907_v24  ;;  %v2596_v27 = vrot.slane %v6255_v1, 4  ;;  %v3026_v61 = vrot.slane %v6259_v47, 4  ;;  %v2175_v33 = vrot.slane %v2007_v56, 3 }
 0x1a6   : > { %4325 = vst [vmem:[%s4932_s21 + $0xb8] sm:$0xff] %v4257_v28  ;;  %4326 = vst [vmem:[%s4932_s21 + $0xc0] sm:$0xff] %v4258_v19  ;;  %v1078_v58 = vadd.f32 %v908_v25, %v6139_v14  ;;  %v3445_v9 = vrot.slane %v6262_v13, 5  ;;  %v1079_v36 = vadd.f32 %v910_v50, %v655_v41  ;;  %v8697_v3 = vrot.slane %v6114_v10, 2 }
 0x1a7   : > { %v1759_v7 = vsel %vm1258_vm1, %v1756_v8, %v1758_v34  ;;  %v3864_v24 = vrot.slane %v6270_v45, 6  ;;  %v2594_v49 = vrot.slane %v2426_v60, 4  ;;  %v1327_v14 = vsel %vm1258_vm1, %v1324_v54, %v1326_v15  ;;  %v465_v54 = vpop.permute.xlu1 %464 }
 0x1a8   : > { %v1757_v29 = vsel %vm1258_vm1, %v8697_v3, %v1756_v8  ;;  %v1932_v19 = vadd.f32 %v1759_v7, %v6091_v2  ;;  %v1329_v10 = vsel %vm1258_vm1, %v1326_v15, %v1328_v46  ;;  %v3024_v41 = vrot.slane %v2861_v26, 4 }
 0x1a9   : > { %v1931_v28 = vadd.f32 %v1757_v29, %v6082_v62  ;;  %v3279_v56 = vmul.f32 %v4641_v52, %v450_v6  ;;  %v6304_v25 = vadd.f32 %v1327_v14, %v1078_v58  ;;  %v2176_v62 = vsel %vm2115_vm2, %v2173_v0, %v2175_v33 }
 0x1aa   : > { %v2178_v2 = vsel %vm2115_vm2, %v2175_v33, %v2177_v30  ;;  %v3698_v4 = vmul.f32 %v4643_v53, %v450_v6  ;;  %v6313_v29 = vadd.f32 %v1329_v10, %v1079_v36  ;;  %v3025_v8 = vsel %vm2534_vm3, %v3022_v16, %v3024_v41 }
 0x1ab   : > { %v3027_v60 = vsel %vm2534_vm3, %v3024_v41, %v3026_v61  ;;  %v3443_v39 = vrot.slane %v3279_v56, 5  ;;  %v2350_v50 = vadd.f32 %v2176_v62, %v1931_v28  ;;  %v2351_v0 = vadd.f32 %v2178_v2, %v1932_v19  ;;  %v460_v2 = vpop.permute.xlu0 %459 }
 0x1ac   : > { %v3203_v15 = vadd.f32 %v3025_v8, %v6134_v20  ;;  %v3204_v26 = vadd.f32 %v3027_v60, %v6136_v57  ;;  %v8698_v6 = vrot.slane %v6157_v22, 5  ;;  %v3862_v16 = vrot.slane %v3698_v4, 6 }
 0x1ad   : > { %v3446_v44 = vsel %vm3391_vm4, %v3443_v39, %v3445_v9  ;;  %v6330_v33 = vmul.f32 %v4593_v11, %v465_v54  ;;  %v6333_v7 = vmul.f32 %v4602_v18, %v465_v54  ;;  %v6336_v20 = vmul.f32 %v4619_v32, %v465_v54 }
 0x1ae   : > { %v3444_v58 = vsel %vm3391_vm4, %v8698_v6, %v3443_v39  ;;  %v3623_v3 = vadd.f32 %v3446_v44, %v3204_v26  ;;  %v8699_v57 = vrot.slane %v6160_v5, 6  ;;  %v3865_v28 = vsel %vm3810_vm5, %v3862_v16, %v3864_v24 }
 0x1af   : > { %v3622_v36 = vadd.f32 %v3444_v58, %v3203_v15  ;;  %v6345_v19 = vmul.f32 %v4627_v38, %v465_v54  ;;  %v6348_v14 = vmul.f32 %v4632_v42, %v465_v54  ;;  %v8700_v10 = vrot.slane %v6126_v40, 4 }
 0x1b0   : > { %v3863_v22 = vsel %vm3810_vm5, %v8699_v57, %v3862_v16  ;;  %v2597_v5 = vsel %vm2534_vm3, %v2594_v49, %v2596_v27  ;;  %v4042_v62 = vadd.f32 %v3865_v28, %v3623_v3  ;;  %v6361_v60 = vmul.f32 %v4611_v23, %v465_v54 }
 0x1b1   : > { %v2595_v41 = vsel %vm2534_vm3, %v8700_v10, %v2594_v49  ;;  %v4041_v56 = vadd.f32 %v3863_v22, %v3622_v36  ;;  %v6358_v8 = vadd.f32 %v2597_v5, %v2351_v0  ;;  %v8586_v39 = vrot.slane %v6330_v33, 1 }
 0x1b2   : > { %v6356_v4 = vadd.f32 %v2595_v41, %v2350_v50  ;;  %v4117_v15 = vmul.f32 %v5691_v17, %v4042_v62  ;;  %v1332_v26 = vrot.slane %v6333_v7, 2  ;;  %v8587_v49 = vrot.slane %v6336_v20, 2 }
 0x1b3   : > { %v4116_v40 = vmul.f32 %v5691_v17, %v4041_v56  ;;  %v2181_v6 = vrot.slane %v6345_v19, 3  ;;  %v737_v0 = vmul.f32 %v4593_v11, %v460_v2  ;;  %v1156_v58 = vmul.f32 %v4602_v18, %v460_v2 }
 0x1b4   : > { %v4192_v16 = vadd.f32 %v5704_v59, %v4117_v15  ;;  %v6375_v17 = vmul.f32 %v4639_v48, %v465_v54  ;;  %v1591_v36 = vmul.f32 %v4619_v32, %v460_v2  ;;  %v6379_v3 = vmul.f32 %v4641_v52, %v465_v54 }
 0x1b5   : > { %v4191_v44 = vadd.f32 %v5704_v59, %v4116_v40  ;;  %v6382_v57 = vmul.f32 %v4643_v53, %v465_v54  ;;  %v911_v22 = vrot.slane %v737_v0, 1  ;;  %v2009_v28 = vmul.f32 %v4627_v38, %v460_v2 }
 0x1b6   : > { %v4260_v41 = vmax.f32 %v4192_v16, 0.0  ;;  %v1760_v5 = vrot.slane %v1591_v36, 2  ;;  %v2863_v59 = vmul.f32 %v4639_v48, %v460_v2  ;;  %v657_v56 = vmul.f32 %v4611_v23, %v460_v2  ;;  %v475_v16 = vpop.permute.xlu1 %474 }
 0x1b7   : > { %v4259_v10 = vmax.f32 %v4191_v44, 0.0  ;;  %v8701_v62 = vrot.slane %v6211_v12, 1  ;;  %v1330_v15 = vrot.slane %v1156_v58, 2  ;;  %v2428_v50 = vmul.f32 %v4632_v42, %v460_v2 }
 0x1b8   : > { %4328 = vst [vmem:[%s4932_s21 + $0xd0] sm:$0xff] %v4260_v41  ;;  %v3030_v54 = vrot.slane %v6375_v17, 4  ;;  %v914_v0 = vsel %vm839_vm0, %v911_v22, %v8586_v39  ;;  %v1761_v44 = vsel %vm1258_vm1, %v1758_v34, %v1760_v5  ;;  %v1763_v12 = vsel %vm1258_vm1, %v1760_v5, %v8587_v49 }
 0x1b9   : > { %v912_v40 = vsel %vm839_vm0, %v8701_v62, %v911_v22  ;;  %4327 = vst [vmem:[%s4932_s21 + $0xc8] sm:$0xff] %v4259_v10  ;;  %v8588_v58 = vrot.slane %v6379_v3, 5  ;;  %v2179_v10 = vrot.slane %v2009_v28, 3  ;;  %v1933_v41 = vadd.f32 %v1761_v44, %v6208_v21 }
 0x1ba   : > { %v1080_v36 = vadd.f32 %v912_v40, %v6247_v63  ;;  %v1934_v62 = vadd.f32 %v1763_v12, %v6222_v55  ;;  %v3028_v22 = vrot.slane %v2863_v59, 4  ;;  %v3281_v37 = vmul.f32 %v4641_v52, %v460_v2 }
 0x1bb   : > { %v1081_v39 = vadd.f32 %v914_v0, %v657_v56  ;;  %v1331_v34 = vsel %vm1258_vm1, %v1328_v46, %v1330_v15  ;;  %v1333_v5 = vsel %vm1258_vm1, %v1330_v15, %v1332_v26  ;;  %v2598_v49 = vrot.slane %v2428_v50, 4 }
 0x1bc   : > { %v2180_v21 = vsel %vm2115_vm2, %v2177_v30, %v2179_v10  ;;  %v2182_v55 = vsel %vm2115_vm2, %v2179_v10, %v2181_v6  ;;  %v3029_v35 = vsel %vm2534_vm3, %v3026_v61, %v3028_v22  ;;  %v3031_v63 = vsel %vm2534_vm3, %v3028_v22, %v3030_v54 }
 0x1bd   : > { %v3205_v46 = vadd.f32 %v3029_v35, %v6242_v51  ;;  %v3206_v50 = vadd.f32 %v3031_v63, %v6244_v43  ;;  %v3447_v28 = vrot.slane %v3281_v37, 5  ;;  %v3700_v31 = vmul.f32 %v4643_v53, %v460_v2 }
 0x1be   : > { %v6430_v30 = vadd.f32 %v1331_v34, %v1080_v36  ;;  %v2352_v59 = vadd.f32 %v2180_v21, %v1933_v41  ;;  %v2353_v56 = vadd.f32 %v2182_v55, %v1934_v62  ;;  %v6433_v40 = vmul.f32 %v4593_v11, %v475_v16 }
 0x1bf   : > { %v3448_v47 = vsel %vm3391_vm4, %v3445_v9, %v3447_v28  ;;  %v3450_v51 = vsel %vm3391_vm4, %v3447_v28, %v8588_v58  ;;  %v3866_v61 = vrot.slane %v3700_v31, 6  ;;  %v6442_v43 = vmul.f32 %v4602_v18, %v475_v16  ;;  %v6495_v31 = vld [vmem:[%s8547_s3] ss:$0 sm:$0xff] }
 0x1c0   : > { %v6444_v2 = vadd.f32 %v1333_v5, %v1081_v39  ;;  %v3624_v15 = vadd.f32 %v3448_v47, %v3205_v46  ;;  %v3625_v0 = vadd.f32 %v3450_v51, %v3206_v50  ;;  %v6447_v44 = vmul.f32 %v4619_v32, %v475_v16  ;;  %v6476_v5 = vld [vmem:[%s8546_s2] ss:$0 sm:$0xff] }
 0x1c1   : > { %v2599_v13 = vsel %vm2534_vm3, %v2596_v27, %v2598_v49  ;;  %v3867_v9 = vsel %vm3810_vm5, %v3864_v24, %v3866_v61  ;;  %v8702_v12 = vrot.slane %v6382_v57, 6  ;;  %v6459_v39 = vmul.f32 %v4627_v38, %v475_v16  ;;  %v470_v27 = vpop.permute.xlu0 %469 }
 0x1c2   : > { %v8703_v10 = vrot.slane %v6348_v14, 4  ;;  %v6464_v62 = vadd.f32 %v2599_v13, %v2352_v59  ;;  %v4043_v1 = vadd.f32 %v3867_v9, %v3624_v15  ;;  %v6469_v45 = vmul.f32 %v4611_v23, %v475_v16 }
 0x1c3   : > { %v3869_v36 = vsel %vm3810_vm5, %v3866_v61, %v8702_v12  ;;  %v8589_v24 = vrot.slane %v6433_v40, 1  ;;  %v1336_v34 = vrot.slane %v6442_v43, 2  ;;  %v1766_v55 = vrot.slane %v6447_v44, 2 }
 0x1c4   : > { %v2601_v41 = vsel %vm2534_vm3, %v2598_v49, %v8703_v10  ;;  %v4044_v22 = vadd.f32 %v3869_v36, %v3625_v0  ;;  %v4118_v49 = vmul.f32 %v6476_v5, %v4043_v1  ;;  %v6482_v35 = vmul.f32 %v4632_v42, %v475_v16 }
 0x1c5   : > { %v6466_v37 = vadd.f32 %v2601_v41, %v2353_v56  ;;  %v2185_v63 = vrot.slane %v6459_v39, 3  ;;  %v6486_v46 = vmul.f32 %v4639_v48, %v475_v16  ;;  %v6489_v50 = vmul.f32 %v4641_v52, %v475_v16 }
 0x1c6   : > { %v4119_v21 = vmul.f32 %v6476_v5, %v4044_v22  ;;  %v739_v28 = vmul.f32 %v4593_v11, %v470_v27  ;;  %v4193_v59 = vadd.f32 %v6495_v31, %v4118_v49  ;;  %v1158_v47 = vmul.f32 %v4602_v18, %v470_v27 }
 0x1c7   : > { %v1593_v51 = vmul.f32 %v4619_v32, %v470_v27  ;;  %v6502_v61 = vmul.f32 %v4643_v53, %v475_v16  ;;  %v659_v15 = vmul.f32 %v4611_v23, %v470_v27  ;;  %v2011_v13 = vmul.f32 %v4627_v38, %v470_v27 }
 0x1c8   : > { %v4194_v56 = vadd.f32 %v6495_v31, %v4119_v21  ;;  %v915_v0 = vrot.slane %v739_v28, 1  ;;  %v4261_v9 = vmax.f32 %v4193_v59, 0.0  ;;  %v2430_v10 = vmul.f32 %v4632_v42, %v470_v27 }
 0x1c9   : > { %v1764_v36 = vrot.slane %v1593_v51, 2  ;;  %v8704_v41 = vrot.slane %v6330_v33, 1  ;;  %v1334_v16 = vrot.slane %v1158_v47, 2  ;;  %v2865_v49 = vmul.f32 %v4639_v48, %v470_v27 }
 0x1ca   : > { %v4262_v12 = vmax.f32 %v4194_v56, 0.0  ;;  %v918_v22 = vsel %vm839_vm0, %v915_v0, %v8589_v24  ;;  %4329 = vst [vmem:[%s4932_s21 + $0xd8] sm:$0xff] %v4261_v9  ;;  %v8591_v21 = vrot.slane %v6482_v35, 4  ;;  %v3034_v28 = vrot.slane %v6486_v46, 4 }
 0x1cb   : > { %v916_v1 = vsel %vm839_vm0, %v8704_v41, %v915_v0  ;;  %v2183_v56 = vrot.slane %v2011_v13, 3  ;;  %v3453_v33 = vrot.slane %v6489_v50, 5  ;;  %v1083_v51 = vadd.f32 %v918_v22, %v659_v15 }
 0x1cc   : > { %4330 = vst [vmem:[%s4932_s21 + $0xe0] sm:$0xff] %v4262_v12  ;;  %v1082_v59 = vadd.f32 %v916_v1, %v6361_v60  ;;  %v8705_v41 = vrot.slane %v6336_v20, 2  ;;  %v1767_v47 = vsel %vm1258_vm1, %v1764_v36, %v1766_v55  ;;  %v8590_v0 = vrot.slane %v6502_v61, 6 }
 0x1cd   : > { %v1936_v12 = vadd.f32 %v1767_v47, %v6313_v29  ;;  %v2602_v24 = vrot.slane %v2430_v10, 4  ;;  %v1335_v60 = vsel %vm1258_vm1, %v1332_v26, %v1334_v16  ;;  %v1337_v20 = vsel %vm1258_vm1, %v1334_v16, %v1336_v34  ;;  %v485_v26 = vpop.permute.xlu1 %484 }
 0x1ce   : > { %v1765_v58 = vsel %vm1258_vm1, %v8705_v41, %v1764_v36  ;;  %v3032_v15 = vrot.slane %v2865_v49, 4  ;;  %v3283_v13 = vmul.f32 %v4641_v52, %v470_v27  ;;  %v6536_v1 = vadd.f32 %v1335_v60, %v1082_v59 }
 0x1cf   : > { %v1935_v9 = vadd.f32 %v1765_v58, %v6304_v25  ;;  %v2184_v25 = vsel %vm2115_vm2, %v2181_v6, %v2183_v56  ;;  %v2186_v29 = vsel %vm2115_vm2, %v2183_v56, %v2185_v63  ;;  %v3702_v7 = vmul.f32 %v4643_v53, %v470_v27 }
 0x1d0   : > { %v6545_v58 = vadd.f32 %v1337_v20, %v1083_v51  ;;  %v3033_v36 = vsel %vm2534_vm3, %v3030_v54, %v3032_v15  ;;  %v3035_v10 = vsel %vm2534_vm3, %v3032_v15, %v3034_v28  ;;  %v3451_v19 = vrot.slane %v3283_v13, 5 }
 0x1d1   : > { %v2354_v22 = vadd.f32 %v2184_v25, %v1935_v9  ;;  %v2355_v6 = vadd.f32 %v2186_v29, %v1936_v12  ;;  %v3207_v16 = vadd.f32 %v3033_v36, %v6356_v4  ;;  %v3208_v49 = vadd.f32 %v3035_v10, %v6358_v8  ;;  %v480_v29 = vpop.permute.xlu0 %479 }
 0x1d2   : > { %v8706_v27 = vrot.slane %v6379_v3, 5  ;;  %v3454_v17 = vsel %vm3391_vm4, %v3451_v19, %v3453_v33  ;;  %v3870_v54 = vrot.slane %v3702_v7, 6  ;;  %v6562_v56 = vmul.f32 %v4593_v11, %v485_v26 }
 0x1d3   : > { %v3627_v41 = vadd.f32 %v3454_v17, %v3208_v49  ;;  %v6565_v47 = vmul.f32 %v4602_v18, %v485_v26  ;;  %v6568_v4 = vmul.f32 %v4619_v32, %v485_v26  ;;  %v8707_v8 = vrot.slane %v6382_v57, 6 }
 0x1d4   : > { %v3452_v59 = vsel %vm3391_vm4, %v8706_v27, %v3451_v19  ;;  %v3873_v9 = vsel %vm3810_vm5, %v3870_v54, %v8590_v0  ;;  %v6577_v12 = vmul.f32 %v4627_v38, %v485_v26  ;;  %v6580_v60 = vmul.f32 %v4632_v42, %v485_v26 }
 0x1d5   : > { %v3626_v51 = vadd.f32 %v3452_v59, %v3207_v16  ;;  %v3871_v3 = vsel %vm3810_vm5, %v8707_v8, %v3870_v54  ;;  %v8708_v20 = vrot.slane %v6348_v14, 4  ;;  %v2605_v57 = vsel %vm2534_vm3, %v2602_v24, %v8591_v21 }
 0x1d6   : > { %v4046_v25 = vadd.f32 %v3873_v9, %v3627_v41  ;;  %v6590_v36 = vadd.f32 %v2605_v57, %v2355_v6  ;;  %v6593_v10 = vmul.f32 %v4611_v23, %v485_v26  ;;  %v8592_v19 = vrot.slane %v6562_v56, 1 }
 0x1d7   : > { %v2603_v15 = vsel %vm2534_vm3, %v8708_v20, %v2602_v24  ;;  %v4045_v13 = vadd.f32 %v3871_v3, %v3626_v51  ;;  %v1340_v49 = vrot.slane %v6565_v47, 2  ;;  %v8593_v24 = vrot.slane %v6568_v4, 2 }
 0x1d8   : > { %v6588_v7 = vadd.f32 %v2603_v15, %v2354_v22  ;;  %v4121_v16 = vmul.f32 %v6476_v5, %v4046_v25  ;;  %v2189_v27 = vrot.slane %v6577_v12, 3  ;;  %v741_v6 = vmul.f32 %v4593_v11, %v480_v29 }
 0x1d9   : > { %v4120_v14 = vmul.f32 %v6476_v5, %v4045_v13  ;;  %v1160_v59 = vmul.f32 %v4602_v18, %v480_v29  ;;  %v6607_v51 = vmul.f32 %v4639_v48, %v485_v26  ;;  %v1595_v41 = vmul.f32 %v4619_v32, %v480_v29 }
 0x1da   : > { %v4196_v54 = vadd.f32 %v6495_v31, %v4121_v16  ;;  %v6611_v8 = vmul.f32 %v4641_v52, %v485_v26  ;;  %v6614_v3 = vmul.f32 %v4643_v53, %v485_v26  ;;  %v919_v9 = vrot.slane %v741_v6, 1 }
 0x1db   : > { %v4195_v17 = vadd.f32 %v6495_v31, %v4120_v14  ;;  %v2013_v20 = vmul.f32 %v4627_v38, %v480_v29  ;;  %v1768_v13 = vrot.slane %v1595_v41, 2  ;;  %v2867_v25 = vmul.f32 %v4639_v48, %v480_v29 }
 0x1dc   : > { %v4264_v57 = vmax.f32 %v4196_v54, 0.0  ;;  %v661_v14 = vmul.f32 %v4611_v23, %v480_v29  ;;  %v8709_v16 = vrot.slane %v6433_v40, 1  ;;  %v1338_v0 = vrot.slane %v1160_v59, 2  ;;  %v495_v54 = vpop.permute.xlu1 %494 }
 0x1dd   : > { %v4263_v15 = vmax.f32 %v4195_v17, 0.0  ;;  %v2432_v21 = vmul.f32 %v4632_v42, %v480_v29  ;;  %v3038_v26 = vrot.slane %v6607_v51, 4  ;;  %v922_v6 = vsel %vm839_vm0, %v919_v9, %v8592_v19 }
 0x1de   : > { %v920_v22 = vsel %vm839_vm0, %v8709_v16, %v919_v9  ;;  %4332 = vst [vmem:[%s4932_s21 + $0xf0] sm:$0xff] %v4264_v57  ;;  %v1769_v17 = vsel %vm1258_vm1, %v1766_v55, %v1768_v13  ;;  %v1771_v40 = vsel %vm1258_vm1, %v1768_v13, %v8593_v24  ;;  %v8594_v59 = vrot.slane %v6611_v8, 5 }
 0x1df   : > { %4331 = vst [vmem:[%s4932_s21 + $0xe8] sm:$0xff] %v4263_v15  ;;  %v1084_v41 = vadd.f32 %v920_v22, %v6469_v45  ;;  %v2187_v15 = vrot.slane %v2013_v20, 3  ;;  %v1937_v57 = vadd.f32 %v1769_v17, %v6430_v30  ;;  %v1938_v16 = vadd.f32 %v1771_v40, %v6444_v2 }
 0x1e0   : > { %v3036_v9 = vrot.slane %v2867_v25, 4  ;;  %v3285_v44 = vmul.f32 %v4641_v52, %v480_v29  ;;  %v1085_v19 = vadd.f32 %v922_v6, %v661_v14  ;;  %v1339_v55 = vsel %vm1258_vm1, %v1336_v34, %v1338_v0 }
 0x1e1   : > { %v1341_v13 = vsel %vm1258_vm1, %v1338_v0, %v1340_v49  ;;  %v2606_v24 = vrot.slane %v2432_v21, 4  ;;  %v2188_v30 = vsel %vm2115_vm2, %v2185_v63, %v2187_v15  ;;  %v2190_v2 = vsel %vm2115_vm2, %v2187_v15, %v2189_v27 }
 0x1e2   : > { %v3037_v43 = vsel %vm2534_vm3, %v3034_v28, %v3036_v9  ;;  %v3039_v45 = vsel %vm2534_vm3, %v3036_v9, %v3038_v26  ;;  %v3455_v0 = vrot.slane %v3285_v44, 5  ;;  %v3704_v39 = vmul.f32 %v4643_v53, %v480_v29 }
 0x1e3   : > { %v3209_v34 = vadd.f32 %v3037_v43, %v6464_v62  ;;  %v3210_v21 = vadd.f32 %v3039_v45, %v6466_v37  ;;  %v6662_v63 = vadd.f32 %v1339_v55, %v1084_v41  ;;  %v2356_v22 = vadd.f32 %v2188_v30, %v1937_v57 }
 0x1e4   : > { %v2357_v20 = vadd.f32 %v2190_v2, %v1938_v16  ;;  %v6665_v25 = vmul.f32 %v4593_v11, %v495_v54  ;;  %v3456_v46 = vsel %vm3391_vm4, %v3453_v33, %v3455_v0  ;;  %v3458_v62 = vsel %vm3391_vm4, %v3455_v0, %v8594_v59 }
 0x1e5   : > { %v3874_v28 = vrot.slane %v3704_v39, 6  ;;  %v6674_v37 = vmul.f32 %v4602_v18, %v495_v54  ;;  %v6676_v29 = vadd.f32 %v1341_v13, %v1085_v19  ;;  %v3628_v14 = vadd.f32 %v3456_v46, %v3209_v34  ;;  %v490_v13 = vpop.permute.xlu0 %489 }
 0x1e6   : > { %v3629_v6 = vadd.f32 %v3458_v62, %v3210_v21  ;;  %v6679_v17 = vmul.f32 %v4619_v32, %v495_v54  ;;  %v8710_v40 = vrot.slane %v6482_v35, 4  ;;  %v8711_v33 = vrot.slane %v6502_v61, 6 }
 0x1e7   : > { %v8712_v15 = vrot.slane %v6614_v3, 6  ;;  %v6691_v19 = vmul.f32 %v4627_v38, %v495_v54  ;;  %v8713_v16 = vrot.slane %v6580_v60, 4  ;;  %v6701_v61 = vmul.f32 %v4611_v23, %v495_v54 }
 0x1e8   : > { %v2607_v50 = vsel %vm2534_vm3, %v8710_v40, %v2606_v24  ;;  %v3875_v41 = vsel %vm3810_vm5, %v8711_v33, %v3874_v28  ;;  %v8595_v2 = vrot.slane %v6665_v25, 1  ;;  %v1344_v43 = vrot.slane %v6674_v37, 2 }
 0x1e9   : > { %v3877_v57 = vsel %vm3810_vm5, %v3874_v28, %v8712_v15  ;;  %v2609_v9 = vsel %vm2534_vm3, %v2606_v24, %v8713_v16  ;;  %v6696_v44 = vadd.f32 %v2607_v50, %v2356_v22  ;;  %v4047_v35 = vadd.f32 %v3875_v41, %v3628_v14 }
 0x1ea   : > { %v4048_v55 = vadd.f32 %v3877_v57, %v3629_v6  ;;  %v6698_v30 = vadd.f32 %v2609_v9, %v2357_v20  ;;  %v1774_v24 = vrot.slane %v6679_v17, 2  ;;  %v6709_v21 = vmul.f32 %v4632_v42, %v495_v54 }
 0x1eb   : > { %v4122_v45 = vmul.f32 %v6476_v5, %v4047_v35  ;;  %v2193_v0 = vrot.slane %v6691_v19, 3  ;;  %v6713_v39 = vmul.f32 %v4639_v48, %v495_v54  ;;  %v6716_v22 = vmul.f32 %v4641_v52, %v495_v54 }
 0x1ec   : > { %v4123_v34 = vmul.f32 %v6476_v5, %v4048_v55  ;;  %v743_v20 = vmul.f32 %v4593_v11, %v490_v13  ;;  %v1162_v28 = vmul.f32 %v4602_v18, %v490_v13  ;;  %v1597_v14 = vmul.f32 %v4619_v32, %v490_v13 }
 0x1ed   : > { %v4197_v46 = vadd.f32 %v6495_v31, %v4122_v45  ;;  %v6724_v6 = vmul.f32 %v4643_v53, %v495_v54  ;;  %v663_v40 = vmul.f32 %v4611_v23, %v490_v13  ;;  %v2015_v33 = vmul.f32 %v4627_v38, %v490_v13 }
 0x1ee   : > { %v4198_v62 = vadd.f32 %v6495_v31, %v4123_v34  ;;  %v923_v50 = vrot.slane %v743_v20, 1  ;;  %v1772_v57 = vrot.slane %v1597_v14, 2  ;;  %v2434_v16 = vmul.f32 %v4632_v42, %v490_v13 }
 0x1ef   : > { %v4265_v41 = vmax.f32 %v4197_v46, 0.0  ;;  %v8714_v9 = vrot.slane %v6562_v56, 1  ;;  %v1342_v54 = vrot.slane %v1162_v28, 2  ;;  %v2869_v45 = vmul.f32 %v4639_v48, %v490_v13 }
 0x1f0   : > { %v4266_v15 = vmax.f32 %v4198_v62, 0.0  ;;  %v926_v55 = vsel %vm839_vm0, %v923_v50, %v8595_v2  ;;  %v8597_v34 = vrot.slane %v6709_v21, 4  ;;  %v3042_v20 = vrot.slane %v6713_v39, 4 }
 0x1f1   : > { %v924_v35 = vsel %vm839_vm0, %v8714_v9, %v923_v50  ;;  %4333 = vst [vmem:[%s4932_s21 + $0xf8] sm:$0xff] %v4265_v41  ;;  %v2191_v62 = vrot.slane %v2015_v33, 3  ;;  %v3461_v56 = vrot.slane %v6716_v22, 5  ;;  %v1087_v14 = vadd.f32 %v926_v55, %v663_v40 }
 0x1f2   : > { %4334 = vst [vmem:[%s4932_s21 + $0x100] sm:$0xff] %v4266_v15  ;;  %v1086_v46 = vadd.f32 %v924_v35, %v6593_v10  ;;  %v8715_v9 = vrot.slane %v6568_v4, 2  ;;  %v1775_v28 = vsel %vm1258_vm1, %v1772_v57, %v1774_v24  ;;  %v8596_v50 = vrot.slane %v6724_v6, 6 }
 0x1f3   : > { %v1940_v15 = vadd.f32 %v1775_v28, %v6545_v58  ;;  %v2610_v2 = vrot.slane %v2434_v16, 4  ;;  %v1343_v10 = vsel %vm1258_vm1, %v1340_v49, %v1342_v54  ;;  %v1345_v4 = vsel %vm1258_vm1, %v1342_v54, %v1344_v43  ;;  %v505_v49 = vpop.permute.xlu1 %504 }
 0x1f4   : > { %v1773_v59 = vsel %vm1258_vm1, %v8715_v9, %v1772_v57  ;;  %v3040_v40 = vrot.slane %v2869_v45, 4  ;;  %v3287_v33 = vmul.f32 %v4641_v52, %v490_v13  ;;  %v6758_v35 = vadd.f32 %v1343_v10, %v1086_v46 }
 0x1f5   : > { %v1939_v41 = vadd.f32 %v1773_v59, %v6536_v1  ;;  %v2192_v1 = vsel %vm2115_vm2, %v2189_v27, %v2191_v62  ;;  %v2194_v58 = vsel %vm2115_vm2, %v2191_v62, %v2193_v0  ;;  %v3706_v47 = vmul.f32 %v4643_v53, %v490_v13 }
 0x1f6   : > { %v6767_v59 = vadd.f32 %v1345_v4, %v1087_v14  ;;  %v3041_v57 = vsel %vm2534_vm3, %v3038_v26, %v3040_v40  ;;  %v3043_v16 = vsel %vm2534_vm3, %v3040_v40, %v3042_v20  ;;  %v3459_v12 = vrot.slane %v3287_v33, 5 }
 0x1f7   : > { %v2358_v55 = vadd.f32 %v2192_v1, %v1939_v41  ;;  %v2359_v27 = vadd.f32 %v2194_v58, %v1940_v15  ;;  %v3211_v54 = vadd.f32 %v3041_v57, %v6588_v7  ;;  %v3212_v45 = vadd.f32 %v3043_v16, %v6590_v36  ;;  %v500_v58 = vpop.permute.xlu0 %499 }
 0x1f8   : > { %v8716_v13 = vrot.slane %v6611_v8, 5  ;;  %v3462_v51 = vsel %vm3391_vm4, %v3459_v12, %v3461_v56  ;;  %v3878_v26 = vrot.slane %v3706_v47, 6  ;;  %v6784_v62 = vmul.f32 %v4593_v11, %v505_v49 }
 0x1f9   : > { %v3631_v9 = vadd.f32 %v3462_v51, %v3212_v45  ;;  %v6787_v28 = vmul.f32 %v4602_v18, %v505_v49  ;;  %v6790_v7 = vmul.f32 %v4619_v32, %v505_v49  ;;  %v8717_v36 = vrot.slane %v6614_v3, 6 }
 0x1fa   : > { %v3460_v46 = vsel %vm3391_vm4, %v8716_v13, %v3459_v12  ;;  %v3881_v41 = vsel %vm3810_vm5, %v3878_v26, %v8596_v50  ;;  %v6799_v15 = vmul.f32 %v4627_v38, %v505_v49  ;;  %v6802_v10 = vmul.f32 %v4632_v42, %v505_v49 }
 0x1fb   : > { %v3630_v14 = vadd.f32 %v3460_v46, %v3211_v54  ;;  %v3879_v8 = vsel %vm3810_vm5, %v8717_v36, %v3878_v26  ;;  %v8718_v4 = vrot.slane %v6580_v60, 4  ;;  %v2613_v3 = vsel %vm2534_vm3, %v2610_v2, %v8597_v34 }
 0x1fc   : > { %v4050_v1 = vadd.f32 %v3881_v41, %v3631_v9  ;;  %v6812_v57 = vadd.f32 %v2613_v3, %v2359_v27  ;;  %v6815_v16 = vmul.f32 %v4611_v23, %v505_v49  ;;  %v8598_v12 = vrot.slane %v6784_v62, 1 }
 0x1fd   : > { %v2611_v40 = vsel %vm2534_vm3, %v8718_v4, %v2610_v2  ;;  %v4049_v33 = vadd.f32 %v3879_v8, %v3630_v14  ;;  %v1348_v45 = vrot.slane %v6787_v28, 2  ;;  %v8599_v2 = vrot.slane %v6790_v7, 2 }
 0x1fe   : > { %v6810_v47 = vadd.f32 %v2611_v40, %v2358_v55  ;;  %v4125_v54 = vmul.f32 %v6476_v5, %v4050_v1  ;;  %v2197_v13 = vrot.slane %v6799_v15, 3  ;;  %v745_v27 = vmul.f32 %v4593_v11, %v500_v58 }
 0x1ff   : > { %v4124_v60 = vmul.f32 %v6476_v5, %v4049_v33  ;;  %v1164_v46 = vmul.f32 %v4602_v18, %v500_v58  ;;  %v6829_v14 = vmul.f32 %v4639_v48, %v505_v49  ;;  %v1599_v9 = vmul.f32 %v4619_v32, %v500_v58 }
 0x200   : > { %v4200_v26 = vadd.f32 %v6495_v31, %v4125_v54  ;;  %v6833_v36 = vmul.f32 %v4641_v52, %v505_v49  ;;  %v6836_v8 = vmul.f32 %v4643_v53, %v505_v49  ;;  %v927_v41 = vrot.slane %v745_v27, 1 }
 0x201   : > { %v4199_v51 = vadd.f32 %v6495_v31, %v4124_v60  ;;  %v2017_v4 = vmul.f32 %v4627_v38, %v500_v58  ;;  %v1776_v33 = vrot.slane %v1599_v9, 2  ;;  %v2871_v1 = vmul.f32 %v4639_v48, %v500_v58 }
 0x202   : > { %v4268_v3 = vmax.f32 %v4200_v26, 0.0  ;;  %v665_v60 = vmul.f32 %v4611_v23, %v500_v58  ;;  %v8719_v54 = vrot.slane %v6665_v25, 1  ;;  %v1346_v50 = vrot.slane %v1164_v46, 2  ;;  %v515_v26 = vpop.permute.xlu1 %514 }
 0x203   : > { %v4267_v40 = vmax.f32 %v4199_v51, 0.0  ;;  %v2436_v34 = vmul.f32 %v4632_v42, %v500_v58  ;;  %v3046_v49 = vrot.slane %v6829_v14, 4  ;;  %v930_v27 = vsel %vm839_vm0, %v927_v41, %v8598_v12 }
 0x204   : > { %v928_v55 = vsel %vm839_vm0, %v8719_v54, %v927_v41  ;;  %4336 = vst [vmem:[%s4932_s21 + $0x110] sm:$0xff] %v4268_v3  ;;  %v1777_v51 = vsel %vm1258_vm1, %v1774_v24, %v1776_v33  ;;  %v1779_v25 = vsel %vm1258_vm1, %v1776_v33, %v8599_v2  ;;  %v8600_v46 = vrot.slane %v6833_v36, 5 }
 0x205   : > { %4335 = vst [vmem:[%s4932_s21 + $0x108] sm:$0xff] %v4267_v40  ;;  %v1088_v9 = vadd.f32 %v928_v55, %v6701_v61  ;;  %v2195_v40 = vrot.slane %v2017_v4, 3  ;;  %v1941_v3 = vadd.f32 %v1777_v51, %v6662_v63  ;;  %v1942_v54 = vadd.f32 %v1779_v25, %v6676_v29 }
 0x206   : > { %v3044_v41 = vrot.slane %v2871_v1, 4  ;;  %v3289_v17 = vmul.f32 %v4641_v52, %v500_v58  ;;  %v1089_v12 = vadd.f32 %v930_v27, %v665_v60  ;;  %v1347_v24 = vsel %vm1258_vm1, %v1344_v43, %v1346_v50 }
 0x207   : > { %v1349_v33 = vsel %vm1258_vm1, %v1346_v50, %v1348_v45  ;;  %v2614_v2 = vrot.slane %v2436_v34, 4  ;;  %v2196_v63 = vsel %vm2115_vm2, %v2193_v0, %v2195_v40  ;;  %v2198_v29 = vsel %vm2115_vm2, %v2195_v40, %v2197_v13 }
 0x208   : > { %v3045_v37 = vsel %vm2534_vm3, %v3042_v20, %v3044_v41  ;;  %v3047_v61 = vsel %vm2534_vm3, %v3044_v41, %v3046_v49  ;;  %v3463_v50 = vrot.slane %v3289_v17, 5  ;;  %v3708_v19 = vmul.f32 %v4643_v53, %v500_v58 }
 0x209   : > { %v3213_v43 = vadd.f32 %v3045_v37, %v6696_v44  ;;  %v3214_v34 = vadd.f32 %v3047_v61, %v6698_v30  ;;  %v6884_v0 = vadd.f32 %v1347_v24, %v1088_v9  ;;  %v2360_v55 = vadd.f32 %v2196_v63, %v1941_v3 }
 0x20a   : > { %v2361_v4 = vadd.f32 %v2198_v29, %v1942_v54  ;;  %v6887_v1 = vmul.f32 %v4593_v11, %v515_v26  ;;  %v3464_v39 = vsel %vm3391_vm4, %v3461_v56, %v3463_v50  ;;  %v3466_v44 = vsel %vm3391_vm4, %v3463_v50, %v8600_v46 }
 0x20b   : > { %v3882_v20 = vrot.slane %v3708_v19, 6  ;;  %v6896_v30 = vmul.f32 %v4602_v18, %v515_v26  ;;  %v6898_v58 = vadd.f32 %v1349_v33, %v1089_v12  ;;  %v3632_v60 = vadd.f32 %v3464_v39, %v3213_v43  ;;  %v510_v33 = vpop.permute.xlu0 %509 }
 0x20c   : > { %v3633_v27 = vadd.f32 %v3466_v44, %v3214_v34  ;;  %v6901_v51 = vmul.f32 %v4619_v32, %v515_v26  ;;  %v8720_v25 = vrot.slane %v6709_v21, 4  ;;  %v8721_v56 = vrot.slane %v6724_v6, 6 }
 0x20d   : > { %v8722_v40 = vrot.slane %v6836_v8, 6  ;;  %v6913_v12 = vmul.f32 %v4627_v38, %v515_v26  ;;  %v8723_v54 = vrot.slane %v6802_v10, 4  ;;  %v6923_v6 = vmul.f32 %v4611_v23, %v515_v26 }
 0x20e   : > { %v2615_v22 = vsel %vm2534_vm3, %v8720_v25, %v2614_v2  ;;  %v3883_v9 = vsel %vm3810_vm5, %v8721_v56, %v3882_v20  ;;  %v8601_v29 = vrot.slane %v6887_v1, 1  ;;  %v1352_v37 = vrot.slane %v6896_v30, 2 }
 0x20f   : > { %v3885_v3 = vsel %vm3810_vm5, %v3882_v20, %v8722_v40  ;;  %v2617_v41 = vsel %vm2534_vm3, %v2614_v2, %v8723_v54  ;;  %v6918_v17 = vadd.f32 %v2615_v22, %v2360_v55  ;;  %v4051_v21 = vadd.f32 %v3883_v9, %v3632_v60 }
 0x210   : > { %v4052_v24 = vadd.f32 %v3885_v3, %v3633_v27  ;;  %v6920_v63 = vadd.f32 %v2617_v41, %v2361_v4  ;;  %v1782_v2 = vrot.slane %v6901_v51, 2  ;;  %v6931_v34 = vmul.f32 %v4632_v42, %v515_v26 }
 0x211   : > { %v4126_v61 = vmul.f32 %v6476_v5, %v4051_v21  ;;  %v2201_v50 = vrot.slane %v6913_v12, 3  ;;  %v6935_v19 = vmul.f32 %v4639_v48, %v515_v26  ;;  %v6938_v55 = vmul.f32 %v4641_v52, %v515_v26 }
 0x212   : > { %v4127_v43 = vmul.f32 %v6476_v5, %v4052_v24  ;;  %v747_v4 = vmul.f32 %v4593_v11, %v510_v33  ;;  %v1166_v20 = vmul.f32 %v4602_v18, %v510_v33  ;;  %v1601_v60 = vmul.f32 %v4619_v32, %v510_v33 }
 0x213   : > { %v4201_v39 = vadd.f32 %v6495_v31, %v4126_v61  ;;  %v6946_v27 = vmul.f32 %v4643_v53, %v515_v26  ;;  %v667_v25 = vmul.f32 %v4611_v23, %v510_v33  ;;  %v2019_v56 = vmul.f32 %v4627_v38, %v510_v33 }
 0x214   : > { %v4202_v44 = vadd.f32 %v6495_v31, %v4127_v43  ;;  %v931_v22 = vrot.slane %v747_v4, 1  ;;  %v1780_v3 = vrot.slane %v1601_v60, 2  ;;  %v2438_v54 = vmul.f32 %v4632_v42, %v510_v33 }
 0x215   : > { %v4269_v9 = vmax.f32 %v4201_v39, 0.0  ;;  %v8724_v41 = vrot.slane %v6784_v62, 1  ;;  %v1350_v26 = vrot.slane %v1166_v20, 2  ;;  %v2873_v61 = vmul.f32 %v4639_v48, %v510_v33 }
 0x216   : > { %v4270_v40 = vmax.f32 %v4202_v44, 0.0  ;;  %v934_v24 = vsel %vm839_vm0, %v931_v22, %v8601_v29  ;;  %v8603_v43 = vrot.slane %v6931_v34, 4  ;;  %v3050_v4 = vrot.slane %v6935_v19, 4 }
 0x217   : > { %v932_v21 = vsel %vm839_vm0, %v8724_v41, %v931_v22  ;;  %4337 = vst [vmem:[%s4932_s21 + $0x118] sm:$0xff] %v4269_v9  ;;  %v2199_v44 = vrot.slane %v2019_v56, 3  ;;  %v3469_v62 = vrot.slane %v6938_v55, 5  ;;  %v1091_v60 = vadd.f32 %v934_v24, %v667_v25 }
 0x218   : > { %4338 = vst [vmem:[%s4932_s21 + $0x120] sm:$0xff] %v4270_v40  ;;  %v1090_v39 = vadd.f32 %v932_v21, %v6815_v16  ;;  %v8725_v41 = vrot.slane %v6790_v7, 2  ;;  %v1783_v20 = vsel %vm1258_vm1, %v1780_v3, %v1782_v2  ;;  %v8602_v22 = vrot.slane %v6946_v27, 6 }
 0x219   : > { %v1944_v40 = vadd.f32 %v1783_v20, %v6767_v59  ;;  %v2618_v29 = vrot.slane %v2438_v54, 4  ;;  %v1351_v16 = vsel %vm1258_vm1, %v1348_v45, %v1350_v26  ;;  %v1353_v7 = vsel %vm1258_vm1, %v1350_v26, %v1352_v37  ;;  %v525_v45 = vpop.permute.xlu1 %524 }
 0x21a   : > { %v1781_v46 = vsel %vm1258_vm1, %v8725_v41, %v1780_v3  ;;  %v3048_v25 = vrot.slane %v2873_v61, 4  ;;  %v3291_v56 = vmul.f32 %v4641_v52, %v510_v33  ;;  %v6980_v21 = vadd.f32 %v1351_v16, %v1090_v39 }
 0x21b   : > { %v1943_v9 = vadd.f32 %v1781_v46, %v6758_v35  ;;  %v2200_v35 = vsel %vm2115_vm2, %v2197_v13, %v2199_v44  ;;  %v2202_v59 = vsel %vm2115_vm2, %v2199_v44, %v2201_v50  ;;  %v3710_v28 = vmul.f32 %v4643_v53, %v510_v33 }
 0x21c   : > { %v6989_v46 = vadd.f32 %v1353_v7, %v1091_v60  ;;  %v3049_v3 = vsel %vm2534_vm3, %v3046_v49, %v3048_v25  ;;  %v3051_v54 = vsel %vm2534_vm3, %v3048_v25, %v3050_v4  ;;  %v3467_v15 = vrot.slane %v3291_v56, 5 }
 0x21d   : > { %v2362_v24 = vadd.f32 %v2200_v35, %v1943_v9  ;;  %v2363_v13 = vadd.f32 %v2202_v59, %v1944_v40  ;;  %v3215_v26 = vadd.f32 %v3049_v3, %v6810_v47  ;;  %v3216_v61 = vadd.f32 %v3051_v54, %v6812_v57  ;;  %v520_v59 = vpop.permute.xlu0 %519 }
 0x21e   : > { %v8726_v33 = vrot.slane %v6833_v36, 5  ;;  %v3470_v14 = vsel %vm3391_vm4, %v3467_v15, %v3469_v62  ;;  %v3886_v49 = vrot.slane %v3710_v28, 6  ;;  %v7006_v44 = vmul.f32 %v4593_v11, %v525_v45 }
 0x21f   : > { %v3635_v41 = vadd.f32 %v3470_v14, %v3216_v61  ;;  %v7009_v20 = vmul.f32 %v4602_v18, %v525_v45  ;;  %v7012_v47 = vmul.f32 %v4619_v32, %v525_v45  ;;  %v8727_v57 = vrot.slane %v6836_v8, 6 }
 0x220   : > { %v3468_v39 = vsel %vm3391_vm4, %v8726_v33, %v3467_v15  ;;  %v3889_v9 = vsel %vm3810_vm5, %v3886_v49, %v8602_v22  ;;  %v7021_v40 = vmul.f32 %v4627_v38, %v525_v45  ;;  %v7024_v16 = vmul.f32 %v4632_v42, %v525_v45 }
 0x221   : > { %v3634_v60 = vadd.f32 %v3468_v39, %v3215_v26  ;;  %v3887_v36 = vsel %vm3810_vm5, %v8727_v57, %v3886_v49  ;;  %v8728_v7 = vrot.slane %v6802_v10, 4  ;;  %v2621_v8 = vsel %vm2534_vm3, %v2618_v29, %v8603_v43 }
 0x222   : > { %v4054_v35 = vadd.f32 %v3889_v9, %v3635_v41  ;;  %v7034_v3 = vadd.f32 %v2621_v8, %v2363_v13  ;;  %v7037_v54 = vmul.f32 %v4611_v23, %v525_v45  ;;  %v8604_v15 = vrot.slane %v7006_v44, 1 }
 0x223   : > { %v2619_v25 = vsel %vm2534_vm3, %v8728_v7, %v2618_v29  ;;  %v4053_v56 = vadd.f32 %v3887_v36, %v3634_v60  ;;  %v1356_v61 = vrot.slane %v7009_v20, 2  ;;  %v8605_v29 = vrot.slane %v7012_v47, 2 }
 0x224   : > { %v7032_v28 = vadd.f32 %v2619_v25, %v2362_v24  ;;  %v4129_v26 = vmul.f32 %v6476_v5, %v4054_v35  ;;  %v2205_v33 = vrot.slane %v7021_v40, 3  ;;  %v749_v13 = vmul.f32 %v4593_v11, %v520_v59 }
 0x225   : > { %v4128_v10 = vmul.f32 %v6476_v5, %v4053_v56  ;;  %v1168_v39 = vmul.f32 %v4602_v18, %v520_v59  ;;  %v7051_v60 = vmul.f32 %v4639_v48, %v525_v45  ;;  %v1603_v41 = vmul.f32 %v4619_v32, %v520_v59 }
 0x226   : > { %v4204_v49 = vadd.f32 %v6495_v31, %v4129_v26  ;;  %v7055_v57 = vmul.f32 %v4641_v52, %v525_v45  ;;  %v7058_v36 = vmul.f32 %v4643_v53, %v525_v45  ;;  %v935_v9 = vrot.slane %v749_v13, 1 }
 0x227   : > { %v4203_v14 = vadd.f32 %v6495_v31, %v4128_v10  ;;  %v2021_v7 = vmul.f32 %v4627_v38, %v520_v59  ;;  %v1784_v56 = vrot.slane %v1603_v41, 2  ;;  %v2875_v35 = vmul.f32 %v4639_v48, %v520_v59 }
 0x228   : > { %v4272_v8 = vmax.f32 %v4204_v49, 0.0  ;;  %v669_v10 = vmul.f32 %v4611_v23, %v520_v59  ;;  %v8729_v26 = vrot.slane %v6887_v1, 1  ;;  %v1354_v22 = vrot.slane %v1168_v39, 2  ;;  %v535_v49 = vpop.permute.xlu1 %534 }
 0x229   : > { %v4271_v25 = vmax.f32 %v4203_v14, 0.0  ;;  %v2440_v43 = vmul.f32 %v4632_v42, %v520_v59  ;;  %v3054_v45 = vrot.slane %v7051_v60, 4  ;;  %v938_v13 = vsel %vm839_vm0, %v935_v9, %v8604_v15 }
 0x22a   : > { %v936_v24 = vsel %vm839_vm0, %v8729_v26, %v935_v9  ;;  %4340 = vst [vmem:[%s4932_s21 + $0x130] sm:$0xff] %v4272_v8  ;;  %v1785_v14 = vsel %vm1258_vm1, %v1782_v2, %v1784_v56  ;;  %v1787_v1 = vsel %vm1258_vm1, %v1784_v56, %v8605_v29  ;;  %v3473_v39 = vrot.slane %v7055_v57, 5 }
 0x22b   : > { %4339 = vst [vmem:[%s4932_s21 + $0x128] sm:$0xff] %v4271_v25  ;;  %v1092_v41 = vadd.f32 %v936_v24, %v6923_v6  ;;  %v2203_v25 = vrot.slane %v2021_v7, 3  ;;  %v1945_v8 = vadd.f32 %v1785_v14, %v6884_v0  ;;  %v1946_v26 = vadd.f32 %v1787_v1, %v6898_v58 }
 0x22c   : > { %v3052_v9 = vrot.slane %v2875_v35, 4  ;;  %v3293_v51 = vmul.f32 %v4641_v52, %v520_v59  ;;  %v1093_v15 = vadd.f32 %v938_v13, %v669_v10  ;;  %v1355_v2 = vsel %vm1258_vm1, %v1352_v37, %v1354_v22 }
 0x22d   : > { %v1357_v56 = vsel %vm1258_vm1, %v1354_v22, %v1356_v61  ;;  %v2622_v29 = vrot.slane %v2440_v43, 4  ;;  %v2204_v0 = vsel %vm2115_vm2, %v2201_v50, %v2203_v25  ;;  %v2206_v58 = vsel %vm2115_vm2, %v2203_v25, %v2205_v33 }
 0x22e   : > { %v3053_v30 = vsel %vm2534_vm3, %v3050_v4, %v3052_v9  ;;  %v3055_v6 = vsel %vm2534_vm3, %v3052_v9, %v3054_v45  ;;  %v3471_v22 = vrot.slane %v3293_v51, 5  ;;  %v3712_v12 = vmul.f32 %v4643_v53, %v520_v59 }
 0x22f   : > { %v3217_v37 = vadd.f32 %v3053_v30, %v6918_v17  ;;  %v3218_v43 = vadd.f32 %v3055_v6, %v6920_v63  ;;  %v7106_v50 = vadd.f32 %v1355_v2, %v1092_v41  ;;  %v2364_v24 = vadd.f32 %v2204_v0, %v1945_v8 }
 0x230   : > { %v2365_v7 = vadd.f32 %v2206_v58, %v1946_v26  ;;  %v7109_v35 = vmul.f32 %v4593_v11, %v535_v49  ;;  %v3472_v19 = vsel %vm3391_vm4, %v3469_v62, %v3471_v22  ;;  %v3474_v17 = vsel %vm3391_vm4, %v3471_v22, %v3473_v39 }
 0x231   : > { %v3890_v4 = vrot.slane %v3712_v12, 6  ;;  %v7118_v63 = vmul.f32 %v4602_v18, %v535_v49  ;;  %v7120_v59 = vadd.f32 %v1357_v56, %v1093_v15  ;;  %v3636_v10 = vadd.f32 %v3472_v19, %v3217_v37  ;;  %v530_v56 = vpop.permute.xlu0 %529 }
 0x232   : > { %v3637_v13 = vadd.f32 %v3474_v17, %v3218_v43  ;;  %v7123_v14 = vmul.f32 %v4619_v32, %v535_v49  ;;  %v8730_v1 = vrot.slane %v6931_v34, 4  ;;  %v8731_v62 = vrot.slane %v6946_v27, 6 }
 0x233   : > { %v8732_v25 = vrot.slane %v7058_v36, 6  ;;  %v7135_v15 = vmul.f32 %v4627_v38, %v535_v49  ;;  %v8733_v26 = vrot.slane %v7024_v16, 4  ;;  %v7145_v27 = vmul.f32 %v4611_v23, %v535_v49 }
 0x234   : > { %v2623_v55 = vsel %vm2534_vm3, %v8730_v1, %v2622_v29  ;;  %v3891_v41 = vsel %vm3810_vm5, %v8731_v62, %v3890_v4  ;;  %v941_v58 = vrot.slane %v7109_v35, 1  ;;  %v1360_v30 = vrot.slane %v7118_v63, 2 }
 0x235   : > { %v3893_v8 = vsel %vm3810_vm5, %v3890_v4, %v8732_v25  ;;  %v2625_v9 = vsel %vm2534_vm3, %v2622_v29, %v8733_v26  ;;  %v7140_v51 = vadd.f32 %v2623_v55, %v2364_v24  ;;  %v4055_v34 = vadd.f32 %v3891_v41, %v3636_v10 }
 0x236   : > { %v4056_v2 = vadd.f32 %v3893_v8, %v3637_v13  ;;  %v7142_v0 = vadd.f32 %v2625_v9, %v2365_v7  ;;  %v1790_v29 = vrot.slane %v7123_v14, 2  ;;  %v7153_v43 = vmul.f32 %v4632_v42, %v535_v49 }
 0x237   : > { %v4130_v6 = vmul.f32 %v6476_v5, %v4055_v34  ;;  %v2209_v22 = vrot.slane %v7135_v15, 3  ;;  %v7157_v12 = vmul.f32 %v4639_v48, %v535_v49  ;;  %v7160_v24 = vmul.f32 %v4641_v52, %v535_v49 }
 0x238   : > { %v4131_v37 = vmul.f32 %v6476_v5, %v4056_v2  ;;  %v751_v7 = vmul.f32 %v4593_v11, %v530_v56  ;;  %v1170_v17 = vmul.f32 %v4602_v18, %v530_v56  ;;  %v1605_v4 = vmul.f32 %v4619_v32, %v530_v56 }
 0x239   : > { %v4205_v19 = vadd.f32 %v6495_v31, %v4130_v6  ;;  %v7168_v10 = vmul.f32 %v4643_v53, %v535_v49  ;;  %v671_v13 = vmul.f32 %v4611_v23, %v530_v56  ;;  %v2023_v55 = vmul.f32 %v4627_v38, %v530_v56 }
 0x23a   : > { %v4206_v5 = vadd.f32 %v6495_v31, %v4131_v37  ;;  %v939_v1 = vrot.slane %v751_v7, 1  ;;  %v1788_v25 = vrot.slane %v1605_v4, 2  ;;  %v2442_v8 = vmul.f32 %v4632_v42, %v530_v56 }
 0x23b   : > { %v4273_v62 = vmax.f32 %v4205_v19, 0.0  ;;  %v8734_v31 = vrot.slane %v7006_v44, 1  ;;  %v1358_v49 = vrot.slane %v1170_v17, 2  ;;  %v2877_v34 = vmul.f32 %v4639_v48, %v530_v56 }
 0x23c   : > { %v4274_v41 = vmax.f32 %v4206_v5, 0.0  ;;  %v942_v9 = vsel %vm839_vm0, %v939_v1, %v941_v58  ;;  %v8607_v2 = vrot.slane %v7153_v43, 4  ;;  %v3058_v6 = vrot.slane %v7157_v12, 4 }
 0x23d   : > { %v940_v26 = vsel %vm839_vm0, %v8734_v31, %v939_v1  ;;  %4341 = vst [vmem:[%s4932_s21 + $0x138] sm:$0xff] %v4273_v62  ;;  %v2207_v7 = vrot.slane %v2023_v55, 3  ;;  %v3477_v44 = vrot.slane %v7160_v24, 5  ;;  %v1095_v19 = vadd.f32 %v942_v9, %v671_v13 }
 0x23e   : > { %4342 = vst [vmem:[%s4932_s21 + $0x140] sm:$0xff] %v4274_v41  ;;  %v1094_v37 = vadd.f32 %v940_v26, %v7037_v54  ;;  %v8735_v5 = vrot.slane %v7012_v47, 2  ;;  %v1791_v17 = vsel %vm1258_vm1, %v1788_v25, %v1790_v29  ;;  %v8606_v1 = vrot.slane %v7168_v10, 6 }
 0x23f   : > { %v1948_v41 = vadd.f32 %v1791_v17, %v6989_v46  ;;  %v2626_v31 = vrot.slane %v2442_v8, 4  ;;  %v1359_v54 = vsel %vm1258_vm1, %v1356_v61, %v1358_v49  ;;  %v1361_v47 = vsel %vm1258_vm1, %v1358_v49, %v1360_v30  ;;  %v545_v61 = vpop.permute.xlu1 %544 }
 0x240   : > { %v1789_v4 = vsel %vm1258_vm1, %v8735_v5, %v1788_v25  ;;  %v3056_v13 = vrot.slane %v2877_v34, 4  ;;  %v3295_v55 = vmul.f32 %v4641_v52, %v530_v56  ;;  %v7202_v26 = vadd.f32 %v1359_v54, %v1094_v37 }
 0x241   : > { %v1947_v62 = vadd.f32 %v1789_v4, %v6980_v21  ;;  %v2208_v21 = vsel %vm2115_vm2, %v2205_v33, %v2207_v7  ;;  %v2210_v46 = vsel %vm2115_vm2, %v2207_v7, %v2209_v22  ;;  %v3714_v20 = vmul.f32 %v4643_v53, %v530_v56 }
 0x242   : > { %v7211_v25 = vadd.f32 %v1361_v47, %v1095_v19  ;;  %v3057_v8 = vsel %vm2534_vm3, %v3054_v45, %v3056_v13  ;;  %v3059_v9 = vsel %vm2534_vm3, %v3056_v13, %v3058_v6  ;;  %v3475_v40 = vrot.slane %v3295_v55, 5  ;;  %v540_v55 = vpop.permute.xlu0 %539 }
 0x243   : > { %v2366_v49 = vadd.f32 %v2208_v21, %v1947_v62  ;;  %v2367_v33 = vadd.f32 %v2210_v46, %v1948_v41  ;;  %v3219_v34 = vadd.f32 %v3057_v8, %v7032_v28  ;;  %v3220_v37 = vadd.f32 %v3059_v9, %v7034_v3 }
 0x244   : > { %v3476_v56 = vsel %vm3391_vm4, %v3473_v39, %v3475_v40  ;;  %v3478_v60 = vsel %vm3391_vm4, %v3475_v40, %v3477_v44  ;;  %v3894_v45 = vrot.slane %v3714_v20, 6  ;;  %v7228_v7 = vmul.f32 %v4593_v11, %v545_v61 }
 0x245   : > { %v3638_v19 = vadd.f32 %v3476_v56, %v3219_v34  ;;  %v3639_v5 = vadd.f32 %v3478_v60, %v3220_v37  ;;  %v7231_v4 = vmul.f32 %v4602_v18, %v545_v61  ;;  %v7234_v28 = vmul.f32 %v4619_v32, %v545_v61  ;;  %v7278_v60 = vld [vmem:[%s8547_s3] ss:$0 sm:$0xff] }
 0x246   : > { %v8736_v3 = vrot.slane %v7058_v36, 6  ;;  %v3897_v39 = vsel %vm3810_vm5, %v3894_v45, %v8606_v1  ;;  %v7243_v17 = vmul.f32 %v4627_v38, %v545_v61  ;;  %v7246_v62 = vmul.f32 %v4632_v42, %v545_v61 }
 0x247   : > { %v8737_v41 = vrot.slane %v7024_v16, 4  ;;  %v2629_v36 = vsel %vm2534_vm3, %v2626_v31, %v8607_v2  ;;  %v4058_v13 = vadd.f32 %v3897_v39, %v3639_v5  ;;  %v7259_v20 = vmul.f32 %v4611_v23, %v545_v61  ;;  %v7265_v16 = vld [vmem:[%s8546_s2] ss:$0 sm:$0xff] }
 0x248   : > { %v3895_v57 = vsel %vm3810_vm5, %v8736_v3, %v3894_v45  ;;  %v7256_v46 = vadd.f32 %v2629_v36, %v2367_v33  ;;  %v8608_v8 = vrot.slane %v7228_v7, 1  ;;  %v1364_v40 = vrot.slane %v7231_v4, 2 }
 0x249   : > { %v2627_v54 = vsel %vm2534_vm3, %v8737_v41, %v2626_v31  ;;  %v4057_v47 = vadd.f32 %v3895_v57, %v3638_v19  ;;  %v4133_v31 = vmul.f32 %v7265_v16, %v4058_v13  ;;  %v2213_v33 = vrot.slane %v7243_v17, 3 }
 0x24a   : > { %v7254_v21 = vadd.f32 %v2627_v54, %v2366_v49  ;;  %v8609_v49 = vrot.slane %v7234_v28, 2  ;;  %v753_v37 = vmul.f32 %v4593_v11, %v540_v55  ;;  %v1172_v56 = vmul.f32 %v4602_v18, %v540_v55 }
 0x24b   : > { %v4132_v9 = vmul.f32 %v7265_v16, %v4057_v47  ;;  %v4208_v19 = vadd.f32 %v7278_v60, %v4133_v31  ;;  %v7283_v5 = vmul.f32 %v4639_v48, %v545_v61  ;;  %v1607_v3 = vmul.f32 %v4619_v32, %v540_v55 }
 0x24c   : > { %v7287_v57 = vmul.f32 %v4641_v52, %v545_v61  ;;  %v7290_v39 = vmul.f32 %v4643_v53, %v545_v61  ;;  %v943_v41 = vrot.slane %v753_v37, 1  ;;  %v2025_v54 = vmul.f32 %v4627_v38, %v540_v55 }
 0x24d   : > { %v4207_v45 = vadd.f32 %v7278_v60, %v4132_v9  ;;  %v4276_v47 = vmax.f32 %v4208_v19, 0.0  ;;  %v1792_v13 = vrot.slane %v1607_v3, 2  ;;  %v2879_v9 = vmul.f32 %v4639_v48, %v540_v55 }
 0x24e   : > { %v673_v31 = vmul.f32 %v4611_v23, %v540_v55  ;;  %v944_v34 = vsel %vm839_vm0, %v941_v58, %v943_v41  ;;  %v1362_v1 = vrot.slane %v1172_v56, 2  ;;  %v2444_v2 = vmul.f32 %v4632_v42, %v540_v55  ;;  %v555_v56 = vpop.permute.xlu1 %554 }
 0x24f   : > { %v4275_v36 = vmax.f32 %v4207_v45, 0.0  ;;  %4344 = vst [vmem:[%s4932_s21 + $0x150] sm:$0xff] %v4276_v47  ;;  %v3062_v61 = vrot.slane %v7283_v5, 4  ;;  %v946_v37 = vsel %vm839_vm0, %v943_v41, %v8608_v8  ;;  %v1793_v45 = vsel %vm1258_vm1, %v1790_v29, %v1792_v13 }
 0x250   : > { %v1795_v35 = vsel %vm1258_vm1, %v1792_v13, %v8609_v49  ;;  %v8610_v58 = vrot.slane %v7287_v57, 5  ;;  %v1096_v19 = vadd.f32 %v944_v34, %v7145_v27  ;;  %v2211_v3 = vrot.slane %v2025_v54, 3 }
 0x251   : > { %4343 = vst [vmem:[%s4932_s21 + $0x148] sm:$0xff] %v4275_v36  ;;  %v1949_v36 = vadd.f32 %v1793_v45, %v7106_v50  ;;  %v1950_v47 = vadd.f32 %v1795_v35, %v7120_v59  ;;  %v3060_v41 = vrot.slane %v2879_v9, 4  ;;  %v3297_v14 = vmul.f32 %v4641_v52, %v540_v55 }
 0x252   : > { %v1097_v8 = vadd.f32 %v946_v37, %v673_v31  ;;  %v1363_v29 = vsel %vm1258_vm1, %v1360_v30, %v1362_v1  ;;  %v1365_v13 = vsel %vm1258_vm1, %v1362_v1, %v1364_v40  ;;  %v2630_v49 = vrot.slane %v2444_v2, 4 }
 0x253   : > { %v2212_v50 = vsel %vm2115_vm2, %v2209_v22, %v2211_v3  ;;  %v2214_v59 = vsel %vm2115_vm2, %v2211_v3, %v2213_v33  ;;  %v3061_v63 = vsel %vm2534_vm3, %v3058_v6, %v3060_v41  ;;  %v3063_v27 = vsel %vm2534_vm3, %v3060_v41, %v3062_v61 }
 0x254   : > { %v3221_v30 = vadd.f32 %v3061_v63, %v7140_v51  ;;  %v3222_v2 = vadd.f32 %v3063_v27, %v7142_v0  ;;  %v3479_v1 = vrot.slane %v3297_v14, 5  ;;  %v3716_v15 = vmul.f32 %v4643_v53, %v540_v55 }
 0x255   : > { %v7338_v22 = vadd.f32 %v1363_v29, %v1096_v19  ;;  %v2368_v34 = vadd.f32 %v2212_v50, %v1949_v36  ;;  %v2369_v54 = vadd.f32 %v2214_v59, %v1950_v47  ;;  %v7341_v9 = vmul.f32 %v4593_v11, %v555_v56 }
 0x256   : > { %v3480_v12 = vsel %vm3391_vm4, %v3477_v44, %v3479_v1  ;;  %v3482_v51 = vsel %vm3391_vm4, %v3479_v1, %v8610_v58  ;;  %v3898_v6 = vrot.slane %v3716_v15, 6  ;;  %v7350_v0 = vmul.f32 %v4602_v18, %v555_v56 }
 0x257   : > { %v7352_v55 = vadd.f32 %v1365_v13, %v1097_v8  ;;  %v3640_v31 = vadd.f32 %v3480_v12, %v3221_v30  ;;  %v3641_v37 = vadd.f32 %v3482_v51, %v3222_v2  ;;  %v7355_v45 = vmul.f32 %v4619_v32, %v555_v56  ;;  %v550_v13 = vpop.permute.xlu0 %549 }
 0x258   : > { %v8738_v35 = vrot.slane %v7153_v43, 4  ;;  %v8739_v44 = vrot.slane %v7168_v10, 6  ;;  %v8740_v3 = vrot.slane %v7290_v39, 6  ;;  %v7367_v8 = vmul.f32 %v4627_v38, %v555_v56 }
 0x259   : > { %v8741_v47 = vrot.slane %v7246_v62, 4  ;;  %v7377_v10 = vmul.f32 %v4611_v23, %v555_v56  ;;  %v8611_v59 = vrot.slane %v7341_v9, 1  ;;  %v1368_v63 = vrot.slane %v7350_v0, 2 }
 0x25a   : > { %v2631_v24 = vsel %vm2534_vm3, %v8738_v35, %v2630_v49  ;;  %v3899_v19 = vsel %vm3810_vm5, %v8739_v44, %v3898_v6  ;;  %v3901_v36 = vsel %vm3810_vm5, %v3898_v6, %v8740_v3  ;;  %v7385_v2 = vmul.f32 %v4632_v42, %v555_v56 }
 0x25b   : > { %v2633_v41 = vsel %vm2534_vm3, %v2630_v49, %v8741_v47  ;;  %v7372_v14 = vadd.f32 %v2631_v24, %v2368_v34  ;;  %v4059_v43 = vadd.f32 %v3899_v19, %v3640_v31  ;;  %v4060_v29 = vadd.f32 %v3901_v36, %v3641_v37 }
 0x25c   : > { %v7374_v50 = vadd.f32 %v2633_v41, %v2369_v54  ;;  %v1798_v49 = vrot.slane %v7355_v45, 2  ;;  %v2217_v1 = vrot.slane %v7367_v8, 3  ;;  %v7389_v15 = vmul.f32 %v4639_v48, %v555_v56 }
 0x25d   : > { %v4134_v27 = vmul.f32 %v7265_v16, %v4059_v43  ;;  %v4135_v30 = vmul.f32 %v7265_v16, %v4060_v29  ;;  %v7392_v34 = vmul.f32 %v4641_v52, %v555_v56  ;;  %v755_v54 = vmul.f32 %v4593_v11, %v550_v13 }
 0x25e   : > { %v1174_v6 = vmul.f32 %v4602_v18, %v550_v13  ;;  %v1609_v31 = vmul.f32 %v4619_v32, %v550_v13  ;;  %v7400_v37 = vmul.f32 %v4643_v53, %v555_v56  ;;  %v675_v35 = vmul.f32 %v4611_v23, %v550_v13 }
 0x25f   : > { %v4209_v12 = vadd.f32 %v7278_v60, %v4134_v27  ;;  %v4210_v51 = vadd.f32 %v7278_v60, %v4135_v30  ;;  %v947_v24 = vrot.slane %v755_v54, 1  ;;  %v2027_v44 = vmul.f32 %v4627_v38, %v550_v13 }
 0x260   : > { %v1796_v36 = vrot.slane %v1609_v31, 2  ;;  %v2446_v47 = vmul.f32 %v4632_v42, %v550_v13  ;;  %v8742_v41 = vrot.slane %v7228_v7, 1  ;;  %v1366_v56 = vrot.slane %v1174_v6, 2 }
 0x261   : > { %v4277_v19 = vmax.f32 %v4209_v12, 0.0  ;;  %v4278_v3 = vmax.f32 %v4210_v51, 0.0  ;;  %v950_v29 = vsel %vm839_vm0, %v947_v24, %v8611_v59  ;;  %v2881_v27 = vmul.f32 %v4639_v48, %v550_v13 }
 0x262   : > { %v948_v43 = vsel %vm839_vm0, %v8742_v41, %v947_v24  ;;  %v8613_v30 = vrot.slane %v7385_v2, 4  ;;  %v3066_v54 = vrot.slane %v7389_v15, 4  ;;  %v2215_v51 = vrot.slane %v2027_v44, 3 }
 0x263   : > { %4345 = vst [vmem:[%s4932_s21 + $0x158] sm:$0xff] %v4277_v19  ;;  %4346 = vst [vmem:[%s4932_s21 + $0x160] sm:$0xff] %v4278_v3  ;;  %v1098_v12 = vadd.f32 %v948_v43, %v7259_v20  ;;  %v3485_v7 = vrot.slane %v7392_v34, 5  ;;  %v1099_v31 = vadd.f32 %v950_v29, %v675_v35  ;;  %v8743_v41 = vrot.slane %v7234_v28, 2 }
 0x264   : > { %v1799_v6 = vsel %vm1258_vm1, %v1796_v36, %v1798_v49  ;;  %v8612_v24 = vrot.slane %v7400_v37, 6  ;;  %v2634_v59 = vrot.slane %v2446_v47, 4  ;;  %v1367_v20 = vsel %vm1258_vm1, %v1364_v40, %v1366_v56  ;;  %v565_v40 = vpop.permute.xlu1 %564 }
 0x265   : > { %v1797_v58 = vsel %vm1258_vm1, %v8743_v41, %v1796_v36  ;;  %v1952_v3 = vadd.f32 %v1799_v6, %v7211_v25  ;;  %v1369_v28 = vsel %vm1258_vm1, %v1366_v56, %v1368_v63  ;;  %v3064_v35 = vrot.slane %v2881_v27, 4 }
 0x266   : > { %v1951_v19 = vadd.f32 %v1797_v58, %v7202_v26  ;;  %v3299_v44 = vmul.f32 %v4641_v52, %v550_v13  ;;  %v7434_v43 = vadd.f32 %v1367_v20, %v1098_v12  ;;  %v2216_v26 = vsel %vm2115_vm2, %v2213_v33, %v2215_v51 }
 0x267   : > { %v2218_v25 = vsel %vm2115_vm2, %v2215_v51, %v2217_v1  ;;  %v3718_v4 = vmul.f32 %v4643_v53, %v550_v13  ;;  %v7443_v58 = vadd.f32 %v1369_v28, %v1099_v31  ;;  %v3065_v36 = vsel %vm2534_vm3, %v3062_v61, %v3064_v35 }
 0x268   : > { %v3067_v47 = vsel %vm2534_vm3, %v3064_v35, %v3066_v54  ;;  %v3483_v17 = vrot.slane %v3299_v44, 5  ;;  %v2370_v29 = vadd.f32 %v2216_v26, %v1951_v19  ;;  %v2371_v33 = vadd.f32 %v2218_v25, %v1952_v3  ;;  %v560_v25 = vpop.permute.xlu0 %559 }
 0x269   : > { %v3223_v56 = vadd.f32 %v3065_v36, %v7254_v21  ;;  %v3224_v27 = vadd.f32 %v3067_v47, %v7256_v46  ;;  %v8744_v13 = vrot.slane %v7287_v57, 5  ;;  %v3902_v61 = vrot.slane %v3718_v4, 6 }
 0x26a   : > { %v3486_v5 = vsel %vm3391_vm4, %v3483_v17, %v3485_v7  ;;  %v7460_v51 = vmul.f32 %v4593_v11, %v565_v40  ;;  %v7463_v6 = vmul.f32 %v4602_v18, %v565_v40  ;;  %v7466_v21 = vmul.f32 %v4619_v32, %v565_v40 }
 0x26b   : > { %v3484_v12 = vsel %vm3391_vm4, %v8744_v13, %v3483_v17  ;;  %v3643_v41 = vadd.f32 %v3486_v5, %v3224_v27  ;;  %v8745_v46 = vrot.slane %v7290_v39, 6  ;;  %v3905_v19 = vsel %vm3810_vm5, %v3902_v61, %v8612_v24 }
 0x26c   : > { %v3642_v31 = vadd.f32 %v3484_v12, %v3223_v56  ;;  %v7475_v3 = vmul.f32 %v4627_v38, %v565_v40  ;;  %v7478_v20 = vmul.f32 %v4632_v42, %v565_v40  ;;  %v8746_v28 = vrot.slane %v7246_v62, 4 }
 0x26d   : > { %v3903_v57 = vsel %vm3810_vm5, %v8745_v46, %v3902_v61  ;;  %v2637_v39 = vsel %vm2534_vm3, %v2634_v59, %v8613_v30  ;;  %v4062_v26 = vadd.f32 %v3905_v19, %v3643_v41  ;;  %v7491_v47 = vmul.f32 %v4611_v23, %v565_v40 }
 0x26e   : > { %v2635_v35 = vsel %vm2534_vm3, %v8746_v28, %v2634_v59  ;;  %v4061_v44 = vadd.f32 %v3903_v57, %v3642_v31  ;;  %v7488_v36 = vadd.f32 %v2637_v39, %v2371_v33  ;;  %v8614_v17 = vrot.slane %v7460_v51, 1 }
 0x26f   : > { %v7486_v4 = vadd.f32 %v2635_v35, %v2370_v29  ;;  %v4137_v56 = vmul.f32 %v7265_v16, %v4062_v26  ;;  %v1372_v27 = vrot.slane %v7463_v6, 2  ;;  %v8615_v59 = vrot.slane %v7466_v21, 2 }
 0x270   : > { %v4136_v62 = vmul.f32 %v7265_v16, %v4061_v44  ;;  %v2221_v13 = vrot.slane %v7475_v3, 3  ;;  %v757_v33 = vmul.f32 %v4593_v11, %v560_v25  ;;  %v1176_v12 = vmul.f32 %v4602_v18, %v560_v25 }
 0x271   : > { %v4212_v61 = vadd.f32 %v7278_v60, %v4137_v56  ;;  %v7505_v31 = vmul.f32 %v4639_v48, %v565_v40  ;;  %v1611_v41 = vmul.f32 %v4619_v32, %v560_v25  ;;  %v7509_v46 = vmul.f32 %v4641_v52, %v565_v40 }
 0x272   : > { %v4211_v5 = vadd.f32 %v7278_v60, %v4136_v62  ;;  %v7512_v57 = vmul.f32 %v4643_v53, %v565_v40  ;;  %v951_v19 = vrot.slane %v757_v33, 1  ;;  %v2029_v28 = vmul.f32 %v4627_v38, %v560_v25 }
 0x273   : > { %v4280_v39 = vmax.f32 %v4212_v61, 0.0  ;;  %v1800_v44 = vrot.slane %v1611_v41, 2  ;;  %v2883_v26 = vmul.f32 %v4639_v48, %v560_v25  ;;  %v677_v62 = vmul.f32 %v4611_v23, %v560_v25  ;;  %v575_v61 = vpop.permute.xlu1 %574 }
 0x274   : > { %v4279_v35 = vmax.f32 %v4211_v5, 0.0  ;;  %v8747_v56 = vrot.slane %v7341_v9, 1  ;;  %v1370_v24 = vrot.slane %v1176_v12, 2  ;;  %v2448_v30 = vmul.f32 %v4632_v42, %v560_v25 }
 0x275   : > { %4348 = vst [vmem:[%s4932_s21 + $0x170] sm:$0xff] %v4280_v39  ;;  %v3070_v40 = vrot.slane %v7505_v31, 4  ;;  %v954_v33 = vsel %vm839_vm0, %v951_v19, %v8614_v17  ;;  %v1801_v5 = vsel %vm1258_vm1, %v1798_v49, %v1800_v44  ;;  %v1803_v9 = vsel %vm1258_vm1, %v1800_v44, %v8615_v59 }
 0x276   : > { %v952_v29 = vsel %vm839_vm0, %v8747_v56, %v951_v19  ;;  %4347 = vst [vmem:[%s4932_s21 + $0x168] sm:$0xff] %v4279_v35  ;;  %v8616_v12 = vrot.slane %v7509_v46, 5  ;;  %v2219_v35 = vrot.slane %v2029_v28, 3  ;;  %v1953_v39 = vadd.f32 %v1801_v5, %v7338_v22 }
 0x277   : > { %v1100_v41 = vadd.f32 %v952_v29, %v7377_v10  ;;  %v1954_v56 = vadd.f32 %v1803_v9, %v7352_v55  ;;  %v3068_v19 = vrot.slane %v2883_v26, 4  ;;  %v3301_v45 = vmul.f32 %v4641_v52, %v560_v25 }
 0x278   : > { %v1101_v17 = vadd.f32 %v954_v33, %v677_v62  ;;  %v1371_v49 = vsel %vm1258_vm1, %v1368_v63, %v1370_v24  ;;  %v1373_v44 = vsel %vm1258_vm1, %v1370_v24, %v1372_v27  ;;  %v2638_v59 = vrot.slane %v2448_v30, 4 }
 0x279   : > { %v2220_v22 = vsel %vm2115_vm2, %v2217_v1, %v2219_v35  ;;  %v2222_v55 = vsel %vm2115_vm2, %v2219_v35, %v2221_v13  ;;  %v3069_v0 = vsel %vm2534_vm3, %v3066_v54, %v3068_v19  ;;  %v3071_v10 = vsel %vm2534_vm3, %v3068_v19, %v3070_v40 }
 0x27a   : > { %v3225_v63 = vadd.f32 %v3069_v0, %v7372_v14  ;;  %v3226_v30 = vadd.f32 %v3071_v10, %v7374_v50  ;;  %v3487_v24 = vrot.slane %v3301_v45, 5  ;;  %v3720_v8 = vmul.f32 %v4643_v53, %v560_v25 }
 0x27b   : > { %v7560_v1 = vadd.f32 %v1371_v49, %v1100_v41  ;;  %v2372_v29 = vadd.f32 %v2220_v22, %v1953_v39  ;;  %v2373_v28 = vadd.f32 %v2222_v55, %v1954_v56  ;;  %v7563_v26 = vmul.f32 %v4593_v11, %v575_v61 }
 0x27c   : > { %v3488_v15 = vsel %vm3391_vm4, %v3485_v7, %v3487_v24  ;;  %v3490_v14 = vsel %vm3391_vm4, %v3487_v24, %v8616_v12  ;;  %v3906_v54 = vrot.slane %v3720_v8, 6  ;;  %v7572_v50 = vmul.f32 %v4602_v18, %v575_v61 }
 0x27d   : > { %v7574_v25 = vadd.f32 %v1373_v44, %v1101_v17  ;;  %v3644_v62 = vadd.f32 %v3488_v15, %v3225_v63  ;;  %v3645_v33 = vadd.f32 %v3490_v14, %v3226_v30  ;;  %v7577_v5 = vmul.f32 %v4619_v32, %v575_v61  ;;  %v570_v44 = vpop.permute.xlu0 %569 }
 0x27e   : > { %v8748_v9 = vrot.slane %v7385_v2, 4  ;;  %v8749_v7 = vrot.slane %v7400_v37, 6  ;;  %v8750_v35 = vrot.slane %v7512_v57, 6  ;;  %v7589_v17 = vmul.f32 %v4627_v38, %v575_v61 }
 0x27f   : > { %v8751_v56 = vrot.slane %v7478_v20, 4  ;;  %v7599_v37 = vmul.f32 %v4611_v23, %v575_v61  ;;  %v8617_v55 = vrot.slane %v7563_v26, 1  ;;  %v1376_v0 = vrot.slane %v7572_v50, 2 }
 0x280   : > { %v2639_v34 = vsel %vm2534_vm3, %v8748_v9, %v2638_v59  ;;  %v3907_v41 = vsel %vm3810_vm5, %v8749_v7, %v3906_v54  ;;  %v3909_v39 = vsel %vm3810_vm5, %v3906_v54, %v8750_v35  ;;  %v7607_v30 = vmul.f32 %v4632_v42, %v575_v61 }
 0x281   : > { %v2641_v19 = vsel %vm2534_vm3, %v2638_v59, %v8751_v56  ;;  %v7594_v45 = vadd.f32 %v2639_v34, %v2372_v29  ;;  %v4063_v2 = vadd.f32 %v3907_v41, %v3644_v62  ;;  %v4064_v49 = vadd.f32 %v3909_v39, %v3645_v33 }
 0x282   : > { %v7596_v22 = vadd.f32 %v2641_v19, %v2373_v28  ;;  %v1806_v59 = vrot.slane %v7577_v5, 2  ;;  %v2225_v24 = vrot.slane %v7589_v17, 3  ;;  %v7611_v8 = vmul.f32 %v4639_v48, %v575_v61 }
 0x283   : > { %v4138_v10 = vmul.f32 %v7265_v16, %v4063_v2  ;;  %v4139_v63 = vmul.f32 %v7265_v16, %v4064_v49  ;;  %v7614_v29 = vmul.f32 %v4641_v52, %v575_v61  ;;  %v759_v28 = vmul.f32 %v4593_v11, %v570_v44 }
 0x284   : > { %v1178_v54 = vmul.f32 %v4602_v18, %v570_v44  ;;  %v1613_v62 = vmul.f32 %v4619_v32, %v570_v44  ;;  %v7622_v33 = vmul.f32 %v4643_v53, %v575_v61  ;;  %v679_v9 = vmul.f32 %v4611_v23, %v570_v44 }
 0x285   : > { %v4213_v15 = vadd.f32 %v7278_v60, %v4138_v10  ;;  %v4214_v14 = vadd.f32 %v7278_v60, %v4139_v63  ;;  %v955_v34 = vrot.slane %v759_v28, 1  ;;  %v2031_v7 = vmul.f32 %v4627_v38, %v570_v44 }
 0x286   : > { %v1804_v39 = vrot.slane %v1613_v62, 2  ;;  %v2450_v56 = vmul.f32 %v4632_v42, %v570_v44  ;;  %v8752_v19 = vrot.slane %v7460_v51, 1  ;;  %v1374_v61 = vrot.slane %v1178_v54, 2 }
 0x287   : > { %v4281_v41 = vmax.f32 %v4213_v15, 0.0  ;;  %v4282_v35 = vmax.f32 %v4214_v14, 0.0  ;;  %v958_v49 = vsel %vm839_vm0, %v955_v34, %v8617_v55  ;;  %v2885_v10 = vmul.f32 %v4639_v48, %v570_v44 }
 0x288   : > { %v956_v2 = vsel %vm839_vm0, %v8752_v19, %v955_v34  ;;  %v8619_v63 = vrot.slane %v7607_v30, 4  ;;  %v3074_v28 = vrot.slane %v7611_v8, 4  ;;  %v2223_v14 = vrot.slane %v2031_v7, 3 }
 0x289   : > { %4349 = vst [vmem:[%s4932_s21 + $0x178] sm:$0xff] %v4281_v41  ;;  %4350 = vst [vmem:[%s4932_s21 + $0x180] sm:$0xff] %v4282_v35  ;;  %v1102_v15 = vadd.f32 %v956_v2, %v7491_v47  ;;  %v3493_v51 = vrot.slane %v7614_v29, 5  ;;  %v1103_v62 = vadd.f32 %v958_v49, %v679_v9  ;;  %v8753_v19 = vrot.slane %v7466_v21, 2 }
 0x28a   : > { %v1807_v54 = vsel %vm1258_vm1, %v1804_v39, %v1806_v59  ;;  %v8618_v34 = vrot.slane %v7622_v33, 6  ;;  %v2642_v55 = vrot.slane %v2450_v56, 4  ;;  %v1375_v47 = vsel %vm1258_vm1, %v1372_v27, %v1374_v61  ;;  %v585_v27 = vpop.permute.xlu1 %584 }
 0x28b   : > { %v1805_v12 = vsel %vm1258_vm1, %v8753_v19, %v1804_v39  ;;  %v1956_v35 = vadd.f32 %v1807_v54, %v7443_v58  ;;  %v1377_v21 = vsel %vm1258_vm1, %v1374_v61, %v1376_v0  ;;  %v3072_v9 = vrot.slane %v2885_v10, 4 }
 0x28c   : > { %v1955_v41 = vadd.f32 %v1805_v12, %v7434_v43  ;;  %v3303_v7 = vmul.f32 %v4641_v52, %v570_v44  ;;  %v7656_v2 = vadd.f32 %v1375_v47, %v1102_v15  ;;  %v2224_v43 = vsel %vm2115_vm2, %v2221_v13, %v2223_v14 }
 0x28d   : > { %v2226_v58 = vsel %vm2115_vm2, %v2223_v14, %v2225_v24  ;;  %v3722_v6 = vmul.f32 %v4643_v53, %v570_v44  ;;  %v7665_v12 = vadd.f32 %v1377_v21, %v1103_v62  ;;  %v3073_v39 = vsel %vm2534_vm3, %v3070_v40, %v3072_v9 }
 0x28e   : > { %v3075_v56 = vsel %vm2534_vm3, %v3072_v9, %v3074_v28  ;;  %v3491_v3 = vrot.slane %v3303_v7, 5  ;;  %v2374_v49 = vadd.f32 %v2224_v43, %v1955_v41  ;;  %v2375_v13 = vadd.f32 %v2226_v58, %v1956_v35  ;;  %v580_v58 = vpop.permute.xlu0 %579 }
 0x28f   : > { %v3227_v61 = vadd.f32 %v3073_v39, %v7486_v4  ;;  %v3228_v10 = vadd.f32 %v3075_v56, %v7488_v36  ;;  %v8754_v44 = vrot.slane %v7509_v46, 5  ;;  %v3910_v40 = vrot.slane %v3722_v6, 6 }
 0x290   : > { %v3494_v31 = vsel %vm3391_vm4, %v3491_v3, %v3493_v51  ;;  %v7682_v14 = vmul.f32 %v4593_v11, %v585_v27  ;;  %v7685_v54 = vmul.f32 %v4602_v18, %v585_v27  ;;  %v7688_v4 = vmul.f32 %v4619_v32, %v585_v27 }
 0x291   : > { %v3492_v15 = vsel %vm3391_vm4, %v8754_v44, %v3491_v3  ;;  %v3647_v19 = vadd.f32 %v3494_v31, %v3228_v10  ;;  %v8755_v36 = vrot.slane %v7478_v20, 4  ;;  %v8756_v41 = vrot.slane %v7512_v57, 6 }
 0x292   : > { %v3646_v62 = vadd.f32 %v3492_v15, %v3227_v61  ;;  %v3913_v47 = vsel %vm3810_vm5, %v3910_v40, %v8618_v34  ;;  %v7700_v21 = vmul.f32 %v4627_v38, %v585_v27  ;;  %v2645_v9 = vsel %vm2534_vm3, %v2642_v55, %v8619_v63 }
 0x293   : > { %v2643_v46 = vsel %vm2534_vm3, %v8755_v36, %v2642_v55  ;;  %v3911_v35 = vsel %vm3810_vm5, %v8756_v41, %v3910_v40  ;;  %v4066_v43 = vadd.f32 %v3913_v47, %v3647_v19  ;;  %v7706_v20 = vmul.f32 %v4611_v23, %v585_v27 }
 0x294   : > { %v4065_v7 = vadd.f32 %v3911_v35, %v3646_v62  ;;  %v7708_v57 = vadd.f32 %v2643_v46, %v2374_v49  ;;  %v7710_v6 = vadd.f32 %v2645_v9, %v2375_v13  ;;  %v8620_v39 = vrot.slane %v7682_v14, 1 }
 0x295   : > { %v7714_v56 = vmul.f32 %v4632_v42, %v585_v27  ;;  %v4141_v61 = vmul.f32 %v7265_v16, %v4066_v43  ;;  %v8621_v55 = vrot.slane %v7685_v54, 2  ;;  %v1810_v10 = vrot.slane %v7688_v4, 2 }
 0x296   : > { %v4140_v3 = vmul.f32 %v7265_v16, %v4065_v7  ;;  %v2229_v44 = vrot.slane %v7700_v21, 3  ;;  %v7722_v49 = vmul.f32 %v4639_v48, %v585_v27  ;;  %v761_v13 = vmul.f32 %v4593_v11, %v580_v58 }
 0x297   : > { %v1180_v15 = vmul.f32 %v4602_v18, %v580_v58  ;;  %v4216_v40 = vadd.f32 %v7278_v60, %v4141_v61  ;;  %v7729_v62 = vmul.f32 %v4641_v52, %v585_v27  ;;  %v1615_v19 = vmul.f32 %v4619_v32, %v580_v58 }
 0x298   : > { %v4215_v31 = vadd.f32 %v7278_v60, %v4140_v3  ;;  %v7733_v36 = vmul.f32 %v4643_v53, %v585_v27  ;;  %v681_v46 = vmul.f32 %v4611_v23, %v580_v58  ;;  %v959_v41 = vrot.slane %v761_v13, 1 }
 0x299   : > { %v2033_v35 = vmul.f32 %v4627_v38, %v580_v58  ;;  %v4284_v9 = vmax.f32 %v4216_v40, 0.0  ;;  %v1808_v7 = vrot.slane %v1615_v19, 2  ;;  %v2887_v43 = vmul.f32 %v4639_v48, %v580_v58 }
 0x29a   : > { %v4283_v47 = vmax.f32 %v4215_v31, 0.0  ;;  %v8757_v3 = vrot.slane %v7563_v26, 1  ;;  %v962_v34 = vsel %vm839_vm0, %v959_v41, %v8620_v39  ;;  %v1378_v27 = vrot.slane %v1180_v15, 2 }
 0x29b   : > { %v2452_v63 = vmul.f32 %v4632_v42, %v580_v58  ;;  %4352 = vst [vmem:[%s4932_s21 + $0x190] sm:$0xff] %v4284_v9  ;;  %v3078_v31 = vrot.slane %v7722_v49, 4  ;;  %v1809_v40 = vsel %vm1258_vm1, %v1806_v59, %v1808_v7  ;;  %v1811_v26 = vsel %vm1258_vm1, %v1808_v7, %v1810_v10 }
 0x29c   : > { %v960_v61 = vsel %vm839_vm0, %v8757_v3, %v959_v41  ;;  %4351 = vst [vmem:[%s4932_s21 + $0x188] sm:$0xff] %v4283_v47  ;;  %v3497_v19 = vrot.slane %v7729_v62, 5  ;;  %v1105_v41 = vadd.f32 %v962_v34, %v681_v46  ;;  %v2227_v3 = vrot.slane %v2033_v35, 3 }
 0x29d   : > { %v1104_v15 = vadd.f32 %v960_v61, %v7599_v37  ;;  %v1957_v47 = vadd.f32 %v1809_v40, %v7560_v1  ;;  %v1958_v9 = vadd.f32 %v1811_v26, %v7574_v25  ;;  %v3076_v39 = vrot.slane %v2887_v43, 4 }
 0x29e   : > { %v3305_v13 = vmul.f32 %v4641_v52, %v580_v58  ;;  %v8622_v5 = vrot.slane %v7733_v36, 6  ;;  %v1379_v59 = vsel %vm1258_vm1, %v1376_v0, %v1378_v27  ;;  %v1381_v7 = vsel %vm1258_vm1, %v1378_v27, %v8621_v55  ;;  %v595_v0 = vpop.permute.xlu1 %594 }
 0x29f   : > { %v2646_v37 = vrot.slane %v2452_v63, 4  ;;  %v2228_v1 = vsel %vm2115_vm2, %v2225_v24, %v2227_v3  ;;  %v2230_v25 = vsel %vm2115_vm2, %v2227_v3, %v2229_v44  ;;  %v3077_v34 = vsel %vm2534_vm3, %v3074_v28, %v3076_v39 }
 0x2a0   : > { %v3079_v50 = vsel %vm2534_vm3, %v3076_v39, %v3078_v31  ;;  %v3229_v46 = vadd.f32 %v3077_v34, %v7594_v45  ;;  %v3495_v17 = vrot.slane %v3305_v13, 5  ;;  %v3724_v24 = vmul.f32 %v4643_v53, %v580_v58 }
 0x2a1   : > { %v3230_v63 = vadd.f32 %v3079_v50, %v7596_v22  ;;  %v7782_v35 = vadd.f32 %v1379_v59, %v1104_v15  ;;  %v7784_v43 = vadd.f32 %v1381_v7, %v1105_v41  ;;  %v2376_v61 = vadd.f32 %v2228_v1, %v1957_v47  ;;  %v590_v1 = vpop.permute.xlu0 %589 }
 0x2a2   : > { %v2377_v8 = vadd.f32 %v2230_v25, %v1958_v9  ;;  %v3496_v28 = vsel %vm3391_vm4, %v3493_v51, %v3495_v17  ;;  %v3498_v39 = vsel %vm3391_vm4, %v3495_v17, %v3497_v19  ;;  %v3914_v45 = vrot.slane %v3724_v24, 6 }
 0x2a3   : > { %v7793_v22 = vmul.f32 %v4593_v11, %v595_v0  ;;  %v3648_v27 = vadd.f32 %v3496_v28, %v3229_v46  ;;  %v3649_v58 = vadd.f32 %v3498_v39, %v3230_v63  ;;  %v7796_v13 = vmul.f32 %v4602_v18, %v595_v0 }
 0x2a4   : > { %v7799_v40 = vmul.f32 %v4619_v32, %v595_v0  ;;  %v8758_v29 = vrot.slane %v7607_v30, 4  ;;  %v8759_v26 = vrot.slane %v7622_v33, 6  ;;  %v3917_v41 = vsel %vm3810_vm5, %v3914_v45, %v8622_v5 }
 0x2a5   : > { %v7811_v3 = vmul.f32 %v4627_v38, %v595_v0  ;;  %v8760_v47 = vrot.slane %v7714_v56, 4  ;;  %v4068_v7 = vadd.f32 %v3917_v41, %v3649_v58  ;;  %v7821_v33 = vmul.f32 %v4611_v23, %v595_v0 }
 0x2a6   : > { %v2647_v51 = vsel %vm2534_vm3, %v8758_v29, %v2646_v37  ;;  %v3915_v15 = vsel %vm3810_vm5, %v8759_v26, %v3914_v45  ;;  %v8623_v34 = vrot.slane %v7793_v22, 1  ;;  %v7825_v50 = vmul.f32 %v4639_v48, %v595_v0 }
 0x2a7   : > { %v2649_v9 = vsel %vm2534_vm3, %v2646_v37, %v8760_v47  ;;  %v7816_v59 = vadd.f32 %v2647_v51, %v2376_v61  ;;  %v4067_v30 = vadd.f32 %v3915_v15, %v3648_v27  ;;  %v4143_v63 = vmul.f32 %v7265_v16, %v4068_v7 }
 0x2a8   : > { %v7818_v25 = vadd.f32 %v2649_v9, %v2377_v8  ;;  %v1814_v17 = vrot.slane %v7799_v40, 2  ;;  %v2233_v24 = vrot.slane %v7811_v3, 3  ;;  %v7833_v61 = vmul.f32 %v4632_v42, %v595_v0 }
 0x2a9   : > { %v4142_v46 = vmul.f32 %v7265_v16, %v4067_v30  ;;  %v7836_v8 = vmul.f32 %v4641_v52, %v595_v0  ;;  %v7839_v28 = vmul.f32 %v4593_v11, %v590_v1  ;;  %v4218_v45 = vadd.f32 %v7278_v60, %v4143_v63 }
 0x2aa   : > { %v7844_v27 = vmul.f32 %v4643_v53, %v595_v0  ;;  %v1617_v58 = vmul.f32 %v4619_v32, %v590_v1  ;;  %v3082_v29 = vrot.slane %v7825_v50, 4  ;;  %v2035_v51 = vmul.f32 %v4627_v38, %v590_v1 }
 0x2ab   : > { %v4217_v39 = vadd.f32 %v7278_v60, %v4142_v46  ;;  %v2454_v26 = vmul.f32 %v4632_v42, %v590_v1  ;;  %v2889_v15 = vmul.f32 %v4639_v48, %v590_v1  ;;  %v4286_v47 = vmax.f32 %v4218_v45, 0.0 }
 0x2ac   : > { %v8624_v9 = vrot.slane %v7839_v28, 1  ;;  %v1812_v30 = vrot.slane %v1617_v58, 2  ;;  %v8625_v7 = vrot.slane %v7833_v61, 4  ;;  %v7854_v0 = vmul.f32 %v4602_v18, %v590_v1 }
 0x2ad   : > { %v4285_v41 = vmax.f32 %v4217_v39, 0.0  ;;  %v2231_v46 = vrot.slane %v2035_v51, 3  ;;  %v3080_v63 = vrot.slane %v2889_v15, 4  ;;  %4354 = vst [vmem:[%s4932_s21 + $0x1a0] sm:$0xff] %v4286_v47  ;;  %v683_v55 = vmul.f32 %v4611_v23, %v590_v1 }
 0x2ae   : > { %v1813_v37 = vsel %vm1258_vm1, %v1810_v10, %v1812_v30  ;;  %v1815_v39 = vsel %vm1258_vm1, %v1812_v30, %v1814_v17  ;;  %v3307_v45 = vmul.f32 %v4641_v52, %v590_v1  ;;  %v8627_v58 = vrot.slane %v7836_v8, 5 }
 0x2af   : > { %4353 = vst [vmem:[%s4932_s21 + $0x198] sm:$0xff] %v4285_v41  ;;  %v1959_v5 = vadd.f32 %v1813_v37, %v7656_v2  ;;  %v1960_v51 = vadd.f32 %v1815_v39, %v7665_v12  ;;  %v2650_v15 = vrot.slane %v2454_v26, 4  ;;  %v8626_v41 = vrot.slane %v7844_v27, 6  ;;  %v7881_v2 = vpop.permute.xlu1 %604 }
 0x2b0   : > { %v966_v4 = vsel %vm839_vm0, %v8624_v9, %v8623_v34  ;;  %v3081_v10 = vsel %vm2534_vm3, %v3078_v31, %v3080_v63  ;;  %v3083_v47 = vsel %vm2534_vm3, %v3080_v63, %v3082_v29  ;;  %8761 = vst [vmem:[#allocation3_spill] sm:$0xff] %v7881_v2  ;;  %v2232_v37 = vsel %vm2115_vm2, %v2229_v44, %v2231_v46 }
 0x2b1   : > { %v3231_v26 = vadd.f32 %v3081_v10, %v7708_v57  ;;  %v3232_v30 = vadd.f32 %v3083_v47, %v7710_v6  ;;  %v2234_v49 = vsel %vm2115_vm2, %v2231_v46, %v2233_v24  ;;  %v2378_v31 = vadd.f32 %v2232_v37, %v1959_v5 }
 0x2b2   : > { %v3499_v39 = vrot.slane %v3307_v45, 5  ;;  %v3726_v63 = vmul.f32 %v4643_v53, %v590_v1  ;;  %v7893_v34 = vadd.f32 %v966_v4, %v683_v55  ;;  %v2379_v9 = vadd.f32 %v2234_v49, %v1960_v51 }
 0x2b3   : > { %v8762_v12 = vrot.slane %v7714_v56, 4  ;;  %v7900_v57 = vmul.f32 %v4593_v11, %v7881_v2  ;;  %v7910_v55 = vmul.f32 %v4602_v18, %v7881_v2  ;;  %v7914_v46 = vmul.f32 %v4619_v32, %v7881_v2 }
 0x2b4   : > { %v3500_v6 = vsel %vm3391_vm4, %v3497_v19, %v3499_v39  ;;  %v3502_v44 = vsel %vm3391_vm4, %v3499_v39, %v8627_v58  ;;  %v3918_v5 = vrot.slane %v3726_v63, 6  ;;  %v7918_v62 = vmul.f32 %v4627_v38, %v7881_v2  ;;  %v600_v19 = vpop.permute.xlu0 %599  ;;  %v7989_v58 = vpop.permute.xlu1 %614 }
 0x2b5   : > { %v2651_v21 = vsel %vm2534_vm3, %v8762_v12, %v2650_v15  ;;  %8763 = vst [vmem:[#allocation4_spill] sm:$0xff] %v7900_v57  ;;  %v3650_v56 = vadd.f32 %v3500_v6, %v3231_v26  ;;  %v3651_v1 = vadd.f32 %v3502_v44, %v3232_v30  ;;  %v2653_v45 = vsel %vm2534_vm3, %v2650_v15, %v8625_v7 }
 0x2b6   : > { %v7923_v51 = vadd.f32 %v2651_v21, %v2378_v31  ;;  %v8764_v4 = vrot.slane %v7733_v36, 6  ;;  %v3921_v47 = vsel %vm3810_vm5, %v3918_v5, %v8626_v41  ;;  %v7931_v12 = vadd.f32 %v2653_v45, %v2379_v9  ;;  %8765 = vst [vmem:[#allocation5_spill] sm:$0xff] %v7989_v58 }
 0x2b7   : > { %v4070_v26 = vadd.f32 %v3921_v47, %v3651_v1  ;;  %v8628_v30 = vrot.slane %v7900_v57, 1  ;;  %v7937_v15 = vmul.f32 %v4632_v42, %v7881_v2  ;;  %v7941_v36 = vmul.f32 %v4639_v48, %v7881_v2 }
 0x2b8   : > { %v3919_v10 = vsel %vm3810_vm5, %v8764_v4, %v3918_v5  ;;  %v7944_v31 = vmul.f32 %v4593_v11, %v600_v19  ;;  %v8631_v63 = vrot.slane %v7914_v46, 2  ;;  %v8630_v21 = vrot.slane %v7918_v62, 3 }
 0x2b9   : > { %v4069_v37 = vadd.f32 %v3919_v10, %v3650_v56  ;;  %v4145_v39 = vmul.f32 %v7265_v16, %v4070_v26  ;;  %v7952_v6 = vmul.f32 %v4641_v52, %v7881_v2  ;;  %v7956_v44 = vmul.f32 %v4643_v53, %v7881_v2 }
 0x2ba   : > { %v8629_v5 = vrot.slane %v7944_v31, 1  ;;  %v1619_v56 = vmul.f32 %v4619_v32, %v600_v19  ;;  %v7963_v45 = vmul.f32 %v4602_v18, %v600_v19  ;;  %v2037_v4 = vmul.f32 %v4627_v38, %v600_v19 }
 0x2bb   : > { %v4144_v9 = vmul.f32 %v7265_v16, %v4069_v37  ;;  %v4220_v16 = vadd.f32 %v7278_v60, %v4145_v39  ;;  %v3086_v47 = vrot.slane %v7941_v36, 4  ;;  %v2891_v26 = vmul.f32 %v4639_v48, %v600_v19 }
 0x2bc   : > { %v1816_v37 = vrot.slane %v1619_v56, 2  ;;  %v7971_v41 = vmul.f32 %v4632_v42, %v600_v19  ;;  %v970_v10 = vsel %vm839_vm0, %v8629_v5, %v8628_v30  ;;  %v2235_v39 = vrot.slane %v2037_v4, 3 }
 0x2bd   : > { %v4219_v1 = vadd.f32 %v7278_v60, %v4144_v9  ;;  %v4288_v7 = vmax.f32 %v4220_v16, 0.0  ;;  %v685_v9 = vmul.f32 %v4611_v23, %v600_v19  ;;  %v3084_v56 = vrot.slane %v2891_v26, 4 }
 0x2be   : > { %v1817_v16 = vsel %vm1258_vm1, %v1814_v17, %v1816_v37  ;;  %v1819_v60 = vsel %vm1258_vm1, %v1816_v37, %v8631_v63  ;;  %v3728_v40 = vmul.f32 %v4643_v53, %v600_v19 }
 0x2bf   : > { %v4287_v49 = vmax.f32 %v4219_v1, 0.0  ;;  %4356 = vst [vmem:[%s4932_s21 + $0x1b0] sm:$0xff] %v4288_v7  ;;  %v3085_v30 = vsel %vm2534_vm3, %v3082_v29, %v3084_v56  ;;  %v3087_v7 = vsel %vm2534_vm3, %v3084_v56, %v3086_v47  ;;  %v7999_v17 = vadd.f32 %v970_v10, %v685_v9 }
 0x2c0   : > { %v3233_v4 = vadd.f32 %v3085_v30, %v7816_v59  ;;  %v3234_v37 = vadd.f32 %v3087_v7, %v7818_v25  ;;  %v8005_v50 = vadd.f32 %v1817_v16, %v7782_v35  ;;  %v3922_v1 = vrot.slane %v3728_v40, 6 }
 0x2c1   : > { %4355 = vst [vmem:[%s4932_s21 + $0x1a8] sm:$0xff] %v4287_v49  ;;  %v3309_v49 = vmul.f32 %v4641_v52, %v600_v19  ;;  %v8009_v56 = vmul.f32 %v4619_v32, %v7989_v58  ;;  %v8012_v5 = vadd.f32 %v1819_v60, %v7784_v43  ;;  %v8017_v19 = vsel %vm2115_vm2, %v2233_v24, %v2235_v39 }
 0x2c2   : > { %v8021_v59 = vmul.f32 %v4627_v38, %v7989_v58  ;;  %v8025_v35 = vmul.f32 %v4639_v48, %v7989_v58  ;;  %v8030_v25 = vsel %vm2115_vm2, %v2235_v39, %v8630_v21  ;;  %v8766_v43 = vrot.slane %v7836_v8, 5  ;;  %v8050_v8 = vpop.permute.xlu0 %609 }
 0x2c3   : > { %v3503_v29 = vrot.slane %v3309_v49, 5  ;;  %v8767_v24 = vrot.slane %v7952_v6, 5  ;;  %v8040_v10 = vmul.f32 %v4593_v11, %v7989_v58  ;;  %v8044_v16 = vmul.f32 %v4632_v42, %v7989_v58  ;;  %8769 = vst [vmem:[#allocation7_spill] sm:$0xff] %v8050_v8 }
 0x2c4   : > { %v8048_v39 = vmul.f32 %v4641_v52, %v7989_v58  ;;  %v8770_v7 = vrot.slane %v7844_v27, 6  ;;  %v8771_v40 = vrot.slane %v7956_v44, 6  ;;  %v8067_v27 = vmul.f32 %v4619_v32, %v8050_v8 }
 0x2c5   : > { %v3504_v3 = vsel %vm3391_vm4, %v8766_v43, %v3503_v29  ;;  %v3506_v30 = vsel %vm3391_vm4, %v3503_v29, %v8767_v24  ;;  %8768 = vst [vmem:[#allocation6_spill] sm:$0xff] %v8040_v10  ;;  %v8087_v63 = vmul.f32 %v4593_v11, %v8050_v8  ;;  %v8102_v24 = vmul.f32 %v4632_v42, %v8050_v8 }
 0x2c6   : > { %v3652_v9 = vadd.f32 %v3504_v3, %v3233_v4  ;;  %v3653_v60 = vadd.f32 %v3506_v30, %v3234_v37  ;;  %v3923_v49 = vsel %vm3810_vm5, %v8770_v7, %v3922_v1  ;;  %v3925_v29 = vsel %vm3810_vm5, %v3922_v1, %v8771_v40  ;;  %v8092_v30 = vld [vmem:[%s8547_s3] ss:$0 sm:$0xff] }
 0x2c7   : > { %v8061_v37 = vmul.f32 %v4643_v53, %v7989_v58  ;;  %v2893_v7 = vmul.f32 %v4639_v48, %v8050_v8  ;;  %v3311_v1 = vmul.f32 %v4641_v52, %v8050_v8  ;;  %v3730_v40 = vmul.f32 %v4643_v53, %v8050_v8  ;;  %8772 = vst [vmem:[#allocation8_spill] sm:$0xff] %v8087_v63 }
 0x2c8   : > { %v4071_v43 = vadd.f32 %v3923_v49, %v3652_v9  ;;  %v4072_v3 = vadd.f32 %v3925_v29, %v3653_v60  ;;  %v8078_v9 = vld [vmem:[%s8546_s2] ss:$0 sm:$0xff]  ;;  %v8098_v29 = vmul.f32 %v4627_v38, %v8050_v8  ;;  %v8774_v8 = vrot.slane %v7952_v6, 5 }
 0x2c9   : > { %v3088_v4 = vrot.slane %v2893_v7, 4  ;;  %v3507_v26 = vrot.slane %v3311_v1, 5  ;;  %v1538_v7 = vpop.permute.xlu1 %1537  ;;  %v3926_v57 = vrot.slane %v3730_v40, 6  ;;  %v8775_v1 = vrot.slane %v8048_v39, 5 }
 0x2ca   : > { %v4146_v60 = vmul.f32 %v8078_v9, %v4071_v43  ;;  %v4147_v49 = vmul.f32 %v8078_v9, %v4072_v3  ;;  %v8776_v6 = vrot.slane %v7956_v44, 6 }
 0x2cb   : > { %v3089_v21 = vsel %vm2534_vm3, %v3086_v47, %v3088_v4  ;;  %v3508_v63 = vsel %vm3391_vm4, %v8774_v8, %v3507_v26  ;;  %v3510_v36 = vsel %vm3391_vm4, %v3507_v26, %v8775_v1  ;;  %v8120_v47 = vmul.f32 %v4619_v32, %v1538_v7  ;;  %v695_v1 = vpop.permute.xlu0 %694 }
 0x2cc   : > { %v4221_v43 = vadd.f32 %v8092_v30, %v4146_v60  ;;  %v4222_v3 = vadd.f32 %v8092_v30, %v4147_v49  ;;  %v8773_v60 = vrot.slane %v8025_v35, 4  ;;  %v3235_v58 = vadd.f32 %v3089_v21, %v7923_v51 }
 0x2cd   : > { %v8131_v21 = vmul.f32 %v4639_v48, %v1538_v7  ;;  %v3927_v26 = vsel %vm3810_vm5, %v8776_v6, %v3926_v57  ;;  %v8777_v8 = vrot.slane %v8061_v37, 6 }
 0x2ce   : > { %v3091_v49 = vsel %vm2534_vm3, %v3088_v4, %v8773_v60  ;;  %v4289_v23 = vmax.f32 %v4221_v43, 0.0  ;;  %v4290_v2 = vmax.f32 %v4222_v3, 0.0  ;;  %v8123_v4 = vmul.f32 %v4627_v38, %v1538_v7 }
 0x2cf   : > { %v3236_v10 = vadd.f32 %v3091_v49, %v7931_v12  ;;  %v3654_v40 = vadd.f32 %v3508_v63, %v3235_v58  ;;  %v8128_v12 = vmul.f32 %v4632_v42, %v1538_v7  ;;  %v3929_v43 = vsel %vm3810_vm5, %v3926_v57, %v8777_v8 }
 0x2d0   : > { %4357 = vst [vmem:[%s4932_s21 + $0x1b8] sm:$0xff] %v4289_v23  ;;  %4358 = vst [vmem:[%s4932_s21 + $0x1c0] sm:$0xff] %v4290_v2  ;;  %v8140_v3 = vmul.f32 %v4641_v52, %v1538_v7  ;;  %v8143_v23 = vmul.f32 %v4643_v53, %v1538_v7  ;;  %v2380_v57 = vadd.f32 %v8017_v19, %v8005_v50  ;;  %v8778_v8 = vrot.slane %v7971_v41, 4 }
 0x2d1   : > { %v3655_v51 = vadd.f32 %v3510_v36, %v3236_v10  ;;  %v4073_v63 = vadd.f32 %v3927_v26, %v3654_v40  ;;  %v2381_v49 = vadd.f32 %v8030_v25, %v8012_v5  ;;  %v8640_v40 = vrot.slane %v8131_v21, 4 }
 0x2d2   : > { %v8165_v5 = vmul.f32 %v4593_v11, %v695_v1  ;;  %v2895_v60 = vmul.f32 %v4639_v48, %v695_v1  ;;  %v8179_v11 = vmul.f32 %v4619_v32, %v695_v1  ;;  %v8185_v41 = vmul.f32 %v4632_v42, %v695_v1 }
 0x2d3   : > { %v4074_v10 = vadd.f32 %v3929_v43, %v3655_v51  ;;  %v4148_v7 = vmul.f32 %v8078_v9, %v4073_v63  ;;  %v3513_v51 = vrot.slane %v8140_v3, 5  ;;  %v8779_v43 = vrot.slane %v7833_v61, 4 }
 0x2d4   : > { %8780 = vst [vmem:[#allocation9_spill] sm:$0xff] %v8165_v5  ;;  %v8781_v63 = vrot.slane %v7937_v15, 4  ;;  %v8783_v58 = vrot.slane %v8025_v35, 4  ;;  %v1824_v35 = vrot.slane %v8179_v11, 2  ;;  %v8807_v3 = vrot.slane %v7944_v31, 1 }
 0x2d5   : > { %v4149_v36 = vmul.f32 %v8078_v9, %v4074_v10  ;;  %v2655_v50 = vsel %vm2534_vm3, %v8779_v43, %v8778_v8  ;;  %v4223_v19 = vadd.f32 %v8092_v30, %v4148_v7  ;;  %v8782_v10 = vmov %v8778_v8 }
 0x2d6   : > { %v2657_v6 = vsel %vm2534_vm3, %v8782_v10, %v8781_v63  ;;  %v2799_v61 = vadd.f32 %v2655_v50, %v2380_v57  ;;  %v8176_v8 = vmul.f32 %v4602_v18, %v695_v1  ;;  %v8182_v7 = vmul.f32 %v4627_v38, %v695_v1 }
 0x2d7   : > { %v4224_v25 = vadd.f32 %v8092_v30, %v4149_v36  ;;  %v1548_v36 = vpop.permute.xlu1 %1547  ;;  %v4291_v43 = vmax.f32 %v4223_v19, 0.0  ;;  %v3092_v63 = vrot.slane %v2895_v60, 4  ;;  %v2800_v10 = vadd.f32 %v2657_v6, %v2381_v49 }
 0x2d8   : > { %v3313_v57 = vmul.f32 %v4641_v52, %v695_v1  ;;  %v3732_v50 = vmul.f32 %v4643_v53, %v695_v1  ;;  %v8202_v60 = vmul.f32 %v4627_v38, %v1548_v36 }
 0x2d9   : > { %v4292_v44 = vmax.f32 %v4224_v25, 0.0  ;;  %4359 = vst [vmem:[%s4932_s21 + $0x1c8] sm:$0xff] %v4291_v43  ;;  %v3093_v26 = vsel %vm2534_vm3, %v8783_v58, %v3092_v63  ;;  %v3095_v19 = vsel %vm2534_vm3, %v3092_v63, %v8640_v40  ;;  %v8199_v25 = vmul.f32 %v4619_v32, %v1548_v36 }
 0x2da   : > { %v3237_v49 = vadd.f32 %v3093_v26, %v2799_v61  ;;  %v3238_v6 = vadd.f32 %v3095_v19, %v2800_v10  ;;  %v3511_v2 = vrot.slane %v3313_v57, 5  ;;  %v3930_v1 = vrot.slane %v3732_v50, 6 }
 0x2db   : > { %4360 = vst [vmem:[%s4932_s21 + $0x1d0] sm:$0xff] %v4292_v44  ;;  %v8784_v63 = vrot.slane %v8048_v39, 5  ;;  %v8215_v26 = vmul.f32 %v4632_v42, %v1548_v36  ;;  %v8218_v61 = vmul.f32 %v4639_v48, %v1548_v36  ;;  %v8785_v39 = vrot.slane %v8061_v37, 6 }
 0x2dc   : > { %v3514_v5 = vsel %vm3391_vm4, %v3511_v2, %v3513_v51  ;;  %v8786_v44 = vrot.slane %v8143_v23, 6  ;;  %v8229_v43 = vmul.f32 %v4641_v52, %v1548_v36  ;;  %v8787_v58 = vrot.slane %v7839_v28, 1 }
 0x2dd   : > { %v3512_v40 = vsel %vm3391_vm4, %v8784_v63, %v3511_v2  ;;  %v3657_v57 = vadd.f32 %v3514_v5, %v3238_v6  ;;  %v3931_v63 = vsel %vm3810_vm5, %v8785_v39, %v3930_v1  ;;  %v8237_v19 = vmul.f32 %v4643_v53, %v1548_v36 }
 0x2de   : > { %v3656_v10 = vadd.f32 %v3512_v40, %v3237_v49  ;;  %v3933_v2 = vsel %vm3810_vm5, %v3930_v1, %v8786_v44  ;;  %v8788_v40 = vrot.slane %v7682_v14, 1  ;;  %v8789_v37 = vrot.slane %v7796_v13, 2 }
 0x2df   : > { %v4076_v6 = vadd.f32 %v3933_v2, %v3657_v57  ;;  %v8790_v39 = vrot.slane %v7854_v0, 2  ;;  %v8791_v14 = vrot.slane %v8009_v56, 2  ;;  %v8794_v2 = vrot.slane %v7685_v54, 2 }
 0x2e0   : > { %v964_v5 = vsel %vm839_vm0, %v8788_v40, %v8787_v58  ;;  %v4075_v49 = vadd.f32 %v3931_v63, %v3656_v10  ;;  %v8792_v58 = vrot.slane %v8067_v27, 2  ;;  %v3936_v54 = vrot.slane %v8237_v19, 6  ;;  %v8828_v19 = vld [vmem:[#allocation2_spill] sm:$0xff] }
 0x2e1   : > { %v1385_v1 = vsel %vm1258_vm1, %v8790_v39, %v8789_v37  ;;  %v1106_v50 = vadd.f32 %v964_v5, %v7706_v20  ;;  %v4151_v57 = vmul.f32 %v8078_v9, %v4076_v6  ;;  %v8793_v63 = vmov %v8790_v39  ;;  %v1543_v37 = vpop.permute.xlu0 %1542 }
 0x2e2   : > { %v1526_v28 = vadd.f32 %v1385_v1, %v7893_v34  ;;  %v1823_v10 = vsel %vm1258_vm1, %v8792_v58, %v8791_v14  ;;  %v4150_v36 = vmul.f32 %v8078_v9, %v4075_v49  ;;  %v1383_v40 = vsel %vm1258_vm1, %v8794_v2, %v8793_v63 }
 0x2e3   : > { %v8795_v20 = vmov %v8792_v58  ;;  %v8796_v34 = vrot.slane %v7914_v46, 2  ;;  %v3098_v39 = vrot.slane %v8218_v61, 4  ;;  %v3517_v1 = vrot.slane %v8229_v43, 5  ;;  %v8823_v43 = vld [vmem:[#allocation8_spill] sm:$0xff] }
 0x2e4   : > { %v1525_v49 = vadd.f32 %v1383_v40, %v1106_v50  ;;  %v1964_v14 = vadd.f32 %v1823_v10, %v1526_v28  ;;  %v4225_v6 = vadd.f32 %v8092_v30, %v4150_v36  ;;  %v4226_v0 = vadd.f32 %v8092_v30, %v4151_v57 }
 0x2e5   : > { %v1821_v5 = vsel %vm1258_vm1, %v8796_v34, %v8795_v20  ;;  %v8797_v27 = vrot.slane %v8021_v59, 3  ;;  %v8798_v46 = vrot.slane %v8098_v29, 3  ;;  %v8800_v50 = vrot.slane %v7918_v62, 3 }
 0x2e6   : > { %v1963_v63 = vadd.f32 %v1821_v5, %v1525_v49  ;;  %v2897_v36 = vmul.f32 %v4639_v48, %v1543_v37  ;;  %v4293_v57 = vmax.f32 %v4225_v6, 0.0  ;;  %v4294_v40 = vmax.f32 %v4226_v0, 0.0  ;;  %v2814_v0 = vpop.permute.xlu1 %2813 }
 0x2e7   : > { %v2242_v58 = vsel %vm2115_vm2, %v8798_v46, %v8797_v27  ;;  %v8799_v2 = vmov %v8798_v46  ;;  %v8801_v20 = vrot.slane %v8102_v24, 4  ;;  %v8802_v34 = vrot.slane %v7937_v15, 4 }
 0x2e8   : > { %v2240_v28 = vsel %vm2115_vm2, %v8800_v50, %v8799_v2  ;;  %v2383_v10 = vadd.f32 %v2242_v58, %v1964_v14  ;;  %v8803_v27 = vrot.slane %v8044_v16, 4  ;;  %v8291_v49 = vmul.f32 %v4619_v32, %v1543_v37  ;;  %4361 = vst [vmem:[%s4932_s21 + $0x1d8] sm:$0xff] %v4293_v57  ;;  %4362 = vst [vmem:[%s4932_s21 + $0x1e0] sm:$0xff] %v4294_v40 }
 0x2e9   : > { %v2659_v44 = vsel %vm2534_vm3, %v8802_v34, %v8801_v20  ;;  %v8804_v5 = vmov %v8801_v20  ;;  %v2382_v62 = vadd.f32 %v2240_v28, %v1963_v63  ;;  %v3096_v14 = vrot.slane %v2897_v36, 4 }
 0x2ea   : > { %v2661_v29 = vsel %vm2534_vm3, %v8804_v5, %v8803_v27  ;;  %v3315_v6 = vmul.f32 %v4641_v52, %v1543_v37  ;;  %v8297_v15 = vmul.f32 %v4627_v38, %v1543_v37  ;;  %v8300_v58 = vmul.f32 %v4632_v42, %v1543_v37 }
 0x2eb   : > { %v2802_v46 = vadd.f32 %v2661_v29, %v2383_v10  ;;  %v3734_v24 = vmul.f32 %v4643_v53, %v1543_v37  ;;  %v2801_v2 = vadd.f32 %v2659_v44, %v2382_v62  ;;  %v8805_v63 = vrot.slane %v8131_v21, 4 }
 0x2ec   : > { %v3099_v28 = vsel %vm2534_vm3, %v3096_v14, %v3098_v39  ;;  %v3515_v36 = vrot.slane %v3315_v6, 5  ;;  %v8310_v40 = vmul.f32 %v4639_v48, %v2814_v0  ;;  %v8313_v20 = vmul.f32 %v4641_v52, %v2814_v0 }
 0x2ed   : > { %v3097_v50 = vsel %vm2534_vm3, %v8805_v63, %v3096_v14  ;;  %v3240_v57 = vadd.f32 %v3099_v28, %v2802_v46  ;;  %v3934_v10 = vrot.slane %v3734_v24, 6  ;;  %v8322_v37 = vmul.f32 %v4643_v53, %v2814_v0 }
 0x2ee   : > { %v3239_v34 = vadd.f32 %v3097_v50, %v2801_v2  ;;  %v3516_v21 = vsel %vm3391_vm4, %v3513_v51, %v3515_v36  ;;  %v3518_v44 = vsel %vm3391_vm4, %v3515_v36, %v3517_v1  ;;  %v8806_v5 = vrot.slane %v8143_v23, 6 }
 0x2ef   : > { %v3659_v27 = vadd.f32 %v3518_v44, %v3240_v57  ;;  %v3937_v62 = vsel %vm3810_vm5, %v3934_v10, %v3936_v54  ;;  %v8808_v51 = vrot.slane %v7793_v22, 1  ;;  %v8809_v0 = vrot.slane %v7963_v45, 2 }
 0x2f0   : > { %v3935_v29 = vsel %vm3810_vm5, %v8806_v5, %v3934_v10  ;;  %v3658_v6 = vadd.f32 %v3516_v21, %v3239_v34  ;;  %v8810_v24 = vrot.slane %v7796_v13, 2  ;;  %v8811_v2 = vrot.slane %v7910_v55, 2  ;;  %v1553_v21 = vpop.permute.xlu0 %1552 }
 0x2f1   : > { %v968_v14 = vsel %vm839_vm0, %v8808_v51, %v8807_v3  ;;  %v8812_v63 = vmov %v8809_v0  ;;  %v4078_v31 = vadd.f32 %v3937_v62, %v3659_v27  ;;  %v8813_v28 = vrot.slane %v8009_v56, 2 }
 0x2f2   : > { %v1108_v46 = vadd.f32 %v968_v14, %v7821_v33  ;;  %v1387_v23 = vsel %vm1258_vm1, %v8810_v24, %v8809_v0  ;;  %v1389_v50 = vsel %vm1258_vm1, %v8812_v63, %v8811_v2  ;;  %v8814_v36 = vrot.slane %v8120_v47, 2 }
 0x2f3   : > { %v1528_v22 = vadd.f32 %v1389_v50, %v7999_v17  ;;  %v1825_v33 = vsel %vm1258_vm1, %v8813_v28, %v1824_v35  ;;  %v1828_v57 = vrot.slane %v8291_v49, 2  ;;  %v2247_v45 = vrot.slane %v8297_v15, 3  ;;  %v2824_v28 = vpop.permute.xlu1 %2823 }
 0x2f4   : > { %v1827_v13 = vsel %vm1258_vm1, %v1824_v35, %v8814_v36  ;;  %v4077_v10 = vadd.f32 %v3935_v29, %v3658_v6  ;;  %v1527_v34 = vadd.f32 %v1387_v23, %v1108_v46  ;;  %v4153_v17 = vmul.f32 %v8078_v9, %v4078_v31 }
 0x2f5   : > { %v3102_v44 = vrot.slane %v8310_v40, 4  ;;  %v3521_v56 = vrot.slane %v8313_v20, 5  ;;  %v1966_v27 = vadd.f32 %v1827_v13, %v1528_v22  ;;  %v3940_v11 = vrot.slane %v8322_v37, 6 }
 0x2f6   : > { %v4152_v5 = vmul.f32 %v8078_v9, %v4077_v10  ;;  %v1965_v62 = vadd.f32 %v1825_v33, %v1527_v34  ;;  %v8815_v35 = vrot.slane %v8123_v4, 3  ;;  %v8816_v3 = vrot.slane %v8182_v7, 3 }
 0x2f7   : > { %v4228_v51 = vadd.f32 %v8092_v30, %v4153_v17  ;;  %v8818_v6 = vrot.slane %v8021_v59, 3  ;;  %v2899_v24 = vmul.f32 %v4639_v48, %v1553_v21  ;;  %v8819_v63 = vrot.slane %v8185_v41, 4 }
 0x2f8   : > { %v2246_v29 = vsel %vm2115_vm2, %v8816_v3, %v8815_v35  ;;  %v8817_v14 = vmov %v8816_v3  ;;  %v4227_v23 = vadd.f32 %v8092_v30, %v4152_v5  ;;  %v8820_v50 = vrot.slane %v8044_v16, 4 }
 0x2f9   : > { %v2244_v46 = vsel %vm2115_vm2, %v8818_v6, %v8817_v14  ;;  %v2385_v0 = vadd.f32 %v2246_v29, %v1966_v27  ;;  %v8821_v22 = vrot.slane %v8128_v12, 4  ;;  %v8822_v7 = vmov %v8819_v63 }
 0x2fa   : > { %v2384_v2 = vadd.f32 %v2244_v46, %v1965_v62  ;;  %v2663_v31 = vsel %vm2534_vm3, %v8820_v50, %v8819_v63  ;;  %v4296_v33 = vmax.f32 %v4228_v51, 0.0  ;;  %v8388_v13 = vmul.f32 %v4619_v32, %v1553_v21  ;;  %v8825_v50 = vld [vmem:[#allocation7_spill] sm:$0xff] }
 0x2fb   : > { %v2665_v59 = vsel %vm2534_vm3, %v8822_v7, %v8821_v22  ;;  %v3100_v10 = vrot.slane %v2899_v24, 4  ;;  %v4295_v34 = vmax.f32 %v4227_v23, 0.0  ;;  %v3317_v16 = vmul.f32 %v4641_v52, %v1553_v21  ;;  %v8826_v22 = vld [vmem:[#allocation5_spill] sm:$0xff] }
 0x2fc   : > { %v2804_v36 = vadd.f32 %v2665_v59, %v2385_v0  ;;  %v2803_v17 = vadd.f32 %v2663_v31, %v2384_v2  ;;  %v3736_v27 = vmul.f32 %v4643_v53, %v1553_v21  ;;  %4364 = vst [vmem:[%s4932_s21 + $0x1f0] sm:$0xff] %v4296_v33  ;;  %v8400_v62 = vmul.f32 %v4639_v48, %v2824_v28 }
 0x2fd   : > { %v3101_v41 = vsel %vm2534_vm3, %v3098_v39, %v3100_v10  ;;  %v3103_v5 = vsel %vm2534_vm3, %v3100_v10, %v3102_v44  ;;  %v8403_v32 = vmul.f32 %v4641_v52, %v2824_v28  ;;  %4363 = vst [vmem:[%s4932_s21 + $0x1e8] sm:$0xff] %v4295_v34  ;;  %v3519_v29 = vrot.slane %v3317_v16, 5  ;;  %v8829_v34 = vld [vmem:[#allocation4_spill] sm:$0xff] }
 0x2fe   : > { %v3241_v35 = vadd.f32 %v3101_v41, %v2803_v17  ;;  %v3242_v3 = vadd.f32 %v3103_v5, %v2804_v36  ;;  %v3938_v51 = vrot.slane %v3736_v27, 6  ;;  %v2666_v14 = vrot.slane %v8300_v58, 4  ;;  %v8827_v36 = vld [vmem:[#allocation3_spill] sm:$0xff] }
 0x2ff   : > { %v1832_v61 = vrot.slane %v8388_v13, 2  ;;  %v8409_v39 = vmul.f32 %v4627_v38, %v1553_v21  ;;  %v8412_v6 = vmul.f32 %v4632_v42, %v1553_v21  ;;  %v3520_v46 = vsel %vm3391_vm4, %v3517_v1, %v3519_v29  ;;  %v8824_v21 = vld [vmem:[#allocation6_spill] sm:$0xff] }
 0x300   : > { %v3522_v0 = vsel %vm3391_vm4, %v3519_v29, %v3521_v56  ;;  %v3106_v24 = vrot.slane %v8400_v62, 4  ;;  %v3525_v58 = vrot.slane %v8403_v32, 5  ;;  %v3660_v23 = vadd.f32 %v3520_v46, %v3241_v35 }
 0x301   : > { %v3661_v2 = vadd.f32 %v3522_v0, %v3242_v3  ;;  %v3939_v38 = vsel %vm3810_vm5, %v3936_v54, %v3938_v51  ;;  %v3941_v42 = vsel %vm3810_vm5, %v3938_v51, %v3940_v11  ;;  %v971_v1 = vrot.slane %v8823_v43, 1  ;;  %v2819_v51 = vpop.permute.xlu0 %2818 }
 0x302   : > { %v973_v63 = vrot.slane %v8824_v21, 1  ;;  %v1186_v31 = vmul.f32 %v4602_v18, %v8825_v50  ;;  %v1187_v7 = vmul.f32 %v4602_v18, %v8826_v22  ;;  %v4079_v59 = vadd.f32 %v3939_v38, %v3660_v23 }
 0x303   : > { %v4080_v33 = vadd.f32 %v3941_v42, %v3661_v2  ;;  %v686_v10 = vmul.f32 %v8828_v19, %v8827_v36  ;;  %v687_v54 = vmul.f32 %v8828_v19, %v8825_v50  ;;  %v8830_v17 = vrot.slane %v8829_v34, 1 }
 0x304   : > { %v974_v27 = vsel %vm839_vm0, %v971_v1, %v973_v63  ;;  %v1390_v41 = vrot.slane %v1186_v31, 2  ;;  %v1392_v5 = vrot.slane %v1187_v7, 2  ;;  %v4154_v35 = vmul.f32 %v8078_v9, %v4079_v59 }
 0x305   : > { %v972_v16 = vsel %vm839_vm0, %v8830_v17, %v971_v1  ;;  %v4155_v18 = vmul.f32 %v8078_v9, %v4080_v33  ;;  %v1111_v29 = vadd.f32 %v974_v27, %v687_v54  ;;  %v8831_v46 = vrot.slane %v7910_v55, 2 }
 0x306   : > { %v1110_v3 = vadd.f32 %v972_v16, %v686_v10  ;;  %v1393_v23 = vsel %vm1258_vm1, %v1390_v41, %v1392_v5  ;;  %v8832_v2 = vrot.slane %v8120_v47, 2  ;;  %v8833_v42 = vrot.slane %v8199_v25, 2 }
 0x307   : > { %v1391_v0 = vsel %vm1258_vm1, %v8831_v46, %v1390_v41  ;;  %v4229_v1 = vadd.f32 %v8092_v30, %v4154_v35  ;;  %v4230_v55 = vadd.f32 %v8092_v30, %v4155_v18  ;;  %v1530_v50 = vadd.f32 %v1393_v23, %v1111_v29  ;;  %v8837_v18 = vld [vmem:[#allocation9_spill] sm:$0xff]  ;;  %v2829_v29 = vpop.permute.xlu0 %2828 }
 0x308   : > { %v1829_v38 = vsel %vm1258_vm1, %v8832_v2, %v1828_v57  ;;  %v1831_v43 = vsel %vm1258_vm1, %v1828_v57, %v8833_v42  ;;  %v1529_v21 = vadd.f32 %v1391_v0, %v1110_v3  ;;  %v8461_v31 = vmul.f32 %v4643_v53, %v2824_v28 }
 0x309   : > { %v8834_v47 = vrot.slane %v8123_v4, 3  ;;  %v2901_v49 = vmul.f32 %v4639_v48, %v2819_v51  ;;  %v3319_v57 = vmul.f32 %v4641_v52, %v2819_v51  ;;  %v4297_v59 = vmax.f32 %v4229_v1, 0.0 }
 0x30a   : > { %v4298_v33 = vmax.f32 %v4230_v55, 0.0  ;;  %v1967_v36 = vadd.f32 %v1829_v38, %v1529_v21  ;;  %v1968_v10 = vadd.f32 %v1831_v43, %v1530_v50  ;;  %v8835_v54 = vrot.slane %v8202_v60, 3 }
 0x30b   : > { %v2248_v7 = vsel %vm2115_vm2, %v8834_v47, %v2247_v45  ;;  %v8836_v34 = vrot.slane %v8128_v12, 4  ;;  %v3104_v17 = vrot.slane %v2901_v49, 4  ;;  %v3738_v16 = vmul.f32 %v4643_v53, %v2819_v51  ;;  %4365 = vst [vmem:[%s4932_s21 + $0x1f8] sm:$0xff] %v4297_v59 }
 0x30c   : > { %v2250_v28 = vsel %vm2115_vm2, %v2247_v45, %v8835_v54  ;;  %4366 = vst [vmem:[%s4932_s21 + $0x200] sm:$0xff] %v4298_v33  ;;  %v2386_v27 = vadd.f32 %v2248_v7, %v1967_v36  ;;  %v688_v35 = vmul.f32 %v8828_v19, %v8826_v22  ;;  %v8838_v3 = vrot.slane %v8837_v18, 1 }
 0x30d   : > { %v2667_v4 = vsel %vm2534_vm3, %v8836_v34, %v2666_v14  ;;  %v2387_v41 = vadd.f32 %v2250_v28, %v1968_v10  ;;  %v8839_v45 = vrot.slane %v8215_v26, 4  ;;  %v3105_v51 = vsel %vm2534_vm3, %v3102_v44, %v3104_v17 }
 0x30e   : > { %v976_v15 = vsel %vm839_vm0, %v973_v63, %v8838_v3  ;;  %v3107_v46 = vsel %vm2534_vm3, %v3104_v17, %v3106_v24  ;;  %v3523_v0 = vrot.slane %v3319_v57, 5  ;;  %v2805_v23 = vadd.f32 %v2667_v4, %v2386_v27 }
 0x30f   : > { %v2669_v12 = vsel %vm2534_vm3, %v2666_v14, %v8839_v45  ;;  %v1112_v19 = vadd.f32 %v976_v15, %v688_v35  ;;  %v2251_v2 = vrot.slane %v8409_v39, 3  ;;  %v3944_v63 = vrot.slane %v8461_v31, 6 }
 0x310   : > { %v2806_v22 = vadd.f32 %v2669_v12, %v2387_v41  ;;  %v3942_v38 = vrot.slane %v3738_v16, 6  ;;  %v2903_v42 = vmul.f32 %v4639_v48, %v2829_v29  ;;  %v3243_v14 = vadd.f32 %v3105_v51, %v2805_v23 }
 0x311   : > { %v8840_v40 = vrot.slane %v8176_v8, 2  ;;  %v8841_v1 = vrot.slane %v8199_v25, 2  ;;  %v2670_v21 = vrot.slane %v8412_v6, 4  ;;  %v3524_v39 = vsel %vm3391_vm4, %v3521_v56, %v3523_v0 }
 0x312   : > { %v3244_v43 = vadd.f32 %v3107_v46, %v2806_v22  ;;  %v3526_v48 = vsel %vm3391_vm4, %v3523_v0, %v3525_v58  ;;  %v3662_v8 = vadd.f32 %v3524_v39, %v3243_v14  ;;  %v3321_v13 = vmul.f32 %v4641_v52, %v2829_v29 }
 0x313   : > { %v1395_v44 = vsel %vm1258_vm1, %v1392_v5, %v8840_v40  ;;  %v1833_v55 = vsel %vm1258_vm1, %v8841_v1, %v1832_v61  ;;  %v3108_v5 = vrot.slane %v2903_v42, 4  ;;  %v3943_v25 = vsel %vm3810_vm5, %v3940_v11, %v3942_v38 }
 0x314   : > { %v1531_v50 = vadd.f32 %v1395_v44, %v1112_v19  ;;  %v3663_v31 = vadd.f32 %v3526_v48, %v3244_v43  ;;  %v3945_v61 = vsel %vm3810_vm5, %v3942_v38, %v3944_v63  ;;  %v4081_v20 = vadd.f32 %v3943_v25, %v3662_v8 }
 0x315   : > { %v8842_v56 = vmov %v8835_v54  ;;  %v3740_v49 = vmul.f32 %v4643_v53, %v2829_v29  ;;  %v8843_v59 = vmov %v8839_v45  ;;  %v3109_v33 = vsel %vm2534_vm3, %v3106_v24, %v3108_v5 }
 0x316   : > { %v1969_v6 = vadd.f32 %v1833_v55, %v1531_v50  ;;  %v4082_v47 = vadd.f32 %v3945_v61, %v3663_v31  ;;  %v2252_v7 = vsel %vm2115_vm2, %v8842_v56, %v2251_v2  ;;  %v2671_v52 = vsel %vm2534_vm3, %v8843_v59, %v2670_v21 }
 0x317   : > { %v4156_v37 = vmul.f32 %v8078_v9, %v4081_v20  ;;  %v3527_v60 = vrot.slane %v3321_v13, 5  ;;  %v3946_v54 = vrot.slane %v3740_v49, 6 }
 0x318   : > { %v2388_v57 = vadd.f32 %v2252_v7, %v1969_v6  ;;  %v4157_v11 = vmul.f32 %v8078_v9, %v4082_v47 }
 0x319   : > { %v4231_v53 = vadd.f32 %v8092_v30, %v4156_v37  ;;  %v3528_v4 = vsel %vm3391_vm4, %v3525_v58, %v3527_v60  ;;  %v3947_v62 = vsel %vm3810_vm5, %v3944_v63, %v3946_v54 }
 0x31a   : > { %v2807_v36 = vadd.f32 %v2671_v52, %v2388_v57  ;;  %v4232_v10 = vadd.f32 %v8092_v30, %v4157_v11 }
 0x31b   : > { %v4299_v28 = vmax.f32 %v4231_v53, 0.0 }
 0x31c   : > { %v3245_v26 = vadd.f32 %v3109_v33, %v2807_v36  ;;  %v4300_v34 = vmax.f32 %v4232_v10, 0.0 }
 0x31d   : > { %4367 = vst [vmem:[%s4932_s21 + $0x208] sm:$0xff] %v4299_v28 }
 0x31e   : > { %v3664_v17 = vadd.f32 %v3528_v4, %v3245_v26  ;;  %4368 = vst [vmem:[%s4932_s21 + $0x210] sm:$0xff] %v4300_v34 }
 0x320   : > { %v4083_v24 = vadd.f32 %v3947_v62, %v3664_v17 }
 0x322   : > { %v4158_v16 = vmul.f32 %v8078_v9, %v4083_v24 }
 0x324   : > { %v4233_v27 = vadd.f32 %v8092_v30, %v4158_v16 }
 0x326   : > { %v4301_v41 = vmax.f32 %v4233_v27, 0.0 }
 0x328   : > { %4369 = vst [vmem:[%s4932_s21 + $0x218] sm:$0xff] %v4301_v41 }
 0x329 PF: > { %s14_s15 = sadd.s32 1, %s4471_s15  }
 0x32a   : > { %p11_p4 = scmp.ge.s32.totalorder %s14_s15, 4  }
 0x32c   :  { %13 = sbr.rel (!%p11_p4) target bundleno = 1 (0x1), region = 74 }

// kernel: cnn_lstm_forward.8
= control target key start
LH: loop header
LB: loop body
LE: loop exit
PB: predicated region body
PF: predicated region fallthrough
CT: control target
= control target key end

     0   :  { %s2510_s15 = smov 0   ;;  %s3211_s0 = inlined_call_operand.vmem [shape: f32[2,70,128], index: 0, kind: input, shape index: {}]   ;;  %s3212_s1 = inlined_call_operand.vmem [shape: bf16[9,128,256], index: 1, kind: input, shape index: {}]   ;;  %s3213_s2 = inlined_call_operand.vmem [shape: f32[1,256], index: 2, kind: input, shape index: {}]   ;;  %s3214_s3 = inlined_call_operand.vmem [shape: f32[1,256], index: 3, kind: input, shape index: {}]   ;;  %s3215_s4 = inlined_call_operand.vmem [shape: f32[2,40,256], index: 4, kind: output, shape index: {}]  }
   0x1 LB: > { %s1952_s16 = sadd.s32 4294967295, %s2482_s15   ;;  %p1956_p0 = scmp.ge.s32.totalorder %s2482_s15, 1  ;;  %s2482_s15 = sphi %s2510_s15, %s14_s15  }
   0x2   : > { %p162_p1 = scmp.lt.s32.totalorder %s2482_s15, 3 }
   0x4   : > { %p163_p2 = pnand %p1956_p0, %p162_p1 }
   0x6   : > { %166 = sbr.rel (%p163_p2) target bundleno = 385 (0x181), region = 36 }
   0xb   : > { %v2260_v0 = vld [vmem:[%s3212_s1 + $0xf4] ss:$8 sps:$4 sm:$0xff]   ;;  %v2484_v2 = vmov 0   ;;  %v2264_v3 = vld [vmem:[%s3212_s1 + $0xf0] ss:$8 sps:$4 sm:$0xff]   ;;  %p188_p3 = scmp.lt.s32.totalorder %s1952_s16, 1 }
   0xc   : > { %v2262_v1 = vld [vmem:[%s3212_s1 + $0x74] ss:$8 sps:$4 sm:$0xff]   ;;  %383 = vmatprep.mubr.bf16.mxu0 %v2484_v2  ;;  %524 = vmatprep.mubr.bf16.mxu1 %v2484_v2  ;;  %v2265_v4 = vld [vmem:[%s3212_s1 + $0x70] ss:$8 sps:$4 sm:$0xff]   ;;  %v2266_v5 = vld [vmem:[%s3212_s1 + $0xe4] ss:$8 sps:$4 sm:$0xff]  }
   0xd   : > { %351 = vmatprep.subr.bf16.mxu0 %v2260_v0  ;;  %492 = vmatprep.subr.bf16.mxu1 %v2262_v1  ;;  %v2268_v6 = vld [vmem:[%s3212_s1 + $0x64] ss:$8 sps:$4 sm:$0xff]   ;;  %v2270_v7 = vld [vmem:[%s3212_s1 + $0xe0] ss:$8 sps:$4 sm:$0xff]   ;;  %v2272_v9 = vld [vmem:[%s3212_s1 + $0xd4] ss:$8 sps:$4 sm:$0xff]  }
   0xe   : > { %352 = vmatpush1.bf16.msra.mxu0 %v2264_v3  ;;  %493 = vmatpush1.bf16.msra.mxu1 %v2265_v4  ;;  %v2271_v8 = vld [vmem:[%s3212_s1 + $0x60] ss:$8 sps:$4 sm:$0xff]   ;;  %v2274_v10 = vld [vmem:[%s3212_s1 + $0x54] ss:$8 sps:$4 sm:$0xff]   ;;  %v2276_v11 = vld [vmem:[%s3212_s1 + $0xd0] ss:$8 sps:$4 sm:$0xff]  }
   0xf   : > { %353 = vmatprep.subr.bf16.mxu0 %v2266_v5  ;;  %494 = vmatprep.subr.bf16.mxu1 %v2268_v6  ;;  %v2277_v12 = vld [vmem:[%s3212_s1 + $0x50] ss:$8 sps:$4 sm:$0xff]   ;;  %v2278_v13 = vld [vmem:[%s3212_s1 + $0xc4] ss:$8 sps:$4 sm:$0xff]   ;;  %s3221_s16 = smov (!%p188_p3, %s1952_s16), 1  ;;  %vm1130_vm2 = vcmask 1045504  }
  0x10   : > { %v2280_v14 = vld [vmem:[%s3212_s1 + $0x44] ss:$8 sps:$4 sm:$0xff]   ;;  %v2282_v15 = vld [vmem:[%s3212_s1 + $0xc0] ss:$8 sps:$4 sm:$0xff]   ;;  %v2284_v17 = vld [vmem:[%s3212_s1 + $0xb4] ss:$8 sps:$4 sm:$0xff]  }
  0x11   : > { %v2283_v16 = vld [vmem:[%s3212_s1 + $0x40] ss:$8 sps:$4 sm:$0xff]   ;;  %v2286_v18 = vld [vmem:[%s3212_s1 + $0x34] ss:$8 sps:$4 sm:$0xff]   ;;  %s2249_s29 = smul.u32 72, %s3221_s16  ;;  %vm1673_vm3 = vcmask 1044480  }
  0x12   : > { %354 = vmatpush1.bf16.msra.mxu0 %v2270_v7  ;;  %495 = vmatpush1.bf16.msra.mxu1 %v2271_v8  ;;  %v2288_v19 = vld [vmem:[%s3212_s1 + $0xb0] ss:$8 sps:$4 sm:$0xff]   ;;  %v2290_v21 = vld [vmem:[%s3212_s1 + $0xa4] ss:$8 sps:$4 sm:$0xff]   ;;  %v2294_v23 = vld [vmem:[%s3212_s1 + $0xa0] ss:$8 sps:$4 sm:$0xff]  }
  0x13   : > { %355 = vmatprep.subr.bf16.mxu0 %v2272_v9  ;;  %496 = vmatprep.subr.bf16.mxu1 %v2274_v10  ;;  %v2289_v20 = vld [vmem:[%s3212_s1 + $0x30] ss:$8 sps:$4 sm:$0xff]   ;;  %v2292_v22 = vld [vmem:[%s3212_s1 + $0x24] ss:$8 sps:$4 sm:$0xff]   ;;  %s2596_s14 = scalar_lea.vmem %s3211_s0, %s2249_s29  ;;  %v2295_v24 = vld [vmem:[%s3212_s1 + $0x20] ss:$8 sps:$4 sm:$0xff]  }
  0x14   : > { %v2296_v25 = vld [vmem:[%s3212_s1 + $0x94] ss:$8 sps:$4 sm:$0xff]   ;;  %v199_v27 = vld [vmem:[%s2596_s14] sm:$0xff]  ;;  %v2612_v28 = vld [vmem:[%s2596_s14 + $0x8] sm:$0xff]  ;;  %vm244_vm0 = vsmask.f32 7424 }
  0x15   : > { %v2298_v26 = vld [vmem:[%s3212_s1 + $0x14] ss:$8 sps:$4 sm:$0xff]   ;;  %v2621_v31 = vpack.c.bf16 %v2612_v28, %v199_v27  ;;  %v2300_v32 = vld [vmem:[%s3212_s1 + $0x90] ss:$8 sps:$4 sm:$0xff]   ;;  %v2302_v35 = vld [vmem:[%s3212_s1 + $0x84] ss:$8 sps:$4 sm:$0xff]  }
  0x16   : > { %356 = vmatpush1.bf16.msra.mxu0 %v2276_v11  ;;  %497 = vmatpush1.bf16.msra.mxu1 %v2277_v12  ;;  %v2615_v29 = vld [vmem:[%s2596_s14 + $0x10] sm:$0xff]  ;;  %v2618_v30 = vld [vmem:[%s2596_s14 + $0x18] sm:$0xff]  ;;  %v2304_v38 = vld [vmem:[%s3212_s1 + $0x4] ss:$8 sps:$4 sm:$0xff]   ;;  %vm1485_vm1 = vsmask.f32 5376 }
  0x17   : > { %357 = vmatprep.subr.bf16.mxu0 %v2278_v13  ;;  %498 = vmatprep.subr.bf16.mxu1 %v2280_v14  ;;  %v2301_v33 = vld [vmem:[%s3212_s1 + $0x10] ss:$8 sps:$4 sm:$0xff]   ;;  %v2631_v34 = vpack.c.bf16 %v2618_v30, %v2615_v29  ;;  %v246_v36 = vshrl.u32 %v2621_v31, 16  ;;  %v248_v37 = vshll.u32 %v2621_v31, 16  ;;  %v2306_v40 = vld [vmem:[%s3212_s1 + $0x80] ss:$8 sps:$4 sm:$0xff]  }
  0x18   : > { %v2307_v43 = vld [vmem:[%s3212_s1] ss:$8 sps:$4 sm:$0xff]   ;;  %v2310_v47 = vld [vmem:[%s3212_s1 + $0x174] ss:$8 sps:$4 sm:$0xff]   ;;  %v2308_v54 = vld [vmem:[%s3212_s1 + $0x170] ss:$8 sps:$4 sm:$0xff]  }
  0x19   : > { %v253_v39 = vshll.u32 %v2631_v34, 16  ;;  %v250_v41 = vrot.slane %v248_v37, 1  ;;  %v257_v42 = vshrl.u32 %v2631_v34, 16  ;;  %v2313_v49 = vld [vmem:[%s3212_s1 + $0x1f4] ss:$8 sps:$4 sm:$0xff]   ;;  %v2656_v50 = vld [vmem:[%s2596_s14 + $0x20] sm:$0xff] }
  0x1a   : > { %358 = vmatpush1.bf16.msra.mxu0 %v2282_v15  ;;  %499 = vmatpush1.bf16.msra.mxu1 %v2283_v16  ;;  %v2659_v52 = vld [vmem:[%s2596_s14 + $0x28] sm:$0xff]  ;;  %v2311_v55 = vld [vmem:[%s3212_s1 + $0x1f0] ss:$8 sps:$4 sm:$0xff]   ;;  %v2322_v63 = vld [vmem:[%s3212_s1 + $0x154] ss:$8 sps:$4 sm:$0xff]   ;;  %v1309_v13 = vrot.slane %v2631_v34, 2 }
  0x1b   : > { %359 = vmatprep.subr.bf16.mxu0 %v2284_v17  ;;  %500 = vmatprep.subr.bf16.mxu1 %v2286_v18  ;;  %v1487_v44 = vrot.slane %v253_v39, 3  ;;  %v251_v45 = vor.u32 %v250_v41, %v246_v36  ;;  %v255_v46 = vrot.slane %v253_v39, 1  ;;  %v1486_v48 = vrot.slane %v257_v42, 2  ;;  %v2316_v57 = vld [vmem:[%s3212_s1 + $0x164] ss:$8 sps:$4 sm:$0xff]   ;;  %s2250_s7 = smul.u32 80, %s3221_s16 }
  0x1c   : > { %v2670_v56 = vpack.c.bf16 %v2659_v52, %v2656_v50  ;;  %v2319_v58 = vld [vmem:[%s3212_s1 + $0x1e4] ss:$8 sps:$4 sm:$0xff]   ;;  %v2314_v60 = vld [vmem:[%s3212_s1 + $0x160] ss:$8 sps:$4 sm:$0xff]   ;;  %v2325_v4 = vld [vmem:[%s3212_s1 + $0x1d4] ss:$8 sps:$4 sm:$0xff]   ;;  %v2782_v41 = vpack.c.bf16 %v2615_v29, %v2612_v28 }
  0x1d   : > { %v1488_v51 = vor.u32 %v1487_v44, %v1486_v48  ;;  %v256_v53 = vsel %vm244_vm0, %v251_v45, %v255_v46  ;;  %v2317_v62 = vld [vmem:[%s3212_s1 + $0x1e0] ss:$8 sps:$4 sm:$0xff]   ;;  %v259_v0 = vor.u32 %v257_v42, %v255_v46  ;;  %v2320_v6 = vld [vmem:[%s3212_s1 + $0x150] ss:$8 sps:$4 sm:$0xff]   ;;  %v2328_v10 = vld [vmem:[%s3212_s1 + $0x144] ss:$8 sps:$4 sm:$0xff]   ;;  %v2786_v42 = vpack.c.bf16 %v2656_v50, %v2618_v30  ;;  %s3186_s9 = scalar_lea.vmem %s3215_s4, %s2250_s7 }
  0x1e   : > { %360 = vmatpush1.bf16.msra.mxu0 %v2288_v19  ;;  %501 = vmatpush1.bf16.msra.mxu1 %v2289_v20  ;;  %v261_v59 = vshll.u32 %v2670_v56, 16  ;;  %v265_v61 = vshrl.u32 %v2670_v56, 16  ;;  %v2323_v8 = vld [vmem:[%s3212_s1 + $0x1d0] ss:$8 sps:$4 sm:$0xff]   ;;  %v2331_v11 = vld [vmem:[%s3212_s1 + $0x1c4] ss:$8 sps:$4 sm:$0xff]  }
  0x1f   : > { %361 = vmatprep.subr.bf16.mxu0 %v2290_v21  ;;  %502 = vmatprep.subr.bf16.mxu1 %v2292_v22  ;;  %v1310_v14 = vrot.slane %v2670_v56, 2  ;;  %v2326_v15 = vld [vmem:[%s3212_s1 + $0x140] ss:$8 sps:$4 sm:$0xff]   ;;  %v2334_v17 = vld [vmem:[%s3212_s1 + $0x134] ss:$8 sps:$4 sm:$0xff]   ;;  %v1674_v19 = vrot.slane %v2631_v34, 3 }
  0x20   : > { %v263_v1 = vrot.slane %v261_v59, 1  ;;  %v1490_v3 = vrot.slane %v261_v59, 3  ;;  %v1489_v5 = vrot.slane %v265_v61, 2  ;;  %v2329_v16 = vld [vmem:[%s3212_s1 + $0x1c0] ss:$8 sps:$4 sm:$0xff]   ;;  %v1675_v21 = vrot.slane %v2670_v56, 3 }
  0x21   : > { %v2729_v18 = vsel %vm1130_vm2, %v1309_v13, %v1310_v14  ;;  %v2337_v20 = vld [vmem:[%s3212_s1 + $0x1b4] ss:$8 sps:$4 sm:$0xff]   ;;  %v2332_v22 = vld [vmem:[%s3212_s1 + $0x130] ss:$8 sps:$4 sm:$0xff]   ;;  %v2340_v27 = vld [vmem:[%s3212_s1 + $0x124] ss:$8 sps:$4 sm:$0xff]  }
  0x22   : > { %362 = vmatpush1.bf16.msra.mxu0 %v2294_v23  ;;  %503 = vmatpush1.bf16.msra.mxu1 %v2295_v24  ;;  %v2698_v7 = vor.u32 %v1490_v3, %v1489_v5  ;;  %v264_v9 = vsel %vm244_vm0, %v259_v0, %v263_v1  ;;  %v209_v23 = vpack.c.bf16 %v2656_v50, %v2656_v50  ;;  %v2346_v36 = vld [vmem:[%s3212_s1 + $0x114] ss:$8 sps:$4 sm:$0xff]   ;;  %v2347_v39 = vld [vmem:[%s3212_s1 + $0x190] ss:$8 sps:$4 sm:$0xff]   ;;  %v2350_v44 = vld [vmem:[%s3212_s1 + $0x100] ss:$8 sps:$4 sm:$0xff]  }
  0x23   : > { %363 = vmatprep.subr.bf16.mxu0 %v2296_v25  ;;  %504 = vmatprep.subr.bf16.mxu1 %v2298_v26  ;;  %v267_v24 = vor.u32 %v265_v61, %v263_v1  ;;  %v2746_v25 = vsel %vm1673_vm3, %v1674_v19, %v1675_v21  ;;  %v2335_v26 = vld [vmem:[%s3212_s1 + $0x1b0] ss:$8 sps:$4 sm:$0xff]   ;;  %v2349_v37 = vld [vmem:[%s3212_s1 + $0x194] ss:$8 sps:$4 sm:$0xff]   ;;  %v574_v45 = vrot.slane %v2621_v31, 1  ;;  %v575_v29 = vrot.slane %v2631_v34, 1 }
  0x24   : > { %v2712_v12 = vsel %vm1485_vm1, %v1488_v51, %v2698_v7  ;;  %v2353_v28 = vld [vmem:[%s3212_s1 + $0x180] ss:$8 sps:$4 sm:$0xff]   ;;  %v2358_v30 = vld [vmem:[%s3212_s1 + $0x274] ss:$8 sps:$4 sm:$0xff]   ;;  %v756_v46 = vrot.slane %v2782_v41, 1  ;;  %vm573_vm4 = vcmask 1046528  }
  0x25   : > { %v2808_v48 = vld [vmem:[%s2596_s14 + $0x30] sm:$0xff]  ;;  %v576_v50 = vsel %vm573_vm4, %v574_v45, %v575_v29  ;;  %v2376_v3 = vld [vmem:[%s3212_s1 + $0x244] ss:$8 sps:$4 sm:$0xff]   ;;  %v2374_v5 = vld [vmem:[%s3212_s1 + $0x240] ss:$8 sps:$4 sm:$0xff]  }
  0x26   : > { %364 = vmatpush1.bf16.msra.mxu0 %v2300_v32  ;;  %505 = vmatpush1.bf16.msra.mxu1 %v2301_v33  ;;  %v2343_v32 = vld [vmem:[%s3212_s1 + $0x1a4] ss:$8 sps:$4 sm:$0xff]   ;;  %v2338_v33 = vld [vmem:[%s3212_s1 + $0x120] ss:$8 sps:$4 sm:$0xff]   ;;  %v2370_v59 = vld [vmem:[%s3212_s1 + $0x254] ss:$8 sps:$4 sm:$0xff]  }
  0x27   : > { %365 = vmatprep.subr.bf16.mxu0 %v2302_v35  ;;  %506 = vmatprep.subr.bf16.mxu1 %v2304_v38  ;;  %v2341_v35 = vld [vmem:[%s3212_s1 + $0x1a0] ss:$8 sps:$4 sm:$0xff]   ;;  %v2344_v38 = vld [vmem:[%s3212_s1 + $0x110] ss:$8 sps:$4 sm:$0xff]   ;;  %v2373_v61 = vld [vmem:[%s3212_s1 + $0x2d4] ss:$8 sps:$4 sm:$0xff]  }
  0x28   : > { %v2388_v13 = vld [vmem:[%s3212_s1 + $0x224] ss:$8 sps:$4 sm:$0xff]   ;;  %v2389_v19 = vld [vmem:[%s3212_s1 + $0x2a0] ss:$8 sps:$4 sm:$0xff]   ;;  %vm932_vm5 = vsmask.f32 6400 }
  0x29   : > { %v2401_v45 = vld [vmem:[%s3212_s1 + $0x280] ss:$8 sps:$4 sm:$0xff]  }
  0x2a   : > { %366 = vmatpush1.bf16.msra.mxu0 %v2306_v40  ;;  %507 = vmatpush1.bf16.msra.mxu1 %v2307_v43  ;;  %v2352_v40 = vld [vmem:[%s3212_s1 + $0x104] ss:$8 sps:$4 sm:$0xff]  }
  0x2b   : > { %662 = vmatprep.subr.bf16.mxu0 %v2310_v47  ;;  %844 = vmatprep.subr.bf16.mxu1 %v2313_v49  ;;  %v2355_v43 = vld [vmem:[%s3212_s1 + $0x184] ss:$8 sps:$4 sm:$0xff]   ;;  %v757_v47 = vrot.slane %v2786_v42, 1  ;;  %v2359_v49 = vld [vmem:[%s3212_s1 + $0x2f0] ss:$8 sps:$4 sm:$0xff]  }
  0x2d   : > { %384 = vmatmul.mubr.bf16.vlgmr.msra.gmra.mxu0 %v256_v53  ;;  %525 = vmatmul.mubr.bf16.vlgmr.msra.gmra.mxu1 %v2621_v31  ;;  %v2361_v31 = vld [vmem:[%s3212_s1 + $0x2f4] ss:$8 sps:$4 sm:$0xff]   ;;  %v758_v51 = vsel %vm573_vm4, %v756_v46, %v757_v47  ;;  %v2364_v53 = vld [vmem:[%s3212_s1 + $0x264] ss:$8 sps:$4 sm:$0xff]  }
  0x2e   : > { %663 = vmatpush1.bf16.msra.mxu0 %v2308_v54  ;;  %845 = vmatpush1.bf16.msra.mxu1 %v2311_v55  ;;  %v2823_v54 = vpack.c.bf16 %v2808_v48, %v2659_v52  ;;  %v2367_v55 = vld [vmem:[%s3212_s1 + $0x2e4] ss:$8 sps:$4 sm:$0xff]   ;;  %v577_v52 = vrot.slane %v2670_v56, 1 }
  0x2f   : > { %664 = vmatprep.subr.bf16.mxu0 %v2316_v57  ;;  %846 = vmatprep.subr.bf16.mxu1 %v2319_v58  ;;  %v2362_v57 = vld [vmem:[%s3212_s1 + $0x260] ss:$8 sps:$4 sm:$0xff]  }
  0x30   : > { %393 = vmatprep.mubr.bf16.mxu0 %v2484_v2  ;;  %534 = vmatprep.mubr.bf16.mxu1 %v2484_v2  ;;  %v2365_v58 = vld [vmem:[%s3212_s1 + $0x2e0] ss:$8 sps:$4 sm:$0xff]   ;;  %v578_v0 = vsel %vm573_vm4, %v575_v29, %v577_v52  ;;  %v954_v46 = vshll.u32 %v2823_v54, 16 }
  0x32   : > { %665 = vmatpush1.bf16.msra.mxu0 %v2314_v60  ;;  %847 = vmatpush1.bf16.msra.mxu1 %v2317_v62  ;;  %v759_v60 = vrot.slane %v2823_v54, 1  ;;  %v2368_v62 = vld [vmem:[%s3212_s1 + $0x250] ss:$8 sps:$4 sm:$0xff]  }
  0x33   : > { %666 = vmatprep.subr.bf16.mxu0 %v2322_v63  ;;  %848 = vmatprep.subr.bf16.mxu1 %v2325_v4  ;;  %v2371_v63 = vld [vmem:[%s3212_s1 + $0x2d0] ss:$8 sps:$4 sm:$0xff]   ;;  %v2379_v4 = vld [vmem:[%s3212_s1 + $0x2c4] ss:$8 sps:$4 sm:$0xff]  }
  0x34   : > { %v760_v1 = vsel %vm573_vm4, %v757_v47, %v759_v60  ;;  %v2409_v47 = vld [vmem:[%s3212_s1 + $0x3f4] ss:$8 sps:$4 sm:$0xff]  }
  0x35   : > { %394 = vmatmul.mubr.bf16.gmra.mxu0 %v264_v9  ;;  %535 = vmatmul.mubr.bf16.gmra.mxu1 %v2631_v34  ;;  %v2356_v34 = vld [vmem:[%s3212_s1 + $0x270] ss:$8 sps:$4 sm:$0xff]   ;;  %v2385_v9 = vld [vmem:[%s3212_s1 + $0x2b4] ss:$8 sps:$4 sm:$0xff]  }
  0x36   : > { %667 = vmatpush1.bf16.msra.mxu0 %v2320_v6  ;;  %849 = vmatpush1.bf16.msra.mxu1 %v2323_v8  ;;  %v2377_v6 = vld [vmem:[%s3212_s1 + $0x2c0] ss:$8 sps:$4 sm:$0xff]   ;;  %v2382_v8 = vld [vmem:[%s3212_s1 + $0x234] ss:$8 sps:$4 sm:$0xff]  }
  0x37   : > { %668 = vmatprep.subr.bf16.mxu0 %v2328_v10  ;;  %850 = vmatprep.subr.bf16.mxu1 %v2331_v11  ;;  %v2380_v10 = vld [vmem:[%s3212_s1 + $0x230] ss:$8 sps:$4 sm:$0xff]  }
  0x38   : > { %544 = vmatprep.mubr.bf16.mxu1 %v2484_v2  ;;  %403 = vmatprep.mubr.bf16.mxu0 %v2484_v2  ;;  %v2383_v11 = vld [vmem:[%s3212_s1 + $0x2b0] ss:$8 sps:$4 sm:$0xff]  }
  0x3a   : > { %669 = vmatpush1.bf16.msra.mxu0 %v2326_v15  ;;  %851 = vmatpush1.bf16.msra.mxu1 %v2329_v16  ;;  %v2391_v15 = vld [vmem:[%s3212_s1 + $0x2a4] ss:$8 sps:$4 sm:$0xff]   ;;  %v934_v16 = vshrl.u32 %v2782_v41, 16 }
  0x3b   : > { %670 = vmatprep.subr.bf16.mxu0 %v2334_v17  ;;  %852 = vmatprep.subr.bf16.mxu1 %v2337_v20  ;;  %v2386_v17 = vld [vmem:[%s3212_s1 + $0x220] ss:$8 sps:$4 sm:$0xff]   ;;  %v937_v20 = vshll.u32 %v2782_v41, 16 }
  0x3d   : > { %545 = vmatmul.mubr.bf16.gmra.mxu1 %v209_v23  ;;  %404 = vmatmul.mubr.bf16.gmra.mxu0 %v267_v24  ;;  %v942_v23 = vshrl.u32 %v2786_v42, 16  ;;  %v945_v24 = vshll.u32 %v2786_v42, 16 }
  0x3e   : > { %671 = vmatpush1.bf16.msra.mxu0 %v2332_v22  ;;  %853 = vmatpush1.bf16.msra.mxu1 %v2335_v26  ;;  %v2394_v22 = vld [vmem:[%s3212_s1 + $0x214] ss:$8 sps:$4 sm:$0xff]  }
  0x3f   : > { %672 = vmatprep.subr.bf16.mxu0 %v2340_v27  ;;  %854 = vmatprep.subr.bf16.mxu1 %v2343_v32  ;;  %v2397_v26 = vld [vmem:[%s3212_s1 + $0x294] ss:$8 sps:$4 sm:$0xff]   ;;  %v936_v27 = vrot.slane %v934_v16, 1  ;;  %v2392_v32 = vld [vmem:[%s3212_s1 + $0x210] ss:$8 sps:$4 sm:$0xff]  }
  0x40   : > { %694 = vmatprep.mubr.bf16.mxu0 %v2484_v2  ;;  %876 = vmatprep.mubr.bf16.mxu1 %v2484_v2  ;;  %v2437_v16 = vld [vmem:[%s3212_s1 + $0x3a0] ss:$8 sps:$4 sm:$0xff]  }
  0x42   : > { %673 = vmatpush1.bf16.msra.mxu0 %v2338_v33  ;;  %855 = vmatpush1.bf16.msra.mxu1 %v2341_v35  ;;  %v2395_v33 = vld [vmem:[%s3212_s1 + $0x290] ss:$8 sps:$4 sm:$0xff]   ;;  %v939_v35 = vrot.slane %v937_v20, 2 }
  0x43   : > { %674 = vmatprep.subr.bf16.mxu0 %v2346_v36  ;;  %856 = vmatprep.subr.bf16.mxu1 %v2349_v37  ;;  %v2400_v36 = vld [vmem:[%s3212_s1 + $0x204] ss:$8 sps:$4 sm:$0xff]   ;;  %v944_v37 = vrot.slane %v942_v23, 1  ;;  %v206_v20 = vld [vmem:[%s2596_s14 + $0x38] sm:$0xff] }
  0x44   : > { %v2443_v23 = vld [vmem:[%s3212_s1 + $0x390] ss:$8 sps:$4 sm:$0xff]  }
  0x46   : > { %675 = vmatpush1.bf16.msra.mxu0 %v2344_v38  ;;  %857 = vmatpush1.bf16.msra.mxu1 %v2347_v39  ;;  %v947_v38 = vrot.slane %v945_v24, 2  ;;  %v2403_v39 = vld [vmem:[%s3212_s1 + $0x284] ss:$8 sps:$4 sm:$0xff]   ;;  %v3021_v24 = vpack.c.bf16 %v206_v20, %v2808_v48  ;;  %v2449_v48 = vld [vmem:[%s3212_s1 + $0x380] ss:$8 sps:$4 sm:$0xff]  }
  0x47   : > { %676 = vmatprep.subr.bf16.mxu0 %v2352_v40  ;;  %858 = vmatprep.subr.bf16.mxu1 %v2355_v43  ;;  %v2398_v40 = vld [vmem:[%s3212_s1 + $0x200] ss:$8 sps:$4 sm:$0xff]   ;;  %v1131_v43 = vrot.slane %v2782_v41, 2  ;;  %v2406_v41 = vld [vmem:[%s3212_s1 + $0x374] ss:$8 sps:$4 sm:$0xff]  }
  0x48   : > { %v948_v29 = vor.u32 %v947_v38, %v944_v37  ;;  %v2452_v37 = vld [vmem:[%s3212_s1 + $0x470] ss:$8 sps:$4 sm:$0xff]  }
  0x4a   : > { %677 = vmatpush1.bf16.msra.mxu0 %v2350_v44  ;;  %859 = vmatpush1.bf16.msra.mxu1 %v2353_v28  ;;  %v951_v44 = vshrl.u32 %v2823_v54, 16  ;;  %v940_v28 = vor.u32 %v939_v35, %v936_v27  ;;  %v2451_v27 = vld [vmem:[%s3212_s1 + $0x384] ss:$8 sps:$4 sm:$0xff]   ;;  %v1497_v35 = vshll.u32 %v3021_v24, 16 }
  0x4b   : > { %1042 = vmatprep.subr.bf16.mxu0 %v2358_v30  ;;  %1219 = vmatprep.subr.bf16.mxu1 %v2361_v31  ;;  %v1132_v30 = vrot.slane %v2786_v42, 2  ;;  %v2404_v42 = vld [vmem:[%s3212_s1 + $0x370] ss:$8 sps:$4 sm:$0xff]  }
  0x4c   : > { %v953_v31 = vrot.slane %v951_v44, 1  ;;  %v1312_v44 = vrot.slane %v3021_v24, 2 }
  0x4d   : > { %695 = vmatmul.mubr.bf16.vlgmr.msra.gmra.mxu0 %v576_v50  ;;  %877 = vmatmul.mubr.bf16.vlgmr.msra.gmra.mxu1 %v758_v51  ;;  %v2407_v50 = vld [vmem:[%s3212_s1 + $0x3f0] ss:$8 sps:$4 sm:$0xff]   ;;  %v956_v51 = vrot.slane %v954_v46, 2 }
  0x4e   : > { %1043 = vmatpush1.bf16.msra.mxu0 %v2356_v34  ;;  %1220 = vmatpush1.bf16.msra.mxu1 %v2359_v49  ;;  %v949_v34 = vsel %vm932_vm5, %v940_v28, %v948_v29  ;;  %v1133_v49 = vsel %vm1130_vm2, %v1131_v43, %v1132_v30  ;;  %v2455_v43 = vld [vmem:[%s3212_s1 + $0x460] ss:$8 sps:$4 sm:$0xff]   ;;  %v2460_v28 = vld [vmem:[%s3212_s1 + $0x454] ss:$8 sps:$4 sm:$0xff]   ;;  %v2464_v46 = vld [vmem:[%s3212_s1 + $0x430] ss:$8 sps:$4 sm:$0xff]  }
  0x4f   : > { %1044 = vmatprep.subr.bf16.mxu0 %v2364_v53  ;;  %1221 = vmatprep.subr.bf16.mxu1 %v2367_v55  ;;  %v2412_v53 = vld [vmem:[%s3212_s1 + $0x364] ss:$8 sps:$4 sm:$0xff]  }
  0x50   : > { %704 = vmatprep.mubr.bf16.mxu0 %v2484_v2  ;;  %886 = vmatprep.mubr.bf16.mxu1 %v2484_v2  ;;  %v2415_v55 = vld [vmem:[%s3212_s1 + $0x3e4] ss:$8 sps:$4 sm:$0xff]  }
  0x52   : > { %1045 = vmatpush1.bf16.msra.mxu0 %v2362_v57  ;;  %1222 = vmatpush1.bf16.msra.mxu1 %v2365_v58  ;;  %v2410_v57 = vld [vmem:[%s3212_s1 + $0x360] ss:$8 sps:$4 sm:$0xff]  }
  0x53   : > { %1046 = vmatprep.subr.bf16.mxu0 %v2370_v59  ;;  %1223 = vmatprep.subr.bf16.mxu1 %v2373_v61  ;;  %v2413_v58 = vld [vmem:[%s3212_s1 + $0x3e0] ss:$8 sps:$4 sm:$0xff]   ;;  %v1134_v59 = vrot.slane %v2823_v54, 2  ;;  %v2421_v61 = vld [vmem:[%s3212_s1 + $0x3d4] ss:$8 sps:$4 sm:$0xff]  }
  0x54   : > { %v2416_v54 = vld [vmem:[%s3212_s1 + $0x350] ss:$8 sps:$4 sm:$0xff]  }
  0x55   : > { %705 = vmatmul.mubr.bf16.gmra.mxu0 %v578_v0  ;;  %887 = vmatmul.mubr.bf16.gmra.mxu1 %v760_v1  ;;  %v1135_v0 = vsel %vm1130_vm2, %v1132_v30, %v1134_v59  ;;  %v2424_v1 = vld [vmem:[%s3212_s1 + $0x344] ss:$8 sps:$4 sm:$0xff]  }
  0x56   : > { %1047 = vmatpush1.bf16.msra.mxu0 %v2368_v62  ;;  %1224 = vmatpush1.bf16.msra.mxu1 %v2371_v63  ;;  %v2419_v63 = vld [vmem:[%s3212_s1 + $0x3d0] ss:$8 sps:$4 sm:$0xff]   ;;  %v2463_v30 = vld [vmem:[%s3212_s1 + $0x444] ss:$8 sps:$4 sm:$0xff]  }
  0x57   : > { %1048 = vmatprep.subr.bf16.mxu0 %v2376_v3  ;;  %1225 = vmatprep.subr.bf16.mxu1 %v2379_v4  ;;  %v2427_v3 = vld [vmem:[%s3212_s1 + $0x3c4] ss:$8 sps:$4 sm:$0xff]   ;;  %v2422_v4 = vld [vmem:[%s3212_s1 + $0x340] ss:$8 sps:$4 sm:$0xff]  }
  0x58   : > { %714 = vmatprep.mubr.bf16.mxu0 %v2484_v2  ;;  %896 = vmatprep.mubr.bf16.mxu1 %v2484_v2 }
  0x5a   : > { %1049 = vmatpush1.bf16.msra.mxu0 %v2374_v5  ;;  %1226 = vmatpush1.bf16.msra.mxu1 %v2377_v6  ;;  %v2425_v5 = vld [vmem:[%s3212_s1 + $0x3c0] ss:$8 sps:$4 sm:$0xff]   ;;  %v2430_v6 = vld [vmem:[%s3212_s1 + $0x334] ss:$8 sps:$4 sm:$0xff]  }
  0x5b   : > { %1050 = vmatprep.subr.bf16.mxu0 %v2382_v8  ;;  %1227 = vmatprep.subr.bf16.mxu1 %v2385_v9  ;;  %v2433_v8 = vld [vmem:[%s3212_s1 + $0x3b4] ss:$8 sps:$4 sm:$0xff]   ;;  %v2428_v9 = vld [vmem:[%s3212_s1 + $0x330] ss:$8 sps:$4 sm:$0xff]  }
  0x5d   : > { %715 = vmatmul.mubr.bf16.gmra.mxu0 %v577_v52  ;;  %897 = vmatmul.mubr.bf16.gmra.mxu1 %v759_v60  ;;  %v957_v52 = vor.u32 %v956_v51, %v953_v31  ;;  %v2418_v60 = vld [vmem:[%s3212_s1 + $0x354] ss:$8 sps:$4 sm:$0xff]  }
  0x5e   : > { %1051 = vmatpush1.bf16.msra.mxu0 %v2380_v10  ;;  %1228 = vmatpush1.bf16.msra.mxu1 %v2383_v11  ;;  %v2431_v10 = vld [vmem:[%s3212_s1 + $0x3b0] ss:$8 sps:$4 sm:$0xff]   ;;  %v2436_v11 = vld [vmem:[%s3212_s1 + $0x324] ss:$8 sps:$4 sm:$0xff]   ;;  %v2472_v31 = vld [vmem:[%s3212_s1 + $0x414] ss:$8 sps:$4 sm:$0xff]  }
  0x5f   : > { %1052 = vmatprep.subr.bf16.mxu0 %v2388_v13  ;;  %1229 = vmatprep.subr.bf16.mxu1 %v2391_v15  ;;  %v958_v62 = vsel %vm932_vm5, %v948_v29, %v957_v52  ;;  %v2439_v13 = vld [vmem:[%s3212_s1 + $0x3a4] ss:$8 sps:$4 sm:$0xff]   ;;  %v2434_v15 = vld [vmem:[%s3212_s1 + $0x320] ss:$8 sps:$4 sm:$0xff]  }
  0x60   : > { %1074 = vmatprep.mubr.bf16.mxu0 %v2484_v2  ;;  %1251 = vmatprep.mubr.bf16.mxu1 %v2484_v2 }
  0x62   : > { %1053 = vmatpush1.bf16.msra.mxu0 %v2386_v17  ;;  %1230 = vmatpush1.bf16.msra.mxu1 %v2389_v19  ;;  %v2442_v17 = vld [vmem:[%s3212_s1 + $0x314] ss:$8 sps:$4 sm:$0xff]  }
  0x63   : > { %1054 = vmatprep.subr.bf16.mxu0 %v2394_v22  ;;  %1231 = vmatprep.subr.bf16.mxu1 %v2397_v26  ;;  %v2445_v19 = vld [vmem:[%s3212_s1 + $0x394] ss:$8 sps:$4 sm:$0xff]   ;;  %v2440_v22 = vld [vmem:[%s3212_s1 + $0x310] ss:$8 sps:$4 sm:$0xff]   ;;  %v2448_v26 = vld [vmem:[%s3212_s1 + $0x304] ss:$8 sps:$4 sm:$0xff]  }
  0x66   : > { %1055 = vmatpush1.bf16.msra.mxu0 %v2392_v32  ;;  %1232 = vmatpush1.bf16.msra.mxu1 %v2395_v33  ;;  %v2446_v32 = vld [vmem:[%s3212_s1 + $0x300] ss:$8 sps:$4 sm:$0xff]   ;;  %v1494_v33 = vshrl.u32 %v3021_v24, 16 }
  0x67   : > { %1056 = vmatprep.subr.bf16.mxu0 %v2400_v36  ;;  %1233 = vmatprep.subr.bf16.mxu1 %v2403_v39  ;;  %v2454_v36 = vld [vmem:[%s3212_s1 + $0x474] ss:$8 sps:$4 sm:$0xff]   ;;  %v1499_v39 = vrot.slane %v1497_v35, 3 }
  0x68   : > { %v1496_v38 = vrot.slane %v1494_v33, 2 }
  0x6a   : > { %1057 = vmatpush1.bf16.msra.mxu0 %v2398_v40  ;;  %1234 = vmatpush1.bf16.msra.mxu1 %v2401_v45  ;;  %v2457_v40 = vld [vmem:[%s3212_s1 + $0x464] ss:$8 sps:$4 sm:$0xff]   ;;  %v1500_v45 = vor.u32 %v1499_v39, %v1496_v38 }
  0x6b   : > { %1397 = vmatprep.subr.bf16.mxu0 %v2406_v41  ;;  %1585 = vmatprep.subr.bf16.mxu1 %v2409_v47  ;;  %v2469_v41 = vld [vmem:[%s3212_s1 + $0x424] ss:$8 sps:$4 sm:$0xff]   ;;  %v2467_v47 = vld [vmem:[%s3212_s1 + $0x420] ss:$8 sps:$4 sm:$0xff]  }
  0x6c   : > { %v1501_v29 = vsel %vm1485_vm1, %v2698_v7, %v1500_v45  ;;  %v2466_v7 = vld [vmem:[%s3212_s1 + $0x434] ss:$8 sps:$4 sm:$0xff]  }
  0x6d   : > { %1075 = vmatmul.mubr.bf16.vlgmr.msra.gmra.mxu0 %v949_v34  ;;  %1252 = vmatmul.mubr.bf16.vlgmr.msra.gmra.mxu1 %v1133_v49  ;;  %v2470_v34 = vld [vmem:[%s3212_s1 + $0x410] ss:$8 sps:$4 sm:$0xff]   ;;  %v2475_v49 = vld [vmem:[%s3212_s1 + $0x404] ss:$8 sps:$4 sm:$0xff]  }
  0x6e   : > { %1398 = vmatpush1.bf16.msra.mxu0 %v2404_v42  ;;  %1586 = vmatpush1.bf16.msra.mxu1 %v2407_v50  ;;  %v2473_v42 = vld [vmem:[%s3212_s1 + $0x400] ss:$8 sps:$4 sm:$0xff]   ;;  %v1677_v50 = vrot.slane %v3021_v24, 3 }
  0x6f   : > { %1399 = vmatprep.subr.bf16.mxu0 %v2412_v53  ;;  %1587 = vmatprep.subr.bf16.mxu1 %v2415_v55 }
  0x70   : > { %1084 = vmatprep.mubr.bf16.mxu0 %v2484_v2  ;;  %1261 = vmatprep.mubr.bf16.mxu1 %v2484_v2  ;;  %v1678_v51 = vsel %vm1673_vm3, %v1675_v21, %v1677_v50 }
  0x72   : > { %1400 = vmatpush1.bf16.msra.mxu0 %v2410_v57  ;;  %1588 = vmatpush1.bf16.msra.mxu1 %v2413_v58 }
  0x73   : > { %1401 = vmatprep.subr.bf16.mxu0 %v2418_v60  ;;  %1589 = vmatprep.subr.bf16.mxu1 %v2421_v61 }
  0x75   : > { %1085 = vmatmul.mubr.bf16.gmra.mxu0 %v958_v62  ;;  %1262 = vmatmul.mubr.bf16.gmra.mxu1 %v1135_v0 }
  0x76   : > { %1402 = vmatpush1.bf16.msra.mxu0 %v2416_v54  ;;  %1590 = vmatpush1.bf16.msra.mxu1 %v2419_v63 }
  0x77   : > { %1403 = vmatprep.subr.bf16.mxu0 %v2424_v1  ;;  %1591 = vmatprep.subr.bf16.mxu1 %v2427_v3 }
  0x78   : > { %1094 = vmatprep.mubr.bf16.mxu0 %v2484_v2  ;;  %1271 = vmatprep.mubr.bf16.mxu1 %v2484_v2 }
  0x7a   : > { %1404 = vmatpush1.bf16.msra.mxu0 %v2422_v4  ;;  %1592 = vmatpush1.bf16.msra.mxu1 %v2425_v5 }
  0x7b   : > { %1405 = vmatprep.subr.bf16.mxu0 %v2430_v6  ;;  %1593 = vmatprep.subr.bf16.mxu1 %v2433_v8 }
  0x7d   : > { %1095 = vmatmul.mubr.bf16.gmra.mxu0 %v957_v52  ;;  %1272 = vmatmul.mubr.bf16.gmra.mxu1 %v1134_v59 }
  0x7e   : > { %1406 = vmatpush1.bf16.msra.mxu0 %v2428_v9  ;;  %1594 = vmatpush1.bf16.msra.mxu1 %v2431_v10 }
  0x7f   : > { %1407 = vmatprep.subr.bf16.mxu0 %v2436_v11  ;;  %1595 = vmatprep.subr.bf16.mxu1 %v2439_v13 }
  0x80   : > { %1429 = vmatprep.mubr.bf16.mxu0 %v2484_v2  ;;  %1617 = vmatprep.mubr.bf16.mxu1 %v2484_v2 }
  0x82   : > { %1408 = vmatpush1.bf16.msra.mxu0 %v2434_v15  ;;  %1596 = vmatpush1.bf16.msra.mxu1 %v2437_v16 }
  0x83   : > { %1409 = vmatprep.subr.bf16.mxu0 %v2442_v17  ;;  %1597 = vmatprep.subr.bf16.mxu1 %v2445_v19 }
  0x86   : > { %1410 = vmatpush1.bf16.msra.mxu0 %v2440_v22  ;;  %1598 = vmatpush1.bf16.msra.mxu1 %v2443_v23 }
  0x87   : > { %1411 = vmatprep.subr.bf16.mxu0 %v2448_v26  ;;  %1599 = vmatprep.subr.bf16.mxu1 %v2451_v27 }
  0x8a   : > { %1412 = vmatpush1.bf16.msra.mxu0 %v2446_v32  ;;  %1600 = vmatpush1.bf16.msra.mxu1 %v2449_v48 }
  0x8b   : > { %1762 = vmatprep.subr.bf16.mxu0 %v2454_v36  ;;  %2233 = vmatprep.subr.bf16.mxu1 %v2454_v36 }
  0x8d   : > { %1430 = vmatmul.mubr.bf16.vlgmr.msra.gmra.mxu0 %v2729_v18  ;;  %1618 = vmatmul.mubr.bf16.vlgmr.msra.gmra.mxu1 %v2712_v12  ;;  %v1313_v12 = vsel %vm1130_vm2, %v1310_v14, %v1312_v44  ;;  %v2458_v18 = vld [vmem:[%s3212_s1 + $0x450] ss:$8 sps:$4 sm:$0xff]   ;;  %v2461_v14 = vld [vmem:[%s3212_s1 + $0x440] ss:$8 sps:$4 sm:$0xff]  }
  0x8e   : > { %1763 = vmatpush1.bf16.msra.mxu0 %v2452_v37  ;;  %2241 = vmatpush1.bf16.msra.mxu1 %v2452_v37 }
  0x8f   : > { %1764 = vmatprep.subr.bf16.mxu0 %v2457_v40  ;;  %2234 = vmatprep.subr.bf16.mxu1 %v2457_v40 }
  0x90   : > { %1439 = vmatprep.mubr.bf16.mxu0 %v2484_v2  ;;  %1627 = vmatprep.mubr.bf16.mxu1 %v2484_v2 }
  0x92   : > { %1765 = vmatpush1.bf16.msra.mxu0 %v2455_v43  ;;  %2242 = vmatpush1.bf16.msra.mxu1 %v2455_v43 }
  0x93   : > { %1766 = vmatprep.subr.bf16.mxu0 %v2460_v28  ;;  %2235 = vmatprep.subr.bf16.mxu1 %v2460_v28 }
  0x95   : > { %1440 = vmatmul.mubr.bf16.gmra.mxu0 %v1313_v12  ;;  %1628 = vmatmul.mubr.bf16.gmra.mxu1 %v1501_v29 }
  0x96   : > { %1767 = vmatpush1.bf16.msra.mxu0 %v2458_v18  ;;  %2243 = vmatpush1.bf16.msra.mxu1 %v2458_v18 }
  0x97   : > { %1768 = vmatprep.subr.bf16.mxu0 %v2463_v30  ;;  %2236 = vmatprep.subr.bf16.mxu1 %v2463_v30 }
  0x98   : > { %1449 = vmatprep.mubr.bf16.mxu0 %v2484_v2  ;;  %1637 = vmatprep.mubr.bf16.mxu1 %v2484_v2 }
  0x9a   : > { %1769 = vmatpush1.bf16.msra.mxu0 %v2461_v14  ;;  %2244 = vmatpush1.bf16.msra.mxu1 %v2461_v14 }
  0x9b   : > { %1770 = vmatprep.subr.bf16.mxu0 %v2466_v7  ;;  %2237 = vmatprep.subr.bf16.mxu1 %v2466_v7 }
  0x9d   : > { %1450 = vmatmul.mubr.bf16.gmra.mxu0 %v1312_v44  ;;  %1638 = vmatmul.mubr.bf16.gmra.mxu1 %v1500_v45 }
  0x9e   : > { %1771 = vmatpush1.bf16.msra.mxu0 %v2464_v46  ;;  %2245 = vmatpush1.bf16.msra.mxu1 %v2464_v46 }
  0x9f   : > { %1772 = vmatprep.subr.bf16.mxu0 %v2469_v41  ;;  %2238 = vmatprep.subr.bf16.mxu1 %v2469_v41 }
  0xa0   : > { %1794 = vmatprep.mubr.bf16.mxu0 %v2484_v2  ;;  %1804 = vmatprep.mubr.bf16.mxu1 %v2484_v2 }
  0xa2   : > { %1773 = vmatpush1.bf16.msra.mxu0 %v2467_v47  ;;  %2246 = vmatpush1.bf16.msra.mxu1 %v2467_v47 }
  0xa3   : > { %1774 = vmatprep.subr.bf16.mxu0 %v2472_v31  ;;  %2239 = vmatprep.subr.bf16.mxu1 %v2472_v31 }
  0xa6   : > { %1775 = vmatpush1.bf16.msra.mxu0 %v2470_v34  ;;  %2247 = vmatpush1.bf16.msra.mxu1 %v2470_v34 }
  0xa7   : > { %1776 = vmatprep.subr.bf16.mxu0 %v2475_v49  ;;  %2240 = vmatprep.subr.bf16.mxu1 %v2475_v49 }
  0xaa   : > { %1777 = vmatpush1.bf16.msra.mxu0 %v2473_v42  ;;  %2248 = vmatpush1.bf16.msra.mxu1 %v2473_v42 }
  0xad   : > { %1795 = vmatmul.mubr.bf16.vlgmr.msra.gmra.mxu0 %v2746_v25  ;;  %1805 = vmatmul.mubr.bf16.vlgmr.msra.gmra.mxu1 %v1678_v51 }
  0xae   : > { %1814 = vmatprep.mubr.bf16.mxu1 %v2484_v2 }
  0xb5   : > { %1815 = vmatmul.mubr.bf16.gmra.mxu1 %v1677_v50 }
  0xed   : > { %v385_v53 = vpop.f32.mrf.mxu0  ;;  %v526_v55 = vpop.f32.mrf.mxu1 }
  0xee   : > { %v527_v57 = vadd.f32 %v526_v55, %v385_v53 }
  0xef   : > { %v387_v58 = vpop.f32.mrf.mxu0  ;;  %v528_v52 = vpop.f32.mrf.mxu1 }
  0xf0   : > { %v529_v59 = vadd.f32 %v528_v52, %v387_v58 }
  0xf1   : > { %v389_v60 = vpop.f32.mrf.mxu0  ;;  %v530_v61 = vpop.f32.mrf.mxu1 }
  0xf2   : > { %v531_v62 = vadd.f32 %v530_v61, %v389_v60 }
  0xf3   : > { %v391_v54 = vpop.f32.mrf.mxu0  ;;  %v532_v63 = vpop.f32.mrf.mxu1 }
  0xf4   : > { %v533_v56 = vadd.f32 %v532_v63, %v391_v54 }
  0xf5   : > { %v395_v0 = vpop.f32.mrf.mxu0  ;;  %v536_v21 = vpop.f32.mrf.mxu1 }
  0xf6   : > { %v537_v1 = vadd.f32 %v536_v21, %v395_v0 }
  0xf7   : > { %v397_v25 = vpop.f32.mrf.mxu0  ;;  %v538_v3 = vpop.f32.mrf.mxu1 }
  0xf8   : > { %v539_v4 = vadd.f32 %v538_v3, %v397_v25 }
  0xf9   : > { %v399_v2 = vpop.f32.mrf.mxu0  ;;  %v540_v5 = vpop.f32.mrf.mxu1 }
  0xfa   : > { %v541_v6 = vadd.f32 %v540_v5, %v399_v2 }
  0xfb   : > { %v401_v8 = vpop.f32.mrf.mxu0  ;;  %v542_v9 = vpop.f32.mrf.mxu1 }
  0xfc   : > { %v543_v10 = vadd.f32 %v542_v9, %v401_v8 }
  0xfd   : > { %v546_v11 = vpop.f32.mrf.mxu1  ;;  %v405_v13 = vpop.f32.mrf.mxu0 }
  0xfe   : > { %v547_v15 = vadd.f32 %v546_v11, %v405_v13 }
  0xff   : > { %v548_v16 = vpop.f32.mrf.mxu1  ;;  %v407_v17 = vpop.f32.mrf.mxu0 }
 0x100   : > { %v549_v19 = vadd.f32 %v548_v16, %v407_v17 }
 0x101   : > { %v550_v20 = vpop.f32.mrf.mxu1  ;;  %v409_v22 = vpop.f32.mrf.mxu0 }
 0x103   : > { %v551_v23 = vpop.f32.mrf.mxu1  ;;  %v410_v24 = vpop.f32.mrf.mxu0 }
 0x10d   : > { %v696_v26 = vpop.f32.mrf.mxu0  ;;  %v878_v27 = vpop.f32.mrf.mxu1 }
 0x10e   : > { %v723_v32 = vadd.f32 %v696_v26, %v527_v57 }
 0x10f   : > { %v698_v48 = vpop.f32.mrf.mxu0  ;;  %v880_v33 = vpop.f32.mrf.mxu1 }
 0x110   : > { %v3105_v35 = vadd.f32 %v878_v27, %v723_v32  ;;  %v724_v36 = vadd.f32 %v698_v48, %v529_v59 }
 0x111   : > { %v700_v37 = vpop.f32.mrf.mxu0  ;;  %v882_v38 = vpop.f32.mrf.mxu1 }
 0x112   : > { %v3107_v39 = vadd.f32 %v880_v33, %v724_v36  ;;  %v725_v40 = vadd.f32 %v700_v37, %v531_v62 }
 0x113   : > { %v702_v43 = vpop.f32.mrf.mxu0  ;;  %v884_v44 = vpop.f32.mrf.mxu1 }
 0x114   : > { %v3109_v45 = vadd.f32 %v882_v38, %v725_v40  ;;  %v726_v28 = vadd.f32 %v702_v43, %v533_v56 }
 0x115   : > { %v706_v12 = vpop.f32.mrf.mxu0  ;;  %v888_v18 = vpop.f32.mrf.mxu1 }
 0x116   : > { %v3111_v29 = vadd.f32 %v884_v44, %v726_v28  ;;  %v727_v30 = vadd.f32 %v706_v12, %v537_v1 }
 0x117   : > { %v708_v14 = vpop.f32.mrf.mxu0  ;;  %v890_v7 = vpop.f32.mrf.mxu1 }
 0x118   : > { %v728_v46 = vadd.f32 %v708_v14, %v539_v4  ;;  %v3113_v41 = vadd.f32 %v888_v18, %v727_v30 }
 0x119   : > { %v710_v47 = vpop.f32.mrf.mxu0  ;;  %v892_v31 = vpop.f32.mrf.mxu1 }
 0x11a   : > { %v729_v34 = vadd.f32 %v710_v47, %v541_v6  ;;  %v3115_v49 = vadd.f32 %v890_v7, %v728_v46 }
 0x11b   : > { %v712_v42 = vpop.f32.mrf.mxu0  ;;  %v894_v50 = vpop.f32.mrf.mxu1 }
 0x11c   : > { %v730_v51 = vadd.f32 %v712_v42, %v543_v10  ;;  %v3117_v53 = vadd.f32 %v892_v31, %v729_v34 }
 0x11d   : > { %v716_v55 = vpop.f32.mrf.mxu0  ;;  %v898_v57 = vpop.f32.mrf.mxu1 }
 0x11e   : > { %v731_v58 = vadd.f32 %v716_v55, %v547_v15  ;;  %v3119_v52 = vadd.f32 %v894_v50, %v730_v51  ;;  %v1835_v50 = vlaneseq }
 0x11f   : > { %v718_v59 = vpop.f32.mrf.mxu0  ;;  %v900_v60 = vpop.f32.mrf.mxu1 }
 0x120   : > { %v732_v61 = vadd.f32 %v718_v59, %v549_v19  ;;  %v3121_v62 = vadd.f32 %v898_v57, %v731_v58 }
 0x121   : > { %v902_v54 = vpop.f32.mrf.mxu1  ;;  %v720_v63 = vpop.f32.mrf.mxu0 }
 0x122   : > { %v3123_v56 = vadd.f32 %v900_v60, %v732_v61  ;;  %v1836_v61 = vshrl.u32 %v1835_v50, 7 }
 0x123   : > { %v903_v0 = vpop.f32.mrf.mxu1  ;;  %v721_v21 = vpop.f32.mrf.mxu0 }
 0x12d   : > { %v1076_v1 = vpop.f32.mrf.mxu0  ;;  %v1253_v25 = vpop.f32.mrf.mxu1 }
 0x12e   : > { %v1103_v59 = vadd.f32 %v1076_v1, %v3105_v35 }
 0x12f   : > { %v1078_v3 = vpop.f32.mrf.mxu0  ;;  %v1255_v4 = vpop.f32.mrf.mxu1 }
 0x130   : > { %v1104_v54 = vadd.f32 %v1078_v3, %v3107_v39  ;;  %v1855_v39 = vld [vmem:[%s3214_s3] sm:$0x3] }
 0x131   : > { %v1080_v2 = vpop.f32.mrf.mxu0  ;;  %v3125_v5 = vpop.f32.mrf.mxu1 }
 0x133   : > { %v1082_v6 = vpop.f32.mrf.mxu0  ;;  %v3127_v8 = vpop.f32.mrf.mxu1 }
 0x135   : > { %v1086_v9 = vpop.f32.mrf.mxu0  ;;  %v1263_v10 = vpop.f32.mrf.mxu1 }
 0x136   : > { %v1107_v60 = vadd.f32 %v1086_v9, %v3113_v41  ;;  %v1833_v41 = vld [vmem:[%s3213_s2] sm:$0x3] }
 0x137   : > { %v1088_v11 = vpop.f32.mrf.mxu0  ;;  %v1265_v13 = vpop.f32.mrf.mxu1 }
 0x138   : > { %v1108_v21 = vadd.f32 %v1088_v11, %v3115_v49 }
 0x139   : > { %v1090_v15 = vpop.f32.mrf.mxu0  ;;  %v1267_v16 = vpop.f32.mrf.mxu1 }
 0x13a   : > { %v1109_v35 = vadd.f32 %v1090_v15, %v3117_v53  ;;  %v1285_v49 = vadd.f32 %v1265_v13, %v1108_v21 }
 0x13b   : > { %v1092_v17 = vpop.f32.mrf.mxu0  ;;  %v1269_v19 = vpop.f32.mrf.mxu1 }
 0x13c   : > { %v1110_v1 = vadd.f32 %v1092_v17, %v3119_v52 }
 0x13d   : > { %v1096_v20 = vpop.f32.mrf.mxu0  ;;  %v3129_v22 = vpop.f32.mrf.mxu1 }
 0x13e   : > { %v1287_v13 = vadd.f32 %v1269_v19, %v1110_v1 }
 0x13f   : > { %v1098_v23 = vpop.f32.mrf.mxu0  ;;  %v3131_v24 = vpop.f32.mrf.mxu1 }
 0x140   : > { %v1112_v11 = vadd.f32 %v1098_v23, %v3123_v56 }
 0x141   : > { %v1277_v26 = vpop.f32.mrf.mxu1  ;;  %v1100_v27 = vpop.f32.mrf.mxu0 }
 0x142   : > { %v1280_v26 = vadd.f32 %v1253_v25, %v1103_v59  ;;  %v1284_v27 = vadd.f32 %v1263_v10, %v1107_v60  ;;  %v1286_v10 = vadd.f32 %v1267_v16, %v1109_v35  ;;  %v1289_v16 = vadd.f32 %v3131_v24, %v1112_v11 }
 0x143   : > { %v1278_v32 = vpop.f32.mrf.mxu1  ;;  %v1101_v48 = vpop.f32.mrf.mxu0 }
 0x144   : > { %v1837_v32 = vsub.s32 0, %v1836_v61  ;;  %v1841_v48 = vsub.s32 1, %v1836_v61 }
 0x146   : > { %v3162_v53 = vrot.slane %v1855_v39, %v1837_v32  ;;  %v3167_v17 = vrot.slane %v1833_v41, %v1841_v48 }
 0x14d   : > { %v1431_v33 = vpop.f32.mrf.mxu0  ;;  %v1619_v36 = vpop.f32.mrf.mxu1 }
 0x14e   : > { %v1458_v25 = vadd.f32 %v1431_v33, %v1280_v26 }
 0x14f   : > { %v1433_v37 = vpop.f32.mrf.mxu0  ;;  %v1621_v38 = vpop.f32.mrf.mxu1 }
 0x150   : > { %v1646_v15 = vadd.f32 %v1619_v36, %v1458_v25  ;;  %v1864_v36 = vrot.slane %v1855_v39, %v1841_v48 }
 0x151   : > { %v1435_v40 = vpop.f32.mrf.mxu0  ;;  %v3133_v43 = vpop.f32.mrf.mxu1 }
 0x153   : > { %v1437_v44 = vpop.f32.mrf.mxu0  ;;  %v3135_v28 = vpop.f32.mrf.mxu1 }
 0x155   : > { %v1441_v12 = vpop.f32.mrf.mxu0  ;;  %v1629_v18 = vpop.f32.mrf.mxu1 }
 0x156   : > { %v1462_v3 = vadd.f32 %v1441_v12, %v1284_v27 }
 0x157   : > { %v1443_v30 = vpop.f32.mrf.mxu0  ;;  %v1631_v14 = vpop.f32.mrf.mxu1 }
 0x158   : > { %v1650_v52 = vadd.f32 %v1629_v18, %v1462_v3 }
 0x159   : > { %v1445_v7 = vpop.f32.mrf.mxu0  ;;  %v3137_v46 = vpop.f32.mrf.mxu1 }
 0x15b   : > { %v1447_v47 = vpop.f32.mrf.mxu0  ;;  %v3139_v31 = vpop.f32.mrf.mxu1 }
 0x15c   : > { %v1465_v56 = vadd.f32 %v1447_v47, %v1287_v13 }
 0x15d   : > { %v1451_v34 = vpop.f32.mrf.mxu0  ;;  %v3141_v42 = vpop.f32.mrf.mxu1 }
 0x15e   : > { %3216 = vst [vmem:[#allocation2_spill] sm:$0xff] %v3141_v42  ;;  %v1281_v42 = vadd.f32 %v1255_v4, %v1104_v54  ;;  %v1111_v4 = vadd.f32 %v1096_v20, %v3121_v62  ;;  %v1653_v54 = vadd.f32 %v3139_v31, %v1465_v56 }
 0x15f   : > { %v1453_v51 = vpop.f32.mrf.mxu0  ;;  %v3143_v55 = vpop.f32.mrf.mxu1 }
 0x160   : > { %3217 = vst [vmem:[#allocation3_spill] sm:$0xff] %v3143_v55  ;;  %v1105_v55 = vadd.f32 %v1080_v2, %v3109_v45  ;;  %v1459_v45 = vadd.f32 %v1433_v37, %v1281_v42  ;;  %v1463_v2 = vadd.f32 %v1443_v30, %v1285_v49  ;;  %v1288_v62 = vadd.f32 %v3129_v22, %v1111_v4 }
 0x161   : > { %v1643_v57 = vpop.f32.mrf.mxu1  ;;  %v1455_v58 = vpop.f32.mrf.mxu0  ;;  %v1464_v37 = vadd.f32 %v1445_v7, %v1286_v10 }
 0x162   : > { %v1106_v57 = vadd.f32 %v1082_v6, %v3111_v29  ;;  %v3160_v29 = vrot.slane %v1833_v41, %v1837_v32  ;;  %v1282_v6 = vadd.f32 %v3125_v5, %v1105_v55  ;;  %v1647_v42 = vadd.f32 %v1621_v38, %v1459_v45 }
 0x163   : > { %v1644_v63 = vpop.f32.mrf.mxu1  ;;  %v1456_v0 = vpop.f32.mrf.mxu0  ;;  %v1651_v5 = vadd.f32 %v1631_v14, %v1463_v2  ;;  %v1466_v19 = vadd.f32 %v1451_v34, %v1288_v62  ;;  %v1652_v14 = vadd.f32 %v3137_v46, %v1464_v37  ;;  %v1467_v58 = vadd.f32 %v1453_v51, %v1289_v16 }
 0x164   : > { %v1283_v9 = vadd.f32 %v3127_v8, %v1106_v57  ;;  %v1460_v20 = vadd.f32 %v1435_v40, %v1282_v6 }
 0x165   : > { %v3218_v63 = vld [vmem:[#allocation2_spill] sm:$0xff] }
 0x166   : > { %v1461_v33 = vadd.f32 %v1437_v44, %v1283_v9  ;;  %v1648_v7 = vadd.f32 %v3133_v43, %v1460_v20  ;;  %v1654_v0 = vadd.f32 %v3218_v63, %v1466_v19 }
 0x167   : > { %v3219_v39 = vld [vmem:[#allocation3_spill] sm:$0xff] }
 0x168   : > { %v1649_v38 = vadd.f32 %v3135_v28, %v1461_v33  ;;  %v1655_v49 = vadd.f32 %v3219_v39, %v1467_v58 }
 0x16d   : > { %v1796_v12 = vpop.f32.mrf.mxu0  ;;  %v1806_v30 = vpop.f32.mrf.mxu1 }
 0x16e   : > { %v1823_v50 = vadd.f32 %v1796_v12, %v1646_v15  ;;  %v1827_v8 = vadd.f32 %v1806_v30, %v1650_v52 }
 0x16f   : > { %v1798_v23 = vpop.f32.mrf.mxu0  ;;  %v1808_v18 = vpop.f32.mrf.mxu1 }
 0x170   : > { %v1845_v55 = vmul.f32 %v3160_v29, %v1823_v50  ;;  %v1849_v22 = vmul.f32 %v3160_v29, %v1827_v8  ;;  %v1824_v40 = vadd.f32 %v1798_v23, %v1647_v42  ;;  %v1828_v44 = vadd.f32 %v1808_v18, %v1651_v5 }
 0x171   : > { %v1800_v24 = vpop.f32.mrf.mxu0  ;;  %v1810_v47 = vpop.f32.mrf.mxu1 }
 0x172   : > { %v1867_v34 = vadd.f32 %v3162_v53, %v1845_v55  ;;  %v1871_v59 = vadd.f32 %v3162_v53, %v1849_v22  ;;  %v1846_v60 = vmul.f32 %v3167_v17, %v1824_v40  ;;  %v1850_v61 = vmul.f32 %v3167_v17, %v1828_v44 }
 0x173   : > { %v1825_v43 = vadd.f32 %v1800_v24, %v1648_v7  ;;  %v1829_v28 = vadd.f32 %v1810_v47, %v1652_v14  ;;  %v1802_v46 = vpop.f32.mrf.mxu0  ;;  %v1812_v51 = vpop.f32.mrf.mxu1 }
 0x174   : > { %v1877_v21 = vmax.f32 %v1867_v34, 0.0  ;;  %v1881_v26 = vmax.f32 %v1871_v59, 0.0  ;;  %v1868_v27 = vadd.f32 %v1864_v36, %v1846_v60  ;;  %v1872_v32 = vadd.f32 %v1864_v36, %v1850_v61 }
 0x175   : > { %v1847_v48 = vmul.f32 %v3160_v29, %v1825_v43  ;;  %v1851_v31 = vmul.f32 %v3160_v29, %v1829_v28  ;;  %v1826_v57 = vadd.f32 %v1802_v46, %v1649_v38  ;;  %v1830_v35 = vadd.f32 %v1812_v51, %v1653_v54  ;;  %v1816_v41 = vpop.f32.mrf.mxu1 }
 0x176   : > { %1887 = vst [vmem:[%s3186_s9] sm:$0xff] %v1877_v21  ;;  %1891 = vst [vmem:[%s3186_s9 + $0x20] sm:$0xff] %v1881_v26  ;;  %v1878_v1 = vmax.f32 %v1868_v27, 0.0  ;;  %v1882_v25 = vmax.f32 %v1872_v32, 0.0  ;;  %v1831_v3 = vadd.f32 %v1816_v41, %v1654_v0 }
 0x177   : > { %v1869_v4 = vadd.f32 %v3162_v53, %v1847_v48  ;;  %v1873_v45 = vadd.f32 %v3162_v53, %v1851_v31  ;;  %v1848_v2 = vmul.f32 %v3167_v17, %v1826_v57  ;;  %v1852_v6 = vmul.f32 %v3167_v17, %v1830_v35  ;;  %v1818_v9 = vpop.f32.mrf.mxu1 }
 0x178   : > { %1888 = vst [vmem:[%s3186_s9 + $0x8] sm:$0xff] %v1878_v1  ;;  %1892 = vst [vmem:[%s3186_s9 + $0x28] sm:$0xff] %v1882_v25  ;;  %v1853_v10 = vmul.f32 %v3160_v29, %v1831_v3  ;;  %v1832_v11 = vadd.f32 %v1818_v9, %v1655_v49 }
 0x179   : > { %v1879_v13 = vmax.f32 %v1869_v4, 0.0  ;;  %v1883_v15 = vmax.f32 %v1873_v45, 0.0  ;;  %v1870_v52 = vadd.f32 %v1864_v36, %v1848_v2  ;;  %v1874_v62 = vadd.f32 %v1864_v36, %v1852_v6  ;;  %v1820_v20 = vpop.f32.mrf.mxu1 }
 0x17a   : > { %v1875_v33 = vadd.f32 %v3162_v53, %v1853_v10  ;;  %v1854_v37 = vmul.f32 %v3167_v17, %v1832_v11 }
 0x17b   : > { %1889 = vst [vmem:[%s3186_s9 + $0x10] sm:$0xff] %v1879_v13  ;;  %1893 = vst [vmem:[%s3186_s9 + $0x30] sm:$0xff] %v1883_v15  ;;  %v1880_v12 = vmax.f32 %v1870_v52, 0.0  ;;  %v1884_v30 = vmax.f32 %v1874_v62, 0.0  ;;  %v1821_v42 = vpop.f32.mrf.mxu1 }
 0x17c   : > { %v1885_v29 = vmax.f32 %v1875_v33, 0.0  ;;  %v1876_v5 = vadd.f32 %v1864_v36, %v1854_v37 }
 0x17d   : > { %1890 = vst [vmem:[%s3186_s9 + $0x18] sm:$0xff] %v1880_v12  ;;  %1894 = vst [vmem:[%s3186_s9 + $0x38] sm:$0xff] %v1884_v30 }
 0x17e   : > { %1895 = vst [vmem:[%s3186_s9 + $0x40] sm:$0xff] %v1885_v29  ;;  %v1886_v50 = vmax.f32 %v1876_v5, 0.0 }
 0x180   : > { %1896 = vst [vmem:[%s3186_s9 + $0x48] sm:$0xff] %v1886_v50 }
 0x181 PF: > { %s14_s15 = sadd.s32 1, %s2482_s15  }
 0x182   : > { %p11_p4 = scmp.ge.s32.totalorder %s14_s15, 4  }
 0x184   :  { %13 = sbr.rel (!%p11_p4) target bundleno = 1 (0x1), region = 74 }

// kernel: cnn_lstm_forward.9
= control target key start
LH: loop header
LB: loop body
LE: loop exit
PB: predicated region body
PF: predicated region fallthrough
CT: control target
= control target key end

     0   :  { %s1574_s1 = inlined_call_operand.vmem [shape: bf16[512,128], index: 1, kind: input, shape index: {}]   ;;  %s1575_s0 = inlined_call_operand.vmem [shape: f32[16,512], index: 0, kind: input, shape index: {}]   ;;  %s1576_s3 = inlined_call_operand.vmem [shape: bf16[128,1024], index: 3, kind: input, shape index: {}]   ;;  %s1577_s2 = inlined_call_operand.vmem [shape: f32[1,128], index: 2, kind: input, shape index: {}]   ;;  %s1578_s4 = inlined_call_operand.vmem [shape: f32[1,1024], index: 4, kind: input, shape index: {}]   ;;  %s1579_s5 = inlined_call_operand.vmem [shape: f32[16,1024], index: 5, kind: output, shape index: {}]  }
   0x1   :  { %v1139_v0 = vld [vmem:[%s1574_s1 + $0x78] sm:$0xff]   ;;  %v1143_v4 = vld [vmem:[%s1574_s1 + $0x70] sm:$0xff]   ;;  %v1147_v8 = vld [vmem:[%s1574_s1 + $0x68] sm:$0xff]  }
   0x2   :  { %v1140_v1 = vld [vmem:[%s1574_s1 + $0xf8] sm:$0xff]   ;;  %1094 = vmatprep.subr.bf16.mxu0 %v1139_v0  ;;  %v1144_v5 = vld [vmem:[%s1574_s1 + $0xf0] sm:$0xff]   ;;  %v1148_v9 = vld [vmem:[%s1574_s1 + $0xe8] sm:$0xff]  }
   0x3   :  { %v1141_v2 = vld [vmem:[%s1574_s1 + $0x38] sm:$0xff]   ;;  %1116 = vmatprep.subr.bf16.mxu1 %v1140_v1  ;;  %v1145_v6 = vld [vmem:[%s1574_s1 + $0x30] sm:$0xff]   ;;  %v1149_v10 = vld [vmem:[%s1574_s1 + $0x28] sm:$0xff]  }
   0x4   :  { %v1142_v3 = vld [vmem:[%s1574_s1 + $0xb8] sm:$0xff]   ;;  %1095 = vmatpush3.bf16.msra.mxu0 %v1141_v2  ;;  %v1146_v7 = vld [vmem:[%s1574_s1 + $0xb0] sm:$0xff]   ;;  %v1150_v11 = vld [vmem:[%s1574_s1 + $0xa8] sm:$0xff]  }
   0x5   :  { %1117 = vmatpush3.bf16.msra.mxu1 %v1142_v3  ;;  %1096 = vmatprep.subr.bf16.mxu0 %v1143_v4  ;;  %v1151_v12 = vld [vmem:[%s1574_s1 + $0x60] sm:$0xff]   ;;  %v1155_v16 = vld [vmem:[%s1574_s1 + $0x58] sm:$0xff]   ;;  %v1159_v20 = vld [vmem:[%s1574_s1 + $0x50] sm:$0xff]  }
   0x6   :  { %1118 = vmatprep.subr.bf16.mxu1 %v1144_v5  ;;  %v1152_v13 = vld [vmem:[%s1574_s1 + $0xe0] sm:$0xff]   ;;  %v1156_v17 = vld [vmem:[%s1574_s1 + $0xd8] sm:$0xff]   ;;  %v1160_v21 = vld [vmem:[%s1574_s1 + $0xd0] sm:$0xff]  }
   0x7   :  { %v1153_v14 = vld [vmem:[%s1574_s1 + $0x20] sm:$0xff]   ;;  %v1157_v18 = vld [vmem:[%s1574_s1 + $0x18] sm:$0xff]   ;;  %v1161_v22 = vld [vmem:[%s1574_s1 + $0x10] sm:$0xff]  }
   0x8   :  { %1097 = vmatpush3.bf16.msra.mxu0 %v1145_v6  ;;  %v1154_v15 = vld [vmem:[%s1574_s1 + $0xa0] sm:$0xff]   ;;  %v1158_v19 = vld [vmem:[%s1574_s1 + $0x98] sm:$0xff]   ;;  %v1162_v23 = vld [vmem:[%s1574_s1 + $0x90] sm:$0xff]  }
   0x9   :  { %1119 = vmatpush3.bf16.msra.mxu1 %v1146_v7  ;;  %1098 = vmatprep.subr.bf16.mxu0 %v1147_v8  ;;  %v1163_v24 = vld [vmem:[%s1574_s1 + $0x48] sm:$0xff]   ;;  %v1167_v28 = vld [vmem:[%s1574_s1 + $0x40] sm:$0xff]   ;;  %v24_v34 = vld [vmem:[%s1575_s0 + $0x18] sm:$0xff] }
   0xa   :  { %1120 = vmatprep.subr.bf16.mxu1 %v1148_v9  ;;  %v1164_v25 = vld [vmem:[%s1574_s1 + $0xc8] sm:$0xff]   ;;  %v1168_v29 = vld [vmem:[%s1574_s1 + $0xc0] sm:$0xff]   ;;  %v28_v36 = vld [vmem:[%s1575_s0 + $0x38] sm:$0xff] }
   0xb   :  { %v1165_v26 = vld [vmem:[%s1574_s1 + $0x8] sm:$0xff]   ;;  %v1169_v30 = vld [vmem:[%s1574_s1] sm:$0xff]   ;;  %v32_v39 = vpack.c.bf16 %v28_v36, %v24_v34  ;;  %v23_v41 = vld [vmem:[%s1575_s0 + $0x10] sm:$0xff] }
   0xc   :  { %1099 = vmatpush3.bf16.msra.mxu0 %v1149_v10  ;;  %v1166_v27 = vld [vmem:[%s1574_s1 + $0x88] sm:$0xff]   ;;  %v1170_v31 = vld [vmem:[%s1574_s1 + $0x80] sm:$0xff]   ;;  %v27_v42 = vld [vmem:[%s1575_s0 + $0x30] sm:$0xff] }
   0xd   :  { %1121 = vmatpush3.bf16.msra.mxu1 %v1150_v11  ;;  %1100 = vmatprep.subr.bf16.mxu0 %v1151_v12  ;;  %v22_v32 = vld [vmem:[%s1575_s0 + $0x8] sm:$0xff]  ;;  %v21_v37 = vld [vmem:[%s1575_s0] sm:$0xff]  ;;  %v31_v44 = vpack.c.bf16 %v27_v42, %v23_v41 }
   0xe   :  { %1122 = vmatprep.subr.bf16.mxu1 %v1152_v13  ;;  %v26_v33 = vld [vmem:[%s1575_s0 + $0x28] sm:$0xff]  ;;  %v25_v38 = vld [vmem:[%s1575_s0 + $0x20] sm:$0xff]  ;;  %369 = vmatprep.mubr.bf16.mxu1 %v32_v39 }
   0xf   :  { %v30_v35 = vpack.c.bf16 %v26_v33, %v22_v32  ;;  %v29_v40 = vpack.c.bf16 %v25_v38, %v21_v37  ;;  %v435_v43 = vld [vmem:[%s1576_s3 + $0x1c0] sm:$0xff]  ;;  %v436_v46 = vld [vmem:[%s1576_s3 + $0x1c8] sm:$0xff] }
  0x10   :  { %1101 = vmatpush3.bf16.msra.mxu0 %v1153_v14  ;;  %v439_v45 = vld [vmem:[%s1576_s3 + $0x1e0] sm:$0xff]  ;;  %v440_v47 = vld [vmem:[%s1576_s3 + $0x1e8] sm:$0xff] }
  0x11   :  { %1123 = vmatpush3.bf16.msra.mxu1 %v1154_v15  ;;  %1102 = vmatprep.subr.bf16.mxu0 %v1155_v16  ;;  %v1086_v48 = vcombine.low %v435_v43, %v439_v45  ;;  %v1087_v49 = vcombine.high %v435_v43, %v439_v45  ;;  %v1088_v50 = vcombine.low %v436_v46, %v440_v47  ;;  %v427_v51 = vld [vmem:[%s1576_s3 + $0x180] sm:$0xff]  ;;  %v428_v53 = vld [vmem:[%s1576_s3 + $0x188] sm:$0xff]  ;;  %v441_v45 = vld [vmem:[%s1576_s3 + $0x1f0] sm:$0xff] }
  0x12   :  { %1124 = vmatprep.subr.bf16.mxu1 %v1156_v17  ;;  %328 = vmatprep.mubr.bf16.mxu0 %v30_v35  ;;  %v431_v52 = vld [vmem:[%s1576_s3 + $0x1a0] sm:$0xff]  ;;  %v1089_v54 = vcombine.high %v436_v46, %v440_v47  ;;  %v432_v56 = vld [vmem:[%s1576_s3 + $0x1a8] sm:$0xff]  ;;  %v438_v46 = vld [vmem:[%s1576_s3 + $0x1d8] sm:$0xff] }
  0x13   :  { %v1079_v55 = vcombine.high %v427_v51, %v431_v52  ;;  %v419_v57 = vld [vmem:[%s1576_s3 + $0x140] sm:$0xff]  ;;  %v1081_v59 = vcombine.high %v428_v53, %v432_v56  ;;  %v420_v60 = vld [vmem:[%s1576_s3 + $0x148] sm:$0xff]  ;;  %v1078_v62 = vcombine.low %v427_v51, %v431_v52  ;;  %v1080_v63 = vcombine.low %v428_v53, %v432_v56 }
  0x14   :  { %1103 = vmatpush3.bf16.msra.mxu0 %v1157_v18  ;;  %v423_v58 = vld [vmem:[%s1576_s3 + $0x160] sm:$0xff]  ;;  %v424_v61 = vld [vmem:[%s1576_s3 + $0x168] sm:$0xff] }
  0x15   :  { %1125 = vmatpush3.bf16.msra.mxu1 %v1158_v19  ;;  %1104 = vmatprep.subr.bf16.mxu0 %v1159_v20  ;;  %v1071_v0 = vcombine.high %v419_v57, %v423_v58  ;;  %v1073_v1 = vcombine.high %v420_v60, %v424_v61  ;;  %v411_v2 = vld [vmem:[%s1576_s3 + $0x100] sm:$0xff]  ;;  %v412_v4 = vld [vmem:[%s1576_s3 + $0x108] sm:$0xff]  ;;  %v1070_v6 = vcombine.low %v419_v57, %v423_v58 }
  0x16   :  { %1126 = vmatprep.subr.bf16.mxu1 %v1160_v21  ;;  %v415_v3 = vld [vmem:[%s1576_s3 + $0x120] sm:$0xff]  ;;  %v416_v5 = vld [vmem:[%s1576_s3 + $0x128] sm:$0xff]  ;;  %v1072_v7 = vcombine.low %v420_v60, %v424_v61 }
  0x17   :  { %v1063_v8 = vcombine.high %v411_v2, %v415_v3  ;;  %v1065_v9 = vcombine.high %v412_v4, %v416_v5  ;;  %v403_v10 = vld [vmem:[%s1576_s3 + $0xc0] sm:$0xff]  ;;  %v404_v12 = vld [vmem:[%s1576_s3 + $0xc8] sm:$0xff]  ;;  %v1062_v14 = vcombine.low %v411_v2, %v415_v3  ;;  %v1064_v15 = vcombine.low %v412_v4, %v416_v5  ;;  %v429_v4 = vld [vmem:[%s1576_s3 + $0x190] sm:$0xff] }
  0x18   :  { %1105 = vmatpush3.bf16.msra.mxu0 %v1161_v22  ;;  %v407_v11 = vld [vmem:[%s1576_s3 + $0xe0] sm:$0xff]  ;;  %v408_v13 = vld [vmem:[%s1576_s3 + $0xe8] sm:$0xff]  ;;  %v433_v5 = vld [vmem:[%s1576_s3 + $0x1b0] sm:$0xff] }
  0x19   :  { %1127 = vmatpush3.bf16.msra.mxu1 %v1162_v23  ;;  %1106 = vmatprep.subr.bf16.mxu0 %v1163_v24  ;;  %v1055_v16 = vcombine.high %v403_v10, %v407_v11  ;;  %v1057_v17 = vcombine.high %v404_v12, %v408_v13  ;;  %v1054_v18 = vcombine.low %v403_v10, %v407_v11  ;;  %v395_v20 = vld [vmem:[%s1576_s3 + $0x80] sm:$0xff]  ;;  %v396_v22 = vld [vmem:[%s1576_s3 + $0x88] sm:$0xff] }
  0x1a   :  { %1128 = vmatprep.subr.bf16.mxu1 %v1164_v25  ;;  %v1056_v19 = vcombine.low %v404_v12, %v408_v13  ;;  %v399_v21 = vld [vmem:[%s1576_s3 + $0xa0] sm:$0xff]  ;;  %v400_v24 = vld [vmem:[%s1576_s3 + $0xa8] sm:$0xff]  ;;  %v1083_v11 = vcombine.high %v429_v4, %v433_v5  ;;  %v421_v13 = vld [vmem:[%s1576_s3 + $0x150] sm:$0xff] }
  0x1b   :  { %v1047_v23 = vcombine.high %v395_v20, %v399_v21  ;;  %v1046_v25 = vcombine.low %v395_v20, %v399_v21  ;;  %v392_v32 = vld [vmem:[%s1576_s3 + $0x68] sm:$0xff]  ;;  %v379_v36 = vld [vmem:[%s1576_s3] sm:$0xff]  ;;  %v413_v21 = vld [vmem:[%s1576_s3 + $0x110] sm:$0xff] }
  0x1c   :  { %1107 = vmatpush3.bf16.msra.mxu0 %v1165_v26  ;;  %v1048_v26 = vcombine.low %v396_v22, %v400_v24  ;;  %v383_v37 = vld [vmem:[%s1576_s3 + $0x20] sm:$0xff]  ;;  %v380_v38 = vld [vmem:[%s1576_s3 + $0x8] sm:$0xff] }
  0x1d   :  { %1129 = vmatpush3.bf16.msra.mxu1 %v1166_v27  ;;  %1108 = vmatprep.subr.bf16.mxu0 %v1167_v28  ;;  %v1049_v27 = vcombine.high %v396_v22, %v400_v24  ;;  %v387_v28 = vld [vmem:[%s1576_s3 + $0x40] sm:$0xff]  ;;  %v1031_v39 = vcombine.high %v379_v36, %v383_v37  ;;  %v1030_v41 = vcombine.low %v379_v36, %v383_v37  ;;  %v417_v22 = vld [vmem:[%s1576_s3 + $0x130] sm:$0xff]  ;;  %v418_v24 = vld [vmem:[%s1576_s3 + $0x138] sm:$0xff] }
  0x1e   :  { %1130 = vmatprep.subr.bf16.mxu1 %v1168_v29  ;;  %v391_v29 = vld [vmem:[%s1576_s3 + $0x60] sm:$0xff]  ;;  %v397_v37 = vld [vmem:[%s1576_s3 + $0x90] sm:$0xff] }
  0x1f   :  { %v1038_v33 = vcombine.low %v387_v28, %v391_v29  ;;  %v997_v58 = vld [vmem:[%s1577_s2] ss:$0 sm:$0xff] }
  0x20   :  { %1109 = vmatpush3.bf16.msra.mxu0 %v1169_v30  ;;  %v388_v30 = vld [vmem:[%s1576_s3 + $0x48] sm:$0xff] }
  0x21   :  { %1131 = vmatpush3.bf16.msra.mxu1 %v1170_v31  ;;  %805 = vmatprep.subr.bf16.mxu0 %v1087_v49  ;;  %v1039_v31 = vcombine.high %v387_v28, %v391_v29  ;;  %v1040_v34 = vcombine.low %v388_v30, %v392_v32  ;;  %v1041_v35 = vcombine.high %v388_v30, %v392_v32  ;;  %v442_v49 = vld [vmem:[%s1576_s3 + $0x1f8] sm:$0xff]  ;;  %v405_v29 = vld [vmem:[%s1576_s3 + $0xd0] sm:$0xff] }
  0x22   :  { %848 = vmatprep.subr.bf16.mxu1 %v1089_v54  ;;  %v1092_v51 = vcombine.low %v438_v46, %v442_v49  ;;  %v1093_v52 = vcombine.high %v438_v46, %v442_v49  ;;  %v409_v30 = vld [vmem:[%s1576_s3 + $0xf0] sm:$0xff]  ;;  %v410_v32 = vld [vmem:[%s1576_s3 + $0xf8] sm:$0xff] }
  0x23   :  { %329 = vmatmul.mubr.bf16.vlgmr.msra.gmra.mxu0 %v29_v40  ;;  %v384_v40 = vld [vmem:[%s1576_s3 + $0x28] sm:$0xff]  ;;  %v393_v46 = vld [vmem:[%s1576_s3 + $0x70] sm:$0xff] }
  0x24   :  { %370 = vmatmul.mubr.bf16.vlgmr.msra.gmra.mxu1 %v31_v44  ;;  %806 = vmatpush1.bf16.msra.mxu0 %v1086_v48  ;;  %v1032_v42 = vcombine.low %v380_v38, %v384_v40  ;;  %v1033_v43 = vcombine.high %v380_v38, %v384_v40  ;;  %v437_v44 = vld [vmem:[%s1576_s3 + $0x1d0] sm:$0xff]  ;;  %v402_v40 = vld [vmem:[%s1576_s3 + $0xb8] sm:$0xff] }
  0x25   :  { %849 = vmatpush1.bf16.msra.mxu1 %v1088_v50  ;;  %807 = vmatprep.subr.bf16.mxu0 %v1079_v55  ;;  %v1090_v47 = vcombine.low %v437_v44, %v441_v45  ;;  %v1091_v48 = vcombine.high %v437_v44, %v441_v45  ;;  %v1171_v50 = vmov 0   ;;  %v401_v38 = vld [vmem:[%s1576_s3 + $0xb0] sm:$0xff] }
  0x26   :  { %850 = vmatprep.subr.bf16.mxu1 %v1081_v59  ;;  %837 = vmatprep.mubr.bf16.mxu0 %v1171_v50  ;;  %v389_v45 = vld [vmem:[%s1576_s3 + $0x50] sm:$0xff]  ;;  %v1050_v49 = vcombine.low %v397_v37, %v401_v38 }
  0x27   :  { %880 = vmatprep.mubr.bf16.mxu1 %v1171_v50 }
  0x28   :  { %808 = vmatpush1.bf16.msra.mxu0 %v1078_v62 }
  0x29   :  { %851 = vmatpush1.bf16.msra.mxu1 %v1080_v63  ;;  %809 = vmatprep.subr.bf16.mxu0 %v1071_v0 }
  0x2a   :  { %852 = vmatprep.subr.bf16.mxu1 %v1073_v1 }
  0x2c   :  { %810 = vmatpush1.bf16.msra.mxu0 %v1070_v6  ;;  %v430_v6 = vld [vmem:[%s1576_s3 + $0x198] sm:$0xff] }
  0x2d   :  { %853 = vmatpush1.bf16.msra.mxu1 %v1072_v7  ;;  %811 = vmatprep.subr.bf16.mxu0 %v1063_v8  ;;  %v434_v7 = vld [vmem:[%s1576_s3 + $0x1b8] sm:$0xff] }
  0x2e   :  { %854 = vmatprep.subr.bf16.mxu1 %v1065_v9  ;;  %v1085_v12 = vcombine.high %v430_v6, %v434_v7 }
  0x30   :  { %812 = vmatpush1.bf16.msra.mxu0 %v1062_v14  ;;  %v425_v14 = vld [vmem:[%s1576_s3 + $0x170] sm:$0xff] }
  0x31   :  { %855 = vmatpush1.bf16.msra.mxu1 %v1064_v15  ;;  %813 = vmatprep.subr.bf16.mxu0 %v1055_v16  ;;  %v422_v15 = vld [vmem:[%s1576_s3 + $0x158] sm:$0xff] }
  0x32   :  { %856 = vmatprep.subr.bf16.mxu1 %v1057_v17  ;;  %v426_v16 = vld [vmem:[%s1576_s3 + $0x178] sm:$0xff]  ;;  %v1082_v17 = vcombine.low %v429_v4, %v433_v5 }
  0x33   :  { %v1077_v20 = vcombine.high %v422_v15, %v426_v16 }
  0x34   :  { %814 = vmatpush1.bf16.msra.mxu0 %v1054_v18  ;;  %v1084_v18 = vcombine.low %v430_v6, %v434_v7 }
  0x35   :  { %857 = vmatpush1.bf16.msra.mxu1 %v1056_v19  ;;  %815 = vmatprep.subr.bf16.mxu0 %v1047_v23  ;;  %v1075_v19 = vcombine.high %v421_v13, %v425_v14  ;;  %v414_v23 = vld [vmem:[%s1576_s3 + $0x118] sm:$0xff] }
  0x36   :  { %858 = vmatprep.subr.bf16.mxu1 %v1049_v27  ;;  %v1067_v27 = vcombine.high %v413_v21, %v417_v22  ;;  %v1069_v28 = vcombine.high %v414_v23, %v418_v24 }
  0x38   :  { %816 = vmatpush1.bf16.msra.mxu0 %v1046_v25  ;;  %v1074_v25 = vcombine.low %v421_v13, %v425_v14 }
  0x39   :  { %859 = vmatpush1.bf16.msra.mxu1 %v1048_v26  ;;  %817 = vmatprep.subr.bf16.mxu0 %v1039_v31  ;;  %v1076_v26 = vcombine.low %v422_v15, %v426_v16  ;;  %v406_v31 = vld [vmem:[%s1576_s3 + $0xd8] sm:$0xff] }
  0x3a   :  { %860 = vmatprep.subr.bf16.mxu1 %v1041_v35  ;;  %v1059_v35 = vcombine.high %v405_v29, %v409_v30  ;;  %v1061_v36 = vcombine.high %v406_v31, %v410_v32 }
  0x3c   :  { %818 = vmatpush1.bf16.msra.mxu0 %v1038_v33  ;;  %v1066_v33 = vcombine.low %v413_v21, %v417_v22 }
  0x3d   :  { %861 = vmatpush1.bf16.msra.mxu1 %v1040_v34  ;;  %819 = vmatprep.subr.bf16.mxu0 %v1031_v39  ;;  %v1068_v34 = vcombine.low %v414_v23, %v418_v24  ;;  %v398_v39 = vld [vmem:[%s1576_s3 + $0x98] sm:$0xff] }
  0x3e   :  { %862 = vmatprep.subr.bf16.mxu1 %v1033_v43  ;;  %v1051_v43 = vcombine.high %v397_v37, %v401_v38  ;;  %v1053_v44 = vcombine.high %v398_v39, %v402_v40 }
  0x40   :  { %820 = vmatpush1.bf16.msra.mxu0 %v1030_v41  ;;  %v1058_v41 = vcombine.low %v405_v29, %v409_v30 }
  0x41   :  { %863 = vmatpush1.bf16.msra.mxu1 %v1032_v42  ;;  %891 = vmatprep.subr.bf16.mxu0 %v1091_v48  ;;  %v1060_v42 = vcombine.low %v406_v31, %v410_v32  ;;  %v394_v48 = vld [vmem:[%s1576_s3 + $0x78] sm:$0xff] }
  0x42   :  { %934 = vmatprep.subr.bf16.mxu1 %v1093_v52 }
  0xe3   :  { %v1110_v53 = vpop.f32.mrf.mxu0 }
  0xe4   :  { %v1132_v54 = vpop.f32.mrf.mxu1 }
  0xe5   :  { %v1111_v55 = vpop.f32.mrf.mxu0 }
  0xe6   :  { %v1112_v56 = vadd.f32 %v1111_v55, %v1110_v53  ;;  %v1133_v57 = vpop.f32.mrf.mxu1  ;;  %v381_v53 = vld [vmem:[%s1576_s3 + $0x10] sm:$0xff]  ;;  %v382_v55 = vld [vmem:[%s1576_s3 + $0x18] sm:$0xff] }
  0xe7   :  { %v1113_v59 = vpop.f32.mrf.mxu0  ;;  %v1134_v1 = vadd.f32 %v1133_v57, %v1132_v54  ;;  %v385_v54 = vld [vmem:[%s1576_s3 + $0x30] sm:$0xff]  ;;  %v1042_v57 = vcombine.low %v389_v45, %v393_v46 }
  0xe8   :  { %v1135_v60 = vpop.f32.mrf.mxu1  ;;  %v331_v62 = vadd.f32 %v1112_v56, %v997_v58  ;;  %v386_v56 = vld [vmem:[%s1576_s3 + $0x38] sm:$0xff] }
  0xe9   :  { %v1114_v61 = vpop.f32.mrf.mxu0 }
  0xea   :  { %v1115_v63 = vadd.f32 %v1114_v61, %v1113_v59  ;;  %v1136_v0 = vpop.f32.mrf.mxu1  ;;  %v372_v8 = vadd.f32 %v1134_v1, %v331_v62  ;;  %v1035_v59 = vcombine.high %v381_v53, %v385_v54  ;;  %v1034_v61 = vcombine.low %v381_v53, %v385_v54 }
  0xeb   :  { %v1137_v3 = vadd.f32 %v1136_v0, %v1135_v60  ;;  %v1037_v60 = vcombine.high %v382_v55, %v386_v56  ;;  %v1036_v62 = vcombine.low %v382_v55, %v386_v56 }
  0xec   :  { %v334_v2 = vadd.f32 %v1115_v63, %v997_v58  ;;  %v445_v63 = vlaneseq }
  0xee   :  { %v375_v9 = vadd.f32 %v1137_v3, %v334_v2  ;;  %v446_v0 = vshrl.u32 %v445_v63, 7  ;;  %v443_v3 = vld [vmem:[%s1578_s4] sm:$0xff] }
  0xf0   :  { %v1445_v10 = vpack.c.bf16 %v375_v9, %v372_v8  ;;  %v447_v1 = vsub.s32 0, %v446_v0  ;;  %v455_v2 = vsub.s32 2, %v446_v0  ;;  %v451_v4 = vsub.s32 1, %v446_v0 }
  0xf1   :  { %v459_v5 = vsub.s32 3, %v446_v0  ;;  %v475_v29 = vsub.s32 7, %v446_v0 }
  0xf2   :  { %838 = vmatmul.mubr.bf16.vlgmr.msra.gmra.mxu0 %v1445_v10  ;;  %881 = vmatmul.mubr.bf16.vlgmr.msra.gmra.mxu1 %v1445_v10  ;;  %v448_v6 = vrot.slane %v443_v3, %v447_v1  ;;  %v456_v7 = vrot.slane %v443_v3, %v455_v2  ;;  %v452_v8 = vrot.slane %v443_v3, %v451_v4 }
  0xf3   :  { %892 = vmatpush1.bf16.msra.mxu0 %v1090_v47  ;;  %935 = vmatpush1.bf16.msra.mxu1 %v1092_v51  ;;  %v390_v47 = vld [vmem:[%s1576_s3 + $0x58] sm:$0xff]  ;;  %v1043_v51 = vcombine.high %v389_v45, %v393_v46  ;;  %v460_v9 = vrot.slane %v443_v3, %v459_v5 }
  0xf4   :  { %893 = vmatprep.subr.bf16.mxu0 %v1083_v11  ;;  %936 = vmatprep.subr.bf16.mxu1 %v1085_v12  ;;  %v1045_v52 = vcombine.high %v390_v47, %v394_v48  ;;  %v1044_v58 = vcombine.low %v390_v47, %v394_v48 }
  0xf5   :  { %923 = vmatprep.mubr.bf16.mxu0 %v1171_v50  ;;  %966 = vmatprep.mubr.bf16.mxu1 %v1171_v50  ;;  %v1052_v50 = vcombine.low %v398_v39, %v402_v40 }
  0xf7   :  { %894 = vmatpush1.bf16.msra.mxu0 %v1082_v17  ;;  %937 = vmatpush1.bf16.msra.mxu1 %v1084_v18 }
  0xf8   :  { %895 = vmatprep.subr.bf16.mxu0 %v1075_v19  ;;  %938 = vmatprep.subr.bf16.mxu1 %v1077_v20 }
  0xfb   :  { %896 = vmatpush1.bf16.msra.mxu0 %v1074_v25  ;;  %939 = vmatpush1.bf16.msra.mxu1 %v1076_v26  ;;  %v463_v26 = vsub.s32 4, %v446_v0 }
  0xfc   :  { %897 = vmatprep.subr.bf16.mxu0 %v1067_v27  ;;  %940 = vmatprep.subr.bf16.mxu1 %v1069_v28  ;;  %v471_v27 = vsub.s32 6, %v446_v0  ;;  %v467_v28 = vsub.s32 5, %v446_v0 }
  0xfd   :  { %v464_v30 = vrot.slane %v443_v3, %v463_v26 }
  0xfe   :  { %v472_v31 = vrot.slane %v443_v3, %v471_v27  ;;  %v468_v32 = vrot.slane %v443_v3, %v467_v28 }
  0xff   :  { %898 = vmatpush1.bf16.msra.mxu0 %v1066_v33  ;;  %941 = vmatpush1.bf16.msra.mxu1 %v1068_v34  ;;  %v476_v33 = vrot.slane %v443_v3, %v475_v29 }
 0x100   :  { %899 = vmatprep.subr.bf16.mxu0 %v1059_v35  ;;  %942 = vmatprep.subr.bf16.mxu1 %v1061_v36 }
 0x103   :  { %900 = vmatpush1.bf16.msra.mxu0 %v1058_v41  ;;  %943 = vmatpush1.bf16.msra.mxu1 %v1060_v42 }
 0x104   :  { %901 = vmatprep.subr.bf16.mxu0 %v1051_v43  ;;  %944 = vmatprep.subr.bf16.mxu1 %v1053_v44 }
 0x107   :  { %902 = vmatpush1.bf16.msra.mxu0 %v1050_v49  ;;  %945 = vmatpush1.bf16.msra.mxu1 %v1052_v50 }
 0x108   :  { %903 = vmatprep.subr.bf16.mxu0 %v1043_v51  ;;  %946 = vmatprep.subr.bf16.mxu1 %v1045_v52 }
 0x10b   :  { %904 = vmatpush1.bf16.msra.mxu0 %v1042_v57  ;;  %947 = vmatpush1.bf16.msra.mxu1 %v1044_v58 }
 0x10c   :  { %905 = vmatprep.subr.bf16.mxu0 %v1035_v59  ;;  %948 = vmatprep.subr.bf16.mxu1 %v1037_v60 }
 0x10f   :  { %906 = vmatpush1.bf16.msra.mxu0 %v1034_v61  ;;  %949 = vmatpush1.bf16.msra.mxu1 %v1036_v62 }
 0x112   :  { %924 = vmatmul.mubr.bf16.vlgmr.msra.gmra.mxu0 %v1445_v10  ;;  %967 = vmatmul.mubr.bf16.vlgmr.msra.gmra.mxu1 %v1445_v10 }
 0x1b2   :  { %v839_v11 = vpop.f32.mrf.mxu0  ;;  %v882_v12 = vpop.f32.mrf.mxu1 }
 0x1b3   :  { %v840_v13 = vadd.f32 %v839_v11, %v448_v6  ;;  %v883_v14 = vadd.f32 %v882_v12, %v456_v7 }
 0x1b4   :  { %v841_v15 = vpop.f32.mrf.mxu0  ;;  %v884_v10 = vpop.f32.mrf.mxu1 }
 0x1b5   :  { %977 = vst [vmem:[%s1579_s5] sm:$0xff] %v840_v13  ;;  %979 = vst [vmem:[%s1579_s5 + $0x10] sm:$0xff] %v883_v14  ;;  %v842_v16 = vadd.f32 %v841_v15, %v452_v8  ;;  %v885_v17 = vadd.f32 %v884_v10, %v460_v9 }
 0x1b6   :  { %v843_v18 = vpop.f32.mrf.mxu0  ;;  %v886_v19 = vpop.f32.mrf.mxu1 }
 0x1b7   :  { %978 = vst [vmem:[%s1579_s5 + $0x8] sm:$0xff] %v842_v16  ;;  %980 = vst [vmem:[%s1579_s5 + $0x18] sm:$0xff] %v885_v17  ;;  %v844_v20 = vadd.f32 %v843_v18, %v448_v6  ;;  %v887_v21 = vadd.f32 %v886_v19, %v456_v7 }
 0x1b8   :  { %v845_v22 = vpop.f32.mrf.mxu0  ;;  %v888_v23 = vpop.f32.mrf.mxu1 }
 0x1b9   :  { %985 = vst [vmem:[%s1579_s5 + $0x40] sm:$0xff] %v844_v20  ;;  %987 = vst [vmem:[%s1579_s5 + $0x50] sm:$0xff] %v887_v21  ;;  %v846_v24 = vadd.f32 %v845_v22, %v452_v8  ;;  %v889_v25 = vadd.f32 %v888_v23, %v460_v9 }
 0x1bb   :  { %986 = vst [vmem:[%s1579_s5 + $0x48] sm:$0xff] %v846_v24  ;;  %988 = vst [vmem:[%s1579_s5 + $0x58] sm:$0xff] %v889_v25 }
 0x1d2   :  { %v925_v34 = vpop.f32.mrf.mxu0  ;;  %v968_v35 = vpop.f32.mrf.mxu1 }
 0x1d3   :  { %v926_v36 = vadd.f32 %v925_v34, %v464_v30  ;;  %v969_v37 = vadd.f32 %v968_v35, %v472_v31 }
 0x1d4   :  { %v927_v38 = vpop.f32.mrf.mxu0  ;;  %v970_v39 = vpop.f32.mrf.mxu1 }
 0x1d5   :  { %981 = vst [vmem:[%s1579_s5 + $0x20] sm:$0xff] %v926_v36  ;;  %983 = vst [vmem:[%s1579_s5 + $0x30] sm:$0xff] %v969_v37  ;;  %v928_v40 = vadd.f32 %v927_v38, %v468_v32  ;;  %v971_v41 = vadd.f32 %v970_v39, %v476_v33 }
 0x1d6   :  { %v929_v42 = vpop.f32.mrf.mxu0  ;;  %v972_v43 = vpop.f32.mrf.mxu1 }
 0x1d7   :  { %982 = vst [vmem:[%s1579_s5 + $0x28] sm:$0xff] %v928_v40  ;;  %984 = vst [vmem:[%s1579_s5 + $0x38] sm:$0xff] %v971_v41  ;;  %v930_v44 = vadd.f32 %v929_v42, %v464_v30  ;;  %v973_v45 = vadd.f32 %v972_v43, %v472_v31 }
 0x1d8   :  { %v931_v46 = vpop.f32.mrf.mxu0  ;;  %v974_v47 = vpop.f32.mrf.mxu1 }
 0x1d9   :  { %989 = vst [vmem:[%s1579_s5 + $0x60] sm:$0xff] %v930_v44  ;;  %991 = vst [vmem:[%s1579_s5 + $0x70] sm:$0xff] %v973_v45  ;;  %v932_v48 = vadd.f32 %v931_v46, %v468_v32  ;;  %v975_v49 = vadd.f32 %v974_v47, %v476_v33 }
 0x1db   :  { %990 = vst [vmem:[%s1579_s5 + $0x68] sm:$0xff] %v932_v48  ;;  %992 = vst [vmem:[%s1579_s5 + $0x78] sm:$0xff] %v975_v49 }

// kernel: cnn_lstm_forward.11
= control target key start
LH: loop header
LB: loop body
LE: loop exit
PB: predicated region body
PF: predicated region fallthrough
CT: control target
= control target key end

     0   :  { %s385_s0 = inlined_call_operand.vmem [shape: f32[16,256], index: 0, kind: input, shape index: {}]   ;;  %s386_s1 = inlined_call_operand.vmem [shape: bf16[256,128], index: 1, kind: input, shape index: {}]   ;;  %s387_s2 = inlined_call_operand.vmem [shape: f32[1,128], index: 2, kind: input, shape index: {}]   ;;  %s388_s3 = inlined_call_operand.hbm [shape: f32[16,128], index: 3, kind: output, shape index: {}]  }
   0x1   :  { %v258_v0 = vld [vmem:[%s386_s1 + $0x78] sm:$0xff]   ;;  %v260_v2 = vld [vmem:[%s386_s1 + $0x70] sm:$0xff]   ;;  %v262_v4 = vld [vmem:[%s386_s1 + $0x68] sm:$0xff]  }
   0x2   :  { %v259_v1 = vld [vmem:[%s386_s1 + $0x38] sm:$0xff]   ;;  %233 = vmatprep.subr.bf16.mxu0 %v258_v0  ;;  %v261_v3 = vld [vmem:[%s386_s1 + $0x30] sm:$0xff]   ;;  %v263_v5 = vld [vmem:[%s386_s1 + $0x28] sm:$0xff]  }
   0x3   :  { %234 = vmatpush3.bf16.msra.mxu0 %v259_v1  ;;  %v264_v6 = vld [vmem:[%s386_s1 + $0x60] sm:$0xff]   ;;  %v266_v8 = vld [vmem:[%s386_s1 + $0x58] sm:$0xff]   ;;  %v268_v10 = vld [vmem:[%s386_s1 + $0x50] sm:$0xff]  }
   0x4   :  { %235 = vmatprep.subr.bf16.mxu0 %v260_v2  ;;  %v265_v7 = vld [vmem:[%s386_s1 + $0x20] sm:$0xff]   ;;  %v267_v9 = vld [vmem:[%s386_s1 + $0x18] sm:$0xff]   ;;  %v17_v11 = vld [vmem:[%s385_s0 + $0x8] sm:$0xff] }
   0x5   :  { %v19_v12 = vld [vmem:[%s385_s0 + $0x18] sm:$0xff] }
   0x6   :  { %v21_v13 = vpack.c.bf16 %v19_v12, %v17_v11 }
   0x7   :  { %236 = vmatpush3.bf16.msra.mxu0 %v261_v3 }
   0x8   :  { %237 = vmatprep.subr.bf16.mxu0 %v262_v4 }
   0xb   :  { %238 = vmatpush3.bf16.msra.mxu0 %v263_v5 }
   0xc   :  { %239 = vmatprep.subr.bf16.mxu0 %v264_v6 }
   0xf   :  { %240 = vmatpush3.bf16.msra.mxu0 %v265_v7 }
  0x10   :  { %241 = vmatprep.subr.bf16.mxu0 %v266_v8 }
  0x11   :  { %8 = vsyncpa [#allocation3], 0  ;;  %v269_v14 = vld [vmem:[%s386_s1 + $0x10] sm:$0xff]   ;;  %189 = vmatprep.mubr.bf16.mxu0 %v21_v13  ;;  %v270_v15 = vld [vmem:[%s386_s1 + $0x48] sm:$0xff]  }
  0x12   :  { %v271_v16 = vld [vmem:[%s386_s1 + $0x8] sm:$0xff]   ;;  %v272_v17 = vld [vmem:[%s386_s1 + $0x40] sm:$0xff]   ;;  %v18_v20 = vld [vmem:[%s385_s0 + $0x10] sm:$0xff] }
  0x13   :  { %242 = vmatpush3.bf16.msra.mxu0 %v267_v9  ;;  %v273_v18 = vld [vmem:[%s386_s1] sm:$0xff]   ;;  %s296_s1 = smov [#allocation2]  }
  0x14   :  { %243 = vmatprep.subr.bf16.mxu0 %v268_v10  ;;  %v16_v19 = vld [vmem:[%s385_s0] sm:$0xff]  ;;  %s205_s27 = sshll.u32 %s296_s1, 4  ;;  %s206_s27 = int_to_ptr.vmem [resolvable:$true] %s205_s27 }
  0x15   :  { %v20_v21 = vpack.c.bf16 %v18_v20, %v16_v19  ;;  %v216_v23 = vld [vmem:[%s387_s2] ss:$0 sm:$0xff]  ;;  %s274_s0 = scalar_lea.vmem %s206_s27, 256  ;;  %p279_p1 = scmp.lt.s32.totalorder %s206_s27, %s206_s27 }
  0x16   :  { %p275_p0 = scmp.ne.s32.totalorder %s206_s27, %s274_s0  ;;  %p280_p2 = scmp.lt.s32.totalorder %s274_s0, %s274_s0 }
  0x17   :  { %244 = vmatpush3.bf16.msra.mxu0 %v269_v14 }
  0x18   :  { %245 = vmatprep.subr.bf16.mxu0 %v270_v15  ;;  %p281_p3 = por %p280_p2, %p279_p1 }
  0x1a   :  { %p282_p4 = pnand %p281_p3, %p275_p0 }
  0x1b   :  { %246 = vmatpush3.bf16.msra.mxu0 %v271_v16 }
  0x1c   :  { %247 = vmatprep.subr.bf16.mxu0 %v272_v17 }
  0x1f   :  { %248 = vmatpush3.bf16.msra.mxu0 %v273_v18 }
  0x22   :  { %190 = vmatmul.mubr.bf16.vlgmr.msra.gmra.mxu0 %v20_v21 }
  0xe2   :  { %v249_v22 = vpop.f32.mrf.mxu0 }
  0xe4   :  { %v250_v24 = vpop.f32.mrf.mxu0 }
  0xe5   :  { %v251_v25 = vadd.f32 %v250_v24, %v249_v22 }
  0xe6   :  { %v252_v26 = vpop.f32.mrf.mxu0 }
  0xe7   :  { %v192_v27 = vadd.f32 %v251_v25, %v216_v23 }
  0xe8   :  { %v253_v28 = vpop.f32.mrf.mxu0 }
  0xe9   :  { %198 = vst [vmem:[#allocation2] sm:$0xff] %v192_v27  ;;  %v254_v29 = vadd.f32 %v253_v28, %v252_v26 }
  0xeb   :  { %v195_v30 = vadd.f32 %v254_v29, %v216_v23 }
  0xed   :  { %199 = vst [vmem:[#allocation2 + $0x8] sm:$0xff] %v195_v30 }
  0xee   :  { %285 = shalt.err (!%p282_p4)
}
  0xef   :  { %s297_s2 = smov 128   ;;  %s298_s28 = smov 8  }
  0xf0   :  { %211 = dma.vmem_to_hbm [thread:$0]  %s206_s27, 256, %s388_s3, [#allocation3], %s297_s2, %s297_s2, %s298_s28  }
  0xf1   :  { %294 = dma.done.wait [#allocation3], 256  }
  0xf2   :  { %295 = vsyncadd [#allocation3], 4294967040 }
  0xf3   :  { %215 = vsyncpa [#allocation3], 1 }

// kernel: cnn_lstm_forward.10
= control target key start
LH: loop header
LB: loop body
LE: loop exit
PB: predicated region body
PF: predicated region fallthrough
CT: control target
= control target key end

     0   :  { %s2135_s9 = smov 0   ;;  %s2137_s10 = smov 0   ;;  %s2743_s0 = inlined_call_operand.vmem [shape: f32[8,2,1024], index: 0, kind: input, shape index: {}]   ;;  %s2744_s1 = inlined_call_operand.vmem [shape: bf16[2,128,512], index: 1, kind: input, shape index: {}]   ;;  %s2745_s2 = inlined_call_operand.vmem [shape: f32[8,2,256], index: 2, kind: output, shape index: {}]  }
   0x1   :  { %s2139_s11 = smov 0  }
   0x2 LB: > { %s2151_s12 = sadd.s32 4294967295, %s2116_s11   ;;  %s2154_s13 = sadd.s32 1, %s2116_s11   ;;  %s2116_s11 = sphi %s2139_s11, %s2749_s11   ;;  %s2112_s10 = sphi %s2137_s10, %s2748_s10   ;;  %s2108_s9 = sphi %s2135_s9, %s2747_s9  }
   0x3   : > { %s16_s14 = ssub.s32 %s2116_s11, %s2154_s13  ;;  %s19_s15 = sadd.s32 1, %s2112_s10 }
   0x4   : > { %p17_p0 = scmp.eq.s32.totalorder %s16_s14, 0  ;;  %p26_p1 = scmp.ne.s32.totalorder %s2112_s10, %s2108_s9 }
   0x5   : > { %p27_p2 = scmp.eq.s32.totalorder %s2116_s11, 0  ;;  %p82_p3 = scmp.eq.s32.totalorder %s2151_s12, 1 }
   0x6   : > { %s2164_s16 = scalar_select %p17_p0, %s2112_s10, %s19_s15  }
   0x7   : > { %p28_p4 = por %p27_p2, %p26_p1  ;;  %p2166_p5 = por %p82_p3, %p26_p1 }
   0x8   : > { %p1757_p6 = scmp.ge.s32.totalorder %s2116_s11, 2 }
   0xa   : > { %104 = sbr.rel (%p1757_p6) target bundleno = 23 (0x17), region = 16 }
   0xf   : > { %107 = sbr.rel (!%p28_p4) target bundleno = 23 (0x17), region = 20  ;;  %s109_s18 = sand.u32 (%p28_p4), 1, %s2112_s10  }
  0x10   : > { %s1850_s19 = sshll.u32 (%p28_p4), %s2116_s11, 3  ;;  %s1758_s20 = sshll.u32 (%p28_p4), %s109_s18, 6 }
  0x11   : > { %s114_s23 = scalar_lea.vmem (%p28_p4), %s2743_s0, %s1850_s19  ;;  %s111_s24 = scalar_lea.vmem (%p28_p4), [#allocation2], %s1758_s20 }
  0x12   : > { %v157_v0 = vld [vmem:[%s114_s23] sm:$0xff] (%p28_p4)  ;;  %v159_v1 = vld [vmem:[%s114_s23 + $0x10] sm:$0xff] (%p28_p4) }
  0x13   : > { %v161_v2 = vld [vmem:[%s114_s23 + $0x20] sm:$0xff] (%p28_p4)  ;;  %158 = vst [vmem:[%s111_s24] sm:$0xff] (%p28_p4), %v157_v0  ;;  %160 = vst [vmem:[%s111_s24 + $0x8] sm:$0xff] (%p28_p4), %v159_v1  ;;  %v163_v3 = vld [vmem:[%s114_s23 + $0x30] sm:$0xff] (%p28_p4) }
  0x14   : > { %162 = vst [vmem:[%s111_s24 + $0x10] sm:$0xff] %v161_v2  ;;  %v165_v4 = vld [vmem:[%s114_s23 + $0x40] sm:$0xff]  ;;  %v167_v5 = vld [vmem:[%s114_s23 + $0x50] sm:$0xff]  ;;  %164 = vst [vmem:[%s111_s24 + $0x18] sm:$0xff] %v163_v3 }
  0x15   : > { %166 = vst [vmem:[%s111_s24 + $0x20] sm:$0xff] %v165_v4  ;;  %168 = vst [vmem:[%s111_s24 + $0x28] sm:$0xff] %v167_v5  ;;  %v169_v6 = vld [vmem:[%s114_s23 + $0x60] sm:$0xff]  ;;  %v171_v7 = vld [vmem:[%s114_s23 + $0x70] sm:$0xff] }
  0x16   : > { %170 = vst [vmem:[%s111_s24 + $0x30] sm:$0xff] %v169_v6  ;;  %172 = vst [vmem:[%s111_s24 + $0x38] sm:$0xff] %v171_v7 }
  0x17 PF: > { %p1761_p7 = scmp.ge.s32.totalorder %s2116_s11, 1  ;;  %p185_p8 = scmp.lt.s32.totalorder %s2116_s11, 3 }
  0x19   : > { %p186_p9 = pnand %p1761_p7, %p185_p8 }
  0x1a   : > { %p218_p10 = scmp.lt.s32.totalorder (!%p186_p9), %s2151_s12, 1  ;;  %p256_p11 = scmp.eq.s32.totalorder (!%p186_p9), %s2151_s12, 0 }
  0x1b   : > { %189 = sbr.rel (%p186_p9) target bundleno = 2152 (0x868), region = 62  ;;  %s192_s30 = sand.u32 (!%p186_p9), 1, %s2108_s9  }
  0x1c   : > { %s1762_s4 = sshll.u32 (!%p186_p9), %s192_s30, 6  ;;  %s1763_s8 = sshll.u32 (!%p186_p9), %s192_s30, 4 }
  0x1d   : > { %s2364_s6 = scalar_lea.vmem (!%p186_p9), [#allocation2], %s1762_s4  ;;  %s2375_s14 = scalar_lea.vmem (!%p186_p9), [#allocation3], %s1763_s8 }
  0x20   : > { %v2118_v8 = vmov 0   ;;  %s219_s25 = scalar_select %p218_p10, %s2151_s12, 1  ;;  %v2119_v41 = vmov 1983009808   ;;  %v513_v43 = vlaneseq }
  0x21   : > { %454 = vmatprep.mubr.bf16.mxu0 %v2118_v8  ;;  %495 = vmatprep.mubr.bf16.mxu1 %v2118_v8  ;;  %v511_v42 = vunpack.c.l.s4 %v2119_v41  ;;  %s2357_s3 = scalar_select %p256_p11, 0, 7 }
  0x22   : > { %s1851_s26 = sshll.u32 %s219_s25, 8  ;;  %v514_v45 = vshrl.u32 %v513_v43, 7 }
  0x23   : > { %s2185_s29 = scalar_lea.vmem %s2744_s1, %s1851_s26  ;;  %v512_v44 = vunpack.c.0.s8 %v511_v42  ;;  %s1852_s5 = sshll.u32 %s2357_s3, 3 }
  0x24   : > { %v2188_v9 = vld [vmem:[%s2185_s29 + $0xe4] ss:$16 sps:$4 sm:$0xff]   ;;  %v2191_v10 = vld [vmem:[%s2185_s29 + $0xec] ss:$16 sps:$4 sm:$0xff]   ;;  %v2195_v11 = vld [vmem:[%s2185_s29 + $0xe0] ss:$16 sps:$4 sm:$0xff]   ;;  %s260_s7 = scalar_lea.vmem %s2364_s6, %s1852_s5 [#allocation2] }
  0x25   : > { %422 = vmatprep.subr.bf16.mxu0 %v2188_v9  ;;  %v2198_v12 = vld [vmem:[%s2185_s29 + $0xe8] ss:$16 sps:$4 sm:$0xff]   ;;  %463 = vmatprep.subr.bf16.mxu1 %v2191_v10  ;;  %v2202_v13 = vld [vmem:[%s2185_s29 + $0xc4] ss:$16 sps:$4 sm:$0xff]   ;;  %v2207_v14 = vld [vmem:[%s2185_s29 + $0xcc] ss:$16 sps:$4 sm:$0xff]   ;;  %v2362_v48 = vsub.s32 %v512_v44, %v514_v45 }
  0x26   : > { %423 = vmatpush1.bf16.msra.mxu0 %v2195_v11  ;;  %464 = vmatpush1.bf16.msra.mxu1 %v2198_v12  ;;  %v2210_v15 = vld [vmem:[%s2185_s29 + $0xc0] ss:$16 sps:$4 sm:$0xff]   ;;  %v2214_v16 = vld [vmem:[%s2185_s29 + $0xc8] ss:$16 sps:$4 sm:$0xff]   ;;  %v2218_v17 = vld [vmem:[%s2185_s29 + $0xa4] ss:$16 sps:$4 sm:$0xff]  }
  0x27   : > { %424 = vmatprep.subr.bf16.mxu0 %v2202_v13  ;;  %465 = vmatprep.subr.bf16.mxu1 %v2207_v14  ;;  %v2221_v18 = vld [vmem:[%s2185_s29 + $0xac] ss:$16 sps:$4 sm:$0xff]   ;;  %v2224_v19 = vld [vmem:[%s2185_s29 + $0xa0] ss:$16 sps:$4 sm:$0xff]   ;;  %v2227_v20 = vld [vmem:[%s2185_s29 + $0xa8] ss:$16 sps:$4 sm:$0xff]  }
  0x28   : > { %v2232_v21 = vld [vmem:[%s2185_s29 + $0x84] ss:$16 sps:$4 sm:$0xff]   ;;  %v2237_v22 = vld [vmem:[%s2185_s29 + $0x8c] ss:$16 sps:$4 sm:$0xff]   ;;  %v2240_v23 = vld [vmem:[%s2185_s29 + $0x80] ss:$16 sps:$4 sm:$0xff]  }
  0x29   : > { %v2245_v24 = vld [vmem:[%s2185_s29 + $0x88] ss:$16 sps:$4 sm:$0xff]   ;;  %v2248_v25 = vld [vmem:[%s2185_s29 + $0x64] ss:$16 sps:$4 sm:$0xff]   ;;  %v2253_v26 = vld [vmem:[%s2185_s29 + $0x6c] ss:$16 sps:$4 sm:$0xff]  }
  0x2a   : > { %425 = vmatpush1.bf16.msra.mxu0 %v2210_v15  ;;  %466 = vmatpush1.bf16.msra.mxu1 %v2214_v16  ;;  %v2256_v27 = vld [vmem:[%s2185_s29 + $0x60] ss:$16 sps:$4 sm:$0xff]   ;;  %v2259_v28 = vld [vmem:[%s2185_s29 + $0x68] ss:$16 sps:$4 sm:$0xff]   ;;  %v2264_v29 = vld [vmem:[%s2185_s29 + $0x44] ss:$16 sps:$4 sm:$0xff]  }
  0x2b   : > { %426 = vmatprep.subr.bf16.mxu0 %v2218_v17  ;;  %467 = vmatprep.subr.bf16.mxu1 %v2221_v18  ;;  %v2269_v30 = vld [vmem:[%s2185_s29 + $0x4c] ss:$16 sps:$4 sm:$0xff]   ;;  %v2274_v31 = vld [vmem:[%s2185_s29 + $0x40] ss:$16 sps:$4 sm:$0xff]   ;;  %v2277_v32 = vld [vmem:[%s2185_s29 + $0x48] ss:$16 sps:$4 sm:$0xff]  }
  0x2c   : > { %v2282_v33 = vld [vmem:[%s2185_s29 + $0x24] ss:$16 sps:$4 sm:$0xff]   ;;  %v2285_v34 = vld [vmem:[%s2185_s29 + $0x2c] ss:$16 sps:$4 sm:$0xff]   ;;  %v2290_v35 = vld [vmem:[%s2185_s29 + $0x20] ss:$16 sps:$4 sm:$0xff]  }
  0x2d   : > { %v2293_v36 = vld [vmem:[%s2185_s29 + $0x28] ss:$16 sps:$4 sm:$0xff]   ;;  %v2298_v37 = vld [vmem:[%s2185_s29 + $0x4] ss:$16 sps:$4 sm:$0xff]   ;;  %v2301_v38 = vld [vmem:[%s2185_s29 + $0xc] ss:$16 sps:$4 sm:$0xff]  }
  0x2e   : > { %427 = vmatpush1.bf16.msra.mxu0 %v2224_v19  ;;  %468 = vmatpush1.bf16.msra.mxu1 %v2227_v20  ;;  %v2306_v39 = vld [vmem:[%s2185_s29] ss:$16 sps:$4 sm:$0xff]   ;;  %v2309_v40 = vld [vmem:[%s2185_s29 + $0x8] ss:$16 sps:$4 sm:$0xff]   ;;  %s1803_s11 = sshll.u32 %s2357_s3, 1 }
  0x2f   : > { %428 = vmatprep.subr.bf16.mxu0 %v2232_v21  ;;  %469 = vmatprep.subr.bf16.mxu1 %v2237_v22  ;;  %v261_v57 = vld [vmem:[%s260_s7] sm:$0xff]  ;;  %s559_s15 = scalar_lea.vmem %s2375_s14, %s1803_s11 [#allocation3] }
  0x30   : > { %s2414_s9 = scalar_select %p256_p11, 1, 6 }
  0x31   : > { %s2462_s22 = scalar_select %p256_p11, 2, 5 }
  0x32   : > { %429 = vmatpush1.bf16.msra.mxu0 %v2240_v23  ;;  %470 = vmatpush1.bf16.msra.mxu1 %v2245_v24  ;;  %s1853_s18 = sshll.u32 %s2414_s9, 3  ;;  %s1809_s20 = sshll.u32 %s2414_s9, 1 }
  0x33   : > { %430 = vmatprep.subr.bf16.mxu0 %v2248_v25  ;;  %471 = vmatprep.subr.bf16.mxu1 %v2253_v26  ;;  %s564_s19 = scalar_lea.vmem %s2364_s6, %s1853_s18 [#allocation2]  ;;  %s704_s21 = scalar_lea.vmem %s2375_s14, %s1809_s20 [#allocation3] }
  0x34   : > { %s1854_s23 = sshll.u32 %s2462_s22, 3  ;;  %s1815_s25 = sshll.u32 %s2462_s22, 1 }
  0x35   : > { %s709_s24 = scalar_lea.vmem %s2364_s6, %s1854_s23 [#allocation2]  ;;  %s849_s26 = scalar_lea.vmem %s2375_s14, %s1815_s25 [#allocation3] }
  0x36   : > { %431 = vmatpush1.bf16.msra.mxu0 %v2256_v27  ;;  %472 = vmatpush1.bf16.msra.mxu1 %v2259_v28  ;;  %s2510_s27 = scalar_select %p256_p11, 3, 4 }
  0x37   : > { %432 = vmatprep.subr.bf16.mxu0 %v2264_v29  ;;  %473 = vmatprep.subr.bf16.mxu1 %v2269_v30  ;;  %s2558_s5 = scalar_select %p256_p11, 4, 3 }
  0x38   : > { %s1855_s28 = sshll.u32 %s2510_s27, 3  ;;  %s1821_s3 = sshll.u32 %s2510_s27, 1 }
  0x39   : > { %s854_s30 = scalar_lea.vmem %s2364_s6, %s1855_s28 [#allocation2]  ;;  %s994_s4 = scalar_lea.vmem %s2375_s14, %s1821_s3 [#allocation3] }
  0x3a   : > { %433 = vmatpush1.bf16.msra.mxu0 %v2274_v31  ;;  %474 = vmatpush1.bf16.msra.mxu1 %v2277_v32  ;;  %s1856_s7 = sshll.u32 %s2558_s5, 3  ;;  %s1827_s11 = sshll.u32 %s2558_s5, 1 }
  0x3b   : > { %434 = vmatprep.subr.bf16.mxu0 %v2282_v33  ;;  %475 = vmatprep.subr.bf16.mxu1 %v2285_v34  ;;  %s999_s8 = scalar_lea.vmem %s2364_s6, %s1856_s7 [#allocation2]  ;;  %s1847_s3 = sshll.u32 (%p2166_p5), %s2151_s12, 1 }
  0x3c   : > { %s2654_s9 = scalar_select %p256_p11, 5, 2 }
  0x3d   : > { %s2700_s22 = scalar_select %p256_p11, 6, 1 }
  0x3e   : > { %435 = vmatpush1.bf16.msra.mxu0 %v2290_v35  ;;  %476 = vmatpush1.bf16.msra.mxu1 %v2293_v36  ;;  %s1857_s18 = sshll.u32 %s2654_s9, 3  ;;  %s1833_s20 = sshll.u32 %s2654_s9, 1 }
  0x3f   : > { %436 = vmatprep.subr.bf16.mxu0 %v2298_v37  ;;  %477 = vmatprep.subr.bf16.mxu1 %v2301_v38  ;;  %s1858_s23 = sshll.u32 %s2700_s22, 3  ;;  %s1584_s7 = scalar_lea.vmem (%p2166_p5), %s2745_s2, %s1847_s3 }
  0x42   : > { %437 = vmatpush1.bf16.msra.mxu0 %v2306_v39  ;;  %478 = vmatpush1.bf16.msra.mxu1 %v2309_v40 }
  0x43   : > { %567 = vmatprep.subr.bf16.mxu0 %v2188_v9  ;;  %608 = vmatprep.subr.bf16.mxu1 %v2191_v10 }
  0x45   : > { %455 = vmatmul.mubr.bf16.vlgmr.msra.gmra.mxu0 %v2118_v8  ;;  %496 = vmatmul.mubr.bf16.vlgmr.msra.gmra.mxu1 %v2118_v8 }
  0x46   : > { %568 = vmatpush1.bf16.msra.mxu0 %v2195_v11  ;;  %609 = vmatpush1.bf16.msra.mxu1 %v2198_v12 }
  0x47   : > { %569 = vmatprep.subr.bf16.mxu0 %v2202_v13  ;;  %610 = vmatprep.subr.bf16.mxu1 %v2207_v14 }
  0x48   : > { %599 = vmatprep.mubr.bf16.mxu0 %v2118_v8  ;;  %640 = vmatprep.mubr.bf16.mxu1 %v2118_v8 }
  0x4a   : > { %570 = vmatpush1.bf16.msra.mxu0 %v2210_v15  ;;  %611 = vmatpush1.bf16.msra.mxu1 %v2214_v16 }
  0x4b   : > { %571 = vmatprep.subr.bf16.mxu0 %v2218_v17  ;;  %612 = vmatprep.subr.bf16.mxu1 %v2221_v18 }
  0x4e   : > { %572 = vmatpush1.bf16.msra.mxu0 %v2224_v19  ;;  %613 = vmatpush1.bf16.msra.mxu1 %v2227_v20 }
  0x4f   : > { %573 = vmatprep.subr.bf16.mxu0 %v2232_v21  ;;  %614 = vmatprep.subr.bf16.mxu1 %v2237_v22 }
  0x52   : > { %574 = vmatpush1.bf16.msra.mxu0 %v2240_v23  ;;  %615 = vmatpush1.bf16.msra.mxu1 %v2245_v24 }
  0x53   : > { %575 = vmatprep.subr.bf16.mxu0 %v2248_v25  ;;  %616 = vmatprep.subr.bf16.mxu1 %v2253_v26 }
  0x56   : > { %576 = vmatpush1.bf16.msra.mxu0 %v2256_v27  ;;  %617 = vmatpush1.bf16.msra.mxu1 %v2259_v28 }
  0x57   : > { %577 = vmatprep.subr.bf16.mxu0 %v2264_v29  ;;  %618 = vmatprep.subr.bf16.mxu1 %v2269_v30 }
  0x5a   : > { %578 = vmatpush1.bf16.msra.mxu0 %v2274_v31  ;;  %619 = vmatpush1.bf16.msra.mxu1 %v2277_v32 }
  0x5b   : > { %579 = vmatprep.subr.bf16.mxu0 %v2282_v33  ;;  %620 = vmatprep.subr.bf16.mxu1 %v2285_v34 }
  0x5e   : > { %580 = vmatpush1.bf16.msra.mxu0 %v2290_v35  ;;  %621 = vmatpush1.bf16.msra.mxu1 %v2293_v36 }
  0x5f   : > { %581 = vmatprep.subr.bf16.mxu0 %v2298_v37  ;;  %622 = vmatprep.subr.bf16.mxu1 %v2301_v38 }
  0x62   : > { %582 = vmatpush1.bf16.msra.mxu0 %v2306_v39  ;;  %623 = vmatpush1.bf16.msra.mxu1 %v2309_v40 }
  0x63   : > { %712 = vmatprep.subr.bf16.mxu0 %v2188_v9  ;;  %753 = vmatprep.subr.bf16.mxu1 %v2191_v10 }
 0x105   : > { %v456_v46 = vpop.f32.mrf.mxu0  ;;  %v497_v47 = vpop.f32.mrf.mxu1 }
 0x107   : > { %v458_v49 = vpop.f32.mrf.mxu0  ;;  %v499_v50 = vpop.f32.mrf.mxu1 }
 0x108   : > { %v508_v51 = vcombine.low %v456_v46, %v458_v49  ;;  %v509_v52 = vcombine.low %v497_v47, %v499_v50 }
 0x109   : > { %v460_v53 = vpop.f32.mrf.mxu0  ;;  %v501_v54 = vpop.f32.mrf.mxu1 }
 0x10a   : > { %v516_v55 = vrot.slane %v508_v51, %v2362_v48  ;;  %v523_v56 = vrot.slane %v509_v52, %v2362_v48 }
 0x10b   : > { %v461_v58 = vpop.f32.mrf.mxu0  ;;  %v502_v59 = vpop.f32.mrf.mxu1 }
 0x10c   : > { %v524_v60 = vcombine.low %v516_v55, %v523_v56 }
 0x10e   : > { %v526_v61 = vadd.f32 %v524_v60, %v261_v57 }
 0x110   : > { %v1800_v62 = vmul.f32 -1.442695, %v526_v61  ;;  %v534_v63 = vrot.slane %v526_v61, 2  ;;  %v545_v1 = vrot.slane %v526_v61, 6  ;;  %v542_v4 = vrot.slane %v526_v61, 4 }
 0x112   : > { %1934 = vpow2.f32 %v1800_v62  ;;  %v1801_v0 = vmul.f32 -1.442695, %v534_v63  ;;  %v1802_v2 = vmul.f32 -1.442695, %v545_v1 }
 0x114   : > { %1936 = vpow2.f32 %v1801_v0  ;;  %v565_v0 = vld [vmem:[%s564_s19] sm:$0xff]  ;;  %s1144_s19 = scalar_lea.vmem %s2364_s6, %s1857_s18 [#allocation2] }
 0x115   : > { %1938 = vpow2.f32 %v1802_v2 }
 0x11f   : > { %v1935_v3 = vpop.eup %1934 }
 0x120   : > { %v530_v5 = vadd.f32 1.0, %v1935_v3 }
 0x121   : > { %v1937_v6 = vpop.eup %1936 }
 0x122   : > { %1940 = vrcp.f32 %v530_v5  ;;  %v539_v7 = vadd.f32 1.0, %v1937_v6  ;;  %v1939_v41 = vpop.eup %1938 }
 0x123   : > { %1942 = vtanh.f32 %v542_v4  ;;  %v550_v45 = vadd.f32 1.0, %v1939_v41 }
 0x124   : > { %1944 = vrcp.f32 %v539_v7 }
 0x125   : > { %1946 = vrcp.f32 %v550_v45 }
 0x12f   : > { %v1941_v42 = vpop.eup %1940 }
 0x130   : > { %v1943_v43 = vpop.eup %1942 }
 0x131   : > { %v1945_v44 = vpop.eup %1944  ;;  %v554_v47 = vmul.f32 %v1943_v43, %v1941_v42 }
 0x132   : > { %v553_v46 = vmul.f32 0.0, %v1945_v44  ;;  %v1947_v50 = vpop.eup %1946 }
 0x134   : > { %v2369_v49 = vadd.f32 %v554_v47, %v553_v46 }
 0x136   : > { %1948 = vtanh.f32 %v2369_v49 }
 0x143   : > { %v1949_v51 = vpop.eup %1948 }
 0x144   : > { %v557_v52 = vmul.f32 %v1949_v51, %v1947_v50 }
 0x146   : > { %560 = vst [vmem:[%s559_s15] sm:$0x3] %v557_v52  ;;  %v566_v53 = vpack.c.bf16 %v557_v52, %v557_v52  ;;  %s1139_s15 = scalar_lea.vmem %s2375_s14, %s1827_s11 [#allocation3] }
 0x148   : > { %600 = vmatmul.mubr.bf16.vlgmr.msra.gmra.mxu0 %v566_v53  ;;  %641 = vmatmul.mubr.bf16.vlgmr.msra.gmra.mxu1 %v566_v53 }
 0x149   : > { %713 = vmatpush1.bf16.msra.mxu0 %v2195_v11  ;;  %754 = vmatpush1.bf16.msra.mxu1 %v2198_v12 }
 0x14a   : > { %714 = vmatprep.subr.bf16.mxu0 %v2202_v13  ;;  %755 = vmatprep.subr.bf16.mxu1 %v2207_v14 }
 0x14b   : > { %744 = vmatprep.mubr.bf16.mxu0 %v2118_v8  ;;  %785 = vmatprep.mubr.bf16.mxu1 %v2118_v8 }
 0x14d   : > { %715 = vmatpush1.bf16.msra.mxu0 %v2210_v15  ;;  %756 = vmatpush1.bf16.msra.mxu1 %v2214_v16 }
 0x14e   : > { %716 = vmatprep.subr.bf16.mxu0 %v2218_v17  ;;  %757 = vmatprep.subr.bf16.mxu1 %v2221_v18 }
 0x151   : > { %717 = vmatpush1.bf16.msra.mxu0 %v2224_v19  ;;  %758 = vmatpush1.bf16.msra.mxu1 %v2227_v20 }
 0x152   : > { %718 = vmatprep.subr.bf16.mxu0 %v2232_v21  ;;  %759 = vmatprep.subr.bf16.mxu1 %v2237_v22 }
 0x155   : > { %719 = vmatpush1.bf16.msra.mxu0 %v2240_v23  ;;  %760 = vmatpush1.bf16.msra.mxu1 %v2245_v24 }
 0x156   : > { %720 = vmatprep.subr.bf16.mxu0 %v2248_v25  ;;  %761 = vmatprep.subr.bf16.mxu1 %v2253_v26 }
 0x159   : > { %721 = vmatpush1.bf16.msra.mxu0 %v2256_v27  ;;  %762 = vmatpush1.bf16.msra.mxu1 %v2259_v28 }
 0x15a   : > { %722 = vmatprep.subr.bf16.mxu0 %v2264_v29  ;;  %763 = vmatprep.subr.bf16.mxu1 %v2269_v30 }
 0x15d   : > { %723 = vmatpush1.bf16.msra.mxu0 %v2274_v31  ;;  %764 = vmatpush1.bf16.msra.mxu1 %v2277_v32 }
 0x15e   : > { %724 = vmatprep.subr.bf16.mxu0 %v2282_v33  ;;  %765 = vmatprep.subr.bf16.mxu1 %v2285_v34 }
 0x161   : > { %725 = vmatpush1.bf16.msra.mxu0 %v2290_v35  ;;  %766 = vmatpush1.bf16.msra.mxu1 %v2293_v36 }
 0x162   : > { %726 = vmatprep.subr.bf16.mxu0 %v2298_v37  ;;  %767 = vmatprep.subr.bf16.mxu1 %v2301_v38 }
 0x165   : > { %727 = vmatpush1.bf16.msra.mxu0 %v2306_v39  ;;  %768 = vmatpush1.bf16.msra.mxu1 %v2309_v40 }
 0x166   : > { %857 = vmatprep.subr.bf16.mxu0 %v2188_v9  ;;  %898 = vmatprep.subr.bf16.mxu1 %v2191_v10 }
 0x208   : > { %v601_v54 = vpop.f32.mrf.mxu0  ;;  %v642_v55 = vpop.f32.mrf.mxu1 }
 0x20a   : > { %v603_v56 = vpop.f32.mrf.mxu0  ;;  %v644_v57 = vpop.f32.mrf.mxu1 }
 0x20b   : > { %v653_v58 = vcombine.low %v601_v54, %v603_v56  ;;  %v654_v59 = vcombine.low %v642_v55, %v644_v57 }
 0x20c   : > { %v605_v60 = vpop.f32.mrf.mxu0  ;;  %v646_v61 = vpop.f32.mrf.mxu1 }
 0x20d   : > { %v661_v62 = vrot.slane %v653_v58, %v2362_v48  ;;  %v668_v63 = vrot.slane %v654_v59, %v2362_v48 }
 0x20e   : > { %v606_v1 = vpop.f32.mrf.mxu0  ;;  %v647_v2 = vpop.f32.mrf.mxu1 }
 0x20f   : > { %v669_v3 = vcombine.low %v661_v62, %v668_v63 }
 0x211   : > { %v671_v4 = vadd.f32 %v669_v3, %v565_v0 }
 0x213   : > { %v1806_v5 = vmul.f32 -1.442695, %v671_v4  ;;  %v679_v6 = vrot.slane %v671_v4, 2  ;;  %v690_v41 = vrot.slane %v671_v4, 6  ;;  %v687_v44 = vrot.slane %v671_v4, 4 }
 0x215   : > { %1950 = vpow2.f32 %v1806_v5  ;;  %v1807_v7 = vmul.f32 -1.442695, %v679_v6  ;;  %v1808_v42 = vmul.f32 -1.442695, %v690_v41 }
 0x217   : > { %1952 = vpow2.f32 %v1807_v7  ;;  %v710_v7 = vld [vmem:[%s709_s24] sm:$0xff]  ;;  %s1289_s24 = scalar_lea.vmem %s2364_s6, %s1858_s23 [#allocation2] }
 0x218   : > { %1954 = vpow2.f32 %v1808_v42 }
 0x222   : > { %v1951_v43 = vpop.eup %1950 }
 0x223   : > { %v675_v45 = vadd.f32 1.0, %v1951_v43 }
 0x224   : > { %v1953_v46 = vpop.eup %1952 }
 0x225   : > { %1956 = vrcp.f32 %v675_v45  ;;  %v684_v47 = vadd.f32 1.0, %v1953_v46  ;;  %v1955_v50 = vpop.eup %1954 }
 0x226   : > { %1958 = vtanh.f32 %v687_v44  ;;  %v695_v54 = vadd.f32 1.0, %v1955_v50 }
 0x227   : > { %1960 = vrcp.f32 %v684_v47 }
 0x228   : > { %1962 = vrcp.f32 %v695_v54 }
 0x232   : > { %v1957_v51 = vpop.eup %1956 }
 0x233   : > { %v1959_v52 = vpop.eup %1958 }
 0x234   : > { %v1961_v53 = vpop.eup %1960  ;;  %v699_v56 = vmul.f32 %v1959_v52, %v1957_v51 }
 0x235   : > { %v698_v55 = vmul.f32 %v1961_v53, %v2369_v49  ;;  %v1963_v58 = vpop.eup %1962 }
 0x237   : > { %v2421_v57 = vadd.f32 %v699_v56, %v698_v55 }
 0x239   : > { %1964 = vtanh.f32 %v2421_v57 }
 0x246   : > { %v1965_v59 = vpop.eup %1964 }
 0x247   : > { %v702_v60 = vmul.f32 %v1965_v59, %v1963_v58 }
 0x249   : > { %705 = vst [vmem:[%s704_s21] sm:$0x3] %v702_v60  ;;  %v711_v61 = vpack.c.bf16 %v702_v60, %v702_v60  ;;  %s1284_s21 = scalar_lea.vmem %s2375_s14, %s1833_s20 [#allocation3] }
 0x24b   : > { %745 = vmatmul.mubr.bf16.vlgmr.msra.gmra.mxu0 %v711_v61  ;;  %786 = vmatmul.mubr.bf16.vlgmr.msra.gmra.mxu1 %v711_v61 }
 0x24c   : > { %858 = vmatpush1.bf16.msra.mxu0 %v2195_v11  ;;  %899 = vmatpush1.bf16.msra.mxu1 %v2198_v12 }
 0x24d   : > { %859 = vmatprep.subr.bf16.mxu0 %v2202_v13  ;;  %900 = vmatprep.subr.bf16.mxu1 %v2207_v14 }
 0x24e   : > { %889 = vmatprep.mubr.bf16.mxu0 %v2118_v8  ;;  %930 = vmatprep.mubr.bf16.mxu1 %v2118_v8 }
 0x250   : > { %860 = vmatpush1.bf16.msra.mxu0 %v2210_v15  ;;  %901 = vmatpush1.bf16.msra.mxu1 %v2214_v16 }
 0x251   : > { %861 = vmatprep.subr.bf16.mxu0 %v2218_v17  ;;  %902 = vmatprep.subr.bf16.mxu1 %v2221_v18 }
 0x254   : > { %862 = vmatpush1.bf16.msra.mxu0 %v2224_v19  ;;  %903 = vmatpush1.bf16.msra.mxu1 %v2227_v20 }
 0x255   : > { %863 = vmatprep.subr.bf16.mxu0 %v2232_v21  ;;  %904 = vmatprep.subr.bf16.mxu1 %v2237_v22 }
 0x258   : > { %864 = vmatpush1.bf16.msra.mxu0 %v2240_v23  ;;  %905 = vmatpush1.bf16.msra.mxu1 %v2245_v24 }
 0x259   : > { %865 = vmatprep.subr.bf16.mxu0 %v2248_v25  ;;  %906 = vmatprep.subr.bf16.mxu1 %v2253_v26 }
 0x25c   : > { %866 = vmatpush1.bf16.msra.mxu0 %v2256_v27  ;;  %907 = vmatpush1.bf16.msra.mxu1 %v2259_v28 }
 0x25d   : > { %867 = vmatprep.subr.bf16.mxu0 %v2264_v29  ;;  %908 = vmatprep.subr.bf16.mxu1 %v2269_v30 }
 0x260   : > { %868 = vmatpush1.bf16.msra.mxu0 %v2274_v31  ;;  %909 = vmatpush1.bf16.msra.mxu1 %v2277_v32 }
 0x261   : > { %869 = vmatprep.subr.bf16.mxu0 %v2282_v33  ;;  %910 = vmatprep.subr.bf16.mxu1 %v2285_v34 }
 0x264   : > { %870 = vmatpush1.bf16.msra.mxu0 %v2290_v35  ;;  %911 = vmatpush1.bf16.msra.mxu1 %v2293_v36 }
 0x265   : > { %871 = vmatprep.subr.bf16.mxu0 %v2298_v37  ;;  %912 = vmatprep.subr.bf16.mxu1 %v2301_v38 }
 0x268   : > { %872 = vmatpush1.bf16.msra.mxu0 %v2306_v39  ;;  %913 = vmatpush1.bf16.msra.mxu1 %v2309_v40 }
 0x269   : > { %1002 = vmatprep.subr.bf16.mxu0 %v2188_v9  ;;  %1043 = vmatprep.subr.bf16.mxu1 %v2191_v10 }
 0x30b   : > { %v746_v49 = vpop.f32.mrf.mxu0  ;;  %v787_v62 = vpop.f32.mrf.mxu1 }
 0x30d   : > { %v748_v63 = vpop.f32.mrf.mxu0  ;;  %v789_v0 = vpop.f32.mrf.mxu1 }
 0x30e   : > { %v798_v1 = vcombine.low %v746_v49, %v748_v63  ;;  %v799_v2 = vcombine.low %v787_v62, %v789_v0 }
 0x30f   : > { %v750_v3 = vpop.f32.mrf.mxu0  ;;  %v791_v4 = vpop.f32.mrf.mxu1 }
 0x310   : > { %v806_v5 = vrot.slane %v798_v1, %v2362_v48  ;;  %v813_v6 = vrot.slane %v799_v2, %v2362_v48 }
 0x311   : > { %v751_v41 = vpop.f32.mrf.mxu0  ;;  %v792_v42 = vpop.f32.mrf.mxu1 }
 0x312   : > { %v814_v43 = vcombine.low %v806_v5, %v813_v6 }
 0x314   : > { %v816_v44 = vadd.f32 %v814_v43, %v710_v7 }
 0x316   : > { %v1812_v45 = vmul.f32 -1.442695, %v816_v44  ;;  %v824_v46 = vrot.slane %v816_v44, 2  ;;  %v835_v50 = vrot.slane %v816_v44, 6  ;;  %v832_v53 = vrot.slane %v816_v44, 4 }
 0x318   : > { %1966 = vpow2.f32 %v1812_v45  ;;  %v1813_v47 = vmul.f32 -1.442695, %v824_v46  ;;  %v1814_v51 = vmul.f32 -1.442695, %v835_v50 }
 0x31a   : > { %1968 = vpow2.f32 %v1813_v47  ;;  %v855_v47 = vld [vmem:[%s854_s30] sm:$0xff] }
 0x31b   : > { %1970 = vpow2.f32 %v1814_v51 }
 0x325   : > { %v1967_v52 = vpop.eup %1966 }
 0x326   : > { %v820_v54 = vadd.f32 1.0, %v1967_v52 }
 0x327   : > { %v1969_v55 = vpop.eup %1968 }
 0x328   : > { %1972 = vrcp.f32 %v820_v54  ;;  %v829_v56 = vadd.f32 1.0, %v1969_v55  ;;  %v1971_v58 = vpop.eup %1970 }
 0x329   : > { %1974 = vtanh.f32 %v832_v53  ;;  %v840_v49 = vadd.f32 1.0, %v1971_v58 }
 0x32a   : > { %1976 = vrcp.f32 %v829_v56 }
 0x32b   : > { %1978 = vrcp.f32 %v840_v49 }
 0x335   : > { %v1973_v59 = vpop.eup %1972 }
 0x336   : > { %v1975_v60 = vpop.eup %1974 }
 0x337   : > { %v1977_v61 = vpop.eup %1976  ;;  %v844_v63 = vmul.f32 %v1975_v60, %v1973_v59 }
 0x338   : > { %v843_v62 = vmul.f32 %v1977_v61, %v2421_v57  ;;  %v1979_v1 = vpop.eup %1978 }
 0x33a   : > { %v2469_v0 = vadd.f32 %v844_v63, %v843_v62 }
 0x33c   : > { %1980 = vtanh.f32 %v2469_v0 }
 0x349   : > { %v1981_v2 = vpop.eup %1980 }
 0x34a   : > { %v847_v3 = vmul.f32 %v1981_v2, %v1979_v1 }
 0x34c   : > { %850 = vst [vmem:[%s849_s26] sm:$0x3] %v847_v3  ;;  %v856_v4 = vpack.c.bf16 %v847_v3, %v847_v3  ;;  %s2711_s26 = scalar_select %p256_p11, 7, 0 }
 0x34e   : > { %890 = vmatmul.mubr.bf16.vlgmr.msra.gmra.mxu0 %v856_v4  ;;  %931 = vmatmul.mubr.bf16.vlgmr.msra.gmra.mxu1 %v856_v4  ;;  %s1859_s27 = sshll.u32 %s2711_s26, 3 }
 0x34f   : > { %1003 = vmatpush1.bf16.msra.mxu0 %v2195_v11  ;;  %1044 = vmatpush1.bf16.msra.mxu1 %v2198_v12  ;;  %s1434_s28 = scalar_lea.vmem %s2364_s6, %s1859_s27 [#allocation2]  ;;  %s1845_s6 = sshll.u32 %s2711_s26, 1 }
 0x350   : > { %1004 = vmatprep.subr.bf16.mxu0 %v2202_v13  ;;  %1045 = vmatprep.subr.bf16.mxu1 %v2207_v14  ;;  %s1574_s30 = scalar_lea.vmem %s2375_s14, %s1845_s6 [#allocation3] }
 0x351   : > { %1034 = vmatprep.mubr.bf16.mxu0 %v2118_v8  ;;  %1075 = vmatprep.mubr.bf16.mxu1 %v2118_v8 }
 0x353   : > { %1005 = vmatpush1.bf16.msra.mxu0 %v2210_v15  ;;  %1046 = vmatpush1.bf16.msra.mxu1 %v2214_v16 }
 0x354   : > { %1006 = vmatprep.subr.bf16.mxu0 %v2218_v17  ;;  %1047 = vmatprep.subr.bf16.mxu1 %v2221_v18 }
 0x357   : > { %1007 = vmatpush1.bf16.msra.mxu0 %v2224_v19  ;;  %1048 = vmatpush1.bf16.msra.mxu1 %v2227_v20 }
 0x358   : > { %1008 = vmatprep.subr.bf16.mxu0 %v2232_v21  ;;  %1049 = vmatprep.subr.bf16.mxu1 %v2237_v22 }
 0x35b   : > { %1009 = vmatpush1.bf16.msra.mxu0 %v2240_v23  ;;  %1050 = vmatpush1.bf16.msra.mxu1 %v2245_v24 }
 0x35c   : > { %1010 = vmatprep.subr.bf16.mxu0 %v2248_v25  ;;  %1051 = vmatprep.subr.bf16.mxu1 %v2253_v26 }
 0x35f   : > { %1011 = vmatpush1.bf16.msra.mxu0 %v2256_v27  ;;  %1052 = vmatpush1.bf16.msra.mxu1 %v2259_v28 }
 0x360   : > { %1012 = vmatprep.subr.bf16.mxu0 %v2264_v29  ;;  %1053 = vmatprep.subr.bf16.mxu1 %v2269_v30 }
 0x363   : > { %1013 = vmatpush1.bf16.msra.mxu0 %v2274_v31  ;;  %1054 = vmatpush1.bf16.msra.mxu1 %v2277_v32 }
 0x364   : > { %1014 = vmatprep.subr.bf16.mxu0 %v2282_v33  ;;  %1055 = vmatprep.subr.bf16.mxu1 %v2285_v34 }
 0x367   : > { %1015 = vmatpush1.bf16.msra.mxu0 %v2290_v35  ;;  %1056 = vmatpush1.bf16.msra.mxu1 %v2293_v36 }
 0x368   : > { %1016 = vmatprep.subr.bf16.mxu0 %v2298_v37  ;;  %1057 = vmatprep.subr.bf16.mxu1 %v2301_v38 }
 0x36b   : > { %1017 = vmatpush1.bf16.msra.mxu0 %v2306_v39  ;;  %1058 = vmatpush1.bf16.msra.mxu1 %v2309_v40 }
 0x36c   : > { %1147 = vmatprep.subr.bf16.mxu0 %v2188_v9  ;;  %1188 = vmatprep.subr.bf16.mxu1 %v2191_v10 }
 0x40e   : > { %v891_v57 = vpop.f32.mrf.mxu0  ;;  %v932_v5 = vpop.f32.mrf.mxu1 }
 0x410   : > { %v893_v6 = vpop.f32.mrf.mxu0  ;;  %v934_v7 = vpop.f32.mrf.mxu1 }
 0x411   : > { %v943_v41 = vcombine.low %v891_v57, %v893_v6  ;;  %v944_v42 = vcombine.low %v932_v5, %v934_v7 }
 0x412   : > { %v895_v43 = vpop.f32.mrf.mxu0  ;;  %v936_v44 = vpop.f32.mrf.mxu1 }
 0x413   : > { %v951_v45 = vrot.slane %v943_v41, %v2362_v48  ;;  %v958_v46 = vrot.slane %v944_v42, %v2362_v48 }
 0x414   : > { %v896_v50 = vpop.f32.mrf.mxu0  ;;  %v937_v51 = vpop.f32.mrf.mxu1 }
 0x415   : > { %v959_v52 = vcombine.low %v951_v45, %v958_v46 }
 0x417   : > { %v961_v53 = vadd.f32 %v959_v52, %v855_v47 }
 0x419   : > { %v1818_v54 = vmul.f32 -1.442695, %v961_v53  ;;  %v969_v55 = vrot.slane %v961_v53, 2  ;;  %v980_v58 = vrot.slane %v961_v53, 6  ;;  %v977_v61 = vrot.slane %v961_v53, 4 }
 0x41b   : > { %1982 = vpow2.f32 %v1818_v54  ;;  %v1819_v56 = vmul.f32 -1.442695, %v969_v55  ;;  %v1820_v59 = vmul.f32 -1.442695, %v980_v58 }
 0x41d   : > { %1984 = vpow2.f32 %v1819_v56 }
 0x41e   : > { %1986 = vpow2.f32 %v1820_v59 }
 0x428   : > { %v1983_v60 = vpop.eup %1982 }
 0x429   : > { %v965_v49 = vadd.f32 1.0, %v1983_v60 }
 0x42a   : > { %v1985_v62 = vpop.eup %1984 }
 0x42b   : > { %1988 = vrcp.f32 %v965_v49  ;;  %v974_v63 = vadd.f32 1.0, %v1985_v62  ;;  %v1987_v1 = vpop.eup %1986 }
 0x42c   : > { %1990 = vtanh.f32 %v977_v61  ;;  %v985_v57 = vadd.f32 1.0, %v1987_v1 }
 0x42d   : > { %1992 = vrcp.f32 %v974_v63 }
 0x42e   : > { %1994 = vrcp.f32 %v985_v57  ;;  %v2583_v57 = vld [vmem:[%s2185_s29 + $0xcc] ss:$16 sps:$4 sm:$0xff]  }
 0x438   : > { %v1989_v2 = vpop.eup %1988 }
 0x439   : > { %v1991_v3 = vpop.eup %1990 }
 0x43a   : > { %v1993_v4 = vpop.eup %1992  ;;  %v989_v6 = vmul.f32 %v1991_v3, %v1989_v2  ;;  %v2571_v2 = vld [vmem:[%s2185_s29 + $0xe0] ss:$16 sps:$4 sm:$0xff]   ;;  %v2575_v3 = vld [vmem:[%s2185_s29 + $0xe8] ss:$16 sps:$4 sm:$0xff]  }
 0x43b   : > { %v988_v5 = vmul.f32 %v1993_v4, %v2469_v0  ;;  %v1995_v41 = vpop.eup %1994  ;;  %v2579_v4 = vld [vmem:[%s2185_s29 + $0xc4] ss:$16 sps:$4 sm:$0xff]  }
 0x43d   : > { %v2517_v7 = vadd.f32 %v989_v6, %v988_v5  ;;  %v2589_v5 = vld [vmem:[%s2185_s29 + $0xc0] ss:$16 sps:$4 sm:$0xff]   ;;  %v2593_v6 = vld [vmem:[%s2185_s29 + $0xc8] ss:$16 sps:$4 sm:$0xff]  }
 0x43f   : > { %1996 = vtanh.f32 %v2517_v7 }
 0x44c   : > { %v1997_v42 = vpop.eup %1996 }
 0x44d   : > { %v992_v43 = vmul.f32 %v1997_v42, %v1995_v41  ;;  %v2601_v41 = vld [vmem:[%s2185_s29 + $0xac] ss:$16 sps:$4 sm:$0xff]   ;;  %v2605_v42 = vld [vmem:[%s2185_s29 + $0xa0] ss:$16 sps:$4 sm:$0xff]  }
 0x44f   : > { %995 = vst [vmem:[%s994_s4] sm:$0x3] %v992_v43  ;;  %v1001_v44 = vpack.c.bf16 %v992_v43, %v992_v43  ;;  %v2609_v43 = vld [vmem:[%s2185_s29 + $0xa8] ss:$16 sps:$4 sm:$0xff]  }
 0x451   : > { %1035 = vmatmul.mubr.bf16.vlgmr.msra.gmra.mxu0 %v1001_v44  ;;  %1076 = vmatmul.mubr.bf16.vlgmr.msra.gmra.mxu1 %v1001_v44  ;;  %v2613_v44 = vld [vmem:[%s2185_s29 + $0x84] ss:$16 sps:$4 sm:$0xff]  }
 0x452   : > { %1148 = vmatpush1.bf16.msra.mxu0 %v2195_v11  ;;  %1189 = vmatpush1.bf16.msra.mxu1 %v2198_v12 }
 0x453   : > { %1149 = vmatprep.subr.bf16.mxu0 %v2202_v13  ;;  %1190 = vmatprep.subr.bf16.mxu1 %v2207_v14 }
 0x454   : > { %1179 = vmatprep.mubr.bf16.mxu0 %v2118_v8  ;;  %1220 = vmatprep.mubr.bf16.mxu1 %v2118_v8 }
 0x456   : > { %1150 = vmatpush1.bf16.msra.mxu0 %v2210_v15  ;;  %1191 = vmatpush1.bf16.msra.mxu1 %v2214_v16 }
 0x457   : > { %1151 = vmatprep.subr.bf16.mxu0 %v2218_v17  ;;  %1192 = vmatprep.subr.bf16.mxu1 %v2221_v18 }
 0x45a   : > { %1152 = vmatpush1.bf16.msra.mxu0 %v2224_v19  ;;  %1193 = vmatpush1.bf16.msra.mxu1 %v2227_v20  ;;  %v1000_v20 = vld [vmem:[%s999_s8] sm:$0xff] }
 0x45b   : > { %1153 = vmatprep.subr.bf16.mxu0 %v2232_v21  ;;  %1194 = vmatprep.subr.bf16.mxu1 %v2237_v22 }
 0x45e   : > { %1154 = vmatpush1.bf16.msra.mxu0 %v2240_v23  ;;  %1195 = vmatpush1.bf16.msra.mxu1 %v2245_v24 }
 0x45f   : > { %1155 = vmatprep.subr.bf16.mxu0 %v2248_v25  ;;  %1196 = vmatprep.subr.bf16.mxu1 %v2253_v26 }
 0x462   : > { %1156 = vmatpush1.bf16.msra.mxu0 %v2256_v27  ;;  %1197 = vmatpush1.bf16.msra.mxu1 %v2259_v28 }
 0x463   : > { %1157 = vmatprep.subr.bf16.mxu0 %v2264_v29  ;;  %1198 = vmatprep.subr.bf16.mxu1 %v2269_v30 }
 0x466   : > { %1158 = vmatpush1.bf16.msra.mxu0 %v2274_v31  ;;  %1199 = vmatpush1.bf16.msra.mxu1 %v2277_v32 }
 0x467   : > { %1159 = vmatprep.subr.bf16.mxu0 %v2282_v33  ;;  %1200 = vmatprep.subr.bf16.mxu1 %v2285_v34 }
 0x46a   : > { %1160 = vmatpush1.bf16.msra.mxu0 %v2290_v35  ;;  %1201 = vmatpush1.bf16.msra.mxu1 %v2293_v36 }
 0x46b   : > { %1161 = vmatprep.subr.bf16.mxu0 %v2298_v37  ;;  %1202 = vmatprep.subr.bf16.mxu1 %v2301_v38 }
 0x46e   : > { %1162 = vmatpush1.bf16.msra.mxu0 %v2306_v39  ;;  %1203 = vmatpush1.bf16.msra.mxu1 %v2309_v40 }
 0x46f   : > { %1292 = vmatprep.subr.bf16.mxu0 %v2188_v9  ;;  %1333 = vmatprep.subr.bf16.mxu1 %v2191_v10 }
 0x511   : > { %v1036_v11 = vpop.f32.mrf.mxu0  ;;  %v1077_v12 = vpop.f32.mrf.mxu1 }
 0x513   : > { %v1038_v13 = vpop.f32.mrf.mxu0  ;;  %v1079_v14 = vpop.f32.mrf.mxu1 }
 0x514   : > { %v1088_v15 = vcombine.low %v1036_v11, %v1038_v13  ;;  %v1089_v16 = vcombine.low %v1077_v12, %v1079_v14  ;;  %v2617_v11 = vld [vmem:[%s2185_s29 + $0x8c] ss:$16 sps:$4 sm:$0xff]   ;;  %v2621_v12 = vld [vmem:[%s2185_s29 + $0x80] ss:$16 sps:$4 sm:$0xff]   ;;  %v2625_v13 = vld [vmem:[%s2185_s29 + $0x88] ss:$16 sps:$4 sm:$0xff]  }
 0x515   : > { %v1040_v17 = vpop.f32.mrf.mxu0  ;;  %v1081_v18 = vpop.f32.mrf.mxu1  ;;  %v2629_v14 = vld [vmem:[%s2185_s29 + $0x64] ss:$16 sps:$4 sm:$0xff]  }
 0x516   : > { %v1096_v19 = vrot.slane %v1088_v15, %v2362_v48  ;;  %v1103_v9 = vrot.slane %v1089_v16, %v2362_v48  ;;  %v2633_v15 = vld [vmem:[%s2185_s29 + $0x6c] ss:$16 sps:$4 sm:$0xff]  }
 0x517   : > { %v1041_v10 = vpop.f32.mrf.mxu0  ;;  %v1082_v21 = vpop.f32.mrf.mxu1 }
 0x518   : > { %v1104_v22 = vcombine.low %v1096_v19, %v1103_v9 }
 0x51a   : > { %v1106_v23 = vadd.f32 %v1104_v22, %v1000_v20 }
 0x51c   : > { %v1824_v24 = vmul.f32 -1.442695, %v1106_v23  ;;  %v1114_v25 = vrot.slane %v1106_v23, 2  ;;  %v1125_v0 = vrot.slane %v1106_v23, 6  ;;  %v1122_v47 = vrot.slane %v1106_v23, 4 }
 0x51e   : > { %1998 = vpow2.f32 %v1824_v24  ;;  %v1825_v26 = vmul.f32 -1.442695, %v1114_v25  ;;  %v1826_v45 = vmul.f32 -1.442695, %v1125_v0 }
 0x520   : > { %2000 = vpow2.f32 %v1825_v26 }
 0x521   : > { %2002 = vpow2.f32 %v1826_v45 }
 0x52b   : > { %v1999_v46 = vpop.eup %1998 }
 0x52c   : > { %v1110_v50 = vadd.f32 1.0, %v1999_v46 }
 0x52d   : > { %v2001_v51 = vpop.eup %2000 }
 0x52e   : > { %2004 = vrcp.f32 %v1110_v50  ;;  %v1119_v52 = vadd.f32 1.0, %v2001_v51  ;;  %v2003_v53 = vpop.eup %2002 }
 0x52f   : > { %2006 = vtanh.f32 %v1122_v47  ;;  %v1130_v58 = vadd.f32 1.0, %v2003_v53 }
 0x530   : > { %2008 = vrcp.f32 %v1119_v52 }
 0x531   : > { %2010 = vrcp.f32 %v1130_v58 }
 0x53b   : > { %v2005_v54 = vpop.eup %2004 }
 0x53c   : > { %v2007_v55 = vpop.eup %2006 }
 0x53d   : > { %v2009_v56 = vpop.eup %2008  ;;  %v1134_v60 = vmul.f32 %v2007_v55, %v2005_v54 }
 0x53e   : > { %v1133_v59 = vmul.f32 %v2009_v56, %v2517_v7  ;;  %v2011_v49 = vpop.eup %2010  ;;  %v2597_v7 = vld [vmem:[%s2185_s29 + $0xa4] ss:$16 sps:$4 sm:$0xff]  }
 0x540   : > { %v2565_v61 = vadd.f32 %v1134_v60, %v1133_v59  ;;  %v2081_v59 = vld [vmem:[%s2185_s29 + $0x68] ss:$16 sps:$4 sm:$0xff]   ;;  %v2082_v60 = vld [vmem:[%s2185_s29 + $0x44] ss:$16 sps:$4 sm:$0xff]  }
 0x542   : > { %2012 = vtanh.f32 %v2565_v61 }
 0x54f   : > { %v2013_v62 = vpop.eup %2012 }
 0x550   : > { %v1137_v63 = vmul.f32 %v2013_v62, %v2011_v49  ;;  %v2084_v49 = vld [vmem:[%s2185_s29 + $0x40] ss:$16 sps:$4 sm:$0xff]   ;;  %v2085_v62 = vld [vmem:[%s2185_s29 + $0x48] ss:$16 sps:$4 sm:$0xff]  }
 0x552   : > { %1140 = vst [vmem:[%s1139_s15] sm:$0x3] %v1137_v63  ;;  %v1146_v1 = vpack.c.bf16 %v1137_v63, %v1137_v63  ;;  %v2086_v63 = vld [vmem:[%s2185_s29 + $0x24] ss:$16 sps:$4 sm:$0xff]  }
 0x554   : > { %1180 = vmatmul.mubr.bf16.vlgmr.msra.gmra.mxu0 %v1146_v1  ;;  %1221 = vmatmul.mubr.bf16.vlgmr.msra.gmra.mxu1 %v1146_v1  ;;  %v2087_v1 = vld [vmem:[%s2185_s29 + $0x2c] ss:$16 sps:$4 sm:$0xff]  }
 0x555   : > { %1293 = vmatpush1.bf16.msra.mxu0 %v2571_v2  ;;  %1334 = vmatpush1.bf16.msra.mxu1 %v2575_v3 }
 0x556   : > { %1294 = vmatprep.subr.bf16.mxu0 %v2579_v4  ;;  %1335 = vmatprep.subr.bf16.mxu1 %v2583_v57 }
 0x557   : > { %1324 = vmatprep.mubr.bf16.mxu0 %v2118_v8  ;;  %1365 = vmatprep.mubr.bf16.mxu1 %v2118_v8 }
 0x559   : > { %1295 = vmatpush1.bf16.msra.mxu0 %v2589_v5  ;;  %1336 = vmatpush1.bf16.msra.mxu1 %v2593_v6 }
 0x55a   : > { %1296 = vmatprep.subr.bf16.mxu0 %v2597_v7  ;;  %1337 = vmatprep.subr.bf16.mxu1 %v2601_v41 }
 0x55d   : > { %1297 = vmatpush1.bf16.msra.mxu0 %v2605_v42  ;;  %1338 = vmatpush1.bf16.msra.mxu1 %v2609_v43 }
 0x55e   : > { %1298 = vmatprep.subr.bf16.mxu0 %v2613_v44  ;;  %1339 = vmatprep.subr.bf16.mxu1 %v2617_v11 }
 0x561   : > { %1299 = vmatpush1.bf16.msra.mxu0 %v2621_v12  ;;  %1340 = vmatpush1.bf16.msra.mxu1 %v2625_v13 }
 0x562   : > { %1300 = vmatprep.subr.bf16.mxu0 %v2629_v14  ;;  %1341 = vmatprep.subr.bf16.mxu1 %v2633_v15 }
 0x565   : > { %1301 = vmatpush1.bf16.msra.mxu0 %v2256_v27  ;;  %1342 = vmatpush1.bf16.msra.mxu1 %v2259_v28  ;;  %v2078_v27 = vld [vmem:[%s2185_s29 + $0xe4] ss:$16 sps:$4 sm:$0xff]   ;;  %v2079_v28 = vld [vmem:[%s2185_s29 + $0xec] ss:$16 sps:$4 sm:$0xff]  }
 0x566   : > { %1302 = vmatprep.subr.bf16.mxu0 %v2264_v29  ;;  %1343 = vmatprep.subr.bf16.mxu1 %v2269_v30 }
 0x569   : > { %1303 = vmatpush1.bf16.msra.mxu0 %v2274_v31  ;;  %1344 = vmatpush1.bf16.msra.mxu1 %v2277_v32 }
 0x56a   : > { %1304 = vmatprep.subr.bf16.mxu0 %v2282_v33  ;;  %1345 = vmatprep.subr.bf16.mxu1 %v2285_v34 }
 0x56d   : > { %1305 = vmatpush1.bf16.msra.mxu0 %v2290_v35  ;;  %1346 = vmatpush1.bf16.msra.mxu1 %v2293_v36 }
 0x56e   : > { %1306 = vmatprep.subr.bf16.mxu0 %v2298_v37  ;;  %1347 = vmatprep.subr.bf16.mxu1 %v2301_v38 }
 0x571   : > { %1307 = vmatpush1.bf16.msra.mxu0 %v2306_v39  ;;  %1348 = vmatpush1.bf16.msra.mxu1 %v2309_v40  ;;  %v1145_v39 = vld [vmem:[%s1144_s19] sm:$0xff] }
 0x572   : > { %1437 = vmatprep.subr.bf16.mxu0 %v2078_v27  ;;  %1478 = vmatprep.subr.bf16.mxu1 %v2079_v28  ;;  %v1290_v27 = vld [vmem:[%s1289_s24] sm:$0xff] }
 0x614   : > { %v1181_v29 = vpop.f32.mrf.mxu0  ;;  %v1222_v30 = vpop.f32.mrf.mxu1 }
 0x616   : > { %v1183_v31 = vpop.f32.mrf.mxu0  ;;  %v1224_v32 = vpop.f32.mrf.mxu1 }
 0x617   : > { %v1233_v33 = vcombine.low %v1181_v29, %v1183_v31  ;;  %v1234_v34 = vcombine.low %v1222_v30, %v1224_v32 }
 0x618   : > { %v1185_v35 = vpop.f32.mrf.mxu0  ;;  %v1226_v36 = vpop.f32.mrf.mxu1 }
 0x619   : > { %v1241_v37 = vrot.slane %v1233_v33, %v2362_v48  ;;  %v1248_v38 = vrot.slane %v1234_v34, %v2362_v48 }
 0x61a   : > { %v1186_v40 = vpop.f32.mrf.mxu0  ;;  %v1227_v16 = vpop.f32.mrf.mxu1 }
 0x61b   : > { %v1249_v17 = vcombine.low %v1241_v37, %v1248_v38 }
 0x61d   : > { %v1251_v18 = vadd.f32 %v1249_v17, %v1145_v39 }
 0x61f   : > { %v1830_v19 = vmul.f32 -1.442695, %v1251_v18  ;;  %v1259_v9 = vrot.slane %v1251_v18, 2  ;;  %v1270_v10 = vrot.slane %v1251_v18, 6  ;;  %v1267_v23 = vrot.slane %v1251_v18, 4 }
 0x621   : > { %2014 = vpow2.f32 %v1830_v19  ;;  %v1831_v20 = vmul.f32 -1.442695, %v1259_v9  ;;  %v1832_v21 = vmul.f32 -1.442695, %v1270_v10 }
 0x623   : > { %2016 = vpow2.f32 %v1831_v20 }
 0x624   : > { %2018 = vpow2.f32 %v1832_v21 }
 0x62e   : > { %v2015_v22 = vpop.eup %2014 }
 0x62f   : > { %v1255_v24 = vadd.f32 1.0, %v2015_v22 }
 0x630   : > { %v2017_v25 = vpop.eup %2016 }
 0x631   : > { %2020 = vrcp.f32 %v1255_v24  ;;  %v1264_v26 = vadd.f32 1.0, %v2017_v25  ;;  %v2019_v0 = vpop.eup %2018 }
 0x632   : > { %2022 = vtanh.f32 %v1267_v23  ;;  %v1275_v50 = vadd.f32 1.0, %v2019_v0 }
 0x633   : > { %2024 = vrcp.f32 %v1264_v26 }
 0x634   : > { %2026 = vrcp.f32 %v1275_v50 }
 0x63e   : > { %v2021_v45 = vpop.eup %2020 }
 0x63f   : > { %v2023_v46 = vpop.eup %2022 }
 0x640   : > { %v2025_v47 = vpop.eup %2024  ;;  %v1279_v52 = vmul.f32 %v2023_v46, %v2021_v45 }
 0x641   : > { %v1278_v51 = vmul.f32 %v2025_v47, %v2565_v61  ;;  %v2027_v54 = vpop.eup %2026  ;;  %v2083_v61 = vld [vmem:[%s2185_s29 + $0x4c] ss:$16 sps:$4 sm:$0xff]  }
 0x643   : > { %v2661_v53 = vadd.f32 %v1279_v52, %v1278_v51 }
 0x645   : > { %2028 = vtanh.f32 %v2661_v53 }
 0x652   : > { %v2029_v55 = vpop.eup %2028 }
 0x653   : > { %v1282_v56 = vmul.f32 %v2029_v55, %v2027_v54 }
 0x655   : > { %1285 = vst [vmem:[%s1284_s21] sm:$0x3] %v1282_v56  ;;  %v1291_v58 = vpack.c.bf16 %v1282_v56, %v1282_v56  ;;  %v1435_v56 = vld [vmem:[%s1434_s28] sm:$0xff] }
 0x657   : > { %1325 = vmatmul.mubr.bf16.vlgmr.msra.gmra.mxu0 %v1291_v58  ;;  %1366 = vmatmul.mubr.bf16.vlgmr.msra.gmra.mxu1 %v1291_v58 }
 0x658   : > { %1438 = vmatpush1.bf16.msra.mxu0 %v2571_v2  ;;  %1479 = vmatpush1.bf16.msra.mxu1 %v2575_v3  ;;  %v2088_v2 = vld [vmem:[%s2185_s29 + $0x20] ss:$16 sps:$4 sm:$0xff]   ;;  %v2089_v3 = vld [vmem:[%s2185_s29 + $0x28] ss:$16 sps:$4 sm:$0xff]  }
 0x659   : > { %1439 = vmatprep.subr.bf16.mxu0 %v2579_v4  ;;  %1480 = vmatprep.subr.bf16.mxu1 %v2583_v57  ;;  %v2090_v4 = vld [vmem:[%s2185_s29 + $0x4] ss:$16 sps:$4 sm:$0xff]   ;;  %v2091_v57 = vld [vmem:[%s2185_s29 + $0xc] ss:$16 sps:$4 sm:$0xff]  }
 0x65a   : > { %1469 = vmatprep.mubr.bf16.mxu0 %v2118_v8  ;;  %1510 = vmatprep.mubr.bf16.mxu1 %v2118_v8  ;;  %v2080_v8 = vld [vmem:[%s2185_s29 + $0x60] ss:$16 sps:$4 sm:$0xff]  }
 0x65c   : > { %1440 = vmatpush1.bf16.msra.mxu0 %v2589_v5  ;;  %1481 = vmatpush1.bf16.msra.mxu1 %v2593_v6  ;;  %v2092_v5 = vld [vmem:[%s2185_s29] ss:$16 sps:$4 sm:$0xff]   ;;  %v2093_v6 = vld [vmem:[%s2185_s29 + $0x8] ss:$16 sps:$4 sm:$0xff]   ;;  %s1839_s29 = sshll.u32 %s2700_s22, 1 }
 0x65d   : > { %1441 = vmatprep.subr.bf16.mxu0 %v2597_v7  ;;  %1482 = vmatprep.subr.bf16.mxu1 %v2601_v41  ;;  %s1429_s25 = scalar_lea.vmem %s2375_s14, %s1839_s29 [#allocation3] }
 0x660   : > { %1442 = vmatpush1.bf16.msra.mxu0 %v2605_v42  ;;  %1483 = vmatpush1.bf16.msra.mxu1 %v2609_v43 }
 0x661   : > { %1443 = vmatprep.subr.bf16.mxu0 %v2613_v44  ;;  %1484 = vmatprep.subr.bf16.mxu1 %v2617_v11 }
 0x664   : > { %1444 = vmatpush1.bf16.msra.mxu0 %v2621_v12  ;;  %1485 = vmatpush1.bf16.msra.mxu1 %v2625_v13 }
 0x665   : > { %1445 = vmatprep.subr.bf16.mxu0 %v2629_v14  ;;  %1486 = vmatprep.subr.bf16.mxu1 %v2633_v15 }
 0x668   : > { %1446 = vmatpush1.bf16.msra.mxu0 %v2080_v8  ;;  %1487 = vmatpush1.bf16.msra.mxu1 %v2081_v59 }
 0x669   : > { %1447 = vmatprep.subr.bf16.mxu0 %v2082_v60  ;;  %1488 = vmatprep.subr.bf16.mxu1 %v2083_v61 }
 0x66c   : > { %1448 = vmatpush1.bf16.msra.mxu0 %v2084_v49  ;;  %1489 = vmatpush1.bf16.msra.mxu1 %v2085_v62 }
 0x66d   : > { %1449 = vmatprep.subr.bf16.mxu0 %v2086_v63  ;;  %1490 = vmatprep.subr.bf16.mxu1 %v2087_v1 }
 0x670   : > { %1450 = vmatpush1.bf16.msra.mxu0 %v2088_v2  ;;  %1491 = vmatpush1.bf16.msra.mxu1 %v2089_v3 }
 0x671   : > { %1451 = vmatprep.subr.bf16.mxu0 %v2090_v4  ;;  %1492 = vmatprep.subr.bf16.mxu1 %v2091_v57 }
 0x674   : > { %1452 = vmatpush1.bf16.msra.mxu0 %v2092_v5  ;;  %1493 = vmatpush1.bf16.msra.mxu1 %v2093_v6 }
 0x717   : > { %v1326_v7 = vpop.f32.mrf.mxu0  ;;  %v1367_v41 = vpop.f32.mrf.mxu1 }
 0x719   : > { %v1328_v42 = vpop.f32.mrf.mxu0  ;;  %v1369_v43 = vpop.f32.mrf.mxu1 }
 0x71a   : > { %v1378_v44 = vcombine.low %v1326_v7, %v1328_v42  ;;  %v1379_v11 = vcombine.low %v1367_v41, %v1369_v43 }
 0x71b   : > { %v1330_v12 = vpop.f32.mrf.mxu0  ;;  %v1371_v13 = vpop.f32.mrf.mxu1 }
 0x71c   : > { %v1386_v14 = vrot.slane %v1378_v44, %v2362_v48  ;;  %v1393_v15 = vrot.slane %v1379_v11, %v2362_v48 }
 0x71d   : > { %v1331_v28 = vpop.f32.mrf.mxu0  ;;  %v1372_v29 = vpop.f32.mrf.mxu1 }
 0x71e   : > { %v1394_v30 = vcombine.low %v1386_v14, %v1393_v15 }
 0x720   : > { %v1396_v31 = vadd.f32 %v1394_v30, %v1290_v27 }
 0x722   : > { %v1836_v32 = vmul.f32 -1.442695, %v1396_v31  ;;  %v1404_v33 = vrot.slane %v1396_v31, 2  ;;  %v1415_v35 = vrot.slane %v1396_v31, 6  ;;  %v1412_v38 = vrot.slane %v1396_v31, 4 }
 0x724   : > { %2030 = vpow2.f32 %v1836_v32  ;;  %v1837_v34 = vmul.f32 -1.442695, %v1404_v33  ;;  %v1838_v36 = vmul.f32 -1.442695, %v1415_v35 }
 0x726   : > { %2032 = vpow2.f32 %v1837_v34 }
 0x727   : > { %2034 = vpow2.f32 %v1838_v36 }
 0x731   : > { %v2031_v37 = vpop.eup %2030 }
 0x732   : > { %v1400_v39 = vadd.f32 1.0, %v2031_v37 }
 0x733   : > { %v2033_v40 = vpop.eup %2032 }
 0x734   : > { %2036 = vrcp.f32 %v1400_v39  ;;  %v1409_v16 = vadd.f32 1.0, %v2033_v40  ;;  %v2035_v17 = vpop.eup %2034 }
 0x735   : > { %2038 = vtanh.f32 %v1412_v38  ;;  %v1420_v20 = vadd.f32 1.0, %v2035_v17 }
 0x736   : > { %2040 = vrcp.f32 %v1409_v16 }
 0x737   : > { %2042 = vrcp.f32 %v1420_v20 }
 0x741   : > { %v2037_v18 = vpop.eup %2036 }
 0x742   : > { %v2039_v19 = vpop.eup %2038 }
 0x743   : > { %v2041_v9 = vpop.eup %2040  ;;  %v1424_v21 = vmul.f32 %v2039_v19, %v2037_v18 }
 0x744   : > { %v1423_v10 = vmul.f32 %v2041_v9, %v2661_v53  ;;  %v2043_v23 = vpop.eup %2042 }
 0x746   : > { %v1425_v22 = vadd.f32 %v1424_v21, %v1423_v10 }
 0x748   : > { %2044 = vtanh.f32 %v1425_v22 }
 0x755   : > { %v2045_v24 = vpop.eup %2044 }
 0x756   : > { %v1427_v25 = vmul.f32 %v2045_v24, %v2043_v23 }
 0x758   : > { %1430 = vst [vmem:[%s1429_s25] sm:$0x3] %v1427_v25  ;;  %v1436_v26 = vpack.c.bf16 %v1427_v25, %v1427_v25 }
 0x75a   : > { %1470 = vmatmul.mubr.bf16.vlgmr.msra.gmra.mxu0 %v1436_v26  ;;  %1511 = vmatmul.mubr.bf16.vlgmr.msra.gmra.mxu1 %v1436_v26 }
 0x81a   : > { %v1471_v0 = vpop.f32.mrf.mxu0  ;;  %v1512_v45 = vpop.f32.mrf.mxu1 }
 0x81c   : > { %v1473_v46 = vpop.f32.mrf.mxu0  ;;  %v1514_v47 = vpop.f32.mrf.mxu1 }
 0x81d   : > { %v1523_v50 = vcombine.low %v1471_v0, %v1473_v46  ;;  %v1524_v51 = vcombine.low %v1512_v45, %v1514_v47 }
 0x81e   : > { %v1475_v52 = vpop.f32.mrf.mxu0  ;;  %v1516_v53 = vpop.f32.mrf.mxu1 }
 0x81f   : > { %v1531_v54 = vrot.slane %v1523_v50, %v2362_v48  ;;  %v1538_v55 = vrot.slane %v1524_v51, %v2362_v48 }
 0x820   : > { %v1476_v58 = vpop.f32.mrf.mxu0  ;;  %v1517_v8 = vpop.f32.mrf.mxu1 }
 0x821   : > { %v1539_v59 = vcombine.low %v1531_v54, %v1538_v55 }
 0x823   : > { %v1541_v60 = vadd.f32 %v1539_v59, %v1435_v56 }
 0x825   : > { %v1842_v61 = vmul.f32 -1.442695, %v1541_v60  ;;  %v1549_v49 = vrot.slane %v1541_v60, 2  ;;  %v1560_v63 = vrot.slane %v1541_v60, 6  ;;  %v1557_v3 = vrot.slane %v1541_v60, 4 }
 0x827   : > { %2046 = vpow2.f32 %v1842_v61  ;;  %v1843_v62 = vmul.f32 -1.442695, %v1549_v49  ;;  %v1844_v1 = vmul.f32 -1.442695, %v1560_v63 }
 0x829   : > { %2048 = vpow2.f32 %v1843_v62 }
 0x82a   : > { %2050 = vpow2.f32 %v1844_v1 }
 0x834   : > { %v2047_v2 = vpop.eup %2046 }
 0x835   : > { %v1545_v4 = vadd.f32 1.0, %v2047_v2 }
 0x836   : > { %v2049_v57 = vpop.eup %2048 }
 0x837   : > { %2052 = vrcp.f32 %v1545_v4  ;;  %v1554_v48 = vadd.f32 1.0, %v2049_v57  ;;  %v2051_v5 = vpop.eup %2050 }
 0x838   : > { %2054 = vtanh.f32 %v1557_v3  ;;  %v1565_v42 = vadd.f32 1.0, %v2051_v5 }
 0x839   : > { %2056 = vrcp.f32 %v1554_v48 }
 0x83a   : > { %2058 = vrcp.f32 %v1565_v42 }
 0x844   : > { %v2053_v6 = vpop.eup %2052 }
 0x845   : > { %v2055_v7 = vpop.eup %2054 }
 0x846   : > { %v2057_v41 = vpop.eup %2056  ;;  %v1569_v44 = vmul.f32 %v2055_v7, %v2053_v6 }
 0x847   : > { %v1568_v43 = vmul.f32 %v2057_v41, %v1425_v22  ;;  %v2059_v12 = vpop.eup %2058 }
 0x849   : > { %v1570_v11 = vadd.f32 %v1569_v44, %v1568_v43 }
 0x84b   : > { %2060 = vtanh.f32 %v1570_v11 }
 0x857   : > { %1582 = sbr.rel (!%p2166_p5) target bundleno = 2152 (0x868), region = 70 }
 0x858   : > { %v2061_v13 = vpop.eup %2060 }
 0x859   : > { %v1572_v14 = vmul.f32 %v2061_v13, %v2059_v12 }
 0x85b   : > { %1575 = vst [vmem:[%s1574_s30] sm:$0x3] %v1572_v14 }
 0x862   : > { %v1601_v15 = vld [vmem:[%s2375_s14] sm:$0x3]  ;;  %v1603_v27 = vld [vmem:[%s2375_s14 + $0x2] sm:$0x3]  ;;  %v1605_v28 = vld [vmem:[%s2375_s14 + $0x4] sm:$0x3] }
 0x863   : > { %v1607_v29 = vld [vmem:[%s2375_s14 + $0x6] sm:$0x3]  ;;  %v1609_v30 = vld [vmem:[%s2375_s14 + $0x8] sm:$0x3]  ;;  %1602 = vst [vmem:[%s1584_s7] sm:$0x3] %v1601_v15 }
 0x864   : > { %1604 = vst [vmem:[%s1584_s7 + $0x4] sm:$0x3] %v1603_v27  ;;  %1606 = vst [vmem:[%s1584_s7 + $0x8] sm:$0x3] %v1605_v28  ;;  %v1611_v31 = vld [vmem:[%s2375_s14 + $0xa] sm:$0x3] }
 0x865   : > { %1608 = vst [vmem:[%s1584_s7 + $0xc] sm:$0x3] %v1607_v29  ;;  %1610 = vst [vmem:[%s1584_s7 + $0x10] sm:$0x3] %v1609_v30  ;;  %v1613_v32 = vld [vmem:[%s2375_s14 + $0xc] sm:$0x3] }
 0x866   : > { %v1615_v33 = vld [vmem:[%s2375_s14 + $0xe] sm:$0x3]  ;;  %1612 = vst [vmem:[%s1584_s7 + $0x14] sm:$0x3] %v1611_v31  ;;  %1614 = vst [vmem:[%s1584_s7 + $0x18] sm:$0x3] %v1613_v32 }
 0x867   : > { %1616 = vst [vmem:[%s1584_s7 + $0x1c] sm:$0x3] %v1615_v33 }
 0x868 PF: > { %p9_p12 = scmp.ge.s32.totalorder %s2154_s13, 4   ;;  %s2747_s9 = smov %s2112_s10 }
 0x869   : > { %s2748_s10 = smov %s2164_s16  ;;  %s2749_s11 = smov %s2154_s13 }
 0x86a   :  { %11 = sbr.rel (!%p9_p12) target bundleno = 2 (0x2), region = 161 }

</bundles_post_ra>
